<compile_context>
chip_gen: v6e
topology: v6e:2x2x1
jax: 0.10.0
libtpu: 0.0.40
codegen_flags: <defaults>
</compile_context>

<pallas_src>
import jax
import jax.numpy as jnp
from jax import lax
from jax.experimental import pallas as pl
from jax.experimental.pallas import tpu as pltpu

COMPUTE_DTYPE = jnp.float32


# ----------------------------- Pallas kernel -------------------------------

def _make_inception_kernel(wg, lanes):
    """Fused Inception-block kernel.

    Spatial grid: each image is a (hg x wg) zero-padded grid flattened to a
    per-image slab of `glen` lanes (multiple of 128); a grid step sees the
    concatenation of all its images' slabs, `lanes` total lanes.
    """

    def offsets(k, p):
        # Flat lane offsets of the KxK window taps (stride-1 'same' conv).
        return [(i - p) * wg + (j - p) for i in range(k) for j in range(k)]

    def shift(v, o):
        # shifted[:, q] == v[:, q + o]; for lanes inside an image's valid
        # region the read always stays inside that image's own slab (the
        # 2-pixel zero border covers the max tap offset 2*wg+2), so cyclic
        # wrap / cross-image reads only land on masked or cropped lanes.
        if o == 0:
            return v
        return pltpu.roll(v, (-o) % lanes, axis=1)

    def tree_sum(xs):
        # Balanced pairwise reduction (short dependent-add chain).
        while len(xs) > 1:
            nxt = [xs[i] + xs[i + 1] for i in range(0, len(xs) - 1, 2)]
            if len(xs) % 2:
                nxt.append(xs[-1])
            xs = nxt
        return xs[0]

    def kernel(x_ref, mask_ref, ws_ref, bs_ref, w5_ref, b5_ref,
               w32_ref, b32_ref, w33_ref, b33_ref, bp_ref, o_ref, slab_ref):
        x = x_ref[0]                      # (Cin, lanes)
        mask = mask_ref[...]              # (1, lanes): 1.0 on real pixels
        cdt = x.dtype

        def conv(src, w_ref, b_ref, k, p):
            # KxK conv as ONE MXU matmul: (Cout, K*K*C) x (K*K*C, lanes).
            # Shifted-window taps are written into the shared VMEM scratch
            # at static sublane offsets (no concat temporaries).
            c = src.shape[0]
            for t, o in enumerate(offsets(k, p)):
                slab_ref[t * c:(t + 1) * c, :] = shift(src, o)
            depth = k * k * c
            return (jnp.dot(w_ref[...], slab_ref[0:depth, :],
                            preferred_element_type=jnp.float32)
                    + b_ref[...])

        # Fused stem (one matmul, M=72):
        #   rows  0:16  branch1x1
        #   rows 16:32  branch5x5_1
        #   rows 32:48  branch3x3_1
        #   rows 48:72  branch_pool 1x1 with weights pre-divided by 9
        stem = jnp.dot(ws_ref[...], x, preferred_element_type=jnp.float32)
        stem48 = (stem[0:48] + bs_ref[...]) * mask    # zero outside image
        br1 = stem48[0:16]
        t5 = stem48[16:32].astype(cdt)
        t3a = stem48[32:48].astype(cdt)

        # Pool branch: avgpool(wp @ x) == wp @ avgpool(x).  stem[48:72] is
        # already zero on padding lanes (x is zero there, no bias added yet),
        # which matches count_include_pad=True semantics.  Sum the 9 taps
        # with a pairwise tree, then add the bias.
        ppre = stem[48:72]
        taps = [shift(ppre, o) if o else ppre for o in offsets(3, 1)]
        brp = tree_sum(taps) + bp_ref[...]

        # 5x5 branch (contraction depth 5*5*16 = 400).
        br5 = conv(t5, w5_ref, b5_ref, 5, 2)

        # 3x3 branch: two stacked 3x3 convs (depths 144 and 216).
        t3b = (conv(t3a, w32_ref, b32_ref, 3, 1) * mask).astype(cdt)
        br3 = conv(t3b, w33_ref, b33_ref, 3, 1)

        # Channel concat -> one lane-dense (88, lanes) store.
        o_ref[0] = jnp.concatenate([br1, br5, br3, brp],
                                   axis=0).astype(o_ref.dtype)

    return kernel


# ------------------------------ JAX wrapper --------------------------------

def _taps_weight(w):
    """(O, I, K, K) -> (O, K*K*I), matching the in-kernel tap ordering."""
    o, i, kh, kw = w.shape
    return jnp.transpose(w, (0, 2, 3, 1)).reshape(o, kh * kw * i)


def inception_forward(params, x_nchw, *, lane_groups=1):
    """Inception block forward: (B, Cin, H, W) -> (B, 88, H, W), NCHW.

    lane_groups: number of grid steps; batch is split into this many groups
    and each group is folded into the lane axis.  Use 1 on v5e/v6e (single
    TensorCore); 2 on v7x to occupy both TensorCores.
    """
    B, cin, H, W = x_nchw.shape
    pmax = 2                                   # largest conv padding (5x5)
    hg, wg = H + 2 * pmax, W + 2 * pmax
    g = hg * wg
    glen = ((g + 127) // 128) * 128            # per-image lane slab
    cdt = COMPUTE_DTYPE

    assert B % lane_groups == 0, "batch must divide lane_groups"
    ipg = B // lane_groups                     # images folded per grid step
    lanes = ipg * glen

    # Static roll-wrap safety: every tap read from a valid pixel stays inside
    # that image's own slab (left border covers -max_tap; right side < glen).
    max_tap = 2 * wg + 2
    assert pmax * wg + pmax >= max_tap
    assert (pmax + H - 1) * wg + (pmax + W - 1) + max_tap < glen

    # Activations on the zero-padded grid, flattened with H*W on lanes, then
    # batch folded into the lane axis: (lane_groups, Cin, ipg*glen).
    xg = jnp.pad(x_nchw, ((0, 0), (0, 0), (pmax, pmax), (pmax, pmax)))
    xg = jnp.pad(xg.reshape(B, cin, g), ((0, 0), (0, 0), (0, glen - g)))
    x_ext = (xg.reshape(lane_groups, ipg, cin, glen)
               .transpose(0, 2, 1, 3)
               .reshape(lane_groups, cin, lanes)).astype(cdt)

    # 1.0 on lanes that correspond to real image pixels, 0.0 elsewhere.
    pos = jnp.arange(glen)
    row, col = pos // wg, pos % wg
    m = ((row >= pmax) & (row < pmax + H) &
         (col >= pmax) & (col < pmax + W)).astype(jnp.float32)
    mask = jnp.tile(m, (ipg,)).reshape(1, lanes)

    def w2d(w):
        return w.reshape(w.shape[0], w.shape[1])

    w1, b1 = params["b1x1"]
    w51, b51 = params["b5x5_1"]
    w31, b31 = params["b3x3_1"]
    w52, b52 = params["b5x5_2"]
    w32, b32 = params["b3x3_2"]
    w33, b33 = params["b3x3_3"]
    wp, bp = params["bpool"]

    # Fused stem weights: [1x1 | 5x5_1 | 3x3_1 | pool_1x1/9] -> (72, Cin).
    ws = jnp.concatenate([w2d(w1), w2d(w51), w2d(w31), w2d(wp) / 9.0],
                         axis=0).astype(cdt)
    bs = jnp.concatenate([b1, b51, b31]).reshape(48, 1)   # no pool bias here
    w5t = _taps_weight(w52).astype(cdt)                   # (24, 400)
    w32t = _taps_weight(w32).astype(cdt)                  # (24, 144)
    w33t = _taps_weight(w33).astype(cdt)                  # (24, 216)
    b5r, b32r, b33r, bpr = (b.reshape(-1, 1) for b in (b52, b32, b33, bp))

    cout = 16 + 24 + 24 + 24
    const2 = lambda s: (0, 0)
    kernel = _make_inception_kernel(wg, lanes)

    out = pl.pallas_call(
        kernel,
        out_shape=jax.ShapeDtypeStruct((lane_groups, cout, lanes),
                                       x_nchw.dtype),
        grid=(lane_groups,),
        in_specs=[
            pl.BlockSpec((1, cin, lanes), lambda s: (s, 0, 0)),
            pl.BlockSpec((1, lanes), const2),
            pl.BlockSpec(ws.shape, const2),
            pl.BlockSpec(bs.shape, const2),
            pl.BlockSpec(w5t.shape, const2),
            pl.BlockSpec(b5r.shape, const2),
            pl.BlockSpec(w32t.shape, const2),
            pl.BlockSpec(b32r.shape, const2),
            pl.BlockSpec(w33t.shape, const2),
            pl.BlockSpec(b33r.shape, const2),
            pl.BlockSpec(bpr.shape, const2),
        ],
        out_specs=pl.BlockSpec((1, cout, lanes), lambda s: (s, 0, 0)),
        scratch_shapes=[pltpu.VMEM((5 * 5 * 16, lanes), cdt)],  # shared slab
        compiler_params=pltpu.CompilerParams(
            dimension_semantics=("parallel",)),
    )(x_ext, mask, ws, bs, w5t, b5r, w32t, b32r, w33t, b33r, bpr)

    # Un-fold batch, drop the padded-grid columns, crop the 2-pixel border.
    out = (out.reshape(lane_groups, cout, ipg, glen)
              .transpose(0, 2, 1, 3)
              .reshape(B, cout, glen))[:, :, :g].reshape(B, cout, hg, wg)
    return out[:, :, pmax:pmax + H, pmax:pmax + W]


# ---------------------------- parameter init -------------------------------

def init_params(key, in_channels):
    """Deterministic init matching PyTorch Conv2d parameter shapes."""
    def conv_init(k, cout, cin, ksz):
        kw_, kb_ = jax.random.split(k)
        fan_in = cin * ksz * ksz
        bound = 1.0 / float(fan_in) ** 0.5
        w = jax.random.uniform(kw_, (cout, cin, ksz, ksz), jnp.float32,
                               -bound, bound)
        b = jax.random.uniform(kb_, (cout,), jnp.float32, -bound, bound)
        return w, b

    keys = jax.random.split(key, 7)
    return {
        "b1x1":   conv_init(keys[0], 16, in_channels, 1),
        "b5x5_1": conv_init(keys[1], 16, in_channels, 1),
        "b5x5_2": conv_init(keys[2], 24, 16, 5),
        "b3x3_1": conv_init(keys[3], 16, in_channels, 1),
        "b3x3_2": conv_init(keys[4], 24, 16, 3),
        "b3x3_3": conv_init(keys[5], 24, 24, 3),
        "bpool":  conv_init(keys[6], 24, in_channels, 1),
    }


# --------------------------- pure-JAX reference ----------------------------

def _conv_ref(x, w, b, pad):
    out = lax.conv_general_dilated(
        x, w, (1, 1), ((pad, pad), (pad, pad)),
        dimension_numbers=("NCHW", "OIHW", "NCHW"))
    return out + b[None, :, None, None]


def inception_ref(params, x):
    w, b = params["b1x1"];   br1 = _conv_ref(x, w, b, 0)
    w, b = params["b5x5_1"]; t5 = _conv_ref(x, w, b, 0)
    w, b = params["b5x5_2"]; br5 = _conv_ref(t5, w, b, 2)
    w, b = params["b3x3_1"]; t3 = _conv_ref(x, w, b, 0)
    w, b = params["b3x3_2"]; t3 = _conv_ref(t3, w, b, 1)
    w, b = params["b3x3_3"]; br3 = _conv_ref(t3, w, b, 1)
    pooled = lax.reduce_window(x, 0.0, lax.add, (1, 1, 3, 3), (1, 1, 1, 1),
                               ((0, 0), (0, 0), (1, 1), (1, 1))) / 9.0
    w, b = params["bpool"];  brp = _conv_ref(pooled, w, b, 0)
    return jnp.concatenate([br1, br5, br3, brp], axis=1)


if __name__ == "__main__":
    key = jax.random.PRNGKey(0)
    kx, kp = jax.random.split(key)

    in_channels = 4
    x = jax.random.normal(kx, (2, in_channels, 16, 16), jnp.float32)  # NCHW
    params = init_params(kp, in_channels)

    out = jax.jit(inception_forward)(params, x)
    out = jax.block_until_ready(out)

    assert out.shape == (2, 16 + 24 + 24 + 24, 16, 16), out.shape
    ref = inception_ref(params, x)
    max_err = float(jnp.max(jnp.abs(out - ref)))
    assert max_err < 1e-3, f"max abs error {max_err}"

    print("KERNEL_OK")
</pallas_src>

<mosaic_0001>
module attributes {stable_mosaic.version = 11 : i64} {
  func.func @kernel(%arg0: i32, %arg1: memref<1x4x1024xf32, #tpu.memory_space<vmem>>, %arg2: memref<1x1024xf32, #tpu.memory_space<vmem>>, %arg3: memref<72x4xf32, #tpu.memory_space<vmem>>, %arg4: memref<48x1xf32, #tpu.memory_space<vmem>>, %arg5: memref<24x400xf32, #tpu.memory_space<vmem>>, %arg6: memref<24x1xf32, #tpu.memory_space<vmem>>, %arg7: memref<24x144xf32, #tpu.memory_space<vmem>>, %arg8: memref<24x1xf32, #tpu.memory_space<vmem>>, %arg9: memref<24x216xf32, #tpu.memory_space<vmem>>, %arg10: memref<24x1xf32, #tpu.memory_space<vmem>>, %arg11: memref<24x1xf32, #tpu.memory_space<vmem>>, %arg12: memref<1x88x1024xf32, #tpu.memory_space<vmem>>, %arg13: memref<400x1024xf32, #tpu.memory_space<vmem>>) attributes {dimension_semantics = [#tpu.dimension_semantics<parallel>], iteration_bounds = array<i64: 1>, scalar_prefetch = 0 : i64, scratch_operands = 1 : i64, tpu.core_type = #tpu.core_type<tc>, window_params = [{transform_indices = @transform_0, window_bounds = array<i64: 1, 4, 1024>}, {pipeline_mode = #tpu.pipeline_mode<synchronous>, transform_indices = @transform_1, window_bounds = array<i64: 1, 1024>}, {pipeline_mode = #tpu.pipeline_mode<synchronous>, transform_indices = @transform_2, window_bounds = array<i64: 72, 4>}, {pipeline_mode = #tpu.pipeline_mode<synchronous>, transform_indices = @transform_3, window_bounds = array<i64: 48, 1>}, {pipeline_mode = #tpu.pipeline_mode<synchronous>, transform_indices = @transform_4, window_bounds = array<i64: 24, 400>}, {pipeline_mode = #tpu.pipeline_mode<synchronous>, transform_indices = @transform_5, window_bounds = array<i64: 24, 1>}, {pipeline_mode = #tpu.pipeline_mode<synchronous>, transform_indices = @transform_6, window_bounds = array<i64: 24, 144>}, {pipeline_mode = #tpu.pipeline_mode<synchronous>, transform_indices = @transform_7, window_bounds = array<i64: 24, 1>}, {pipeline_mode = #tpu.pipeline_mode<synchronous>, transform_indices = @transform_8, window_bounds = array<i64: 24, 216>}, {pipeline_mode = #tpu.pipeline_mode<synchronous>, transform_indices = @transform_9, window_bounds = array<i64: 24, 1>}, {pipeline_mode = #tpu.pipeline_mode<synchronous>, transform_indices = @transform_10, window_bounds = array<i64: 24, 1>}, {transform_indices = @transform_11, window_bounds = array<i64: 1, 88, 1024>}]} {
    %c0 = arith.constant 0 : index
    %c0_0 = arith.constant 0 : index
    %c0_1 = arith.constant 0 : index
    %0 = vector.load %arg1[%c0, %c0_0, %c0_1] : memref<1x4x1024xf32, #tpu.memory_space<vmem>>, vector<1x4x1024xf32>
    %1 = vector.shape_cast %0 : vector<1x4x1024xf32> to vector<4x1024xf32>
    %c0_2 = arith.constant 0 : index
    %c0_3 = arith.constant 0 : index
    %2 = vector.load %arg2[%c0_2, %c0_3] : memref<1x1024xf32, #tpu.memory_space<vmem>>, vector<1x1024xf32>
    %c0_4 = arith.constant 0 : index
    %c0_5 = arith.constant 0 : index
    %3 = vector.load %arg3[%c0_4, %c0_5] : memref<72x4xf32, #tpu.memory_space<vmem>>, vector<72x4xf32>
    %cst = arith.constant dense<0.000000e+00> : vector<72x1024xf32>
    %4 = tpu.matmul %3, %1, %cst {dimension_numbers = #tpu.dot_dimension_numbers<[1], [0], [0], [1], [0, 0, 1, 1], [], []>} : vector<72x4xf32>, vector<4x1024xf32>, vector<72x1024xf32> -> vector<72x1024xf32>
    %5 = vector.extract_strided_slice %4 {offsets = [0, 0], sizes = [48, 1024], strides = [1, 1]} : vector<72x1024xf32> to vector<48x1024xf32>
    %c0_6 = arith.constant 0 : index
    %c0_7 = arith.constant 0 : index
    %6 = vector.load %arg4[%c0_6, %c0_7] : memref<48x1xf32, #tpu.memory_space<vmem>>, vector<48x1xf32>
    %7 = vector.broadcast %6 : vector<48x1xf32> to vector<48x1024xf32>
    %8 = arith.addf %5, %7 : vector<48x1024xf32>
    %9 = vector.broadcast %2 : vector<1x1024xf32> to vector<48x1024xf32>
    %10 = arith.mulf %8, %9 : vector<48x1024xf32>
    %11 = vector.extract_strided_slice %10 {offsets = [0, 0], sizes = [16, 1024], strides = [1, 1]} : vector<48x1024xf32> to vector<16x1024xf32>
    %12 = vector.extract_strided_slice %10 {offsets = [16, 0], sizes = [16, 1024], strides = [1, 1]} : vector<48x1024xf32> to vector<16x1024xf32>
    %13 = vector.extract_strided_slice %10 {offsets = [32, 0], sizes = [16, 1024], strides = [1, 1]} : vector<48x1024xf32> to vector<16x1024xf32>
    %14 = vector.extract_strided_slice %4 {offsets = [48, 0], sizes = [24, 1024], strides = [1, 1]} : vector<72x1024xf32> to vector<24x1024xf32>
    %c21_i32 = arith.constant 21 : i32
    %15 = tpu.dynamic_rotate %14 by %c21_i32 dim 1 : vector<24x1024xf32>, i32 -> vector<24x1024xf32>
    %c20_i32 = arith.constant 20 : i32
    %16 = tpu.dynamic_rotate %14 by %c20_i32 dim 1 : vector<24x1024xf32>, i32 -> vector<24x1024xf32>
    %c19_i32 = arith.constant 19 : i32
    %17 = tpu.dynamic_rotate %14 by %c19_i32 dim 1 : vector<24x1024xf32>, i32 -> vector<24x1024xf32>
    %c1_i32 = arith.constant 1 : i32
    %18 = tpu.dynamic_rotate %14 by %c1_i32 dim 1 : vector<24x1024xf32>, i32 -> vector<24x1024xf32>
    %c1023_i32 = arith.constant 1023 : i32
    %19 = tpu.dynamic_rotate %14 by %c1023_i32 dim 1 : vector<24x1024xf32>, i32 -> vector<24x1024xf32>
    %c1005_i32 = arith.constant 1005 : i32
    %20 = tpu.dynamic_rotate %14 by %c1005_i32 dim 1 : vector<24x1024xf32>, i32 -> vector<24x1024xf32>
    %c1004_i32 = arith.constant 1004 : i32
    %21 = tpu.dynamic_rotate %14 by %c1004_i32 dim 1 : vector<24x1024xf32>, i32 -> vector<24x1024xf32>
    %c1003_i32 = arith.constant 1003 : i32
    %22 = tpu.dynamic_rotate %14 by %c1003_i32 dim 1 : vector<24x1024xf32>, i32 -> vector<24x1024xf32>
    %23 = arith.addf %15, %16 : vector<24x1024xf32>
    %24 = arith.addf %17, %18 : vector<24x1024xf32>
    %25 = arith.addf %14, %19 : vector<24x1024xf32>
    %26 = arith.addf %20, %21 : vector<24x1024xf32>
    %27 = arith.addf %23, %24 : vector<24x1024xf32>
    %28 = arith.addf %25, %26 : vector<24x1024xf32>
    %29 = arith.addf %27, %28 : vector<24x1024xf32>
    %30 = arith.addf %29, %22 : vector<24x1024xf32>
    %c0_8 = arith.constant 0 : index
    %c0_9 = arith.constant 0 : index
    %31 = vector.load %arg11[%c0_8, %c0_9] : memref<24x1xf32, #tpu.memory_space<vmem>>, vector<24x1xf32>
    %32 = vector.broadcast %31 : vector<24x1xf32> to vector<24x1024xf32>
    %33 = arith.addf %30, %32 : vector<24x1024xf32>
    %c42_i32 = arith.constant 42 : i32
    %34 = tpu.dynamic_rotate %12 by %c42_i32 dim 1 : vector<16x1024xf32>, i32 -> vector<16x1024xf32>
    %c0_10 = arith.constant 0 : index
    %c0_11 = arith.constant 0 : index
    %35 = vector.load %arg13[%c0_10, %c0_11] : memref<400x1024xf32, #tpu.memory_space<vmem>>, vector<16x1024xf32>
    tpu.vector_store %arg13[%c0_10, %c0_11], %34 {strides = array<i32>} : memref<400x1024xf32, #tpu.memory_space<vmem>>, vector<16x1024xf32>,
    %c41_i32 = arith.constant 41 : i32
    %36 = tpu.dynamic_rotate %12 by %c41_i32 dim 1 : vector<16x1024xf32>, i32 -> vector<16x1024xf32>
    %c16 = arith.constant 16 : index
    %c0_12 = arith.constant 0 : index
    %37 = vector.load %arg13[%c16, %c0_12] : memref<400x1024xf32, #tpu.memory_space<vmem>>, vector<16x1024xf32>
    tpu.vector_store %arg13[%c16, %c0_12], %36 {strides = array<i32>} : memref<400x1024xf32, #tpu.memory_space<vmem>>, vector<16x1024xf32>,
    %c40_i32 = arith.constant 40 : i32
    %38 = tpu.dynamic_rotate %12 by %c40_i32 dim 1 : vector<16x1024xf32>, i32 -> vector<16x1024xf32>
    %c32 = arith.constant 32 : index
    %c0_13 = arith.constant 0 : index
    %39 = vector.load %arg13[%c32, %c0_13] : memref<400x1024xf32, #tpu.memory_space<vmem>>, vector<16x1024xf32>
    tpu.vector_store %arg13[%c32, %c0_13], %38 {strides = array<i32>} : memref<400x1024xf32, #tpu.memory_space<vmem>>, vector<16x1024xf32>,
    %c39_i32 = arith.constant 39 : i32
    %40 = tpu.dynamic_rotate %12 by %c39_i32 dim 1 : vector<16x1024xf32>, i32 -> vector<16x1024xf32>
    %c48 = arith.constant 48 : index
    %c0_14 = arith.constant 0 : index
    %41 = vector.load %arg13[%c48, %c0_14] : memref<400x1024xf32, #tpu.memory_space<vmem>>, vector<16x1024xf32>
    tpu.vector_store %arg13[%c48, %c0_14], %40 {strides = array<i32>} : memref<400x1024xf32, #tpu.memory_space<vmem>>, vector<16x1024xf32>,
    %c38_i32 = arith.constant 38 : i32
    %42 = tpu.dynamic_rotate %12 by %c38_i32 dim 1 : vector<16x1024xf32>, i32 -> vector<16x1024xf32>
    %c64 = arith.constant 64 : index
    %c0_15 = arith.constant 0 : index
    %43 = vector.load %arg13[%c64, %c0_15] : memref<400x1024xf32, #tpu.memory_space<vmem>>, vector<16x1024xf32>
    tpu.vector_store %arg13[%c64, %c0_15], %42 {strides = array<i32>} : memref<400x1024xf32, #tpu.memory_space<vmem>>, vector<16x1024xf32>,
    %c22_i32 = arith.constant 22 : i32
    %44 = tpu.dynamic_rotate %12 by %c22_i32 dim 1 : vector<16x1024xf32>, i32 -> vector<16x1024xf32>
    %c80 = arith.constant 80 : index
    %c0_16 = arith.constant 0 : index
    %45 = vector.load %arg13[%c80, %c0_16] : memref<400x1024xf32, #tpu.memory_space<vmem>>, vector<16x1024xf32>
    tpu.vector_store %arg13[%c80, %c0_16], %44 {strides = array<i32>} : memref<400x1024xf32, #tpu.memory_space<vmem>>, vector<16x1024xf32>,
    %c21_i32_17 = arith.constant 21 : i32
    %46 = tpu.dynamic_rotate %12 by %c21_i32_17 dim 1 : vector<16x1024xf32>, i32 -> vector<16x1024xf32>
    %c96 = arith.constant 96 : index
    %c0_18 = arith.constant 0 : index
    %47 = vector.load %arg13[%c96, %c0_18] : memref<400x1024xf32, #tpu.memory_space<vmem>>, vector<16x1024xf32>
    tpu.vector_store %arg13[%c96, %c0_18], %46 {strides = array<i32>} : memref<400x1024xf32, #tpu.memory_space<vmem>>, vector<16x1024xf32>,
    %c20_i32_19 = arith.constant 20 : i32
    %48 = tpu.dynamic_rotate %12 by %c20_i32_19 dim 1 : vector<16x1024xf32>, i32 -> vector<16x1024xf32>
    %c112 = arith.constant 112 : index
    %c0_20 = arith.constant 0 : index
    %49 = vector.load %arg13[%c112, %c0_20] : memref<400x1024xf32, #tpu.memory_space<vmem>>, vector<16x1024xf32>
    tpu.vector_store %arg13[%c112, %c0_20], %48 {strides = array<i32>} : memref<400x1024xf32, #tpu.memory_space<vmem>>, vector<16x1024xf32>,
    %c19_i32_21 = arith.constant 19 : i32
    %50 = tpu.dynamic_rotate %12 by %c19_i32_21 dim 1 : vector<16x1024xf32>, i32 -> vector<16x1024xf32>
    %c128 = arith.constant 128 : index
    %c0_22 = arith.constant 0 : index
    %51 = vector.load %arg13[%c128, %c0_22] : memref<400x1024xf32, #tpu.memory_space<vmem>>, vector<16x1024xf32>
    tpu.vector_store %arg13[%c128, %c0_22], %50 {strides = array<i32>} : memref<400x1024xf32, #tpu.memory_space<vmem>>, vector<16x1024xf32>,
    %c18_i32 = arith.constant 18 : i32
    %52 = tpu.dynamic_rotate %12 by %c18_i32 dim 1 : vector<16x1024xf32>, i32 -> vector<16x1024xf32>
    %c144 = arith.constant 144 : index
    %c0_23 = arith.constant 0 : index
    %53 = vector.load %arg13[%c144, %c0_23] : memref<400x1024xf32, #tpu.memory_space<vmem>>, vector<16x1024xf32>
    tpu.vector_store %arg13[%c144, %c0_23], %52 {strides = array<i32>} : memref<400x1024xf32, #tpu.memory_space<vmem>>, vector<16x1024xf32>,
    %c2_i32 = arith.constant 2 : i32
    %54 = tpu.dynamic_rotate %12 by %c2_i32 dim 1 : vector<16x1024xf32>, i32 -> vector<16x1024xf32>
    %c160 = arith.constant 160 : index
    %c0_24 = arith.constant 0 : index
    %55 = vector.load %arg13[%c160, %c0_24] : memref<400x1024xf32, #tpu.memory_space<vmem>>, vector<16x1024xf32>
    tpu.vector_store %arg13[%c160, %c0_24], %54 {strides = array<i32>} : memref<400x1024xf32, #tpu.memory_space<vmem>>, vector<16x1024xf32>,
    %c1_i32_25 = arith.constant 1 : i32
    %56 = tpu.dynamic_rotate %12 by %c1_i32_25 dim 1 : vector<16x1024xf32>, i32 -> vector<16x1024xf32>
    %c176 = arith.constant 176 : index
    %c0_26 = arith.constant 0 : index
    %57 = vector.load %arg13[%c176, %c0_26] : memref<400x1024xf32, #tpu.memory_space<vmem>>, vector<16x1024xf32>
    tpu.vector_store %arg13[%c176, %c0_26], %56 {strides = array<i32>} : memref<400x1024xf32, #tpu.memory_space<vmem>>, vector<16x1024xf32>,
    %c192 = arith.constant 192 : index
    %c0_27 = arith.constant 0 : index
    %58 = vector.load %arg13[%c192, %c0_27] : memref<400x1024xf32, #tpu.memory_space<vmem>>, vector<16x1024xf32>
    tpu.vector_store %arg13[%c192, %c0_27], %12 {strides = array<i32>} : memref<400x1024xf32, #tpu.memory_space<vmem>>, vector<16x1024xf32>,
    %c1023_i32_28 = arith.constant 1023 : i32
    %59 = tpu.dynamic_rotate %12 by %c1023_i32_28 dim 1 : vector<16x1024xf32>, i32 -> vector<16x1024xf32>
    %c208 = arith.constant 208 : index
    %c0_29 = arith.constant 0 : index
    %60 = vector.load %arg13[%c208, %c0_29] : memref<400x1024xf32, #tpu.memory_space<vmem>>, vector<16x1024xf32>
    tpu.vector_store %arg13[%c208, %c0_29], %59 {strides = array<i32>} : memref<400x1024xf32, #tpu.memory_space<vmem>>, vector<16x1024xf32>,
    %c1022_i32 = arith.constant 1022 : i32
    %61 = tpu.dynamic_rotate %12 by %c1022_i32 dim 1 : vector<16x1024xf32>, i32 -> vector<16x1024xf32>
    %c224 = arith.constant 224 : index
    %c0_30 = arith.constant 0 : index
    %62 = vector.load %arg13[%c224, %c0_30] : memref<400x1024xf32, #tpu.memory_space<vmem>>, vector<16x1024xf32>
    tpu.vector_store %arg13[%c224, %c0_30], %61 {strides = array<i32>} : memref<400x1024xf32, #tpu.memory_space<vmem>>, vector<16x1024xf32>,
    %c1006_i32 = arith.constant 1006 : i32
    %63 = tpu.dynamic_rotate %12 by %c1006_i32 dim 1 : vector<16x1024xf32>, i32 -> vector<16x1024xf32>
    %c240 = arith.constant 240 : index
    %c0_31 = arith.constant 0 : index
    %64 = vector.load %arg13[%c240, %c0_31] : memref<400x1024xf32, #tpu.memory_space<vmem>>, vector<16x1024xf32>
    tpu.vector_store %arg13[%c240, %c0_31], %63 {strides = array<i32>} : memref<400x1024xf32, #tpu.memory_space<vmem>>, vector<16x1024xf32>,
    %c1005_i32_32 = arith.constant 1005 : i32
    %65 = tpu.dynamic_rotate %12 by %c1005_i32_32 dim 1 : vector<16x1024xf32>, i32 -> vector<16x1024xf32>
    %c256 = arith.constant 256 : index
    %c0_33 = arith.constant 0 : index
    %66 = vector.load %arg13[%c256, %c0_33] : memref<400x1024xf32, #tpu.memory_space<vmem>>, vector<16x1024xf32>
    tpu.vector_store %arg13[%c256, %c0_33], %65 {strides = array<i32>} : memref<400x1024xf32, #tpu.memory_space<vmem>>, vector<16x1024xf32>,
    %c1004_i32_34 = arith.constant 1004 : i32
    %67 = tpu.dynamic_rotate %12 by %c1004_i32_34 dim 1 : vector<16x1024xf32>, i32 -> vector<16x1024xf32>
    %c272 = arith.constant 272 : index
    %c0_35 = arith.constant 0 : index
    %68 = vector.load %arg13[%c272, %c0_35] : memref<400x1024xf32, #tpu.memory_space<vmem>>, vector<16x1024xf32>
    tpu.vector_store %arg13[%c272, %c0_35], %67 {strides = array<i32>} : memref<400x1024xf32, #tpu.memory_space<vmem>>, vector<16x1024xf32>,
    %c1003_i32_36 = arith.constant 1003 : i32
    %69 = tpu.dynamic_rotate %12 by %c1003_i32_36 dim 1 : vector<16x1024xf32>, i32 -> vector<16x1024xf32>
    %c288 = arith.constant 288 : index
    %c0_37 = arith.constant 0 : index
    %70 = vector.load %arg13[%c288, %c0_37] : memref<400x1024xf32, #tpu.memory_space<vmem>>, vector<16x1024xf32>
    tpu.vector_store %arg13[%c288, %c0_37], %69 {strides = array<i32>} : memref<400x1024xf32, #tpu.memory_space<vmem>>, vector<16x1024xf32>,
    %c1002_i32 = arith.constant 1002 : i32
    %71 = tpu.dynamic_rotate %12 by %c1002_i32 dim 1 : vector<16x1024xf32>, i32 -> vector<16x1024xf32>
    %c304 = arith.constant 304 : index
    %c0_38 = arith.constant 0 : index
    %72 = vector.load %arg13[%c304, %c0_38] : memref<400x1024xf32, #tpu.memory_space<vmem>>, vector<16x1024xf32>
    tpu.vector_store %arg13[%c304, %c0_38], %71 {strides = array<i32>} : memref<400x1024xf32, #tpu.memory_space<vmem>>, vector<16x1024xf32>,
    %c986_i32 = arith.constant 986 : i32
    %73 = tpu.dynamic_rotate %12 by %c986_i32 dim 1 : vector<16x1024xf32>, i32 -> vector<16x1024xf32>
    %c320 = arith.constant 320 : index
    %c0_39 = arith.constant 0 : index
    %74 = vector.load %arg13[%c320, %c0_39] : memref<400x1024xf32, #tpu.memory_space<vmem>>, vector<16x1024xf32>
    tpu.vector_store %arg13[%c320, %c0_39], %73 {strides = array<i32>} : memref<400x1024xf32, #tpu.memory_space<vmem>>, vector<16x1024xf32>,
    %c985_i32 = arith.constant 985 : i32
    %75 = tpu.dynamic_rotate %12 by %c985_i32 dim 1 : vector<16x1024xf32>, i32 -> vector<16x1024xf32>
    %c336 = arith.constant 336 : index
    %c0_40 = arith.constant 0 : index
    %76 = vector.load %arg13[%c336, %c0_40] : memref<400x1024xf32, #tpu.memory_space<vmem>>, vector<16x1024xf32>
    tpu.vector_store %arg13[%c336, %c0_40], %75 {strides = array<i32>} : memref<400x1024xf32, #tpu.memory_space<vmem>>, vector<16x1024xf32>,
    %c984_i32 = arith.constant 984 : i32
    %77 = tpu.dynamic_rotate %12 by %c984_i32 dim 1 : vector<16x1024xf32>, i32 -> vector<16x1024xf32>
    %c352 = arith.constant 352 : index
    %c0_41 = arith.constant 0 : index
    %78 = vector.load %arg13[%c352, %c0_41] : memref<400x1024xf32, #tpu.memory_space<vmem>>, vector<16x1024xf32>
    tpu.vector_store %arg13[%c352, %c0_41], %77 {strides = array<i32>} : memref<400x1024xf32, #tpu.memory_space<vmem>>, vector<16x1024xf32>,
    %c983_i32 = arith.constant 983 : i32
    %79 = tpu.dynamic_rotate %12 by %c983_i32 dim 1 : vector<16x1024xf32>, i32 -> vector<16x1024xf32>
    %c368 = arith.constant 368 : index
    %c0_42 = arith.constant 0 : index
    %80 = vector.load %arg13[%c368, %c0_42] : memref<400x1024xf32, #tpu.memory_space<vmem>>, vector<16x1024xf32>
    tpu.vector_store %arg13[%c368, %c0_42], %79 {strides = array<i32>} : memref<400x1024xf32, #tpu.memory_space<vmem>>, vector<16x1024xf32>,
    %c982_i32 = arith.constant 982 : i32
    %81 = tpu.dynamic_rotate %12 by %c982_i32 dim 1 : vector<16x1024xf32>, i32 -> vector<16x1024xf32>
    %c384 = arith.constant 384 : index
    %c0_43 = arith.constant 0 : index
    %82 = vector.load %arg13[%c384, %c0_43] : memref<400x1024xf32, #tpu.memory_space<vmem>>, vector<16x1024xf32>
    tpu.vector_store %arg13[%c384, %c0_43], %81 {strides = array<i32>} : memref<400x1024xf32, #tpu.memory_space<vmem>>, vector<16x1024xf32>,
    %c0_44 = arith.constant 0 : index
    %c0_45 = arith.constant 0 : index
    %83 = vector.load %arg5[%c0_44, %c0_45] : memref<24x400xf32, #tpu.memory_space<vmem>>, vector<24x400xf32>
    %c0_46 = arith.constant 0 : index
    %c0_47 = arith.constant 0 : index
    %84 = vector.load %arg13[%c0_46, %c0_47] : memref<400x1024xf32, #tpu.memory_space<vmem>>, vector<400x1024xf32>
    %cst_48 = arith.constant dense<0.000000e+00> : vector<24x1024xf32>
    %85 = tpu.matmul %83, %84, %cst_48 {dimension_numbers = #tpu.dot_dimension_numbers<[1], [0], [0], [1], [0, 0, 1, 1], [], []>} : vector<24x400xf32>, vector<400x1024xf32>, vector<24x1024xf32> -> vector<24x1024xf32>
    %c0_49 = arith.constant 0 : index
    %c0_50 = arith.constant 0 : index
    %86 = vector.load %arg6[%c0_49, %c0_50] : memref<24x1xf32, #tpu.memory_space<vmem>>, vector<24x1xf32>
    %87 = vector.broadcast %86 : vector<24x1xf32> to vector<24x1024xf32>
    %88 = arith.addf %85, %87 : vector<24x1024xf32>
    %c21_i32_51 = arith.constant 21 : i32
    %89 = tpu.dynamic_rotate %13 by %c21_i32_51 dim 1 : vector<16x1024xf32>, i32 -> vector<16x1024xf32>
    %c0_52 = arith.constant 0 : index
    %c0_53 = arith.constant 0 : index
    %90 = vector.load %arg13[%c0_52, %c0_53] : memref<400x1024xf32, #tpu.memory_space<vmem>>, vector<16x1024xf32>
    tpu.vector_store %arg13[%c0_52, %c0_53], %89 {strides = array<i32>} : memref<400x1024xf32, #tpu.memory_space<vmem>>, vector<16x1024xf32>,
    %c20_i32_54 = arith.constant 20 : i32
    %91 = tpu.dynamic_rotate %13 by %c20_i32_54 dim 1 : vector<16x1024xf32>, i32 -> vector<16x1024xf32>
    %c16_55 = arith.constant 16 : index
    %c0_56 = arith.constant 0 : index
    %92 = vector.load %arg13[%c16_55, %c0_56] : memref<400x1024xf32, #tpu.memory_space<vmem>>, vector<16x1024xf32>
    tpu.vector_store %arg13[%c16_55, %c0_56], %91 {strides = array<i32>} : memref<400x1024xf32, #tpu.memory_space<vmem>>, vector<16x1024xf32>,
    %c19_i32_57 = arith.constant 19 : i32
    %93 = tpu.dynamic_rotate %13 by %c19_i32_57 dim 1 : vector<16x1024xf32>, i32 -> vector<16x1024xf32>
    %c32_58 = arith.constant 32 : index
    %c0_59 = arith.constant 0 : index
    %94 = vector.load %arg13[%c32_58, %c0_59] : memref<400x1024xf32, #tpu.memory_space<vmem>>, vector<16x1024xf32>
    tpu.vector_store %arg13[%c32_58, %c0_59], %93 {strides = array<i32>} : memref<400x1024xf32, #tpu.memory_space<vmem>>, vector<16x1024xf32>,
    %c1_i32_60 = arith.constant 1 : i32
    %95 = tpu.dynamic_rotate %13 by %c1_i32_60 dim 1 : vector<16x1024xf32>, i32 -> vector<16x1024xf32>
    %c48_61 = arith.constant 48 : index
    %c0_62 = arith.constant 0 : index
    %96 = vector.load %arg13[%c48_61, %c0_62] : memref<400x1024xf32, #tpu.memory_space<vmem>>, vector<16x1024xf32>
    tpu.vector_store %arg13[%c48_61, %c0_62], %95 {strides = array<i32>} : memref<400x1024xf32, #tpu.memory_space<vmem>>, vector<16x1024xf32>,
    %c64_63 = arith.constant 64 : index
    %c0_64 = arith.constant 0 : index
    %97 = vector.load %arg13[%c64_63, %c0_64] : memref<400x1024xf32, #tpu.memory_space<vmem>>, vector<16x1024xf32>
    tpu.vector_store %arg13[%c64_63, %c0_64], %13 {strides = array<i32>} : memref<400x1024xf32, #tpu.memory_space<vmem>>, vector<16x1024xf32>,
    %c1023_i32_65 = arith.constant 1023 : i32
    %98 = tpu.dynamic_rotate %13 by %c1023_i32_65 dim 1 : vector<16x1024xf32>, i32 -> vector<16x1024xf32>
    %c80_66 = arith.constant 80 : index
    %c0_67 = arith.constant 0 : index
    %99 = vector.load %arg13[%c80_66, %c0_67] : memref<400x1024xf32, #tpu.memory_space<vmem>>, vector<16x1024xf32>
    tpu.vector_store %arg13[%c80_66, %c0_67], %98 {strides = array<i32>} : memref<400x1024xf32, #tpu.memory_space<vmem>>, vector<16x1024xf32>,
    %c1005_i32_68 = arith.constant 1005 : i32
    %100 = tpu.dynamic_rotate %13 by %c1005_i32_68 dim 1 : vector<16x1024xf32>, i32 -> vector<16x1024xf32>
    %c96_69 = arith.constant 96 : index
    %c0_70 = arith.constant 0 : index
    %101 = vector.load %arg13[%c96_69, %c0_70] : memref<400x1024xf32, #tpu.memory_space<vmem>>, vector<16x1024xf32>
    tpu.vector_store %arg13[%c96_69, %c0_70], %100 {strides = array<i32>} : memref<400x1024xf32, #tpu.memory_space<vmem>>, vector<16x1024xf32>,
    %c1004_i32_71 = arith.constant 1004 : i32
    %102 = tpu.dynamic_rotate %13 by %c1004_i32_71 dim 1 : vector<16x1024xf32>, i32 -> vector<16x1024xf32>
    %c112_72 = arith.constant 112 : index
    %c0_73 = arith.constant 0 : index
    %103 = vector.load %arg13[%c112_72, %c0_73] : memref<400x1024xf32, #tpu.memory_space<vmem>>, vector<16x1024xf32>
    tpu.vector_store %arg13[%c112_72, %c0_73], %102 {strides = array<i32>} : memref<400x1024xf32, #tpu.memory_space<vmem>>, vector<16x1024xf32>,
    %c1003_i32_74 = arith.constant 1003 : i32
    %104 = tpu.dynamic_rotate %13 by %c1003_i32_74 dim 1 : vector<16x1024xf32>, i32 -> vector<16x1024xf32>
    %c128_75 = arith.constant 128 : index
    %c0_76 = arith.constant 0 : index
    %105 = vector.load %arg13[%c128_75, %c0_76] : memref<400x1024xf32, #tpu.memory_space<vmem>>, vector<16x1024xf32>
    tpu.vector_store %arg13[%c128_75, %c0_76], %104 {strides = array<i32>} : memref<400x1024xf32, #tpu.memory_space<vmem>>, vector<16x1024xf32>,
    %c0_77 = arith.constant 0 : index
    %c0_78 = arith.constant 0 : index
    %106 = vector.load %arg7[%c0_77, %c0_78] : memref<24x144xf32, #tpu.memory_space<vmem>>, vector<24x144xf32>
    %c0_79 = arith.constant 0 : index
    %c0_80 = arith.constant 0 : index
    %107 = vector.load %arg13[%c0_79, %c0_80] : memref<400x1024xf32, #tpu.memory_space<vmem>>, vector<144x1024xf32>
    %cst_81 = arith.constant dense<0.000000e+00> : vector<24x1024xf32>
    %108 = tpu.matmul %106, %107, %cst_81 {dimension_numbers = #tpu.dot_dimension_numbers<[1], [0], [0], [1], [0, 0, 1, 1], [], []>} : vector<24x144xf32>, vector<144x1024xf32>, vector<24x1024xf32> -> vector<24x1024xf32>
    %c0_82 = arith.constant 0 : index
    %c0_83 = arith.constant 0 : index
    %109 = vector.load %arg8[%c0_82, %c0_83] : memref<24x1xf32, #tpu.memory_space<vmem>>, vector<24x1xf32>
    %110 = vector.broadcast %109 : vector<24x1xf32> to vector<24x1024xf32>
    %111 = arith.addf %108, %110 : vector<24x1024xf32>
    %112 = vector.broadcast %2 : vector<1x1024xf32> to vector<24x1024xf32>
    %113 = arith.mulf %111, %112 : vector<24x1024xf32>
    %c21_i32_84 = arith.constant 21 : i32
    %114 = tpu.dynamic_rotate %113 by %c21_i32_84 dim 1 : vector<24x1024xf32>, i32 -> vector<24x1024xf32>
    %c0_85 = arith.constant 0 : index
    %c0_86 = arith.constant 0 : index
    %115 = vector.load %arg13[%c0_85, %c0_86] : memref<400x1024xf32, #tpu.memory_space<vmem>>, vector<24x1024xf32>
    tpu.vector_store %arg13[%c0_85, %c0_86], %114 {strides = array<i32>} : memref<400x1024xf32, #tpu.memory_space<vmem>>, vector<24x1024xf32>,
    %c20_i32_87 = arith.constant 20 : i32
    %116 = tpu.dynamic_rotate %113 by %c20_i32_87 dim 1 : vector<24x1024xf32>, i32 -> vector<24x1024xf32>
    %c24 = arith.constant 24 : index
    %c0_88 = arith.constant 0 : index
    %117 = vector.load %arg13[%c24, %c0_88] : memref<400x1024xf32, #tpu.memory_space<vmem>>, vector<24x1024xf32>
    tpu.vector_store %arg13[%c24, %c0_88], %116 {strides = array<i32>} : memref<400x1024xf32, #tpu.memory_space<vmem>>, vector<24x1024xf32>,
    %c19_i32_89 = arith.constant 19 : i32
    %118 = tpu.dynamic_rotate %113 by %c19_i32_89 dim 1 : vector<24x1024xf32>, i32 -> vector<24x1024xf32>
    %c48_90 = arith.constant 48 : index
    %c0_91 = arith.constant 0 : index
    %119 = vector.load %arg13[%c48_90, %c0_91] : memref<400x1024xf32, #tpu.memory_space<vmem>>, vector<24x1024xf32>
    tpu.vector_store %arg13[%c48_90, %c0_91], %118 {strides = array<i32>} : memref<400x1024xf32, #tpu.memory_space<vmem>>, vector<24x1024xf32>,
    %c1_i32_92 = arith.constant 1 : i32
    %120 = tpu.dynamic_rotate %113 by %c1_i32_92 dim 1 : vector<24x1024xf32>, i32 -> vector<24x1024xf32>
    %c72 = arith.constant 72 : index
    %c0_93 = arith.constant 0 : index
    %121 = vector.load %arg13[%c72, %c0_93] : memref<400x1024xf32, #tpu.memory_space<vmem>>, vector<24x1024xf32>
    tpu.vector_store %arg13[%c72, %c0_93], %120 {strides = array<i32>} : memref<400x1024xf32, #tpu.memory_space<vmem>>, vector<24x1024xf32>,
    %c96_94 = arith.constant 96 : index
    %c0_95 = arith.constant 0 : index
    %122 = vector.load %arg13[%c96_94, %c0_95] : memref<400x1024xf32, #tpu.memory_space<vmem>>, vector<24x1024xf32>
    tpu.vector_store %arg13[%c96_94, %c0_95], %113 {strides = array<i32>} : memref<400x1024xf32, #tpu.memory_space<vmem>>, vector<24x1024xf32>,
    %c1023_i32_96 = arith.constant 1023 : i32
    %123 = tpu.dynamic_rotate %113 by %c1023_i32_96 dim 1 : vector<24x1024xf32>, i32 -> vector<24x1024xf32>
    %c120 = arith.constant 120 : index
    %c0_97 = arith.constant 0 : index
    %124 = vector.load %arg13[%c120, %c0_97] : memref<400x1024xf32, #tpu.memory_space<vmem>>, vector<24x1024xf32>
    tpu.vector_store %arg13[%c120, %c0_97], %123 {strides = array<i32>} : memref<400x1024xf32, #tpu.memory_space<vmem>>, vector<24x1024xf32>,
    %c1005_i32_98 = arith.constant 1005 : i32
    %125 = tpu.dynamic_rotate %113 by %c1005_i32_98 dim 1 : vector<24x1024xf32>, i32 -> vector<24x1024xf32>
    %c144_99 = arith.constant 144 : index
    %c0_100 = arith.constant 0 : index
    %126 = vector.load %arg13[%c144_99, %c0_100] : memref<400x1024xf32, #tpu.memory_space<vmem>>, vector<24x1024xf32>
    tpu.vector_store %arg13[%c144_99, %c0_100], %125 {strides = array<i32>} : memref<400x1024xf32, #tpu.memory_space<vmem>>, vector<24x1024xf32>,
    %c1004_i32_101 = arith.constant 1004 : i32
    %127 = tpu.dynamic_rotate %113 by %c1004_i32_101 dim 1 : vector<24x1024xf32>, i32 -> vector<24x1024xf32>
    %c168 = arith.constant 168 : index
    %c0_102 = arith.constant 0 : index
    %128 = vector.load %arg13[%c168, %c0_102] : memref<400x1024xf32, #tpu.memory_space<vmem>>, vector<24x1024xf32>
    tpu.vector_store %arg13[%c168, %c0_102], %127 {strides = array<i32>} : memref<400x1024xf32, #tpu.memory_space<vmem>>, vector<24x1024xf32>,
    %c1003_i32_103 = arith.constant 1003 : i32
    %129 = tpu.dynamic_rotate %113 by %c1003_i32_103 dim 1 : vector<24x1024xf32>, i32 -> vector<24x1024xf32>
    %c192_104 = arith.constant 192 : index
    %c0_105 = arith.constant 0 : index
    %130 = vector.load %arg13[%c192_104, %c0_105] : memref<400x1024xf32, #tpu.memory_space<vmem>>, vector<24x1024xf32>
    tpu.vector_store %arg13[%c192_104, %c0_105], %129 {strides = array<i32>} : memref<400x1024xf32, #tpu.memory_space<vmem>>, vector<24x1024xf32>,
    %c0_106 = arith.constant 0 : index
    %c0_107 = arith.constant 0 : index
    %131 = vector.load %arg9[%c0_106, %c0_107] : memref<24x216xf32, #tpu.memory_space<vmem>>, vector<24x216xf32>
    %c0_108 = arith.constant 0 : index
    %c0_109 = arith.constant 0 : index
    %132 = vector.load %arg13[%c0_108, %c0_109] : memref<400x1024xf32, #tpu.memory_space<vmem>>, vector<216x1024xf32>
    %cst_110 = arith.constant dense<0.000000e+00> : vector<24x1024xf32>
    %133 = tpu.matmul %131, %132, %cst_110 {dimension_numbers = #tpu.dot_dimension_numbers<[1], [0], [0], [1], [0, 0, 1, 1], [], []>} : vector<24x216xf32>, vector<216x1024xf32>, vector<24x1024xf32> -> vector<24x1024xf32>
    %c0_111 = arith.constant 0 : index
    %c0_112 = arith.constant 0 : index
    %134 = vector.load %arg10[%c0_111, %c0_112] : memref<24x1xf32, #tpu.memory_space<vmem>>, vector<24x1xf32>
    %135 = vector.broadcast %134 : vector<24x1xf32> to vector<24x1024xf32>
    %136 = arith.addf %133, %135 : vector<24x1024xf32>
    %137 = tpu.concatenate %11, %88, %136, %33 in 0 : vector<16x1024xf32>, vector<24x1024xf32>, vector<24x1024xf32>, vector<24x1024xf32> -> vector<88x1024xf32>
    %c0_113 = arith.constant 0 : index
    %c0_114 = arith.constant 0 : index
    %c0_115 = arith.constant 0 : index
    %138 = vector.load %arg12[%c0_113, %c0_114, %c0_115] : memref<1x88x1024xf32, #tpu.memory_space<vmem>>, vector<1x88x1024xf32>
    %139 = vector.shape_cast %138 : vector<1x88x1024xf32> to vector<88x1024xf32>
    %140 = vector.shape_cast %137 : vector<88x1024xf32> to vector<1x88x1024xf32>
    tpu.vector_store %arg12[%c0_113, %c0_114, %c0_115], %140 {strides = array<i32>} : memref<1x88x1024xf32, #tpu.memory_space<vmem>>, vector<1x88x1024xf32>,
    return
  }
  func.func @transform_0(%arg0: i32) -> (i32, i32, i32) {
    %c0_i32 = arith.constant 0 : i32
    %c0_i32_0 = arith.constant 0 : i32
    %c0_i32_1 = arith.constant 0 : i32
    return %arg0, %c0_i32, %c0_i32_0 : i32, i32, i32
  }
  func.func @transform_1(%arg0: i32) -> (i32, i32) {
    %c0_i32 = arith.constant 0 : i32
    %c0_i32_0 = arith.constant 0 : i32
    %c0_i32_1 = arith.constant 0 : i32
    return %c0_i32, %c0_i32_0 : i32, i32
  }
  func.func @transform_2(%arg0: i32) -> (i32, i32) {
    %c0_i32 = arith.constant 0 : i32
    %c0_i32_0 = arith.constant 0 : i32
    %c0_i32_1 = arith.constant 0 : i32
    return %c0_i32, %c0_i32_0 : i32, i32
  }
  func.func @transform_3(%arg0: i32) -> (i32, i32) {
    %c0_i32 = arith.constant 0 : i32
    %c0_i32_0 = arith.constant 0 : i32
    %c0_i32_1 = arith.constant 0 : i32
    return %c0_i32, %c0_i32_0 : i32, i32
  }
  func.func @transform_4(%arg0: i32) -> (i32, i32) {
    %c0_i32 = arith.constant 0 : i32
    %c0_i32_0 = arith.constant 0 : i32
    %c0_i32_1 = arith.constant 0 : i32
    return %c0_i32, %c0_i32_0 : i32, i32
  }
  func.func @transform_5(%arg0: i32) -> (i32, i32) {
    %c0_i32 = arith.constant 0 : i32
    %c0_i32_0 = arith.constant 0 : i32
    %c0_i32_1 = arith.constant 0 : i32
    return %c0_i32, %c0_i32_0 : i32, i32
  }
  func.func @transform_6(%arg0: i32) -> (i32, i32) {
    %c0_i32 = arith.constant 0 : i32
    %c0_i32_0 = arith.constant 0 : i32
    %c0_i32_1 = arith.constant 0 : i32
    return %c0_i32, %c0_i32_0 : i32, i32
  }
  func.func @transform_7(%arg0: i32) -> (i32, i32) {
    %c0_i32 = arith.constant 0 : i32
    %c0_i32_0 = arith.constant 0 : i32
    %c0_i32_1 = arith.constant 0 : i32
    return %c0_i32, %c0_i32_0 : i32, i32
  }
  func.func @transform_8(%arg0: i32) -> (i32, i32) {
    %c0_i32 = arith.constant 0 : i32
    %c0_i32_0 = arith.constant 0 : i32
    %c0_i32_1 = arith.constant 0 : i32
    return %c0_i32, %c0_i32_0 : i32, i32
  }
  func.func @transform_9(%arg0: i32) -> (i32, i32) {
    %c0_i32 = arith.constant 0 : i32
    %c0_i32_0 = arith.constant 0 : i32
    %c0_i32_1 = arith.constant 0 : i32
    return %c0_i32, %c0_i32_0 : i32, i32
  }
  func.func @transform_10(%arg0: i32) -> (i32, i32) {
    %c0_i32 = arith.constant 0 : i32
    %c0_i32_0 = arith.constant 0 : i32
    %c0_i32_1 = arith.constant 0 : i32
    return %c0_i32, %c0_i32_0 : i32, i32
  }
  func.func @transform_11(%arg0: i32) -> (i32, i32, i32) {
    %c0_i32 = arith.constant 0 : i32
    %c0_i32_0 = arith.constant 0 : i32
    %c0_i32_1 = arith.constant 0 : i32
    return %arg0, %c0_i32, %c0_i32_0 : i32, i32, i32
  }
}

</mosaic_0001>

<bundles_post_ra>
// kernel: inception_forward.1
= control target key start
LH: loop header
LB: loop body
LE: loop exit
PB: predicated region body
PF: predicated region fallthrough
CT: control target
= control target key end

     0   :  { %vm88_vm0 = vcmask 1043456   ;;  %v6899_v1 = vmov 0.0   ;;  %v6900_v5 = vmov 0   ;;  %vm60_vm1 = vcmask 31744   ;;  %s6901_s29 = smov 21   ;;  %s6902_s30 = smov 20   ;;  %s14808_s0 = inlined_call_operand.vmem [shape: f32[1,4,1024], index: 0, kind: input, shape index: {}]   ;;  %s14809_s2 = inlined_call_operand.vmem [shape: f32[72,4], index: 2, kind: input, shape index: {}]   ;;  %s14810_s3 = inlined_call_operand.vmem [shape: f32[48,1], index: 3, kind: input, shape index: {}]   ;;  %s14811_s1 = inlined_call_operand.vmem [shape: f32[1,1024], index: 1, kind: input, shape index: {}]   ;;  %s14812_s11 = inlined_call_operand.vmem [shape: f32[1,88,1024], index: 11, kind: output, shape index: {}]   ;;  %s14813_s10 = inlined_call_operand.vmem [shape: f32[24,1], index: 10, kind: input, shape index: {}]   ;;  %s14814_s4 = inlined_call_operand.vmem [shape: f32[24,400], index: 4, kind: input, shape index: {}]   ;;  %s14815_s6 = inlined_call_operand.vmem [shape: f32[24,144], index: 6, kind: input, shape index: {}]   ;;  %s14816_s7 = inlined_call_operand.vmem [shape: f32[24,1], index: 7, kind: input, shape index: {}]   ;;  %s14817_s5 = inlined_call_operand.vmem [shape: f32[24,1], index: 5, kind: input, shape index: {}]   ;;  %s14818_s8 = inlined_call_operand.vmem [shape: f32[24,216], index: 8, kind: input, shape index: {}]   ;;  %s14819_s9 = inlined_call_operand.vmem [shape: f32[24,1], index: 9, kind: input, shape index: {}]  }
   0x1   :  { %v38_v0 = vld [vmem:[%s14808_s0] sm:$0xff]  ;;  %169 = vmatprep.mubr.f32.mxu0 %v6899_v1  ;;  %v39_v2 = vld [vmem:[%s14808_s0 + $0x8] sm:$0xff]  ;;  %288 = vmatprep.mubr.f32.mxu1 %v6899_v1  ;;  %v583_v8 = vld [vmem:[%s14810_s3 + $0x10] sm:$0xff]  ;;  %v14820_v25 = vlaneseq  ;;  %s6903_s12 = smov 19   ;;  %s6904_s25 = smov 1  }
   0x2   :  { %v56_v3 = vcombine.high %v38_v0, %v38_v0  ;;  %v57_v4 = vcombine.high %v39_v2, %v39_v2  ;;  %6879 = vset.pattern.permute.xlu0 %v6900_v5  ;;  %6880 = vset.pattern.permute.xlu1 %v6900_v5  ;;  %v6996_v6 = vld [vmem:[%s14809_s2] sm:$0xff]  ;;  %v40_v9 = vld [vmem:[%s14808_s0 + $0x10] sm:$0xff]  ;;  %v41_v10 = vld [vmem:[%s14808_s0 + $0x18] sm:$0xff]  ;;  %s6905_s26 = smov 127   ;;  %s6906_s27 = smov 109  }
   0x3   :  { %v581_v7 = vld [vmem:[%s14810_s3] sm:$0xff]  ;;  %v44_v11 = vld [vmem:[%s14809_s2 + $0x8] sm:$0xff]  ;;  %v58_v12 = vcombine.high %v40_v9, %v40_v9  ;;  %v59_v13 = vcombine.high %v41_v10, %v41_v10  ;;  %599 = vperm.xlu1 %6880, %v583_v8   ;;  %v584_v15 = vld [vmem:[%s14810_s3 + $0x18] sm:$0xff]  ;;  %v7129_v26 = vshrl.u32 %v14820_v25, 7  ;;  %s6907_s28 = smov 108   ;;  %s6908_s13 = smov 107  }
   0x4   :  { %6773 = vmatprep.subr.msk.mxu0 %vm88_vm0, %v56_v3  ;;  %6784 = vmatprep.subr.msk.mxu1 %vm88_vm0, %v57_v4  ;;  %v582_v14 = vld [vmem:[%s14810_s3 + $0x8] sm:$0xff]  ;;  %v45_v16 = vld [vmem:[%s14809_s2 + $0x10] sm:$0xff]  ;;  %v585_v17 = vld [vmem:[%s14810_s3 + $0x20] sm:$0xff]  ;;  %s6910_s0 = smov 41   ;;  %s6911_s18 = smov 40  }
   0x5   :  { %6774 = vmatpush1.msk.msra.mxu0 %vm88_vm0, %v38_v0  ;;  %6785 = vmatpush1.msk.msra.mxu1 %vm88_vm0, %v39_v2  ;;  %v586_v18 = vld [vmem:[%s14810_s3 + $0x28] sm:$0xff]  ;;  %v46_v19 = vld [vmem:[%s14809_s2 + $0x18] sm:$0xff]  ;;  %v47_v20 = vld [vmem:[%s14809_s2 + $0x20] sm:$0xff]  ;;  %v668_v28 = vsub.s32 0, %v7129_v26  ;;  %v676_v29 = vsub.s32 2, %v7129_v26  ;;  %v672_v31 = vsub.s32 1, %v7129_v26 }
   0x6   :  { %6775 = vmatmul.mubr.msk.f32.vlgmr.msra.gmra.mxu0 %vm60_vm1, %v6996_v6  ;;  %6786 = vmatmul.mubr.msk.f32.vlgmr.msra.gmra.mxu1 %vm60_vm1, %v6996_v6  ;;  %v48_v21 = vld [vmem:[%s14809_s2 + $0x28] sm:$0xff]  ;;  %v49_v22 = vld [vmem:[%s14809_s2 + $0x30] sm:$0xff]  ;;  %v50_v23 = vld [vmem:[%s14809_s2 + $0x38] sm:$0xff]  ;;  %v680_v32 = vsub.s32 3, %v7129_v26  ;;  %s6912_s19 = smov 39   ;;  %s6913_s23 = smov 38  }
   0x7   :  { %175 = vmatprep.mubr.f32.mxu0 %v6899_v1  ;;  %294 = vmatprep.mubr.f32.mxu1 %v6899_v1  ;;  %v51_v24 = vld [vmem:[%s14809_s2 + $0x40] sm:$0xff]  ;;  %s6915_s24 = smov 18   ;;  %s6916_s3 = smov 2  }
   0x8   :  { %589 = vperm.xlu0 %6879, %v581_v7   ;;  %6795 = vmatprep.subr.msk.mxu0 %vm88_vm0, %v58_v12  ;;  %v7138_v30 = vld [vmem:[%s14811_s1] sm:$0xff]  ;;  %s6917_s14 = smov 126   ;;  %s6918_s2 = smov 110  }
   0x9   :  { %6806 = vmatprep.subr.msk.mxu1 %vm88_vm0, %v59_v13  ;;  %604 = vperm.xlu1 %6880, %v584_v15   ;;  %v7143_v33 = vrot.slane %v7138_v30, %v668_v28  ;;  %v7146_v34 = vrot.slane %v7138_v30, %v676_v29  ;;  %v7150_v38 = vrot.slane %v7138_v30, %v672_v31  ;;  %v688_v29 = vsub.s32 5, %v7129_v26  ;;  %s6919_s15 = smov 87   ;;  %s6920_s1 = smov 88  }
   0xa   :  { %6776 = vmatmul.mubr.msk.f32.gmra.mxu0 %vm60_vm1, %v44_v11  ;;  %6787 = vmatmul.mubr.msk.f32.gmra.mxu1 %vm60_vm1, %v44_v11  ;;  %v7156_v41 = vrot.slane %v7138_v30, %v680_v32  ;;  %v696_v31 = vsub.s32 7, %v7129_v26  ;;  %s6921_s16 = smov 89   ;;  %s6922_s17 = smov 90  }
   0xb   :  { %181 = vmatprep.mubr.f32.mxu0 %v6899_v1  ;;  %300 = vmatprep.mubr.f32.mxu1 %v6899_v1  ;;  %15348 = vst [vmem:[#allocation3_spill] sm:$0xff] %v7143_v33  ;;  %15349 = vst [vmem:[#allocation4_spill] sm:$0xff] %v7146_v34 }
   0xc   :  { %594 = vperm.xlu0 %6879, %v582_v14   ;;  %6796 = vmatpush1.msk.msra.mxu0 %vm88_vm0, %v40_v9  ;;  %15350 = vst [vmem:[#allocation5_spill] sm:$0xff] %v7150_v38  ;;  %15351 = vst [vmem:[#allocation6_spill] sm:$0xff] %v7156_v41 }
   0xd   :  { %6807 = vmatpush1.msk.msra.mxu1 %vm88_vm0, %v41_v10  ;;  %614 = vperm.xlu1 %6880, %v586_v18  }
   0xe   :  { %6777 = vmatmul.mubr.msk.f32.gmra.mxu0 %vm60_vm1, %v45_v16  ;;  %6788 = vmatmul.mubr.msk.f32.gmra.mxu1 %vm60_vm1, %v45_v16 }
   0xf   :  { %187 = vmatprep.mubr.f32.mxu0 %v6899_v1  ;;  %306 = vmatprep.mubr.f32.mxu1 %v6899_v1 }
  0x10   :  { %609 = vperm.xlu0 %6879, %v585_v17  }
  0x12   :  { %6778 = vmatmul.mubr.msk.f32.gmra.mxu0 %vm60_vm1, %v46_v19  ;;  %6789 = vmatmul.mubr.msk.f32.gmra.mxu1 %vm60_vm1, %v46_v19 }
  0x13   :  { %193 = vmatprep.mubr.f32.mxu0 %v6899_v1  ;;  %312 = vmatprep.mubr.f32.mxu1 %v6899_v1 }
  0x16   :  { %6779 = vmatmul.mubr.msk.f32.gmra.mxu0 %vm60_vm1, %v47_v20  ;;  %6790 = vmatmul.mubr.msk.f32.gmra.mxu1 %vm60_vm1, %v47_v20 }
  0x17   :  { %199 = vmatprep.mubr.f32.mxu0 %v6899_v1  ;;  %318 = vmatprep.mubr.f32.mxu1 %v6899_v1 }
  0x1a   :  { %6780 = vmatmul.mubr.msk.f32.gmra.mxu0 %vm60_vm1, %v48_v21  ;;  %6791 = vmatmul.mubr.msk.f32.gmra.mxu1 %vm60_vm1, %v48_v21 }
  0x1b   :  { %205 = vmatprep.mubr.f32.mxu0 %v6899_v1  ;;  %324 = vmatprep.mubr.f32.mxu1 %v6899_v1 }
  0x1e   :  { %6781 = vmatmul.mubr.msk.f32.gmra.mxu0 %vm60_vm1, %v49_v22  ;;  %6792 = vmatmul.mubr.msk.f32.gmra.mxu1 %vm60_vm1, %v49_v22 }
  0x1f   :  { %211 = vmatprep.mubr.f32.mxu0 %v6899_v1  ;;  %330 = vmatprep.mubr.f32.mxu1 %v6899_v1 }
  0x22   :  { %6782 = vmatmul.mubr.msk.f32.gmra.mxu0 %vm60_vm1, %v50_v23  ;;  %6793 = vmatmul.mubr.msk.f32.gmra.mxu1 %vm60_vm1, %v50_v23 }
  0x23   :  { %217 = vmatprep.mubr.f32.mxu0 %v6899_v1  ;;  %336 = vmatprep.mubr.f32.mxu1 %v6899_v1 }
  0x26   :  { %6783 = vmatmul.mubr.msk.f32.gmra.mxu0 %vm60_vm1, %v51_v24  ;;  %6794 = vmatmul.mubr.msk.f32.gmra.mxu1 %vm60_vm1, %v51_v24 }
  0x27   :  { %407 = vmatprep.mubr.f32.mxu0 %v6899_v1  ;;  %526 = vmatprep.mubr.f32.mxu1 %v6899_v1 }
  0x2a   :  { %6797 = vmatmul.mubr.msk.f32.vlgmr.msra.gmra.mxu0 %vm60_vm1, %v6996_v6  ;;  %6808 = vmatmul.mubr.msk.f32.vlgmr.msra.gmra.mxu1 %vm60_vm1, %v6996_v6 }
  0x2b   :  { %413 = vmatprep.mubr.f32.mxu0 %v6899_v1  ;;  %532 = vmatprep.mubr.f32.mxu1 %v6899_v1 }
  0x2e   :  { %6798 = vmatmul.mubr.msk.f32.gmra.mxu0 %vm60_vm1, %v44_v11  ;;  %6809 = vmatmul.mubr.msk.f32.gmra.mxu1 %vm60_vm1, %v44_v11 }
  0x2f   :  { %419 = vmatprep.mubr.f32.mxu0 %v6899_v1  ;;  %538 = vmatprep.mubr.f32.mxu1 %v6899_v1 }
  0x32   :  { %6799 = vmatmul.mubr.msk.f32.gmra.mxu0 %vm60_vm1, %v45_v16  ;;  %6810 = vmatmul.mubr.msk.f32.gmra.mxu1 %vm60_vm1, %v45_v16 }
  0x33   :  { %425 = vmatprep.mubr.f32.mxu0 %v6899_v1  ;;  %544 = vmatprep.mubr.f32.mxu1 %v6899_v1 }
  0x36   :  { %6800 = vmatmul.mubr.msk.f32.gmra.mxu0 %vm60_vm1, %v46_v19  ;;  %6811 = vmatmul.mubr.msk.f32.gmra.mxu1 %vm60_vm1, %v46_v19 }
  0x37   :  { %431 = vmatprep.mubr.f32.mxu0 %v6899_v1  ;;  %550 = vmatprep.mubr.f32.mxu1 %v6899_v1 }
  0x3a   :  { %6801 = vmatmul.mubr.msk.f32.gmra.mxu0 %vm60_vm1, %v47_v20  ;;  %6812 = vmatmul.mubr.msk.f32.gmra.mxu1 %vm60_vm1, %v47_v20 }
  0x3b   :  { %437 = vmatprep.mubr.f32.mxu0 %v6899_v1  ;;  %556 = vmatprep.mubr.f32.mxu1 %v6899_v1 }
  0x3e   :  { %6802 = vmatmul.mubr.msk.f32.gmra.mxu0 %vm60_vm1, %v48_v21  ;;  %6813 = vmatmul.mubr.msk.f32.gmra.mxu1 %vm60_vm1, %v48_v21 }
  0x3f   :  { %443 = vmatprep.mubr.f32.mxu0 %v6899_v1  ;;  %562 = vmatprep.mubr.f32.mxu1 %v6899_v1 }
  0x42   :  { %6803 = vmatmul.mubr.msk.f32.gmra.mxu0 %vm60_vm1, %v49_v22  ;;  %6814 = vmatmul.mubr.msk.f32.gmra.mxu1 %vm60_vm1, %v49_v22  ;;  %v684_v22 = vsub.s32 4, %v7129_v26 }
  0x43   :  { %449 = vmatprep.mubr.f32.mxu0 %v6899_v1  ;;  %568 = vmatprep.mubr.f32.mxu1 %v6899_v1 }
  0x46   :  { %6804 = vmatmul.mubr.msk.f32.gmra.mxu0 %vm60_vm1, %v50_v23  ;;  %6815 = vmatmul.mubr.msk.f32.gmra.mxu1 %vm60_vm1, %v50_v23  ;;  %v692_v23 = vsub.s32 6, %v7129_v26 }
  0x47   :  { %455 = vmatprep.mubr.f32.mxu0 %v6899_v1  ;;  %574 = vmatprep.mubr.f32.mxu1 %v6899_v1 }
  0x4a   :  { %6805 = vmatmul.mubr.msk.f32.gmra.mxu0 %vm60_vm1, %v51_v24  ;;  %6816 = vmatmul.mubr.msk.f32.gmra.mxu1 %vm60_vm1, %v51_v24 }
  0x83   :  { %v7131_v27 = vpop.permute.xlu0 %589 }
  0x87   :  { %v7153_v40 = vpop.permute.xlu0 %594 }
  0xc6   :  { %v171_v35 = vpop.f32.mrf.mxu0  ;;  %v290_v36 = vpop.f32.mrf.mxu1 }
  0xc7   :  { %v617_v37 = vadd.f32 %v7131_v27, %v171_v35  ;;  %v619_v39 = vadd.f32 %v7131_v27, %v290_v36  ;;  %v7269_v36 = vrot.slane %v7138_v30, %v684_v22 }
  0xc8   :  { %v173_v42 = vpop.f32.mrf.mxu0  ;;  %v292_v43 = vpop.f32.mrf.mxu1 }
  0xc9   :  { %v706_v44 = vmul.f32 %v7143_v33, %v617_v37  ;;  %v618_v45 = vadd.f32 %v7131_v27, %v173_v42  ;;  %v708_v46 = vmul.f32 %v7146_v34, %v619_v39  ;;  %v620_v47 = vadd.f32 %v7131_v27, %v292_v43  ;;  %15362 = vst [vmem:[#allocation17_spill] sm:$0xff] %v7269_v36 }
  0xca   :  { %v177_v48 = vpop.f32.mrf.mxu0  ;;  %v296_v49 = vpop.f32.mrf.mxu1  ;;  %v7272_v37 = vrot.slane %v7138_v30, %v692_v23 }
  0xcb   :  { %6681 = vst [vmem:[%s14812_s11] sm:$0xff] %v706_v44  ;;  %v707_v50 = vmul.f32 %v7150_v38, %v618_v45  ;;  %6683 = vst [vmem:[%s14812_s11 + $0x10] sm:$0xff] %v708_v46  ;;  %v625_v51 = vadd.f32 %v7153_v40, %v177_v48  ;;  %v709_v52 = vmul.f32 %v7156_v41, %v620_v47 }
  0xcc   :  { %v627_v53 = vadd.f32 %v7153_v40, %v296_v49  ;;  %v179_v54 = vpop.f32.mrf.mxu0  ;;  %v298_v55 = vpop.f32.mrf.mxu1  ;;  %15363 = vst [vmem:[#allocation18_spill] sm:$0xff] %v7272_v37  ;;  %v7279_v44 = vrot.slane %v7138_v30, %v688_v29  ;;  %v7282_v45 = vrot.slane %v7138_v30, %v696_v31 }
  0xcd   :  { %6682 = vst [vmem:[%s14812_s11 + $0x8] sm:$0xff] %v707_v50  ;;  %v714_v56 = vmul.f32 %v7143_v33, %v625_v51  ;;  %6684 = vst [vmem:[%s14812_s11 + $0x18] sm:$0xff] %v709_v52  ;;  %v626_v57 = vadd.f32 %v7153_v40, %v179_v54  ;;  %v628_v59 = vadd.f32 %v7153_v40, %v298_v55 }
  0xce   :  { %v716_v58 = vmul.f32 %v7146_v34, %v627_v53  ;;  %v7182_v60 = vpop.f32.mrf.mxu0  ;;  %v7184_v61 = vpop.f32.mrf.mxu1  ;;  %15364 = vst [vmem:[#allocation19_spill] sm:$0xff] %v7279_v44  ;;  %15365 = vst [vmem:[#allocation20_spill] sm:$0xff] %v7282_v45 }
  0xcf   :  { %6689 = vst [vmem:[%s14812_s11 + $0x40] sm:$0xff] %v714_v56  ;;  %v715_v62 = vmul.f32 %v7150_v38, %v626_v57  ;;  %v717_v63 = vmul.f32 %v7156_v41, %v628_v59 }
  0xd0   :  { %6691 = vst [vmem:[%s14812_s11 + $0x50] sm:$0xff] %v716_v58  ;;  %v7194_v0 = vpop.f32.mrf.mxu0  ;;  %v7196_v1 = vpop.f32.mrf.mxu1 }
  0xd1   :  { %6690 = vst [vmem:[%s14812_s11 + $0x48] sm:$0xff] %v715_v62  ;;  %6692 = vst [vmem:[%s14812_s11 + $0x58] sm:$0xff] %v717_v63 }
  0xd2   :  { %v7204_v2 = vpop.f32.mrf.mxu0  ;;  %v7206_v3 = vpop.f32.mrf.mxu1 }
  0xd4   :  { %v7208_v4 = vpop.f32.mrf.mxu0  ;;  %v7210_v5 = vpop.f32.mrf.mxu1 }
  0xd6   :  { %v7212_v6 = vpop.f32.mrf.mxu0  ;;  %v7214_v7 = vpop.f32.mrf.mxu1 }
  0xd7   :  { %15352 = vst [vmem:[#allocation7_spill] sm:$0xff] %v7212_v6  ;;  %15353 = vst [vmem:[#allocation8_spill] sm:$0xff] %v7214_v7 }
  0xd8   :  { %v7216_v8 = vpop.f32.mrf.mxu0  ;;  %v7218_v9 = vpop.f32.mrf.mxu1 }
  0xd9   :  { %15354 = vst [vmem:[#allocation9_spill] sm:$0xff] %v7216_v8  ;;  %15355 = vst [vmem:[#allocation10_spill] sm:$0xff] %v7218_v9 }
  0xda   :  { %v7220_v10 = vpop.f32.mrf.mxu0  ;;  %v7222_v11 = vpop.f32.mrf.mxu1 }
  0xdb   :  { %15356 = vst [vmem:[#allocation11_spill] sm:$0xff] %v7220_v10  ;;  %15357 = vst [vmem:[#allocation12_spill] sm:$0xff] %v7222_v11 }
  0xdc   :  { %v7224_v12 = vpop.f32.mrf.mxu0  ;;  %v7226_v13 = vpop.f32.mrf.mxu1 }
  0xdd   :  { %15358 = vst [vmem:[#allocation13_spill] sm:$0xff] %v7224_v12  ;;  %15359 = vst [vmem:[#allocation14_spill] sm:$0xff] %v7226_v13 }
  0xde   :  { %v7228_v14 = vpop.f32.mrf.mxu0  ;;  %v7230_v15 = vpop.f32.mrf.mxu1 }
  0xdf   :  { %754 = vrot.lane.b32.xlu0 %v7228_v14, %s6901_s29 }
  0xe0   :  { %v7234_v16 = vpop.f32.mrf.mxu0  ;;  %v7236_v17 = vpop.f32.mrf.mxu1 }
  0xe1   :  { %760 = vrot.lane.b32.xlu1 %v7234_v16, %s6901_s29 }
  0xe2   :  { %v7240_v18 = vpop.f32.mrf.mxu0  ;;  %v7242_v19 = vpop.f32.mrf.mxu1 }
  0xe3   :  { %766 = vrot.lane.b32.xlu0 %v7230_v15, %s6901_s29 }
  0xe4   :  { %v7246_v20 = vpop.f32.mrf.mxu0  ;;  %v7248_v21 = vpop.f32.mrf.mxu1 }
  0xe5   :  { %15360 = vst [vmem:[#allocation15_spill] sm:$0xff] %v7248_v21  ;;  %772 = vrot.lane.b32.xlu1 %v7236_v17, %s6901_s29 }
  0xe6   :  { %v7254_v24 = vpop.f32.mrf.mxu0  ;;  %v7256_v28 = vpop.f32.mrf.mxu1 }
  0xe7   :  { %829 = vrot.lane.b32.xlu0 %v7228_v14, %s6902_s30 }
  0xe8   :  { %v7262_v32 = vpop.f32.mrf.mxu0  ;;  %v7264_v35 = vpop.f32.mrf.mxu1 }
  0xe9   :  { %15361 = vst [vmem:[#allocation16_spill] sm:$0xff] %v7264_v35  ;;  %835 = vrot.lane.b32.xlu1 %v7234_v16, %s6902_s30 }
  0xea   :  { %v409_v39 = vpop.f32.mrf.mxu0  ;;  %v528_v42 = vpop.f32.mrf.mxu1 }
  0xeb   :  { %841 = vrot.lane.b32.xlu0 %v7230_v15, %s6902_s30  ;;  %v621_v26 = vadd.f32 %v7131_v27, %v409_v39  ;;  %v623_v43 = vadd.f32 %v7131_v27, %v528_v42 }
  0xec   :  { %v411_v46 = vpop.f32.mrf.mxu0  ;;  %v530_v47 = vpop.f32.mrf.mxu1 }
  0xed   :  { %847 = vrot.lane.b32.xlu1 %v7236_v17, %s6902_s30  ;;  %v710_v48 = vmul.f32 %v7269_v36, %v621_v26  ;;  %v712_v49 = vmul.f32 %v7272_v37, %v623_v43  ;;  %v622_v50 = vadd.f32 %v7131_v27, %v411_v46  ;;  %v624_v51 = vadd.f32 %v7131_v27, %v530_v47  ;;  %v7428_v26 = vpop.permute.xlu0 %609 }
  0xee   :  { %v415_v52 = vpop.f32.mrf.mxu0  ;;  %v534_v53 = vpop.f32.mrf.mxu1  ;;  %15366 = vst [vmem:[#allocation21_spill] sm:$0xff] %v7428_v26 }
  0xef   :  { %902 = vrot.lane.b32.xlu0 %v7228_v14, %s6903_s12  ;;  %6685 = vst [vmem:[%s14812_s11 + $0x20] sm:$0xff] %v710_v48  ;;  %6687 = vst [vmem:[%s14812_s11 + $0x30] sm:$0xff] %v712_v49  ;;  %v711_v30 = vmul.f32 %v7279_v44, %v622_v50  ;;  %v713_v54 = vmul.f32 %v7282_v45, %v624_v51  ;;  %v629_v27 = vadd.f32 %v7153_v40, %v415_v52 }
  0xf0   :  { %v631_v55 = vadd.f32 %v7153_v40, %v534_v53  ;;  %v417_v56 = vpop.f32.mrf.mxu0  ;;  %v536_v57 = vpop.f32.mrf.mxu1 }
  0xf1   :  { %908 = vrot.lane.b32.xlu1 %v7234_v16, %s6903_s12  ;;  %6686 = vst [vmem:[%s14812_s11 + $0x28] sm:$0xff] %v711_v30  ;;  %6688 = vst [vmem:[%s14812_s11 + $0x38] sm:$0xff] %v713_v54  ;;  %v718_v58 = vmul.f32 %v7269_v36, %v629_v27  ;;  %v630_v62 = vadd.f32 %v7153_v40, %v417_v56  ;;  %v632_v63 = vadd.f32 %v7153_v40, %v536_v57  ;;  %v7410_v40 = vpop.permute.xlu1 %599 }
  0xf2   :  { %v720_v59 = vmul.f32 %v7272_v37, %v631_v55  ;;  %v7414_v29 = vpop.f32.mrf.mxu0  ;;  %v7420_v31 = vpop.f32.mrf.mxu1 }
  0xf3   :  { %914 = vrot.lane.b32.xlu0 %v7230_v15, %s6903_s12  ;;  %6693 = vst [vmem:[%s14812_s11 + $0x60] sm:$0xff] %v718_v58  ;;  %v719_v22 = vmul.f32 %v7279_v44, %v630_v62  ;;  %v721_v23 = vmul.f32 %v7282_v45, %v632_v63 }
  0xf4   :  { %6695 = vst [vmem:[%s14812_s11 + $0x70] sm:$0xff] %v720_v59  ;;  %v7422_v39 = vpop.f32.mrf.mxu0  ;;  %v7432_v43 = vpop.f32.mrf.mxu1 }
  0xf5   :  { %920 = vrot.lane.b32.xlu1 %v7236_v17, %s6903_s12  ;;  %6694 = vst [vmem:[%s14812_s11 + $0x68] sm:$0xff] %v719_v22  ;;  %6696 = vst [vmem:[%s14812_s11 + $0x78] sm:$0xff] %v721_v23  ;;  %v7424_v42 = vpop.permute.xlu1 %604 }
  0xf6   :  { %v7434_v46 = vpop.f32.mrf.mxu0  ;;  %v7444_v49 = vpop.f32.mrf.mxu1 }
  0xf7   :  { %975 = vrot.lane.b32.xlu0 %v7228_v14, %s6904_s25 }
  0xf8   :  { %v7446_v50 = vpop.f32.mrf.mxu0  ;;  %v7456_v53 = vpop.f32.mrf.mxu1 }
  0xf9   :  { %981 = vrot.lane.b32.xlu1 %v7234_v16, %s6904_s25  ;;  %v7436_v47 = vpop.permute.xlu1 %614 }
  0xfa   :  { %15367 = vst [vmem:[#allocation22_spill] sm:$0xff] %v7436_v47  ;;  %v7458_v30 = vpop.f32.mrf.mxu0  ;;  %v7468_v55 = vpop.f32.mrf.mxu1 }
  0xfb   :  { %987 = vrot.lane.b32.xlu0 %v7230_v15, %s6904_s25  ;;  %15371 = vst [vmem:[#allocation26_spill] sm:$0xff] %v7458_v30  ;;  %15373 = vst [vmem:[#allocation28_spill] sm:$0xff] %v7468_v55 }
  0xfc   :  { %v7470_v56 = vpop.f32.mrf.mxu0  ;;  %v7480_v59 = vpop.f32.mrf.mxu1 }
  0xfd   :  { %993 = vrot.lane.b32.xlu1 %v7236_v17, %s6904_s25  ;;  %15374 = vst [vmem:[#allocation29_spill] sm:$0xff] %v7470_v56  ;;  %15375 = vst [vmem:[#allocation30_spill] sm:$0xff] %v7480_v59 }
  0xfe   :  { %v7482_v62 = vpop.f32.mrf.mxu0  ;;  %v7492_v23 = vpop.f32.mrf.mxu1 }
  0xff   :  { %1048 = vrot.lane.b32.xlu0 %v7228_v14, %s6905_s26  ;;  %15376 = vst [vmem:[#allocation31_spill] sm:$0xff] %v7482_v62  ;;  %15377 = vst [vmem:[#allocation32_spill] sm:$0xff] %v7492_v23 }
 0x100   :  { %v7494_v25 = vpop.f32.mrf.mxu0  ;;  %v7506_v6 = vpop.f32.mrf.mxu1 }
 0x101   :  { %1054 = vrot.lane.b32.xlu1 %v7234_v16, %s6905_s26  ;;  %15378 = vst [vmem:[#allocation33_spill] sm:$0xff] %v7494_v25  ;;  %15379 = vst [vmem:[#allocation34_spill] sm:$0xff] %v7506_v6 }
 0x102   :  { %v7500_v56 = vpop.f32.mrf.mxu0  ;;  %v7514_v25 = vpop.f32.mrf.mxu1 }
 0x103   :  { %1060 = vrot.lane.b32.xlu0 %v7230_v15, %s6905_s26 }
 0x104   :  { %v7512_v23 = vpop.f32.mrf.mxu0  ;;  %v7524_v6 = vpop.f32.mrf.mxu1 }
 0x105   :  { %1066 = vrot.lane.b32.xlu1 %v7236_v17, %s6905_s26  ;;  %15381 = vst [vmem:[#allocation36_spill] sm:$0xff] %v7524_v6 }
 0x107   :  { %1121 = vrot.lane.b32.xlu0 %v7228_v14, %s6906_s27 }
 0x109   :  { %1127 = vrot.lane.b32.xlu1 %v7234_v16, %s6906_s27 }
 0x10b   :  { %1133 = vrot.lane.b32.xlu0 %v7230_v15, %s6906_s27 }
 0x10d   :  { %756 = vrot.lane.b32.xlu1 %v7240_v18, %s6901_s29 }
 0x10f   :  { %762 = vrot.lane.b32.xlu0 %v7246_v20, %s6901_s29 }
 0x111   :  { %768 = vrot.lane.b32.xlu1 %v7242_v19, %s6901_s29 }
 0x113   :  { %774 = vrot.lane.b32.xlu0 %v7248_v21, %s6901_s29 }
 0x115   :  { %831 = vrot.lane.b32.xlu1 %v7240_v18, %s6902_s30 }
 0x117   :  { %837 = vrot.lane.b32.xlu0 %v7246_v20, %s6902_s30 }
 0x119   :  { %843 = vrot.lane.b32.xlu1 %v7242_v19, %s6902_s30 }
 0x11b   :  { %849 = vrot.lane.b32.xlu0 %v7248_v21, %s6902_s30 }
 0x11d   :  { %904 = vrot.lane.b32.xlu1 %v7240_v18, %s6903_s12 }
 0x11f   :  { %910 = vrot.lane.b32.xlu0 %v7246_v20, %s6903_s12 }
 0x121   :  { %916 = vrot.lane.b32.xlu1 %v7242_v19, %s6903_s12 }
 0x123   :  { %922 = vrot.lane.b32.xlu0 %v7248_v21, %s6903_s12 }
 0x125   :  { %977 = vrot.lane.b32.xlu1 %v7240_v18, %s6904_s25 }
 0x127   :  { %983 = vrot.lane.b32.xlu0 %v7246_v20, %s6904_s25 }
 0x129   :  { %989 = vrot.lane.b32.xlu1 %v7242_v19, %s6904_s25 }
 0x12b   :  { %995 = vrot.lane.b32.xlu0 %v7248_v21, %s6904_s25 }
 0x12d   :  { %1050 = vrot.lane.b32.xlu1 %v7240_v18, %s6905_s26 }
 0x12f   :  { %1056 = vrot.lane.b32.xlu0 %v7246_v20, %s6905_s26 }
 0x131   :  { %1062 = vrot.lane.b32.xlu1 %v7242_v19, %s6905_s26 }
 0x133   :  { %1068 = vrot.lane.b32.xlu0 %v7248_v21, %s6905_s26 }
 0x135   :  { %1123 = vrot.lane.b32.xlu1 %v7240_v18, %s6906_s27 }
 0x137   :  { %1129 = vrot.lane.b32.xlu0 %v7246_v20, %s6906_s27 }
 0x139   :  { %1135 = vrot.lane.b32.xlu1 %v7242_v19, %s6906_s27 }
 0x13b   :  { %758 = vrot.lane.b32.xlu0 %v7254_v24, %s6901_s29 }
 0x13d   :  { %764 = vrot.lane.b32.xlu1 %v7262_v32, %s6901_s29 }
 0x13f   :  { %770 = vrot.lane.b32.xlu0 %v7256_v28, %s6901_s29 }
 0x141   :  { %776 = vrot.lane.b32.xlu1 %v7264_v35, %s6901_s29 }
 0x143   :  { %833 = vrot.lane.b32.xlu0 %v7254_v24, %s6902_s30 }
 0x145   :  { %839 = vrot.lane.b32.xlu1 %v7262_v32, %s6902_s30 }
 0x147   :  { %845 = vrot.lane.b32.xlu0 %v7256_v28, %s6902_s30 }
 0x149   :  { %851 = vrot.lane.b32.xlu1 %v7264_v35, %s6902_s30 }
 0x14b   :  { %906 = vrot.lane.b32.xlu0 %v7254_v24, %s6903_s12 }
 0x14d   :  { %912 = vrot.lane.b32.xlu1 %v7262_v32, %s6903_s12 }
 0x14f   :  { %918 = vrot.lane.b32.xlu0 %v7256_v28, %s6903_s12 }
 0x151   :  { %v7440_v48 = vpop.permute.xlu0 %754  ;;  %924 = vrot.lane.b32.xlu1 %v7264_v35, %s6903_s12 }
 0x152   :  { %15368 = vst [vmem:[#allocation23_spill] sm:$0xff] %v7440_v48 }
 0x153   :  { %v7448_v51 = vpop.permute.xlu1 %760  ;;  %979 = vrot.lane.b32.xlu0 %v7254_v24, %s6904_s25 }
 0x154   :  { %15369 = vst [vmem:[#allocation24_spill] sm:$0xff] %v7448_v51 }
 0x155   :  { %v7452_v52 = vpop.permute.xlu0 %766  ;;  %985 = vrot.lane.b32.xlu1 %v7262_v32, %s6904_s25 }
 0x156   :  { %15370 = vst [vmem:[#allocation25_spill] sm:$0xff] %v7452_v52 }
 0x157   :  { %v7460_v54 = vpop.permute.xlu1 %772  ;;  %991 = vrot.lane.b32.xlu0 %v7256_v28, %s6904_s25 }
 0x158   :  { %15372 = vst [vmem:[#allocation27_spill] sm:$0xff] %v7460_v54 }
 0x159   :  { %v7464_v27 = vpop.permute.xlu0 %829  ;;  %997 = vrot.lane.b32.xlu1 %v7264_v35, %s6904_s25 }
 0x15b   :  { %v7472_v57 = vpop.permute.xlu1 %835  ;;  %1052 = vrot.lane.b32.xlu0 %v7254_v24, %s6905_s26 }
 0x15d   :  { %v7476_v58 = vpop.permute.xlu0 %841  ;;  %1058 = vrot.lane.b32.xlu1 %v7262_v32, %s6905_s26 }
 0x15f   :  { %v7484_v63 = vpop.permute.xlu1 %847  ;;  %1064 = vrot.lane.b32.xlu0 %v7256_v28, %s6905_s26 }
 0x161   :  { %v7488_v22 = vpop.permute.xlu0 %902  ;;  %1070 = vrot.lane.b32.xlu1 %v7264_v35, %s6905_s26 }
 0x163   :  { %v7496_v55 = vpop.permute.xlu1 %908  ;;  %1125 = vrot.lane.b32.xlu0 %v7254_v24, %s6906_s27 }
 0x165   :  { %v7502_v59 = vpop.permute.xlu0 %914  ;;  %1131 = vrot.lane.b32.xlu1 %v7262_v32, %s6906_s27 }
 0x167   :  { %v7508_v7 = vpop.permute.xlu1 %920  ;;  %778 = vrot.lane.b32.xlu0 %v7500_v56, %s6901_s29 }
 0x168   :  { %15380 = vst [vmem:[#allocation35_spill] sm:$0xff] %v7508_v7 }
 0x169   :  { %v7516_v8 = vpop.permute.xlu0 %975  ;;  %784 = vrot.lane.b32.xlu1 %v7512_v23, %s6901_s29 }
 0x16b   :  { %v7520_v30 = vpop.permute.xlu1 %981  ;;  %790 = vrot.lane.b32.xlu0 %v7514_v25, %s6901_s29 }
 0x16d   :  { %v7526_v26 = vpop.permute.xlu0 %987  ;;  %796 = vrot.lane.b32.xlu1 %v7524_v6, %s6901_s29 }
 0x16f   :  { %v7530_v9 = vpop.permute.xlu1 %993  ;;  %853 = vrot.lane.b32.xlu0 %v7500_v56, %s6902_s30 }
 0x170   :  { %15382 = vst [vmem:[#allocation37_spill] sm:$0xff] %v7530_v9 }
 0x171   :  { %v7534_v10 = vpop.permute.xlu0 %1048  ;;  %859 = vrot.lane.b32.xlu1 %v7512_v23, %s6902_s30 }
 0x172   :  { %15383 = vst [vmem:[#allocation38_spill] sm:$0xff] %v7534_v10 }
 0x173   :  { %v7538_v11 = vpop.permute.xlu1 %1054  ;;  %865 = vrot.lane.b32.xlu0 %v7514_v25, %s6902_s30 }
 0x174   :  { %15384 = vst [vmem:[#allocation39_spill] sm:$0xff] %v7538_v11  ;;  %v7598_v11 = vpop.f32.mrf.mxu1 }
 0x175   :  { %v7542_v12 = vpop.permute.xlu0 %1060  ;;  %871 = vrot.lane.b32.xlu1 %v7524_v6, %s6902_s30  ;;  %15400 = vst [vmem:[#allocation55_spill] sm:$0xff] %v7598_v11 }
 0x176   :  { %15385 = vst [vmem:[#allocation40_spill] sm:$0xff] %v7542_v12 }
 0x177   :  { %v7546_v62 = vpop.permute.xlu1 %1066  ;;  %926 = vrot.lane.b32.xlu0 %v7500_v56, %s6903_s12 }
 0x178   :  { %15386 = vst [vmem:[#allocation41_spill] sm:$0xff] %v7546_v62 }
 0x179   :  { %v7550_v47 = vpop.permute.xlu0 %1121  ;;  %932 = vrot.lane.b32.xlu1 %v7512_v23, %s6903_s12 }
 0x17a   :  { %15387 = vst [vmem:[#allocation42_spill] sm:$0xff] %v7550_v47 }
 0x17b   :  { %v7554_v13 = vpop.permute.xlu1 %1127  ;;  %938 = vrot.lane.b32.xlu0 %v7514_v25, %s6903_s12 }
 0x17c   :  { %15388 = vst [vmem:[#allocation43_spill] sm:$0xff] %v7554_v13 }
 0x17d   :  { %v7558_v10 = vpop.permute.xlu0 %1133  ;;  %944 = vrot.lane.b32.xlu1 %v7524_v6, %s6903_s12 }
 0x17e   :  { %15389 = vst [vmem:[#allocation44_spill] sm:$0xff] %v7558_v10 }
 0x17f   :  { %v7562_v12 = vpop.permute.xlu1 %756  ;;  %999 = vrot.lane.b32.xlu0 %v7500_v56, %s6904_s25 }
 0x180   :  { %15390 = vst [vmem:[#allocation45_spill] sm:$0xff] %v7562_v12 }
 0x181   :  { %v7566_v62 = vpop.permute.xlu0 %762  ;;  %1005 = vrot.lane.b32.xlu1 %v7512_v23, %s6904_s25 }
 0x182   :  { %15391 = vst [vmem:[#allocation46_spill] sm:$0xff] %v7566_v62  ;;  %v7586_v62 = vpop.f32.mrf.mxu0 }
 0x183   :  { %v7570_v47 = vpop.permute.xlu1 %768  ;;  %1011 = vrot.lane.b32.xlu0 %v7514_v25, %s6904_s25  ;;  %15396 = vst [vmem:[#allocation51_spill] sm:$0xff] %v7586_v62 }
 0x184   :  { %15392 = vst [vmem:[#allocation47_spill] sm:$0xff] %v7570_v47 }
 0x185   :  { %v7574_v13 = vpop.permute.xlu0 %774  ;;  %1017 = vrot.lane.b32.xlu1 %v7524_v6, %s6904_s25 }
 0x186   :  { %15393 = vst [vmem:[#allocation48_spill] sm:$0xff] %v7574_v13 }
 0x187   :  { %v7578_v10 = vpop.permute.xlu1 %831  ;;  %1072 = vrot.lane.b32.xlu0 %v7500_v56, %s6905_s26 }
 0x188   :  { %15394 = vst [vmem:[#allocation49_spill] sm:$0xff] %v7578_v10  ;;  %v7596_v10 = vpop.f32.mrf.mxu0 }
 0x189   :  { %v7582_v12 = vpop.permute.xlu0 %837  ;;  %1078 = vrot.lane.b32.xlu1 %v7512_v23, %s6905_s26  ;;  %15399 = vst [vmem:[#allocation54_spill] sm:$0xff] %v7596_v10 }
 0x18a   :  { %15395 = vst [vmem:[#allocation50_spill] sm:$0xff] %v7582_v12 }
 0x18b   :  { %v7588_v47 = vpop.permute.xlu1 %843  ;;  %1084 = vrot.lane.b32.xlu0 %v7514_v25, %s6905_s26 }
 0x18c   :  { %15397 = vst [vmem:[#allocation52_spill] sm:$0xff] %v7588_v47  ;;  %v7608_v47 = vpop.f32.mrf.mxu1 }
 0x18d   :  { %v7592_v13 = vpop.permute.xlu0 %849  ;;  %1090 = vrot.lane.b32.xlu1 %v7524_v6, %s6905_s26  ;;  %15403 = vst [vmem:[#allocation58_spill] sm:$0xff] %v7608_v47 }
 0x18e   :  { %15398 = vst [vmem:[#allocation53_spill] sm:$0xff] %v7592_v13 }
 0x18f   :  { %v7600_v12 = vpop.permute.xlu1 %904  ;;  %786 = vrot.lane.b32.xlu0 %v7596_v10, %s6901_s29 }
 0x190   :  { %15401 = vst [vmem:[#allocation56_spill] sm:$0xff] %v7600_v12 }
 0x191   :  { %v7604_v7 = vpop.permute.xlu0 %910  ;;  %780 = vrot.lane.b32.xlu1 %v7586_v62, %s6901_s29 }
 0x192   :  { %15402 = vst [vmem:[#allocation57_spill] sm:$0xff] %v7604_v7 }
 0x193   :  { %v7610_v13 = vpop.permute.xlu1 %916  ;;  %798 = vrot.lane.b32.xlu0 %v7608_v47, %s6901_s29 }
 0x194   :  { %15404 = vst [vmem:[#allocation59_spill] sm:$0xff] %v7610_v13 }
 0x195   :  { %v7614_v45 = vpop.permute.xlu0 %922  ;;  %792 = vrot.lane.b32.xlu1 %v7598_v11, %s6901_s29 }
 0x196   :  { %15405 = vst [vmem:[#allocation60_spill] sm:$0xff] %v7614_v45 }
 0x197   :  { %v7618_v12 = vpop.permute.xlu1 %977  ;;  %861 = vrot.lane.b32.xlu0 %v7596_v10, %s6902_s30 }
 0x198   :  { %15406 = vst [vmem:[#allocation61_spill] sm:$0xff] %v7618_v12 }
 0x199   :  { %v7622_v7 = vpop.permute.xlu0 %983  ;;  %855 = vrot.lane.b32.xlu1 %v7586_v62, %s6902_s30 }
 0x19a   :  { %15407 = vst [vmem:[#allocation62_spill] sm:$0xff] %v7622_v7 }
 0x19b   :  { %v7626_v9 = vpop.permute.xlu1 %989  ;;  %873 = vrot.lane.b32.xlu0 %v7608_v47, %s6902_s30 }
 0x19c   :  { %15408 = vst [vmem:[#allocation63_spill] sm:$0xff] %v7626_v9 }
 0x19d   :  { %v7630_v13 = vpop.permute.xlu0 %995  ;;  %867 = vrot.lane.b32.xlu1 %v7598_v11, %s6902_s30 }
 0x19e   :  { %15409 = vst [vmem:[#allocation64_spill] sm:$0xff] %v7630_v13 }
 0x19f   :  { %v7634_v45 = vpop.permute.xlu1 %1050  ;;  %934 = vrot.lane.b32.xlu0 %v7596_v10, %s6903_s12 }
 0x1a0   :  { %15410 = vst [vmem:[#allocation65_spill] sm:$0xff] %v7634_v45 }
 0x1a1   :  { %v7638_v12 = vpop.permute.xlu0 %1056  ;;  %928 = vrot.lane.b32.xlu1 %v7586_v62, %s6903_s12 }
 0x1a2   :  { %15411 = vst [vmem:[#allocation66_spill] sm:$0xff] %v7638_v12 }
 0x1a3   :  { %v7642_v7 = vpop.permute.xlu1 %1062  ;;  %946 = vrot.lane.b32.xlu0 %v7608_v47, %s6903_s12 }
 0x1a4   :  { %15412 = vst [vmem:[#allocation67_spill] sm:$0xff] %v7642_v7 }
 0x1a5   :  { %v7646_v9 = vpop.permute.xlu0 %1068  ;;  %940 = vrot.lane.b32.xlu1 %v7598_v11, %s6903_s12 }
 0x1a6   :  { %15413 = vst [vmem:[#allocation68_spill] sm:$0xff] %v7646_v9 }
 0x1a7   :  { %v7650_v13 = vpop.permute.xlu1 %1123  ;;  %1007 = vrot.lane.b32.xlu0 %v7596_v10, %s6904_s25 }
 0x1a8   :  { %15414 = vst [vmem:[#allocation69_spill] sm:$0xff] %v7650_v13 }
 0x1a9   :  { %v7654_v45 = vpop.permute.xlu0 %1129  ;;  %1001 = vrot.lane.b32.xlu1 %v7586_v62, %s6904_s25 }
 0x1aa   :  { %15415 = vst [vmem:[#allocation70_spill] sm:$0xff] %v7654_v45 }
 0x1ab   :  { %v7658_v12 = vpop.permute.xlu1 %1135  ;;  %1019 = vrot.lane.b32.xlu0 %v7608_v47, %s6904_s25 }
 0x1ac   :  { %15416 = vst [vmem:[#allocation71_spill] sm:$0xff] %v7658_v12 }
 0x1ad   :  { %v7662_v7 = vpop.permute.xlu0 %758  ;;  %1013 = vrot.lane.b32.xlu1 %v7598_v11, %s6904_s25 }
 0x1ae   :  { %15417 = vst [vmem:[#allocation72_spill] sm:$0xff] %v7662_v7  ;;  %v7682_v7 = vpop.f32.mrf.mxu0 }
 0x1af   :  { %v7666_v9 = vpop.permute.xlu1 %764  ;;  %1080 = vrot.lane.b32.xlu0 %v7596_v10, %s6905_s26  ;;  %15422 = vst [vmem:[#allocation77_spill] sm:$0xff] %v7682_v7 }
 0x1b0   :  { %15418 = vst [vmem:[#allocation73_spill] sm:$0xff] %v7666_v9 }
 0x1b1   :  { %v7670_v13 = vpop.permute.xlu0 %770  ;;  %1074 = vrot.lane.b32.xlu1 %v7586_v62, %s6905_s26 }
 0x1b2   :  { %15419 = vst [vmem:[#allocation74_spill] sm:$0xff] %v7670_v13 }
 0x1b3   :  { %v7674_v45 = vpop.permute.xlu1 %776  ;;  %1092 = vrot.lane.b32.xlu0 %v7608_v47, %s6905_s26 }
 0x1b4   :  { %15420 = vst [vmem:[#allocation75_spill] sm:$0xff] %v7674_v45  ;;  %v7692_v45 = vpop.f32.mrf.mxu1 }
 0x1b5   :  { %v7678_v12 = vpop.permute.xlu0 %833  ;;  %1086 = vrot.lane.b32.xlu1 %v7598_v11, %s6905_s26  ;;  %15425 = vst [vmem:[#allocation80_spill] sm:$0xff] %v7692_v45 }
 0x1b6   :  { %15421 = vst [vmem:[#allocation76_spill] sm:$0xff] %v7678_v12  ;;  %v7698_v12 = vpop.f32.mrf.mxu0 }
 0x1b7   :  { %v7684_v9 = vpop.permute.xlu1 %839  ;;  %782 = vrot.lane.b32.xlu0 %v7682_v7, %s6901_s29  ;;  %15427 = vst [vmem:[#allocation82_spill] sm:$0xff] %v7698_v12 }
 0x1b8   :  { %15423 = vst [vmem:[#allocation78_spill] sm:$0xff] %v7684_v9 }
 0x1b9   :  { %v7688_v13 = vpop.permute.xlu0 %845  ;;  %1139 = vrot.lane.b32.xlu1 %v7236_v17, %s6906_s27 }
 0x1ba   :  { %15424 = vst [vmem:[#allocation79_spill] sm:$0xff] %v7688_v13  ;;  %v7708_v13 = vpop.f32.mrf.mxu1 }
 0x1bb   :  { %v7694_v54 = vpop.permute.xlu1 %851  ;;  %794 = vrot.lane.b32.xlu0 %v7692_v45, %s6901_s29  ;;  %15430 = vst [vmem:[#allocation85_spill] sm:$0xff] %v7708_v13 }
 0x1bc   :  { %15426 = vst [vmem:[#allocation81_spill] sm:$0xff] %v7694_v54 }
 0x1bd   :  { %v7700_v52 = vpop.permute.xlu0 %906  ;;  %788 = vrot.lane.b32.xlu1 %v7698_v12, %s6901_s29 }
 0x1be   :  { %15428 = vst [vmem:[#allocation83_spill] sm:$0xff] %v7700_v52 }
 0x1bf   :  { %v7704_v9 = vpop.permute.xlu1 %912  ;;  %857 = vrot.lane.b32.xlu0 %v7682_v7, %s6902_s30 }
 0x1c0   :  { %15429 = vst [vmem:[#allocation84_spill] sm:$0xff] %v7704_v9 }
 0x1c1   :  { %v7710_v48 = vpop.permute.xlu0 %918  ;;  %800 = vrot.lane.b32.xlu1 %v7708_v13, %s6901_s29 }
 0x1c2   :  { %15431 = vst [vmem:[#allocation86_spill] sm:$0xff] %v7710_v48 }
 0x1c3   :  { %v7714_v54 = vpop.permute.xlu1 %924  ;;  %869 = vrot.lane.b32.xlu0 %v7692_v45, %s6902_s30 }
 0x1c4   :  { %15432 = vst [vmem:[#allocation87_spill] sm:$0xff] %v7714_v54 }
 0x1c5   :  { %v7718_v52 = vpop.permute.xlu0 %979  ;;  %863 = vrot.lane.b32.xlu1 %v7698_v12, %s6902_s30 }
 0x1c6   :  { %15433 = vst [vmem:[#allocation88_spill] sm:$0xff] %v7718_v52 }
 0x1c7   :  { %v7722_v9 = vpop.permute.xlu1 %985  ;;  %930 = vrot.lane.b32.xlu0 %v7682_v7, %s6903_s12 }
 0x1c8   :  { %15434 = vst [vmem:[#allocation89_spill] sm:$0xff] %v7722_v9 }
 0x1c9   :  { %v7726_v51 = vpop.permute.xlu0 %991  ;;  %875 = vrot.lane.b32.xlu1 %v7708_v13, %s6902_s30 }
 0x1ca   :  { %15435 = vst [vmem:[#allocation90_spill] sm:$0xff] %v7726_v51 }
 0x1cb   :  { %v7730_v48 = vpop.permute.xlu1 %997  ;;  %942 = vrot.lane.b32.xlu0 %v7692_v45, %s6903_s12 }
 0x1cc   :  { %15436 = vst [vmem:[#allocation91_spill] sm:$0xff] %v7730_v48 }
 0x1cd   :  { %v7734_v54 = vpop.permute.xlu0 %1052  ;;  %936 = vrot.lane.b32.xlu1 %v7698_v12, %s6903_s12 }
 0x1ce   :  { %15437 = vst [vmem:[#allocation92_spill] sm:$0xff] %v7734_v54 }
 0x1cf   :  { %v7738_v52 = vpop.permute.xlu1 %1058  ;;  %1003 = vrot.lane.b32.xlu0 %v7682_v7, %s6904_s25 }
 0x1d0   :  { %15438 = vst [vmem:[#allocation93_spill] sm:$0xff] %v7738_v52 }
 0x1d1   :  { %v7742_v9 = vpop.permute.xlu0 %1064  ;;  %948 = vrot.lane.b32.xlu1 %v7708_v13, %s6903_s12 }
 0x1d2   :  { %15439 = vst [vmem:[#allocation94_spill] sm:$0xff] %v7742_v9 }
 0x1d3   :  { %v7746_v51 = vpop.permute.xlu1 %1070  ;;  %1015 = vrot.lane.b32.xlu0 %v7692_v45, %s6904_s25 }
 0x1d4   :  { %15440 = vst [vmem:[#allocation95_spill] sm:$0xff] %v7746_v51 }
 0x1d5   :  { %v7750_v48 = vpop.permute.xlu0 %1125  ;;  %1009 = vrot.lane.b32.xlu1 %v7698_v12, %s6904_s25 }
 0x1d6   :  { %15441 = vst [vmem:[#allocation96_spill] sm:$0xff] %v7750_v48 }
 0x1d7   :  { %v7754_v54 = vpop.permute.xlu1 %1131  ;;  %1076 = vrot.lane.b32.xlu0 %v7682_v7, %s6905_s26 }
 0x1d8   :  { %15442 = vst [vmem:[#allocation97_spill] sm:$0xff] %v7754_v54 }
 0x1d9   :  { %v7758_v52 = vpop.permute.xlu0 %778  ;;  %1021 = vrot.lane.b32.xlu1 %v7708_v13, %s6904_s25 }
 0x1da   :  { %15443 = vst [vmem:[#allocation98_spill] sm:$0xff] %v7758_v52 }
 0x1db   :  { %v7762_v9 = vpop.permute.xlu1 %784  ;;  %1088 = vrot.lane.b32.xlu0 %v7692_v45, %s6905_s26 }
 0x1dc   :  { %15444 = vst [vmem:[#allocation99_spill] sm:$0xff] %v7762_v9 }
 0x1dd   :  { %v7766_v51 = vpop.permute.xlu0 %790  ;;  %1082 = vrot.lane.b32.xlu1 %v7698_v12, %s6905_s26 }
 0x1de   :  { %15445 = vst [vmem:[#allocation100_spill] sm:$0xff] %v7766_v51 }
 0x1df   :  { %v7770_v48 = vpop.permute.xlu1 %796  ;;  %1137 = vrot.lane.b32.xlu0 %v7256_v28, %s6906_s27 }
 0x1e0   :  { %15446 = vst [vmem:[#allocation101_spill] sm:$0xff] %v7770_v48 }
 0x1e1   :  { %v7774_v54 = vpop.permute.xlu0 %853  ;;  %1094 = vrot.lane.b32.xlu1 %v7708_v13, %s6905_s26 }
 0x1e2   :  { %15447 = vst [vmem:[#allocation102_spill] sm:$0xff] %v7774_v54 }
 0x1e3   :  { %v7778_v52 = vpop.permute.xlu1 %859  ;;  %1141 = vrot.lane.b32.xlu0 %v7248_v21, %s6906_s27 }
 0x1e4   :  { %15448 = vst [vmem:[#allocation103_spill] sm:$0xff] %v7778_v52 }
 0x1e5   :  { %v7782_v9 = vpop.permute.xlu0 %865  ;;  %1143 = vrot.lane.b32.xlu1 %v7264_v35, %s6906_s27 }
 0x1e6   :  { %15449 = vst [vmem:[#allocation104_spill] sm:$0xff] %v7782_v9 }
 0x1e7   :  { %v7786_v51 = vpop.permute.xlu1 %871  ;;  %1145 = vrot.lane.b32.xlu0 %v7500_v56, %s6906_s27 }
 0x1e8   :  { %15450 = vst [vmem:[#allocation105_spill] sm:$0xff] %v7786_v51 }
 0x1e9   :  { %v7790_v48 = vpop.permute.xlu0 %926  ;;  %1147 = vrot.lane.b32.xlu1 %v7586_v62, %s6906_s27 }
 0x1ea   :  { %15451 = vst [vmem:[#allocation106_spill] sm:$0xff] %v7790_v48 }
 0x1eb   :  { %v7794_v54 = vpop.permute.xlu1 %932  ;;  %1149 = vrot.lane.b32.xlu0 %v7682_v7, %s6906_s27 }
 0x1ec   :  { %15452 = vst [vmem:[#allocation107_spill] sm:$0xff] %v7794_v54 }
 0x1ed   :  { %v7798_v52 = vpop.permute.xlu0 %938  ;;  %1151 = vrot.lane.b32.xlu1 %v7512_v23, %s6906_s27 }
 0x1ee   :  { %15453 = vst [vmem:[#allocation108_spill] sm:$0xff] %v7798_v52 }
 0x1ef   :  { %v7802_v9 = vpop.permute.xlu1 %944  ;;  %1153 = vrot.lane.b32.xlu0 %v7596_v10, %s6906_s27 }
 0x1f0   :  { %15454 = vst [vmem:[#allocation109_spill] sm:$0xff] %v7802_v9 }
 0x1f1   :  { %v7806_v51 = vpop.permute.xlu0 %999  ;;  %1155 = vrot.lane.b32.xlu1 %v7698_v12, %s6906_s27 }
 0x1f2   :  { %15455 = vst [vmem:[#allocation110_spill] sm:$0xff] %v7806_v51 }
 0x1f3   :  { %v7810_v48 = vpop.permute.xlu1 %1005  ;;  %1157 = vrot.lane.b32.xlu0 %v7514_v25, %s6906_s27 }
 0x1f4   :  { %15456 = vst [vmem:[#allocation111_spill] sm:$0xff] %v7810_v48 }
 0x1f5   :  { %v7814_v54 = vpop.permute.xlu0 %1011  ;;  %1159 = vrot.lane.b32.xlu1 %v7598_v11, %s6906_s27 }
 0x1f6   :  { %15457 = vst [vmem:[#allocation112_spill] sm:$0xff] %v7814_v54 }
 0x1f7   :  { %v7818_v52 = vpop.permute.xlu1 %1017  ;;  %1161 = vrot.lane.b32.xlu0 %v7692_v45, %s6906_s27 }
 0x1f8   :  { %15458 = vst [vmem:[#allocation113_spill] sm:$0xff] %v7818_v52 }
 0x1f9   :  { %v7822_v9 = vpop.permute.xlu0 %1072  ;;  %1163 = vrot.lane.b32.xlu1 %v7524_v6, %s6906_s27 }
 0x1fa   :  { %15459 = vst [vmem:[#allocation114_spill] sm:$0xff] %v7822_v9 }
 0x1fb   :  { %v7826_v51 = vpop.permute.xlu1 %1078  ;;  %1165 = vrot.lane.b32.xlu0 %v7608_v47, %s6906_s27 }
 0x1fc   :  { %15460 = vst [vmem:[#allocation115_spill] sm:$0xff] %v7826_v51 }
 0x1fd   :  { %v7830_v48 = vpop.permute.xlu0 %1084  ;;  %1167 = vrot.lane.b32.xlu1 %v7708_v13, %s6906_s27 }
 0x1fe   :  { %15461 = vst [vmem:[#allocation116_spill] sm:$0xff] %v7830_v48 }
 0x1ff   :  { %v7834_v54 = vpop.permute.xlu1 %1090  ;;  %1194 = vrot.lane.b32.xlu0 %v7228_v14, %s6907_s28 }
 0x200   :  { %15462 = vst [vmem:[#allocation117_spill] sm:$0xff] %v7834_v54 }
 0x201   :  { %v7838_v9 = vpop.permute.xlu0 %786  ;;  %1196 = vrot.lane.b32.xlu1 %v7240_v18, %s6907_s28 }
 0x202   :  { %15463 = vst [vmem:[#allocation118_spill] sm:$0xff] %v7838_v9 }
 0x203   :  { %v7842_v51 = vpop.permute.xlu1 %780  ;;  %1198 = vrot.lane.b32.xlu0 %v7254_v24, %s6907_s28 }
 0x204   :  { %15464 = vst [vmem:[#allocation119_spill] sm:$0xff] %v7842_v51 }
 0x205   :  { %v7846_v48 = vpop.permute.xlu0 %798  ;;  %1200 = vrot.lane.b32.xlu1 %v7234_v16, %s6907_s28 }
 0x206   :  { %15465 = vst [vmem:[#allocation120_spill] sm:$0xff] %v7846_v48 }
 0x207   :  { %v7850_v54 = vpop.permute.xlu1 %792  ;;  %1202 = vrot.lane.b32.xlu0 %v7246_v20, %s6907_s28 }
 0x208   :  { %15466 = vst [vmem:[#allocation121_spill] sm:$0xff] %v7850_v54 }
 0x209   :  { %v7854_v52 = vpop.permute.xlu0 %861  ;;  %1204 = vrot.lane.b32.xlu1 %v7262_v32, %s6907_s28 }
 0x20a   :  { %15467 = vst [vmem:[#allocation122_spill] sm:$0xff] %v7854_v52 }
 0x20b   :  { %v7858_v9 = vpop.permute.xlu1 %855  ;;  %1206 = vrot.lane.b32.xlu0 %v7230_v15, %s6907_s28 }
 0x20c   :  { %15468 = vst [vmem:[#allocation123_spill] sm:$0xff] %v7858_v9 }
 0x20d   :  { %v7862_v51 = vpop.permute.xlu0 %873  ;;  %1208 = vrot.lane.b32.xlu1 %v7242_v19, %s6907_s28 }
 0x20e   :  { %15469 = vst [vmem:[#allocation124_spill] sm:$0xff] %v7862_v51 }
 0x20f   :  { %v7866_v48 = vpop.permute.xlu1 %867  ;;  %1210 = vrot.lane.b32.xlu0 %v7256_v28, %s6907_s28 }
 0x210   :  { %15470 = vst [vmem:[#allocation125_spill] sm:$0xff] %v7866_v48 }
 0x211   :  { %v7870_v54 = vpop.permute.xlu0 %934  ;;  %1212 = vrot.lane.b32.xlu1 %v7236_v17, %s6907_s28 }
 0x212   :  { %15471 = vst [vmem:[#allocation126_spill] sm:$0xff] %v7870_v54 }
 0x213   :  { %v7874_v52 = vpop.permute.xlu1 %928  ;;  %1214 = vrot.lane.b32.xlu0 %v7248_v21, %s6907_s28 }
 0x214   :  { %15472 = vst [vmem:[#allocation127_spill] sm:$0xff] %v7874_v52 }
 0x215   :  { %v7878_v9 = vpop.permute.xlu0 %946  ;;  %1216 = vrot.lane.b32.xlu1 %v7264_v35, %s6907_s28 }
 0x216   :  { %15473 = vst [vmem:[#allocation128_spill] sm:$0xff] %v7878_v9 }
 0x217   :  { %v7882_v51 = vpop.permute.xlu1 %940  ;;  %1218 = vrot.lane.b32.xlu0 %v7500_v56, %s6907_s28 }
 0x218   :  { %15474 = vst [vmem:[#allocation129_spill] sm:$0xff] %v7882_v51 }
 0x219   :  { %v7886_v48 = vpop.permute.xlu0 %1007  ;;  %1220 = vrot.lane.b32.xlu1 %v7586_v62, %s6907_s28 }
 0x21a   :  { %15475 = vst [vmem:[#allocation130_spill] sm:$0xff] %v7886_v48 }
 0x21b   :  { %v7890_v54 = vpop.permute.xlu1 %1001  ;;  %1222 = vrot.lane.b32.xlu0 %v7682_v7, %s6907_s28 }
 0x21c   :  { %15476 = vst [vmem:[#allocation131_spill] sm:$0xff] %v7890_v54 }
 0x21d   :  { %v7894_v52 = vpop.permute.xlu0 %1019  ;;  %1224 = vrot.lane.b32.xlu1 %v7512_v23, %s6907_s28 }
 0x21e   :  { %15477 = vst [vmem:[#allocation132_spill] sm:$0xff] %v7894_v52 }
 0x21f   :  { %v7898_v9 = vpop.permute.xlu1 %1013  ;;  %1226 = vrot.lane.b32.xlu0 %v7596_v10, %s6907_s28 }
 0x220   :  { %15478 = vst [vmem:[#allocation133_spill] sm:$0xff] %v7898_v9 }
 0x221   :  { %v7902_v51 = vpop.permute.xlu0 %1080  ;;  %1228 = vrot.lane.b32.xlu1 %v7698_v12, %s6907_s28 }
 0x222   :  { %15479 = vst [vmem:[#allocation134_spill] sm:$0xff] %v7902_v51 }
 0x223   :  { %v7906_v48 = vpop.permute.xlu1 %1074  ;;  %1230 = vrot.lane.b32.xlu0 %v7514_v25, %s6907_s28 }
 0x224   :  { %15480 = vst [vmem:[#allocation135_spill] sm:$0xff] %v7906_v48 }
 0x225   :  { %v7910_v54 = vpop.permute.xlu0 %1092  ;;  %1232 = vrot.lane.b32.xlu1 %v7598_v11, %s6907_s28 }
 0x226   :  { %15481 = vst [vmem:[#allocation136_spill] sm:$0xff] %v7910_v54 }
 0x227   :  { %v7914_v52 = vpop.permute.xlu1 %1086  ;;  %1234 = vrot.lane.b32.xlu0 %v7692_v45, %s6907_s28 }
 0x228   :  { %15482 = vst [vmem:[#allocation137_spill] sm:$0xff] %v7914_v52 }
 0x229   :  { %v7918_v9 = vpop.permute.xlu0 %782  ;;  %1236 = vrot.lane.b32.xlu1 %v7524_v6, %s6907_s28 }
 0x22a   :  { %15483 = vst [vmem:[#allocation138_spill] sm:$0xff] %v7918_v9 }
 0x22b   :  { %v7922_v51 = vpop.permute.xlu1 %1139  ;;  %1238 = vrot.lane.b32.xlu0 %v7608_v47, %s6907_s28 }
 0x22c   :  { %15484 = vst [vmem:[#allocation139_spill] sm:$0xff] %v7922_v51 }
 0x22d   :  { %v7926_v48 = vpop.permute.xlu0 %794  ;;  %1240 = vrot.lane.b32.xlu1 %v7708_v13, %s6907_s28 }
 0x22e   :  { %15485 = vst [vmem:[#allocation140_spill] sm:$0xff] %v7926_v48 }
 0x22f   :  { %1267 = vrot.lane.b32.xlu0 %v7228_v14, %s6908_s13  ;;  %v7932_v52 = vpop.permute.xlu1 %788 }
 0x230   :  { %15486 = vst [vmem:[#allocation141_spill] sm:$0xff] %v7932_v52 }
 0x231   :  { %v7934_v9 = vpop.permute.xlu0 %857  ;;  %1269 = vrot.lane.b32.xlu1 %v7240_v18, %s6908_s13 }
 0x232   :  { %15487 = vst [vmem:[#allocation142_spill] sm:$0xff] %v7934_v9 }
 0x233   :  { %1271 = vrot.lane.b32.xlu0 %v7254_v24, %s6908_s13  ;;  %v7940_v51 = vpop.permute.xlu1 %800 }
 0x234   :  { %15488 = vst [vmem:[#allocation143_spill] sm:$0xff] %v7940_v51 }
 0x235   :  { %v7942_v48 = vpop.permute.xlu0 %869  ;;  %1273 = vrot.lane.b32.xlu1 %v7234_v16, %s6908_s13 }
 0x236   :  { %15489 = vst [vmem:[#allocation144_spill] sm:$0xff] %v7942_v48 }
 0x237   :  { %1275 = vrot.lane.b32.xlu0 %v7246_v20, %s6908_s13  ;;  %v7948_v54 = vpop.permute.xlu1 %863 }
 0x238   :  { %15490 = vst [vmem:[#allocation145_spill] sm:$0xff] %v7948_v54 }
 0x239   :  { %v7950_v52 = vpop.permute.xlu0 %930  ;;  %1277 = vrot.lane.b32.xlu1 %v7262_v32, %s6908_s13 }
 0x23a   :  { %15491 = vst [vmem:[#allocation146_spill] sm:$0xff] %v7950_v52 }
 0x23b   :  { %1279 = vrot.lane.b32.xlu0 %v7230_v15, %s6908_s13  ;;  %v7956_v9 = vpop.permute.xlu1 %875 }
 0x23c   :  { %15492 = vst [vmem:[#allocation147_spill] sm:$0xff] %v7956_v9 }
 0x23d   :  { %v7958_v51 = vpop.permute.xlu0 %942  ;;  %1281 = vrot.lane.b32.xlu1 %v7242_v19, %s6908_s13 }
 0x23e   :  { %15493 = vst [vmem:[#allocation148_spill] sm:$0xff] %v7958_v51 }
 0x23f   :  { %1283 = vrot.lane.b32.xlu0 %v7256_v28, %s6908_s13  ;;  %v7964_v48 = vpop.permute.xlu1 %936 }
 0x240   :  { %15494 = vst [vmem:[#allocation149_spill] sm:$0xff] %v7964_v48 }
 0x241   :  { %v7966_v54 = vpop.permute.xlu0 %1003  ;;  %1285 = vrot.lane.b32.xlu1 %v7236_v17, %s6908_s13 }
 0x242   :  { %15495 = vst [vmem:[#allocation150_spill] sm:$0xff] %v7966_v54 }
 0x243   :  { %1287 = vrot.lane.b32.xlu0 %v7248_v21, %s6908_s13  ;;  %v7972_v52 = vpop.permute.xlu1 %948 }
 0x244   :  { %15496 = vst [vmem:[#allocation151_spill] sm:$0xff] %v7972_v52 }
 0x245   :  { %v7974_v9 = vpop.permute.xlu0 %1015  ;;  %1289 = vrot.lane.b32.xlu1 %v7264_v35, %s6908_s13 }
 0x246   :  { %15497 = vst [vmem:[#allocation152_spill] sm:$0xff] %v7974_v9 }
 0x247   :  { %1291 = vrot.lane.b32.xlu0 %v7500_v56, %s6908_s13  ;;  %v7980_v51 = vpop.permute.xlu1 %1009 }
 0x248   :  { %15498 = vst [vmem:[#allocation153_spill] sm:$0xff] %v7980_v51 }
 0x249   :  { %v7982_v48 = vpop.permute.xlu0 %1076  ;;  %1293 = vrot.lane.b32.xlu1 %v7586_v62, %s6908_s13  ;;  %v15568_v62 = vld [vmem:[#allocation60_spill] sm:$0xff] }
 0x24a   :  { %15499 = vst [vmem:[#allocation154_spill] sm:$0xff] %v7982_v48 }
 0x24b   :  { %1295 = vrot.lane.b32.xlu0 %v7682_v7, %s6908_s13  ;;  %v7988_v54 = vpop.permute.xlu1 %1021 }
 0x24c   :  { %15500 = vst [vmem:[#allocation155_spill] sm:$0xff] %v7988_v54  ;;  %v634_v54 = vadd.f32 %v7410_v40, %v7194_v0  ;;  %v635_v0 = vadd.f32 %v7410_v40, %v7184_v61  ;;  %v636_v61 = vadd.f32 %v7410_v40, %v7196_v1  ;;  %v637_v1 = vadd.f32 %v7410_v40, %v7414_v29 }
 0x24d   :  { %v7990_v52 = vpop.permute.xlu0 %1088  ;;  %1297 = vrot.lane.b32.xlu1 %v7512_v23, %s6908_s13 }
 0x24e   :  { %15501 = vst [vmem:[#allocation156_spill] sm:$0xff] %v7990_v52  ;;  %v8117_v29 = vmul.f32 %v7269_v36, %v637_v1 }
 0x24f   :  { %1299 = vrot.lane.b32.xlu0 %v7596_v10, %s6908_s13  ;;  %v7996_v35 = vpop.permute.xlu1 %1082 }
 0x250   :  { %15502 = vst [vmem:[#allocation157_spill] sm:$0xff] %v7996_v35  ;;  %15529 = vst [vmem:[#allocation183_spill] sm:$0xff] %v8117_v29 }
 0x251   :  { %v7998_v51 = vpop.permute.xlu0 %1137  ;;  %1301 = vrot.lane.b32.xlu1 %v7698_v12, %s6908_s13 }
 0x252   :  { %15503 = vst [vmem:[#allocation158_spill] sm:$0xff] %v7998_v51 }
 0x253   :  { %1303 = vrot.lane.b32.xlu0 %v7514_v25, %s6908_s13  ;;  %v8004_v7 = vpop.permute.xlu1 %1094 }
 0x254   :  { %15504 = vst [vmem:[#allocation159_spill] sm:$0xff] %v8004_v7 }
 0x255   :  { %v8006_v48 = vpop.permute.xlu0 %1141  ;;  %1305 = vrot.lane.b32.xlu1 %v7598_v11, %s6908_s13 }
 0x256   :  { %15505 = vst [vmem:[#allocation160_spill] sm:$0xff] %v8006_v48  ;;  %v1532_v48 = vld [vmem:[%s14813_s10] sm:$0xff] }
 0x257   :  { %1307 = vrot.lane.b32.xlu0 %v7692_v45, %s6908_s13  ;;  %v8012_v52 = vpop.permute.xlu1 %1143 }
 0x258   :  { %15506 = vst [vmem:[#allocation161_spill] sm:$0xff] %v8012_v52  ;;  %v633_v52 = vadd.f32 %v7410_v40, %v7182_v60 }
 0x259   :  { %v8014_v35 = vpop.permute.xlu0 %1145  ;;  %1309 = vrot.lane.b32.xlu1 %v7524_v6, %s6908_s13 }
 0x25a   :  { %15507 = vst [vmem:[#allocation162_spill] sm:$0xff] %v8014_v35  ;;  %v1533_v35 = vld [vmem:[%s14813_s10 + $0x8] sm:$0xff] }
 0x25b   :  { %1311 = vrot.lane.b32.xlu0 %v7608_v47, %s6908_s13  ;;  %v8020_v51 = vpop.permute.xlu1 %1147  ;;  %v15567_v47 = vld [vmem:[#allocation59_spill] sm:$0xff] }
 0x25c   :  { %15508 = vst [vmem:[#allocation163_spill] sm:$0xff] %v8020_v51  ;;  %v1534_v51 = vld [vmem:[%s14813_s10 + $0x10] sm:$0xff]  ;;  %s6909_s10 = smov 42  }
 0x25d   :  { %v8025_v12 = vpop.permute.xlu0 %1149  ;;  %1313 = vrot.lane.b32.xlu1 %v7708_v13, %s6908_s13  ;;  %v8044_v13 = vmul.f32 %v7143_v33, %v633_v52  ;;  %v8078_v52 = vmul.f32 %v7146_v34, %v635_v0  ;;  %v8096_v0 = vmul.f32 %v7156_v41, %v636_v61  ;;  %v15528_v61 = vlaneseq }
 0x25e   :  { %15509 = vst [vmem:[#allocation164_spill] sm:$0xff] %v8025_v12  ;;  %v641_v12 = vadd.f32 %v7424_v42, %v7204_v2  ;;  %v8060_v2 = vmul.f32 %v7150_v38, %v634_v54 }
 0x25f   :  { %1537 = vperm.xlu0 %6879, %v1532_v48   ;;  %v8034_v45 = vpop.permute.xlu1 %1151  ;;  %15512 = vst [vmem:[#allocation167_spill] sm:$0xff] %v8044_v13  ;;  %15520 = vst [vmem:[#allocation175_spill] sm:$0xff] %v8078_v52 }
 0x260   :  { %15510 = vst [vmem:[#allocation165_spill] sm:$0xff] %v8034_v45  ;;  %v8051_v48 = vmul.f32 %v7143_v33, %v641_v12  ;;  %v642_v45 = vadd.f32 %v7424_v42, %v7208_v4  ;;  %15516 = vst [vmem:[#allocation171_spill] sm:$0xff] %v8060_v2  ;;  %v643_v4 = vadd.f32 %v7424_v42, %v7206_v3 }
 0x261   :  { %v8041_v7 = vpop.permute.xlu0 %1153  ;;  %1542 = vperm.xlu1 %6880, %v1533_v35   ;;  %v644_v3 = vadd.f32 %v7424_v42, %v7210_v5  ;;  %15524 = vst [vmem:[#allocation179_spill] sm:$0xff] %v8096_v0  ;;  %v645_v5 = vadd.f32 %v7424_v42, %v7434_v46 }
 0x262   :  { %15511 = vst [vmem:[#allocation166_spill] sm:$0xff] %v8041_v7  ;;  %15514 = vst [vmem:[#allocation169_spill] sm:$0xff] %v8051_v48  ;;  %v8069_v35 = vmul.f32 %v7150_v38, %v642_v45  ;;  %v8087_v45 = vmul.f32 %v7146_v34, %v643_v4  ;;  %v15542_v7 = vld [vmem:[#allocation25_spill] sm:$0xff] }
 0x263   :  { %1547 = vperm.xlu0 %6879, %v1534_v51   ;;  %v8048_v60 = vpop.permute.xlu1 %1155  ;;  %v8105_v4 = vmul.f32 %v7156_v41, %v644_v3  ;;  %v8127_v46 = vmul.f32 %v7269_v36, %v645_v5 }
 0x264   :  { %15513 = vst [vmem:[#allocation168_spill] sm:$0xff] %v8048_v60  ;;  %15518 = vst [vmem:[#allocation173_spill] sm:$0xff] %v8069_v35 }
 0x265   :  { %v8055_v9 = vpop.permute.xlu0 %1157  ;;  %1574 = vrot.lane.b32.xlu1 %v8044_v13, %s6909_s10  ;;  %15522 = vst [vmem:[#allocation177_spill] sm:$0xff] %v8087_v45  ;;  %15526 = vst [vmem:[#allocation181_spill] sm:$0xff] %v8105_v4 }
 0x266   :  { %15515 = vst [vmem:[#allocation170_spill] sm:$0xff] %v8055_v9  ;;  %15531 = vst [vmem:[#allocation185_spill] sm:$0xff] %v8127_v46 }
 0x267   :  { %1576 = vrot.lane.b32.xlu0 %v8051_v48, %s6909_s10  ;;  %v8066_v12 = vpop.permute.xlu1 %1159 }
 0x268   :  { %15517 = vst [vmem:[#allocation172_spill] sm:$0xff] %v8066_v12 }
 0x269   :  { %v8073_v51 = vpop.permute.xlu0 %1161  ;;  %1578 = vrot.lane.b32.xlu1 %v8060_v2, %s6909_s10 }
 0x26a   :  { %15519 = vst [vmem:[#allocation174_spill] sm:$0xff] %v8073_v51 }
 0x26b   :  { %1580 = vrot.lane.b32.xlu0 %v8069_v35, %s6909_s10  ;;  %v8084_v54 = vpop.permute.xlu1 %1163 }
 0x26c   :  { %15521 = vst [vmem:[#allocation176_spill] sm:$0xff] %v8084_v54 }
 0x26d   :  { %v8091_v33 = vpop.permute.xlu0 %1165  ;;  %1582 = vrot.lane.b32.xlu1 %v8078_v52, %s6909_s10 }
 0x26e   :  { %15523 = vst [vmem:[#allocation178_spill] sm:$0xff] %v8091_v33  ;;  %v8114_v33 = vand.u32 127, %v15528_v61  ;;  %v646_v61 = vadd.f32 %v7424_v42, %v7446_v50  ;;  %v647_v50 = vadd.f32 %v7424_v42, %v7444_v49  ;;  %v648_v49 = vadd.f32 %v7424_v42, %v7456_v53 }
 0x26f   :  { %1584 = vrot.lane.b32.xlu0 %v8087_v45, %s6909_s10  ;;  %v8102_v38 = vpop.permute.xlu1 %1167 }
 0x270   :  { %15525 = vst [vmem:[#allocation180_spill] sm:$0xff] %v8102_v38  ;;  %v638_v38 = vadd.f32 %v7410_v40, %v7422_v39  ;;  %vm15228_vm2 = vcmp.lt.s32.totalorder %v8114_v33, 1  ;;  %vm877_vm3 = vcmp.lt.s32.totalorder %v8114_v33, 20  ;;  %vm15229_vm4 = vcmp.lt.s32.totalorder %v8114_v33, 19 }
 0x271   :  { %v8109_v34 = vpop.permute.xlu0 %1194  ;;  %1586 = vrot.lane.b32.xlu1 %v8096_v0, %s6909_s10  ;;  %v639_v39 = vadd.f32 %v7410_v40, %v7420_v31  ;;  %v1042_v36 = vsel %vm15228_vm2, %v7516_v8, %v7520_v30  ;;  %v1039_v31 = vsel %vm15228_vm2, %v7520_v30, %v7526_v26  ;;  %vm804_vm5 = vcmp.lt.s32.totalorder %v8114_v33, 21 }
 0x272   :  { %15527 = vst [vmem:[#allocation182_spill] sm:$0xff] %v8109_v34  ;;  %v8140_v1 = vmul.f32 %v7279_v44, %v638_v38  ;;  %v640_v38 = vadd.f32 %v7410_v40, %v7432_v43  ;;  %v8160_v54 = vmul.f32 %v7279_v44, %v646_v61  ;;  %v896_v30 = vsel %vm877_vm3, %v7464_v27, %v7472_v57  ;;  %v15563_v34 = vld [vmem:[#allocation57_spill] sm:$0xff] }
 0x273   :  { %1588 = vrot.lane.b32.xlu0 %v8105_v4, %s6909_s10  ;;  %v8123_v3 = vpop.permute.xlu1 %1196  ;;  %v893_v40 = vsel %vm877_vm3, %v7472_v57, %v7476_v58  ;;  %v969_v42 = vsel %vm15229_vm4, %v7488_v22, %v7496_v55  ;;  %v966_v43 = vsel %vm15229_vm4, %v7496_v55, %v7502_v59  ;;  %v8185_v53 = vmul.f32 %v7272_v37, %v639_v39  ;;  %v15540_v55 = vld [vmem:[#allocation24_spill] sm:$0xff]  ;;  %v15541_v39 = vld [vmem:[#allocation23_spill] sm:$0xff] }
 0x274   :  { %15530 = vst [vmem:[#allocation184_spill] sm:$0xff] %v8123_v3  ;;  %15533 = vst [vmem:[#allocation187_spill] sm:$0xff] %v8140_v1  ;;  %v890_v61 = vsel %vm877_vm3, %v7476_v58, %v7484_v63  ;;  %v1365_v44 = vadd.f32 %v1042_v36, %v969_v42  ;;  %v1366_v57 = vadd.f32 %v1039_v31, %v966_v43  ;;  %vm15227_vm6 = vcmp.lt.s32.totalorder %v8114_v33, 127  ;;  %v15543_v58 = vld [vmem:[#allocation27_spill] sm:$0xff] }
 0x275   :  { %v8131_v41 = vpop.permute.xlu0 %1198  ;;  %1590 = vrot.lane.b32.xlu1 %v8117_v29, %s6909_s10  ;;  %15535 = vst [vmem:[#allocation189_spill] sm:$0xff] %v8160_v54  ;;  %15537 = vst [vmem:[#allocation191_spill] sm:$0xff] %v8185_v53  ;;  %v8197_v9 = vmul.f32 %v7272_v37, %v647_v50  ;;  %v823_v60 = vsel %vm804_vm5, %v15541_v39, %v15540_v55  ;;  %v820_v36 = vsel %vm804_vm5, %v15540_v55, %v15542_v7  ;;  %v15546_v55 = vld [vmem:[#allocation20_spill] sm:$0xff] }
 0x276   :  { %15532 = vst [vmem:[#allocation186_spill] sm:$0xff] %v8131_v41  ;;  %v817_v31 = vsel %vm804_vm5, %v15542_v7, %v15543_v58  ;;  %v1341_v42 = vadd.f32 %v896_v30, %v823_v60  ;;  %v1342_v43 = vadd.f32 %v893_v40, %v820_v36  ;;  %v15544_v41 = vld [vmem:[#allocation37_spill] sm:$0xff]  ;;  %vm1169_vm7 = vcmp.lt.s32.totalorder %v8114_v33, 109  ;;  %v15549_v60 = vld [vmem:[#allocation35_spill] sm:$0xff]  ;;  %v15552_v36 = vld [vmem:[#allocation62_spill] sm:$0xff] }
 0x277   :  { %1592 = vrot.lane.b32.xlu0 %v8127_v46, %s6909_s10  ;;  %v8144_v5 = vpop.permute.xlu1 %1200  ;;  %15539 = vst [vmem:[#allocation193_spill] sm:$0xff] %v8197_v9  ;;  %v1036_v50 = vsel %vm15228_vm2, %v7526_v26, %v15544_v41  ;;  %v8224_v3 = vmul.f32 %v15546_v55, %v648_v49  ;;  %v1343_v7 = vadd.f32 %v890_v61, %v817_v31  ;;  %v15555_v61 = vld [vmem:[#allocation39_spill] sm:$0xff]  ;;  %v15556_v31 = vld [vmem:[#allocation38_spill] sm:$0xff]  ;;  %vm1242_vm8 = vcmp.lt.s32.totalorder %v8114_v33, 108 }
 0x278   :  { %15534 = vst [vmem:[#allocation188_spill] sm:$0xff] %v8144_v5  ;;  %v963_v30 = vsel %vm15229_vm4, %v7502_v59, %v15549_v60  ;;  %v8230_v26 = vadd.f32 %v1365_v44, %v1341_v42  ;;  %v8232_v40 = vadd.f32 %v1366_v57, %v1342_v43  ;;  %v1115_v59 = vsel %vm15227_vm6, %v15556_v31, %v15555_v61  ;;  %v15557_v44 = vld [vmem:[#allocation63_spill] sm:$0xff]  ;;  %v15558_v42 = vld [vmem:[#allocation64_spill] sm:$0xff] }
 0x279   :  { %v8164_v51 = vpop.permute.xlu0 %1202  ;;  %1594 = vrot.lane.b32.xlu1 %v8140_v1, %s6909_s10  ;;  %15548 = vst [vmem:[#allocation25_spill] sm:$0xff] %v8224_v3  ;;  %v1367_v49 = vadd.f32 %v1036_v50, %v963_v30  ;;  %v1040_v57 = vsel %vm15228_vm2, %v15552_v36, %v15557_v44  ;;  %v1037_v43 = vsel %vm15228_vm2, %v15557_v44, %v15558_v42  ;;  %v15560_v30 = vld [vmem:[#allocation50_spill] sm:$0xff]  ;;  %v15564_v5 = vld [vmem:[#allocation56_spill] sm:$0xff]  ;;  %vm15282_vm9 = vcmp.lt.s32.totalorder %v8114_v33, 107 }
 0x27a   :  { %15536 = vst [vmem:[#allocation190_spill] sm:$0xff] %v8164_v51  ;;  %15550 = vst [vmem:[#allocation27_spill] sm:$0xff] %v8230_v26  ;;  %v970_v44 = vsel %vm15229_vm4, %v15564_v5, %v15563_v34  ;;  %v964_v21 = vsel %vm15229_vm4, %v15567_v47, %v15568_v62  ;;  %v15571_v5 = vld [vmem:[#allocation45_spill] sm:$0xff]  ;;  %vm1931_vm10 = vcmp.lt.s32.totalorder %v8114_v33, 22  ;;  %vm1866_vm11 = vcmp.lt.s32.totalorder %v8114_v33, 38 }
 0x27b   :  { %1596 = vrot.lane.b32.xlu0 %v8160_v54, %s6909_s10  ;;  %v8193_v12 = vpop.permute.xlu1 %1204  ;;  %15551 = vst [vmem:[#allocation37_spill] sm:$0xff] %v8232_v40  ;;  %v15561_v40 = vld [vmem:[#allocation49_spill] sm:$0xff]  ;;  %v8298_v42 = vadd.f32 %v1367_v49, %v1343_v7  ;;  %vm1801_vm12 = vcmp.lt.s32.totalorder %v8114_v33, 39  ;;  %vm15311_vm13 = vcmp.lt.s32.totalorder %v8114_v33, 40  ;;  %vm15309_vm14 = vcmp.lt.s32.totalorder %v8114_v33, 41 }
 0x27c   :  { %15538 = vst [vmem:[#allocation192_spill] sm:$0xff] %v8193_v12  ;;  %v8221_v12 = vmul.f32 %v15546_v55, %v640_v38  ;;  %v15559_v55 = vld [vmem:[#allocation40_spill] sm:$0xff]  ;;  %v897_v26 = vsel %vm877_vm3, %v15561_v40, %v15560_v30  ;;  %vm15310_vm15 = vcmp.lt.s32.totalorder %v8114_v33, 42  ;;  %vm15271_vm0 = vcmp.lt.s32.totalorder %v8114_v33, 110 }
 0x27d   :  { %v8215_v37 = vpop.permute.xlu0 %1206  ;;  %1598 = vrot.lane.b32.xlu1 %v8185_v53, %s6909_s10  ;;  %v1112_v50 = vsel %vm15227_vm6, %v15555_v61, %v15559_v55  ;;  %v15566_v61 = vld [vmem:[#allocation53_spill] sm:$0xff]  ;;  %v1375_v53 = vadd.f32 %v1037_v43, %v964_v21  ;;  %15573 = vst [vmem:[#allocation38_spill] sm:$0xff] %v8298_v42  ;;  %v8309_v21 = vadd.f32 %v1115_v59, %v7228_v14  ;;  %v15597_v42 = vld [vmem:[#allocation78_spill] sm:$0xff]  ;;  %vm15266_vm1 = vcmp.lt.s32.totalorder %v8114_v33, 126 }
 0x27e   :  { %15545 = vst [vmem:[#allocation24_spill] sm:$0xff] %v8215_v37  ;;  %15547 = vst [vmem:[#allocation23_spill] sm:$0xff] %v8221_v12  ;;  %v15553_v37 = vld [vmem:[#allocation61_spill] sm:$0xff] }
 0x27f   :  { %v1043_v51 = vsel %vm15228_vm2, %v15553_v37, %v15552_v36  ;;  %1600 = vrot.lane.b32.xlu0 %v8197_v9, %s6909_s10  ;;  %v8240_v38 = vpop.permute.xlu1 %1208  ;;  %v15570_v9 = vld [vmem:[#allocation46_spill] sm:$0xff]  ;;  %15576 = vst [vmem:[#allocation63_spill] sm:$0xff] %v8309_v21  ;;  %v15601_v21 = vld [vmem:[#allocation83_spill] sm:$0xff] }
 0x280   :  { %15554 = vst [vmem:[#allocation35_spill] sm:$0xff] %v8240_v38  ;;  %v15562_v38 = vld [vmem:[#allocation52_spill] sm:$0xff]  ;;  %v1373_v6 = vadd.f32 %v1043_v51, %v970_v44 }
 0x281   :  { %v894_v36 = vsel %vm877_vm3, %v15560_v30, %v15562_v38  ;;  %v8270_v11 = vpop.permute.xlu0 %1210  ;;  %1602 = vrot.lane.b32.xlu1 %v8221_v12, %s6909_s10  ;;  %v891_v10 = vsel %vm877_vm3, %v15562_v38, %v15566_v61  ;;  %v967_v30 = vsel %vm15229_vm4, %v15563_v34, %v15567_v47  ;;  %v824_v38 = vsel %vm804_vm5, %v15571_v5, %v15570_v9  ;;  %v15574_v47 = vld [vmem:[#allocation47_spill] sm:$0xff] }
 0x282   :  { %15565 = vst [vmem:[#allocation62_spill] sm:$0xff] %v8270_v11  ;;  %v15569_v11 = vld [vmem:[#allocation41_spill] sm:$0xff]  ;;  %v1374_v37 = vadd.f32 %v1040_v57, %v967_v30  ;;  %v821_v51 = vsel %vm804_vm5, %v15570_v9, %v15574_v47  ;;  %v1349_v62 = vadd.f32 %v897_v26, %v824_v38  ;;  %v8312_v57 = vadd.f32 %v1112_v50, %v7234_v16  ;;  %v15580_v30 = vld [vmem:[#allocation43_spill] sm:$0xff]  ;;  %v15583_v26 = vld [vmem:[#allocation44_spill] sm:$0xff] }
 0x283   :  { %v1109_v12 = vsel %vm15227_vm6, %v15559_v55, %v15569_v11  ;;  %1604 = vrot.lane.b32.xlu0 %v8224_v3, %s6909_s10  ;;  %v8296_v34 = vpop.permute.xlu1 %1212  ;;  %v15575_v55 = vld [vmem:[#allocation48_spill] sm:$0xff]  ;;  %v1350_v43 = vadd.f32 %v894_v36, %v821_v51  ;;  %v15590_v38 = vld [vmem:[#allocation90_spill] sm:$0xff]  ;;  %s6923_s10 = smov 106  }
 0x284   :  { %15572 = vst [vmem:[#allocation39_spill] sm:$0xff] %v8296_v34  ;;  %v818_v44 = vsel %vm804_vm5, %v15574_v47, %v15575_v55  ;;  %15577 = vst [vmem:[#allocation40_spill] sm:$0xff] %v8312_v57  ;;  %v8319_v9 = vadd.f32 %v1109_v12, %v7230_v15  ;;  %v15581_v47 = vld [vmem:[#allocation42_spill] sm:$0xff]  ;;  %v8333_v16 = vadd.f32 %v1373_v6, %v1349_v62  ;;  %v15588_v15 = vld [vmem:[#allocation89_spill] sm:$0xff] }
 0x285   :  { %v1351_v7 = vadd.f32 %v891_v10, %v818_v44  ;;  %v8314_v49 = vpop.permute.xlu0 %1214  ;;  %1639 = vrot.lane.b32.xlu1 %v8044_v13, %s6910_s0  ;;  %v8325_v14 = vsel %vm1169_vm7, %v15581_v47, %v15580_v30  ;;  %v8331_v10 = vsel %vm1169_vm7, %v15580_v30, %v15583_v26  ;;  %v8335_v59 = vadd.f32 %v1374_v37, %v1350_v43  ;;  %v15589_v12 = vld [vmem:[#allocation88_spill] sm:$0xff]  ;;  %v15592_v6 = vld [vmem:[#allocation66_spill] sm:$0xff]  ;;  %v15593_v37 = vld [vmem:[#allocation65_spill] sm:$0xff] }
 0x286   :  { %15578 = vst [vmem:[#allocation50_spill] sm:$0xff] %v8314_v49  ;;  %15579 = vst [vmem:[#allocation49_spill] sm:$0xff] %v8319_v9  ;;  %v1044_v36 = vsel %vm15228_vm2, %v15589_v12, %v15588_v15  ;;  %v1041_v51 = vsel %vm15228_vm2, %v15588_v15, %v15590_v38  ;;  %v1116_v62 = vsel %vm15227_vm6, %v15593_v37, %v15592_v6  ;;  %v15596_v15 = vld [vmem:[#allocation91_spill] sm:$0xff]  ;;  %v15600_v57 = vld [vmem:[#allocation84_spill] sm:$0xff] }
 0x287   :  { %15582 = vst [vmem:[#allocation52_spill] sm:$0xff] %v8325_v14  ;;  %15584 = vst [vmem:[#allocation57_spill] sm:$0xff] %v8331_v10  ;;  %v8337_v50 = vadd.f32 %v1375_v53, %v1351_v7  ;;  %1641 = vrot.lane.b32.xlu0 %v8051_v48, %s6910_s0  ;;  %v8349_v44 = vpop.permute.xlu1 %1216  ;;  %v15594_v53 = vld [vmem:[#allocation67_spill] sm:$0xff]  ;;  %v15595_v7 = vld [vmem:[#allocation68_spill] sm:$0xff] }
 0x288   :  { %15585 = vst [vmem:[#allocation53_spill] sm:$0xff] %v8333_v16  ;;  %15586 = vst [vmem:[#allocation59_spill] sm:$0xff] %v8335_v59  ;;  %v1113_v43 = vsel %vm15227_vm6, %v15592_v6, %v15594_v53  ;;  %v1110_v30 = vsel %vm15227_vm6, %v15594_v53, %v15595_v7  ;;  %v15598_v59 = vld [vmem:[#allocation76_spill] sm:$0xff]  ;;  %v15599_v9 = vld [vmem:[#allocation79_spill] sm:$0xff]  ;;  %v971_v53 = vsel %vm15229_vm4, %v15601_v21, %v15600_v57 }
 0x289   :  { %15587 = vst [vmem:[#allocation41_spill] sm:$0xff] %v8337_v50  ;;  %15591 = vst [vmem:[#allocation46_spill] sm:$0xff] %v8349_v44  ;;  %v1038_v50 = vsel %vm15228_vm2, %v15590_v38, %v15596_v15  ;;  %v898_v16 = vsel %vm877_vm3, %v15598_v59, %v15597_v42  ;;  %v895_v6 = vsel %vm877_vm3, %v15597_v42, %v15599_v9  ;;  %v15602_v44 = vld [vmem:[#allocation86_spill] sm:$0xff]  ;;  %v8383_v47 = vpop.permute.xlu0 %1218  ;;  %1643 = vrot.lane.b32.xlu1 %v8060_v2, %s6910_s0  ;;  %v15604_v49 = vld [vmem:[#allocation81_spill] sm:$0xff] }
 0x28a   :  { %v968_v38 = vsel %vm15229_vm4, %v15600_v57, %v15602_v44  ;;  %15603 = vst [vmem:[#allocation45_spill] sm:$0xff] %v8383_v47  ;;  %v892_v42 = vsel %vm877_vm3, %v15599_v9, %v15604_v49  ;;  %v15605_v10 = vld [vmem:[#allocation87_spill] sm:$0xff]  ;;  %v1381_v34 = vadd.f32 %v1044_v36, %v971_v53  ;;  %v15606_v59 = vld [vmem:[#allocation73_spill] sm:$0xff]  ;;  %v15607_v12 = vld [vmem:[#allocation72_spill] sm:$0xff] }
 0x28b   :  { %v965_v14 = vsel %vm15229_vm4, %v15602_v44, %v15605_v10  ;;  %v1382_v21 = vadd.f32 %v1041_v51, %v968_v38  ;;  %v825_v57 = vsel %vm804_vm5, %v15607_v12, %v15606_v59  ;;  %v15608_v47 = vld [vmem:[#allocation74_spill] sm:$0xff]  ;;  %v15609_v15 = vld [vmem:[#allocation75_spill] sm:$0xff]  ;;  %1645 = vrot.lane.b32.xlu0 %v8069_v35, %s6910_s0  ;;  %v8409_v36 = vpop.permute.xlu1 %1220  ;;  %v15611_v53 = vld [vmem:[#allocation93_spill] sm:$0xff] }
 0x28c   :  { %v822_v2 = vsel %vm804_vm5, %v15606_v59, %v15608_v47  ;;  %v819_v9 = vsel %vm804_vm5, %v15608_v47, %v15609_v15  ;;  %v1383_v48 = vadd.f32 %v1038_v50, %v965_v14  ;;  %15610 = vst [vmem:[#allocation47_spill] sm:$0xff] %v8409_v36  ;;  %v1357_v51 = vadd.f32 %v898_v16, %v825_v57  ;;  %v15612_v38 = vld [vmem:[#allocation92_spill] sm:$0xff]  ;;  %v15613_v10 = vld [vmem:[#allocation94_spill] sm:$0xff]  ;;  %v15619_v57 = vld [vmem:[#allocation69_spill] sm:$0xff] }
 0x28d   :  { %v1358_v44 = vadd.f32 %v895_v6, %v822_v2  ;;  %v1117_v12 = vsel %vm15227_vm6, %v15612_v38, %v15611_v53  ;;  %v1114_v59 = vsel %vm15227_vm6, %v15611_v53, %v15613_v10  ;;  %v8420_v47 = vadd.f32 %v1116_v62, %v7240_v18  ;;  %v8428_v16 = vpop.permute.xlu0 %1222  ;;  %1647 = vrot.lane.b32.xlu1 %v8078_v52, %s6910_s0  ;;  %v15618_v6 = vld [vmem:[#allocation70_spill] sm:$0xff]  ;;  %v15621_v18 = vld [vmem:[#allocation71_spill] sm:$0xff] }
 0x28e   :  { %v8423_v14 = vadd.f32 %v1113_v43, %v7246_v20  ;;  %v8426_v50 = vadd.f32 %v1110_v30, %v7242_v19  ;;  %v1359_v2 = vadd.f32 %v892_v42, %v819_v9  ;;  %15617 = vst [vmem:[#allocation89_spill] sm:$0xff] %v8428_v16  ;;  %v8436_v53 = vsel %vm1169_vm7, %v15619_v57, %v15618_v6  ;;  %v15628_v9 = vld [vmem:[#allocation95_spill] sm:$0xff]  ;;  %v15643_v16 = vld [vmem:[#allocation106_spill] sm:$0xff]  ;;  %v15647_v57 = vld [vmem:[#allocation109_spill] sm:$0xff] }
 0x28f   :  { %15614 = vst [vmem:[#allocation48_spill] sm:$0xff] %v8420_v47  ;;  %15620 = vst [vmem:[#allocation90_spill] sm:$0xff] %v8436_v53  ;;  %v8442_v20 = vsel %vm1169_vm7, %v15618_v6, %v15621_v18  ;;  %v8444_v19 = vadd.f32 %v1381_v34, %v1357_v51  ;;  %v8446_v62 = vadd.f32 %v1382_v21, %v1358_v44  ;;  %1649 = vrot.lane.b32.xlu0 %v8087_v45, %s6910_s0  ;;  %v8462_v34 = vpop.permute.xlu1 %1224  ;;  %v15630_v21 = vld [vmem:[#allocation98_spill] sm:$0xff]  ;;  %v15633_v51 = vld [vmem:[#allocation101_spill] sm:$0xff] }
 0x290   :  { %15615 = vst [vmem:[#allocation43_spill] sm:$0xff] %v8423_v14  ;;  %15616 = vst [vmem:[#allocation44_spill] sm:$0xff] %v8426_v50  ;;  %v8448_v43 = vadd.f32 %v1383_v48, %v1359_v2  ;;  %v8451_v30 = vadd.f32 %v1117_v12, %v7254_v24  ;;  %v8454_v42 = vadd.f32 %v1114_v59, %v7262_v32  ;;  %v15631_v24 = vld [vmem:[#allocation99_spill] sm:$0xff]  ;;  %v15632_v12 = vld [vmem:[#allocation100_spill] sm:$0xff] }
 0x291   :  { %15622 = vst [vmem:[#allocation66_spill] sm:$0xff] %v8442_v20  ;;  %15623 = vst [vmem:[#allocation65_spill] sm:$0xff] %v8444_v19  ;;  %v1111_v50 = vsel %vm15227_vm6, %v15613_v10, %v15628_v9  ;;  %v814_v48 = vsel %vm804_vm5, %v15543_v58, %v15630_v21  ;;  %v811_v32 = vsel %vm804_vm5, %v15630_v21, %v15631_v24  ;;  %v15634_v59 = vld [vmem:[#allocation102_spill] sm:$0xff]  ;;  %v15635_v6 = vld [vmem:[#allocation103_spill] sm:$0xff]  ;;  %1651 = vrot.lane.b32.xlu1 %v8096_v0, %s6910_s0 }
 0x292   :  { %15624 = vst [vmem:[#allocation67_spill] sm:$0xff] %v8446_v62  ;;  %15625 = vst [vmem:[#allocation68_spill] sm:$0xff] %v8448_v43  ;;  %v808_v10 = vsel %vm804_vm5, %v15631_v24, %v15632_v12  ;;  %v805_v44 = vsel %vm804_vm5, %v15632_v12, %v15633_v51  ;;  %v826_v58 = vsel %vm804_vm5, %v15633_v51, %v15541_v39  ;;  %v15636_v24 = vld [vmem:[#allocation104_spill] sm:$0xff]  ;;  %v8496_v43 = vpop.permute.xlu0 %1226  ;;  %v15638_v39 = vld [vmem:[#allocation110_spill] sm:$0xff] }
 0x293   :  { %15626 = vst [vmem:[#allocation78_spill] sm:$0xff] %v8451_v30  ;;  %15627 = vst [vmem:[#allocation79_spill] sm:$0xff] %v8454_v42  ;;  %v887_v2 = vsel %vm877_vm3, %v7484_v63, %v15634_v59  ;;  %v884_v21 = vsel %vm877_vm3, %v15634_v59, %v15635_v6  ;;  %v881_v12 = vsel %vm877_vm3, %v15635_v6, %v15636_v24  ;;  %v15639_v51 = vld [vmem:[#allocation111_spill] sm:$0xff]  ;;  %v15640_v62 = vld [vmem:[#allocation112_spill] sm:$0xff]  ;;  %1653 = vrot.lane.b32.xlu0 %v8105_v4, %s6910_s0  ;;  %v8534_v36 = vpop.permute.xlu1 %1228 }
 0x294   :  { %15629 = vst [vmem:[#allocation84_spill] sm:$0xff] %v8462_v34  ;;  %15637 = vst [vmem:[#allocation86_spill] sm:$0xff] %v8496_v43  ;;  %v1033_v63 = vsel %vm15228_vm2, %v15544_v41, %v15638_v39  ;;  %v1030_v59 = vsel %vm15228_vm2, %v15638_v39, %v15639_v51  ;;  %v1027_v6 = vsel %vm15228_vm2, %v15639_v51, %v15640_v62  ;;  %v15641_v43 = vld [vmem:[#allocation113_spill] sm:$0xff] }
 0x295   :  { %v1045_v34 = vsel %vm15228_vm2, %v15641_v43, %v7516_v8  ;;  %v15642_v19 = vld [vmem:[#allocation105_spill] sm:$0xff]  ;;  %v960_v51 = vsel %vm15229_vm4, %v15549_v60, %v15643_v16  ;;  %v1024_v8 = vsel %vm15228_vm2, %v15640_v62, %v15641_v43  ;;  %15644 = vst [vmem:[#allocation81_spill] sm:$0xff] %v8534_v36  ;;  %v972_v43 = vsel %vm15229_vm4, %v15647_v57, %v7488_v22  ;;  %v15649_v22 = vld [vmem:[#allocation115_spill] sm:$0xff] }
 0x296   :  { %v878_v41 = vsel %vm877_vm3, %v15636_v24, %v15642_v19  ;;  %v899_v39 = vsel %vm877_vm3, %v15642_v19, %v7464_v27  ;;  %v15645_v24 = vld [vmem:[#allocation107_spill] sm:$0xff]  ;;  %v15646_v19 = vld [vmem:[#allocation108_spill] sm:$0xff]  ;;  %v1368_v36 = vadd.f32 %v1033_v63, %v960_v51  ;;  %v1364_v30 = vadd.f32 %v1045_v34, %v972_v43  ;;  %1655 = vrot.lane.b32.xlu1 %v8117_v29, %s6910_s0 }
 0x297   :  { %v957_v27 = vsel %vm15229_vm4, %v15643_v16, %v15645_v24  ;;  %v954_v60 = vsel %vm15229_vm4, %v15645_v24, %v15646_v19  ;;  %v951_v62 = vsel %vm15229_vm4, %v15646_v19, %v15647_v57  ;;  %v8552_v16 = vpop.permute.xlu0 %1230  ;;  %v1344_v24 = vadd.f32 %v887_v2, %v814_v48  ;;  %v15648_v19 = vld [vmem:[#allocation114_spill] sm:$0xff]  ;;  %v15650_v34 = vld [vmem:[#allocation116_spill] sm:$0xff]  ;;  %1657 = vrot.lane.b32.xlu0 %v8127_v46, %s6910_s0  ;;  %v8570_v48 = vpop.permute.xlu1 %1232  ;;  %v15672_v43 = vld [vmem:[#allocation131_spill] sm:$0xff] }
 0x298   :  { %v1369_v42 = vadd.f32 %v1030_v59, %v957_v27  ;;  %v1370_v14 = vadd.f32 %v1027_v6, %v954_v60  ;;  %v1345_v47 = vadd.f32 %v884_v21, %v811_v32  ;;  %v1346_v20 = vadd.f32 %v881_v12, %v808_v10  ;;  %v15651_v10 = vld [vmem:[#allocation97_spill] sm:$0xff]  ;;  %v15670_v27 = vld [vmem:[#allocation124_spill] sm:$0xff] }
 0x299   :  { %v1371_v53 = vadd.f32 %v1024_v8, %v951_v62  ;;  %v1340_v4 = vadd.f32 %v899_v39, %v826_v58  ;;  %v1106_v18 = vsel %vm15227_vm6, %v15569_v11, %v15648_v19  ;;  %v1103_v57 = vsel %vm15227_vm6, %v15648_v19, %v15649_v22  ;;  %v15652_v11 = vld [vmem:[#allocation96_spill] sm:$0xff]  ;;  %v15653_v21 = vld [vmem:[#allocation117_spill] sm:$0xff]  ;;  %v15671_v62 = vld [vmem:[#allocation130_spill] sm:$0xff] }
 0x29a   :  { %v1100_v63 = vsel %vm15227_vm6, %v15649_v22, %v15650_v34  ;;  %v8573_v32 = vadd.f32 %v1111_v50, %v7256_v28  ;;  %v8579_v58 = vsel %vm1169_vm7, %v15652_v11, %v15651_v10  ;;  %v1347_v2 = vadd.f32 %v878_v41, %v805_v44  ;;  %1659 = vrot.lane.b32.xlu1 %v8140_v1, %s6910_s0  ;;  %v15673_v19 = vld [vmem:[#allocation64_spill] sm:$0xff] }
 0x29b   :  { %v1097_v12 = vsel %vm15227_vm6, %v15650_v34, %v15653_v21  ;;  %v8585_v59 = vadd.f32 %v1368_v36, %v1344_v24  ;;  %v8587_v6 = vadd.f32 %v1369_v42, %v1345_v47  ;;  %v8589_v39 = vadd.f32 %v1370_v14, %v1346_v20  ;;  %v8593_v50 = vpop.permute.xlu0 %1234  ;;  %v15663_v14 = vld [vmem:[#allocation118_spill] sm:$0xff]  ;;  %1661 = vrot.lane.b32.xlu0 %v8160_v54, %s6910_s0  ;;  %v15669_v42 = vld [vmem:[#allocation123_spill] sm:$0xff] }
 0x29c   :  { %v8591_v28 = vadd.f32 %v1364_v30, %v1340_v4  ;;  %15657 = vst [vmem:[#allocation93_spill] sm:$0xff] %v8593_v50  ;;  %v8597_v51 = vadd.f32 %v1371_v53, %v1347_v2  ;;  %v8600_v44 = vadd.f32 %v1106_v18, %v7236_v17  ;;  %v8603_v41 = vadd.f32 %v1103_v57, %v7500_v56  ;;  %v15664_v53 = vld [vmem:[#allocation119_spill] sm:$0xff]  ;;  %v15667_v18 = vld [vmem:[#allocation121_spill] sm:$0xff]  ;;  %v15668_v30 = vld [vmem:[#allocation122_spill] sm:$0xff] }
 0x29d   :  { %15654 = vst [vmem:[#allocation73_spill] sm:$0xff] %v8585_v59  ;;  %15655 = vst [vmem:[#allocation74_spill] sm:$0xff] %v8587_v6  ;;  %v8606_v36 = vadd.f32 %v1100_v63, %v7512_v23  ;;  %v1118_v4 = vsel %vm15227_vm6, %v15653_v21, %v15556_v31  ;;  %v8613_v47 = vadd.f32 %v1097_v12, %v7514_v25  ;;  %v8625_v23 = vpop.permute.xlu1 %1236  ;;  %v15666_v31 = vld [vmem:[#allocation120_spill] sm:$0xff]  ;;  %v15675_v34 = vld [vmem:[#allocation191_spill] sm:$0xff] }
 0x29e   :  { %15656 = vst [vmem:[#allocation75_spill] sm:$0xff] %v8589_v39  ;;  %15658 = vst [vmem:[#allocation92_spill] sm:$0xff] %v8597_v51  ;;  %v812_v17 = vsel %vm804_vm5, %v15664_v53, %v15663_v14  ;;  %v815_v56 = vsel %vm804_vm5, %v15575_v55, %v15664_v53  ;;  %v827_v25 = vsel %vm804_vm5, %v15666_v31, %v15571_v5  ;;  %1663 = vrot.lane.b32.xlu1 %v15675_v34, %s6910_s0  ;;  %v15677_v63 = vld [vmem:[#allocation61_spill] sm:$0xff]  ;;  %v15678_v2 = vld [vmem:[#allocation132_spill] sm:$0xff] }
 0x29f   :  { %15659 = vst [vmem:[#allocation94_spill] sm:$0xff] %v8600_v44  ;;  %15660 = vst [vmem:[#allocation70_spill] sm:$0xff] %v8603_v41  ;;  %v806_v20 = vsel %vm804_vm5, %v15667_v18, %v15666_v31  ;;  %v809_v55 = vsel %vm804_vm5, %v15663_v14, %v15667_v18  ;;  %v885_v8 = vsel %vm877_vm3, %v15669_v42, %v15668_v30  ;;  %v8659_v57 = vpop.permute.xlu0 %1238  ;;  %v15679_v12 = vld [vmem:[#allocation133_spill] sm:$0xff]  ;;  %v15680_v18 = vld [vmem:[#allocation126_spill] sm:$0xff] }
 0x2a0   :  { %15661 = vst [vmem:[#allocation95_spill] sm:$0xff] %v8606_v36  ;;  %15662 = vst [vmem:[#allocation98_spill] sm:$0xff] %v8613_v47  ;;  %v888_v5 = vsel %vm877_vm3, %v15566_v61, %v15669_v42  ;;  %v900_v60 = vsel %vm877_vm3, %v15670_v27, %v15561_v40  ;;  %v1031_v24 = vsel %vm15228_vm2, %v15672_v43, %v15671_v62  ;;  %v15676_v61 = vld [vmem:[#allocation125_spill] sm:$0xff]  ;;  %v15681_v42 = vld [vmem:[#allocation127_spill] sm:$0xff] }
 0x2a1   :  { %15665 = vst [vmem:[#allocation99_spill] sm:$0xff] %v8625_v23  ;;  %v1034_v22 = vsel %vm15228_vm2, %v15673_v19, %v15672_v43  ;;  %15674 = vst [vmem:[#allocation100_spill] sm:$0xff] %v8659_v57  ;;  %v879_v40 = vsel %vm877_vm3, %v15676_v61, %v15670_v27  ;;  %v1046_v21 = vsel %vm15228_vm2, %v15678_v2, %v15677_v63  ;;  %v15682_v43 = vld [vmem:[#allocation60_spill] sm:$0xff]  ;;  %v8697_v51 = vpop.permute.xlu1 %1240  ;;  %v15689_v41 = vld [vmem:[#allocation23_spill] sm:$0xff] }
 0x2a2   :  { %v1025_v14 = vsel %vm15228_vm2, %v15679_v12, %v15678_v2  ;;  %v1028_v53 = vsel %vm15228_vm2, %v15671_v62, %v15679_v12  ;;  %v882_v31 = vsel %vm877_vm3, %v15668_v30, %v15676_v61  ;;  %v958_v27 = vsel %vm15229_vm4, %v15681_v42, %v15680_v18  ;;  %v15683_v63 = vld [vmem:[#allocation56_spill] sm:$0xff]  ;;  %v15685_v12 = vld [vmem:[#allocation193_spill] sm:$0xff]  ;;  %15686 = vst [vmem:[#allocation101_spill] sm:$0xff] %v8697_v51  ;;  %v15690_v23 = vld [vmem:[#allocation134_spill] sm:$0xff] }
 0x2a3   :  { %v961_v19 = vsel %vm15229_vm4, %v15682_v43, %v15681_v42  ;;  %v15684_v2 = vld [vmem:[#allocation128_spill] sm:$0xff]  ;;  %1665 = vrot.lane.b32.xlu0 %v15685_v12, %s6910_s0  ;;  %v15687_v30 = vld [vmem:[#allocation129_spill] sm:$0xff]  ;;  %v1377_v39 = vadd.f32 %v1031_v24, %v958_v27  ;;  %v1352_v6 = vadd.f32 %v888_v5, %v815_v56  ;;  %v8707_v36 = vpop.permute.xlu0 %1267  ;;  %1667 = vrot.lane.b32.xlu1 %v15689_v41, %s6910_s0  ;;  %v15691_v50 = vld [vmem:[#allocation135_spill] sm:$0xff] }
 0x2a4   :  { %v973_v62 = vsel %vm15229_vm4, %v15684_v2, %v15683_v63  ;;  %v952_v61 = vsel %vm15229_vm4, %v15687_v30, %v15684_v2  ;;  %v955_v42 = vsel %vm15229_vm4, %v15680_v18, %v15687_v30  ;;  %v1376_v43 = vadd.f32 %v1034_v22, %v961_v19  ;;  %15688 = vst [vmem:[#allocation102_spill] sm:$0xff] %v8707_v36  ;;  %v15692_v5 = vld [vmem:[#allocation136_spill] sm:$0xff]  ;;  %v15693_v22 = vld [vmem:[#allocation137_spill] sm:$0xff]  ;;  %v15713_v19 = vld [vmem:[#allocation139_spill] sm:$0xff] }
 0x2a5   :  { %v1372_v59 = vadd.f32 %v1046_v21, %v973_v62  ;;  %v1378_v63 = vadd.f32 %v1028_v53, %v955_v42  ;;  %v1379_v47 = vadd.f32 %v1025_v14, %v952_v61  ;;  %v1353_v44 = vadd.f32 %v885_v8, %v812_v17  ;;  %v15708_v21 = vld [vmem:[#allocation54_spill] sm:$0xff]  ;;  %v15710_v53 = vld [vmem:[#allocation55_spill] sm:$0xff]  ;;  %v15714_v30 = vld [vmem:[#allocation140_spill] sm:$0xff] }
 0x2a6   :  { %v1348_v51 = vadd.f32 %v900_v60, %v827_v25  ;;  %v1354_v57 = vadd.f32 %v882_v31, %v809_v55  ;;  %v1355_v2 = vadd.f32 %v879_v40, %v806_v20  ;;  %v1104_v18 = vsel %vm15227_vm6, %v15691_v50, %v15690_v23  ;;  %v8729_v25 = vpop.permute.xlu1 %1269  ;;  %v15695_v20 = vld [vmem:[#allocation36_spill] sm:$0xff]  ;;  %v15701_v40 = vld [vmem:[#allocation142_spill] sm:$0xff]  ;;  %v15715_v61 = vld [vmem:[#allocation141_spill] sm:$0xff] }
 0x2a7   :  { %v1107_v56 = vsel %vm15227_vm6, %v15595_v7, %v15691_v50  ;;  %v1119_v24 = vsel %vm15227_vm6, %v15692_v5, %v15593_v37  ;;  %v1101_v17 = vsel %vm15227_vm6, %v15690_v23, %v15693_v22  ;;  %1669 = vrot.lane.b32.xlu0 %v8224_v3, %s6910_s0  ;;  %15694 = vst [vmem:[#allocation103_spill] sm:$0xff] %v8729_v25  ;;  %v15712_v31 = vld [vmem:[#allocation138_spill] sm:$0xff]  ;;  %v15733_v25 = vld [vmem:[#allocation148_spill] sm:$0xff]  ;;  %s6924_s0 = smov 86  }
 0x2a8   :  { %v8732_v55 = vadd.f32 %v1118_v4, %v15695_v20  ;;  %v8734_v8 = vadd.f32 %v1376_v43, %v1352_v6  ;;  %v8736_v7 = vadd.f32 %v1377_v39, %v1353_v44  ;;  %v1098_v37 = vsel %vm15227_vm6, %v15693_v22, %v15692_v5  ;;  %v8752_v6 = vpop.permute.xlu0 %1271  ;;  %1704 = vrot.lane.b32.xlu1 %v8044_v13, %s6911_s18  ;;  %v15703_v39 = vld [vmem:[#allocation15_spill] sm:$0xff]  ;;  %v15716_v43 = vld [vmem:[#allocation169_spill] sm:$0xff]  ;;  %v15721_v22 = vld [vmem:[#allocation144_spill] sm:$0xff] }
 0x2a9   :  { %v8742_v50 = vadd.f32 %v1372_v59, %v1348_v51  ;;  %v8744_v23 = vadd.f32 %v1378_v63, %v1354_v57  ;;  %v8746_v60 = vadd.f32 %v1379_v47, %v1355_v2  ;;  %v889_v4 = vsel %vm877_vm3, %v15604_v49, %v15701_v40  ;;  %15702 = vst [vmem:[#allocation105_spill] sm:$0xff] %v8752_v6  ;;  %v15704_v59 = vld [vmem:[#allocation51_spill] sm:$0xff]  ;;  %v15706_v57 = vld [vmem:[#allocation58_spill] sm:$0xff]  ;;  %v15732_v6 = vld [vmem:[#allocation76_spill] sm:$0xff] }
 0x2aa   :  { %15696 = vst [vmem:[#allocation104_spill] sm:$0xff] %v8732_v55  ;;  %15697 = vst [vmem:[#allocation110_spill] sm:$0xff] %v8734_v8  ;;  %v8757_v44 = vadd.f32 %v1107_v56, %v15703_v39  ;;  %v8760_v51 = vadd.f32 %v1104_v18, %v15704_v59  ;;  %v8763_v47 = vadd.f32 %v1119_v24, %v15706_v57  ;;  %v8787_v63 = vpop.permute.xlu1 %1273  ;;  %v15719_v56 = vld [vmem:[#allocation150_spill] sm:$0xff]  ;;  %v15720_v5 = vld [vmem:[#allocation91_spill] sm:$0xff] }
 0x2ab   :  { %15698 = vst [vmem:[#allocation111_spill] sm:$0xff] %v8736_v7  ;;  %15699 = vst [vmem:[#allocation112_spill] sm:$0xff] %v8744_v23  ;;  %v8766_v14 = vadd.f32 %v1101_v17, %v15708_v21  ;;  %v8769_v49 = vadd.f32 %v1098_v37, %v15710_v53  ;;  %v816_v27 = vsel %vm804_vm5, %v15609_v15, %v15712_v31  ;;  %1706 = vrot.lane.b32.xlu0 %v15716_v43, %s6911_s18  ;;  %v15722_v17 = vld [vmem:[#allocation145_spill] sm:$0xff]  ;;  %v15726_v53 = vld [vmem:[#allocation171_spill] sm:$0xff] }
 0x2ac   :  { %15700 = vst [vmem:[#allocation113_spill] sm:$0xff] %v8746_v60  ;;  %15705 = vst [vmem:[#allocation106_spill] sm:$0xff] %v8760_v51  ;;  %v8779_v62 = vsel %vm1169_vm7, %v15583_v26, %v15713_v19  ;;  %v810_v42 = vsel %vm804_vm5, %v15715_v61, %v15714_v30  ;;  %v813_v15 = vsel %vm804_vm5, %v15712_v31, %v15715_v61  ;;  %v15718_v26 = vld [vmem:[#allocation143_spill] sm:$0xff]  ;;  %v15724_v39 = vld [vmem:[#allocation153_spill] sm:$0xff]  ;;  %v8818_v21 = vpop.permute.xlu0 %1275  ;;  %1708 = vrot.lane.b32.xlu1 %v15726_v53, %s6911_s18 }
 0x2ad   :  { %15707 = vst [vmem:[#allocation107_spill] sm:$0xff] %v8763_v47  ;;  %15709 = vst [vmem:[#allocation108_spill] sm:$0xff] %v8766_v14  ;;  %v1360_v2 = vadd.f32 %v889_v4, %v816_v27  ;;  %v807_v18 = vsel %vm804_vm5, %v15714_v30, %v15718_v26  ;;  %v1035_v24 = vsel %vm15228_vm2, %v15720_v5, %v15719_v56  ;;  %v15723_v4 = vld [vmem:[#allocation152_spill] sm:$0xff]  ;;  %v15727_v31 = vld [vmem:[#allocation146_spill] sm:$0xff] }
 0x2ae   :  { %15711 = vst [vmem:[#allocation109_spill] sm:$0xff] %v8769_v49  ;;  %15717 = vst [vmem:[#allocation114_spill] sm:$0xff] %v8787_v63  ;;  %v883_v20 = vsel %vm877_vm3, %v15722_v17, %v15721_v22  ;;  %v886_v37 = vsel %vm877_vm3, %v15701_v40, %v15722_v17  ;;  %v1029_v59 = vsel %vm15228_vm2, %v15724_v39, %v15723_v4  ;;  %v15728_v27 = vld [vmem:[#allocation87_spill] sm:$0xff]  ;;  %v15731_v17 = vld [vmem:[#allocation88_spill] sm:$0xff] }
 0x2af   :  { %v1032_v57 = vsel %vm15228_vm2, %v15719_v56, %v15724_v39  ;;  %15725 = vst [vmem:[#allocation115_spill] sm:$0xff] %v8818_v21  ;;  %v962_v40 = vsel %vm15229_vm4, %v15728_v27, %v15727_v31  ;;  %v15729_v30 = vld [vmem:[#allocation147_spill] sm:$0xff]  ;;  %v15734_v21 = vld [vmem:[#allocation149_spill] sm:$0xff]  ;;  %1710 = vrot.lane.b32.xlu0 %v8069_v35, %s6911_s18  ;;  %v15738_v7 = vld [vmem:[#allocation72_spill] sm:$0xff] }
 0x2b0   :  { %v880_v61 = vsel %vm877_vm3, %v15721_v22, %v15729_v30  ;;  %v15730_v5 = vld [vmem:[#allocation155_spill] sm:$0xff]  ;;  %v901_v27 = vsel %vm877_vm3, %v15729_v30, %v15732_v6  ;;  %v956_v22 = vsel %vm15229_vm4, %v15734_v21, %v15733_v25  ;;  %v1384_v36 = vadd.f32 %v1035_v24, %v962_v40  ;;  %1712 = vrot.lane.b32.xlu1 %v8078_v52, %s6911_s18  ;;  %v15782_v35 = vld [vmem:[#allocation57_spill] sm:$0xff]  ;;  %v15798_v53 = vld [vmem:[#allocation40_spill] sm:$0xff] }
 0x2b1   :  { %v1026_v56 = vsel %vm15228_vm2, %v15723_v4, %v15730_v5  ;;  %v1047_v39 = vsel %vm15228_vm2, %v15730_v5, %v15731_v17  ;;  %v959_v4 = vsel %vm15229_vm4, %v15727_v31, %v15734_v21  ;;  %v8852_v5 = vpop.permute.xlu1 %1277  ;;  %v15736_v17 = vld [vmem:[#allocation151_spill] sm:$0xff]  ;;  %v1386_v23 = vadd.f32 %v1029_v59, %v956_v22  ;;  %v15739_v21 = vld [vmem:[#allocation154_spill] sm:$0xff]  ;;  %v15741_v59 = vld [vmem:[#allocation156_spill] sm:$0xff] }
 0x2b2   :  { %15735 = vst [vmem:[#allocation116_spill] sm:$0xff] %v8852_v5  ;;  %v953_v6 = vsel %vm15229_vm4, %v15733_v25, %v15736_v17  ;;  %v15737_v30 = vld [vmem:[#allocation83_spill] sm:$0xff]  ;;  %v1385_v60 = vadd.f32 %v1032_v57, %v959_v4  ;;  %v828_v24 = vsel %vm804_vm5, %v15718_v26, %v15738_v7  ;;  %v1108_v31 = vsel %vm15227_vm6, %v15628_v9, %v15739_v21  ;;  %v8870_v25 = vpop.permute.xlu0 %1279  ;;  %v15742_v22 = vld [vmem:[#allocation157_spill] sm:$0xff] }
 0x2b3   :  { %v974_v63 = vsel %vm15229_vm4, %v15736_v17, %v15737_v30  ;;  %v1387_v5 = vadd.f32 %v1026_v56, %v953_v6  ;;  %15740 = vst [vmem:[#allocation97_spill] sm:$0xff] %v8870_v25  ;;  %v1361_v17 = vadd.f32 %v886_v37, %v813_v15  ;;  %v1362_v57 = vadd.f32 %v883_v20, %v810_v42  ;;  %v15743_v26 = vld [vmem:[#allocation159_spill] sm:$0xff]  ;;  %v15750_v30 = vld [vmem:[#allocation77_spill] sm:$0xff] }
 0x2b4   :  { %v1380_v40 = vadd.f32 %v1047_v39, %v974_v63  ;;  %v1102_v4 = vsel %vm15227_vm6, %v15742_v22, %v15741_v59  ;;  %v1105_v7 = vsel %vm15227_vm6, %v15739_v21, %v15742_v22  ;;  %v1356_v9 = vadd.f32 %v901_v27, %v828_v24  ;;  %1714 = vrot.lane.b32.xlu0 %v8087_v45, %s6911_s18  ;;  %v15752_v24 = vld [vmem:[#allocation82_spill] sm:$0xff]  ;;  %v15762_v22 = vld [vmem:[#allocation188_spill] sm:$0xff]  ;;  %v15774_v45 = vld [vmem:[#allocation39_spill] sm:$0xff] }
 0x2b5   :  { %v1363_v63 = vadd.f32 %v880_v61, %v807_v18  ;;  %v1099_v56 = vsel %vm15227_vm6, %v15741_v59, %v15743_v26  ;;  %v1120_v42 = vsel %vm15227_vm6, %v15743_v26, %v15612_v38  ;;  %v8892_v15 = vpop.permute.xlu1 %1281  ;;  %v8894_v20 = vadd.f32 %v1384_v36, %v1360_v2  ;;  %v15748_v61 = vld [vmem:[#allocation16_spill] sm:$0xff]  ;;  %1716 = vrot.lane.b32.xlu1 %v8096_v0, %s6911_s18  ;;  %v15755_v36 = vld [vmem:[#allocation158_spill] sm:$0xff]  ;;  %v15772_v0 = vld [vmem:[#allocation35_spill] sm:$0xff] }
 0x2b6   :  { %15744 = vst [vmem:[#allocation96_spill] sm:$0xff] %v8892_v15  ;;  %v8896_v37 = vadd.f32 %v1385_v60, %v1361_v17  ;;  %v8898_v18 = vadd.f32 %v1386_v23, %v1362_v57  ;;  %v8901_v39 = vadd.f32 %v1108_v31, %v15748_v61  ;;  %v8903_v27 = vadd.f32 %v1380_v40, %v1356_v9  ;;  %v8913_v59 = vpop.permute.xlu0 %1283  ;;  %v15756_v60 = vld [vmem:[#allocation80_spill] sm:$0xff]  ;;  %v15761_v17 = vld [vmem:[#allocation71_spill] sm:$0xff]  ;;  %v15764_v9 = vld [vmem:[#allocation190_spill] sm:$0xff] }
 0x2b7   :  { %15745 = vst [vmem:[#allocation117_spill] sm:$0xff] %v8894_v20  ;;  %v8905_v6 = vadd.f32 %v1387_v5, %v1363_v63  ;;  %v8908_v38 = vadd.f32 %v1105_v7, %v15750_v30  ;;  %v8911_v21 = vadd.f32 %v1102_v4, %v15752_v24  ;;  %15754 = vst [vmem:[#allocation123_spill] sm:$0xff] %v8913_v59  ;;  %v15758_v5 = vld [vmem:[#allocation85_spill] sm:$0xff]  ;;  %v15760_v40 = vld [vmem:[#allocation160_spill] sm:$0xff] }
 0x2b8   :  { %15746 = vst [vmem:[#allocation118_spill] sm:$0xff] %v8896_v37  ;;  %15747 = vst [vmem:[#allocation119_spill] sm:$0xff] %v8898_v18  ;;  %v1187_v23 = vsel %vm1169_vm7, %v15651_v10, %v15755_v36  ;;  %v8922_v2 = vadd.f32 %v1099_v56, %v15756_v60  ;;  %v8925_v31 = vadd.f32 %v1120_v42, %v15758_v5  ;;  %v15763_v4 = vld [vmem:[#allocation182_spill] sm:$0xff]  ;;  %v15765_v63 = vld [vmem:[#allocation184_spill] sm:$0xff] }
 0x2b9   :  { %15749 = vst [vmem:[#allocation120_spill] sm:$0xff] %v8905_v6  ;;  %15751 = vst [vmem:[#allocation121_spill] sm:$0xff] %v8908_v38  ;;  %v1183_v57 = vsel %vm1169_vm7, %v15761_v17, %v15760_v40  ;;  %v1261_v7 = vsel %vm1242_vm8, %v15763_v4, %v15762_v22  ;;  %v1262_v10 = vsel %vm1242_vm8, %v15765_v63, %v15764_v9  ;;  %v15766_v26 = vld [vmem:[#allocation192_spill] sm:$0xff]  ;;  %v15767_v56 = vld [vmem:[#allocation186_spill] sm:$0xff]  ;;  %v8949_v60 = vpop.permute.xlu1 %1285  ;;  %1720 = vrot.lane.b32.xlu1 %v8117_v29, %s6911_s18 }
 0x2ba   :  { %15753 = vst [vmem:[#allocation122_spill] sm:$0xff] %v8911_v21  ;;  %15757 = vst [vmem:[#allocation124_spill] sm:$0xff] %v8922_v2  ;;  %v1263_v42 = vsel %vm1242_vm8, %v15767_v56, %v15766_v26  ;;  %v15768_v61 = vld [vmem:[#allocation24_spill] sm:$0xff]  ;;  %v15769_v24 = vld [vmem:[#allocation181_spill] sm:$0xff]  ;;  %v1259_v59 = vsel %vm1242_vm8, %v15764_v9, %v15772_v0  ;;  %v8985_v52 = vpop.permute.xlu0 %1287 }
 0x2bb   :  { %15759 = vst [vmem:[#allocation130_spill] sm:$0xff] %v8925_v31  ;;  %v1258_v30 = vsel %vm1242_vm8, %v15762_v22, %v15768_v61  ;;  %1718 = vrot.lane.b32.xlu0 %v15769_v24, %s6911_s18  ;;  %15770 = vst [vmem:[#allocation131_spill] sm:$0xff] %v8949_v60  ;;  %v15771_v5 = vld [vmem:[#allocation161_spill] sm:$0xff]  ;;  %v15773_v15 = vld [vmem:[#allocation62_spill] sm:$0xff]  ;;  %v1255_v24 = vsel %vm1242_vm8, %v15768_v61, %v15774_v45  ;;  %v1428_v8 = vadd.f32 %v1263_v42, %v8579_v58 }
 0x2bc   :  { %v1184_v17 = vsel %vm1169_vm7, %v15755_v36, %v15771_v5  ;;  %v1260_v22 = vsel %vm1242_vm8, %v15766_v26, %v15773_v15  ;;  %v15775_v60 = vld [vmem:[#allocation162_spill] sm:$0xff]  ;;  %v15776_v25 = vld [vmem:[#allocation163_spill] sm:$0xff]  ;;  %v15777_v6 = vld [vmem:[#allocation164_spill] sm:$0xff]  ;;  %15779 = vst [vmem:[#allocation64_spill] sm:$0xff] %v8985_v52  ;;  %v1413_v31 = vadd.f32 %v1258_v30, %v15782_v35  ;;  %v1414_v49 = vadd.f32 %v1255_v24, %v8779_v62 }
 0x2bd   :  { %v1179_v36 = vsel %vm1169_vm7, %v15713_v19, %v15775_v60  ;;  %v1180_v9 = vsel %vm1169_vm7, %v15760_v40, %v15776_v25  ;;  %v1181_v26 = vsel %vm1169_vm7, %v15771_v5, %v15777_v6  ;;  %v15778_v18 = vld [vmem:[#allocation165_spill] sm:$0xff]  ;;  %v15780_v19 = vld [vmem:[#allocation52_spill] sm:$0xff]  ;;  %v15781_v20 = vld [vmem:[#allocation90_spill] sm:$0xff]  ;;  %v1429_v52 = vadd.f32 %v1260_v22, %v1187_v23  ;;  %1724 = vrot.lane.b32.xlu1 %v8140_v1, %s6911_s18 }
 0x2be   :  { %v8983_v61 = vsel %vm1169_vm7, %v15775_v60, %v15778_v18  ;;  %v1412_v37 = vadd.f32 %v1261_v7, %v15780_v19  ;;  %v1420_v40 = vadd.f32 %v1262_v10, %v15781_v20  ;;  %v15783_v5 = vld [vmem:[#allocation166_spill] sm:$0xff]  ;;  %v9003_v7 = vpop.permute.xlu1 %1289  ;;  %v15786_v20 = vld [vmem:[#allocation168_spill] sm:$0xff]  ;;  %v1461_v55 = vadd.f32 %v1413_v31, %v15798_v53  ;;  %v15799_v21 = vld [vmem:[#allocation43_spill] sm:$0xff] }
 0x2bf   :  { %v8997_v2 = vsel %vm1169_vm7, %v15776_v25, %v15783_v5  ;;  %v15784_v60 = vld [vmem:[#allocation66_spill] sm:$0xff]  ;;  %1722 = vrot.lane.b32.xlu0 %v8127_v46, %s6911_s18  ;;  %15785 = vst [vmem:[#allocation125_spill] sm:$0xff] %v9003_v7  ;;  %v9009_v35 = vsel %vm1169_vm7, %v15777_v6, %v15786_v20  ;;  %v15791_v30 = vld [vmem:[#allocation176_spill] sm:$0xff]  ;;  %v15801_v38 = vld [vmem:[#allocation49_spill] sm:$0xff] }
 0x2c0   :  { %v1421_v47 = vadd.f32 %v1259_v59, %v15784_v60  ;;  %v15787_v58 = vld [vmem:[#allocation170_spill] sm:$0xff]  ;;  %v15788_v59 = vld [vmem:[#allocation172_spill] sm:$0xff]  ;;  %v15795_v60 = vld [vmem:[#allocation63_spill] sm:$0xff]  ;;  %v1462_v51 = vadd.f32 %v1414_v49, %v15801_v38 }
 0x2c1   :  { %v9015_v25 = vsel %vm1169_vm7, %v15778_v18, %v15787_v58  ;;  %v9021_v62 = vsel %vm1169_vm7, %v15783_v5, %v15788_v59  ;;  %v15789_v23 = vld [vmem:[#allocation50_spill] sm:$0xff]  ;;  %v1170_v18 = vsel %vm1169_vm7, %v15787_v58, %v15791_v30  ;;  %v9043_v5 = vpop.permute.xlu0 %1291  ;;  %v15796_v46 = vld [vmem:[#allocation48_spill] sm:$0xff]  ;;  %v15805_v38 = vld [vmem:[#allocation45_spill] sm:$0xff]  ;;  %1728 = vrot.lane.b32.xlu1 %v15675_v34, %s6911_s18 }
 0x2c2   :  { %v1256_v10 = vsel %vm1242_vm8, %v15772_v0, %v15789_v23  ;;  %v15790_v42 = vld [vmem:[#allocation174_spill] sm:$0xff]  ;;  %15794 = vst [vmem:[#allocation61_spill] sm:$0xff] %v9043_v5  ;;  %v1468_v29 = vadd.f32 %v1420_v40, %v15796_v46  ;;  %v9056_v5 = vpop.permute.xlu1 %1293  ;;  %v15804_v53 = vld [vmem:[#allocation180_spill] sm:$0xff]  ;;  %v15806_v31 = vld [vmem:[#allocation47_spill] sm:$0xff] }
 0x2c3   :  { %v1175_v6 = vsel %vm1169_vm7, %v15786_v20, %v15790_v42  ;;  %v15792_v24 = vld [vmem:[#allocation42_spill] sm:$0xff]  ;;  %v1460_v20 = vadd.f32 %v1412_v37, %v15795_v60  ;;  %1726 = vrot.lane.b32.xlu0 %v8160_v54, %s6911_s18  ;;  %v1193_v37 = vsel %vm1169_vm7, %v15804_v53, %v15652_v11 }
 0x2c4   :  { %v1191_v22 = vsel %vm1169_vm7, %v15791_v30, %v15792_v24  ;;  %v15793_v19 = vld [vmem:[#allocation46_spill] sm:$0xff]  ;;  %v1469_v30 = vadd.f32 %v1421_v47, %v15799_v21  ;;  %v15800_v24 = vld [vmem:[#allocation79_spill] sm:$0xff]  ;;  %v1252_v21 = vsel %vm1242_vm8, %v15774_v45, %v15805_v38  ;;  %v9094_v45 = vadd.f32 %v1468_v29, %v8742_v50 }
 0x2c5   :  { %v1257_v0 = vsel %vm1242_vm8, %v15773_v15, %v15793_v19  ;;  %v15797_v58 = vld [vmem:[#allocation78_spill] sm:$0xff]  ;;  %v1477_v14 = vadd.f32 %v1429_v52, %v15800_v24  ;;  %v1422_v15 = vadd.f32 %v1256_v10, %v1183_v57  ;;  %v1172_v52 = vsel %vm1169_vm7, %v15790_v42, %v15804_v53  ;;  %v15807_v57 = vld [vmem:[#allocation89_spill] sm:$0xff]  ;;  %v9086_v40 = vpop.permute.xlu0 %1295  ;;  %v15809_v42 = vld [vmem:[#allocation44_spill] sm:$0xff]  ;;  %1732 = vrot.lane.b32.xlu1 %v15689_v41, %s6911_s18 }
 0x2c6   :  { %v1476_v7 = vadd.f32 %v1428_v8, %v15797_v58  ;;  %v15802_v1 = vld [vmem:[#allocation178_spill] sm:$0xff]  ;;  %v15803_v8 = vld [vmem:[#allocation69_spill] sm:$0xff]  ;;  %v1430_v49 = vadd.f32 %v1257_v0, %v1184_v17  ;;  %v1254_v17 = vsel %vm1242_vm8, %v15793_v19, %v15807_v57  ;;  %v9091_v11 = vadd.f32 %v1460_v20, %v8591_v28  ;;  %v9114_v29 = vpop.permute.xlu1 %1297  ;;  %v15813_v20 = vld [vmem:[#allocation84_spill] sm:$0xff] }
 0x2c7   :  { %v1171_v46 = vsel %vm1169_vm7, %v15788_v59, %v15802_v1  ;;  %v1192_v47 = vsel %vm1169_vm7, %v15802_v1, %v15803_v8  ;;  %v1253_v1 = vsel %vm1242_vm8, %v15789_v23, %v15806_v31  ;;  %v15808_v23 = vld [vmem:[#allocation27_spill] sm:$0xff]  ;;  %v1470_v0 = vadd.f32 %v1422_v15, %v15809_v42  ;;  %v15810_v19 = vld [vmem:[#allocation53_spill] sm:$0xff]  ;;  %1730 = vrot.lane.b32.xlu0 %v15685_v12, %s6911_s18 }
 0x2c8   :  { %v9097_v59 = vadd.f32 %v1476_v7, %v8903_v27  ;;  %v9100_v10 = vadd.f32 %v1461_v55, %v15808_v23  ;;  %v9104_v60 = vadd.f32 %v1469_v30, %v15810_v19  ;;  %v15811_v58 = vld [vmem:[#allocation65_spill] sm:$0xff]  ;;  %v1478_v50 = vadd.f32 %v1430_v49, %v8573_v32  ;;  %v15817_v49 = vld [vmem:[#allocation99_spill] sm:$0xff] }
 0x2c9   :  { %v9107_v24 = vadd.f32 %v1477_v14, %v15811_v58  ;;  %v15812_v8 = vld [vmem:[#allocation37_spill] sm:$0xff]  ;;  %v1415_v55 = vadd.f32 %v1252_v21, %v1179_v36  ;;  %v1423_v27 = vadd.f32 %v1253_v1, %v1180_v9  ;;  %v1431_v7 = vadd.f32 %v1254_v17, %v1181_v26  ;;  %v15814_v14 = vld [vmem:[#allocation86_spill] sm:$0xff]  ;;  %v15818_v1 = vld [vmem:[#allocation100_spill] sm:$0xff]  ;;  %1769 = vrot.lane.b32.xlu1 %v8044_v13, %s6912_s19 }
 0x2ca   :  { %v9110_v28 = vadd.f32 %v1462_v51, %v15812_v8  ;;  %v1249_v30 = vsel %vm1242_vm8, %v15805_v38, %v15813_v20  ;;  %v1250_v51 = vsel %vm1242_vm8, %v15806_v31, %v15814_v14  ;;  %v15815_v15 = vld [vmem:[#allocation81_spill] sm:$0xff]  ;;  %v1246_v32 = vsel %vm1242_vm8, %v15813_v20, %v8552_v16  ;;  %v9151_v31 = vpop.permute.xlu0 %1299  ;;  %v9171_v42 = vpop.permute.xlu1 %1301 }
 0x2cb   :  { %v1251_v53 = vsel %vm1242_vm8, %v15807_v57, %v15815_v15  ;;  %v1247_v36 = vsel %vm1242_vm8, %v15814_v14, %v8570_v48  ;;  %v15816_v9 = vld [vmem:[#allocation93_spill] sm:$0xff]  ;;  %v1243_v38 = vsel %vm1242_vm8, %v8552_v16, %v15817_v49  ;;  %v1264_v21 = vsel %vm1242_vm8, %v15817_v49, %v15763_v4  ;;  %1734 = vrot.lane.b32.xlu0 %v8224_v3, %s6911_s18 }
 0x2cc   :  { %v1248_v26 = vsel %vm1242_vm8, %v15815_v15, %v15816_v9  ;;  %v1244_v57 = vsel %vm1242_vm8, %v8570_v48, %v15818_v1  ;;  %v1265_v17 = vsel %vm1242_vm8, %v15818_v1, %v15765_v63  ;;  %v15819_v23 = vld [vmem:[#allocation101_spill] sm:$0xff]  ;;  %v1416_v48 = vadd.f32 %v1249_v30, %v8983_v61  ;;  %v15820_v61 = vld [vmem:[#allocation94_spill] sm:$0xff] }
 0x2cd   :  { %v1245_v16 = vsel %vm1242_vm8, %v15816_v9, %v15819_v23  ;;  %v1266_v4 = vsel %vm1242_vm8, %v15819_v23, %v15767_v56  ;;  %v1424_v63 = vadd.f32 %v1250_v51, %v8997_v2  ;;  %v1432_v19 = vadd.f32 %v1251_v53, %v9009_v35  ;;  %v15824_v53 = vld [vmem:[#allocation121_spill] sm:$0xff] }
 0x2ce   :  { %v1417_v58 = vadd.f32 %v1246_v32, %v9015_v25  ;;  %v1425_v8 = vadd.f32 %v1247_v36, %v9021_v62  ;;  %v1433_v20 = vadd.f32 %v1248_v26, %v1175_v6  ;;  %v1418_v14 = vadd.f32 %v1243_v38, %v1170_v18  ;;  %v15821_v25 = vld [vmem:[#allocation59_spill] sm:$0xff]  ;;  %v15822_v62 = vld [vmem:[#allocation70_spill] sm:$0xff]  ;;  %v15829_v36 = vld [vmem:[#allocation104_spill] sm:$0xff] }
 0x2cf   :  { %v1419_v56 = vadd.f32 %v1264_v21, %v1191_v22  ;;  %v1426_v15 = vadd.f32 %v1244_v57, %v1171_v46  ;;  %v1427_v9 = vadd.f32 %v1265_v17, %v1192_v47  ;;  %v1434_v49 = vadd.f32 %v1245_v16, %v1172_v52  ;;  %1771 = vrot.lane.b32.xlu0 %v15716_v43, %s6912_s19  ;;  %v15823_v18 = vld [vmem:[#allocation106_spill] sm:$0xff]  ;;  %v15825_v47 = vld [vmem:[#allocation95_spill] sm:$0xff]  ;;  %v15831_v21 = vld [vmem:[#allocation109_spill] sm:$0xff] }
 0x2d0   :  { %v1435_v1 = vadd.f32 %v1266_v4, %v1193_v37  ;;  %v1463_v30 = vadd.f32 %v1415_v55, %v15820_v61  ;;  %v1471_v2 = vadd.f32 %v1423_v27, %v8757_v44  ;;  %v1479_v35 = vadd.f32 %v1431_v7, %v8901_v39  ;;  %v9191_v37 = vpop.permute.xlu0 %1303  ;;  %v9193_v55 = vpop.permute.xlu1 %1305  ;;  %v15826_v44 = vld [vmem:[#allocation108_spill] sm:$0xff]  ;;  %v15827_v39 = vld [vmem:[#allocation122_spill] sm:$0xff]  ;;  %v15830_v38 = vld [vmem:[#allocation171_spill] sm:$0xff] }
 0x2d1   :  { %v1494_v51 = vadd.f32 %v1470_v0, %v15821_v25  ;;  %v1464_v6 = vadd.f32 %v1416_v48, %v15822_v62  ;;  %v1472_v22 = vadd.f32 %v1424_v63, %v15823_v18  ;;  %v1480_v46 = vadd.f32 %v1432_v19, %v15824_v53  ;;  %v15828_v0 = vld [vmem:[#allocation98_spill] sm:$0xff]  ;;  %1773 = vrot.lane.b32.xlu1 %v15830_v38, %s6912_s19  ;;  %v15832_v17 = vld [vmem:[#allocation107_spill] sm:$0xff]  ;;  %v15833_v16 = vld [vmem:[#allocation124_spill] sm:$0xff] }
 0x2d2   :  { %v1465_v52 = vadd.f32 %v1417_v58, %v15825_v47  ;;  %v1473_v27 = vadd.f32 %v1425_v8, %v15826_v44  ;;  %v1481_v7 = vadd.f32 %v1433_v20, %v15827_v39  ;;  %v1466_v32 = vadd.f32 %v1418_v14, %v15828_v0  ;;  %v15834_v48 = vld [vmem:[#allocation130_spill] sm:$0xff]  ;;  %v15835_v19 = vld [vmem:[#allocation67_spill] sm:$0xff]  ;;  %v15837_v20 = vld [vmem:[#allocation41_spill] sm:$0xff] }
 0x2d3   :  { %v1467_v26 = vadd.f32 %v1419_v56, %v15829_v36  ;;  %v1474_v57 = vadd.f32 %v1426_v15, %v15831_v21  ;;  %v1475_v23 = vadd.f32 %v1427_v9, %v15832_v17  ;;  %v1482_v4 = vadd.f32 %v1434_v49, %v15833_v16  ;;  %v15836_v8 = vld [vmem:[#allocation38_spill] sm:$0xff]  ;;  %v15838_v14 = vld [vmem:[#allocation68_spill] sm:$0xff]  ;;  %v15839_v56 = vld [vmem:[#allocation173_spill] sm:$0xff] }
 0x2d4   :  { %v1483_v63 = vadd.f32 %v1435_v1, %v15834_v48  ;;  %v1502_v58 = vadd.f32 %v1478_v50, %v15835_v19  ;;  %v1487_v61 = vadd.f32 %v1463_v30, %v15836_v8  ;;  %v1495_v25 = vadd.f32 %v1471_v2, %v15837_v20  ;;  %1775 = vrot.lane.b32.xlu0 %v15839_v56, %s6912_s19  ;;  %v15840_v18 = vld [vmem:[#allocation73_spill] sm:$0xff]  ;;  %v15841_v15 = vld [vmem:[#allocation110_spill] sm:$0xff]  ;;  %v15844_v1 = vld [vmem:[#allocation111_spill] sm:$0xff]  ;;  %v1308_v16 = vpop.permute.xlu0 %1307  ;;  %v1310_v48 = vpop.permute.xlu1 %1309 }
 0x2d5   :  { %v1503_v62 = vadd.f32 %v1479_v35, %v15838_v14  ;;  %v1488_v53 = vadd.f32 %v1464_v6, %v15840_v18  ;;  %v1496_v47 = vadd.f32 %v1472_v22, %v15841_v15  ;;  %v15842_v9 = vld [vmem:[#allocation117_spill] sm:$0xff]  ;;  %v15843_v49 = vld [vmem:[#allocation74_spill] sm:$0xff]  ;;  %v1497_v0 = vadd.f32 %v1473_v27, %v15844_v1  ;;  %v15846_v30 = vld [vmem:[#allocation75_spill] sm:$0xff] }
 0x2d6   :  { %v1504_v44 = vadd.f32 %v1480_v46, %v15842_v9  ;;  %v1489_v39 = vadd.f32 %v1465_v52, %v15843_v49  ;;  %v15845_v50 = vld [vmem:[#allocation118_spill] sm:$0xff]  ;;  %v1490_v21 = vadd.f32 %v1466_v32, %v15846_v30  ;;  %v15847_v2 = vld [vmem:[#allocation92_spill] sm:$0xff]  ;;  %v15848_v35 = vld [vmem:[#allocation175_spill] sm:$0xff] }
 0x2d7   :  { %v1505_v36 = vadd.f32 %v1481_v7, %v15845_v50  ;;  %v1491_v17 = vadd.f32 %v1467_v26, %v15847_v2  ;;  %1777 = vrot.lane.b32.xlu1 %v15848_v35, %s6912_s19  ;;  %v15849_v6 = vld [vmem:[#allocation112_spill] sm:$0xff]  ;;  %v15850_v22 = vld [vmem:[#allocation113_spill] sm:$0xff]  ;;  %v15851_v46 = vld [vmem:[#allocation119_spill] sm:$0xff] }
 0x2d8   :  { %v1498_v19 = vadd.f32 %v1474_v57, %v15849_v6  ;;  %v1499_v8 = vadd.f32 %v1475_v23, %v15850_v22  ;;  %v1506_v20 = vadd.f32 %v1482_v4, %v15851_v46  ;;  %v15852_v52 = vld [vmem:[#allocation120_spill] sm:$0xff]  ;;  %v15853_v27 = vld [vmem:[#allocation114_spill] sm:$0xff]  ;;  %v15855_v32 = vld [vmem:[#allocation115_spill] sm:$0xff] }
 0x2d9   :  { %v1507_v14 = vadd.f32 %v1483_v63, %v15852_v52  ;;  %v15854_v18 = vld [vmem:[#allocation102_spill] sm:$0xff]  ;;  %v15856_v26 = vld [vmem:[#allocation103_spill] sm:$0xff]  ;;  %v15857_v9 = vld [vmem:[#allocation116_spill] sm:$0xff] }
 0x2da   :  { %v1334_v7 = vsel %vm15282_vm9, %v15854_v18, %v15853_v27  ;;  %v1335_v15 = vsel %vm15282_vm9, %v15856_v26, %v15855_v32  ;;  %v15858_v49 = vld [vmem:[#allocation105_spill] sm:$0xff]  ;;  %v15861_v1 = vld [vmem:[#allocation96_spill] sm:$0xff]  ;;  %v15862_v30 = vld [vmem:[#allocation123_spill] sm:$0xff] }
 0x2db   :  { %v1336_v57 = vsel %vm15282_vm9, %v15858_v49, %v15857_v9  ;;  %v15859_v23 = vld [vmem:[#allocation97_spill] sm:$0xff]  ;;  %v1332_v50 = vsel %vm15282_vm9, %v15855_v32, %v15861_v1  ;;  %v1333_v2 = vsel %vm15282_vm9, %v15857_v9, %v15862_v30  ;;  %v15863_v6 = vld [vmem:[#allocation131_spill] sm:$0xff]  ;;  %v15864_v46 = vld [vmem:[#allocation64_spill] sm:$0xff]  ;;  %v1516_v56 = vadd.f32 %v9094_v45, %v1335_v15  ;;  %v1314_v15 = vpop.permute.xlu1 %1313 }
 0x2dc   :  { %v1331_v4 = vsel %vm15282_vm9, %v15853_v27, %v15859_v23  ;;  %v15860_v63 = vld [vmem:[#allocation177_spill] sm:$0xff]  ;;  %v1328_v22 = vsel %vm15282_vm9, %v15859_v23, %v15863_v6  ;;  %v1329_v52 = vsel %vm15282_vm9, %v15861_v1, %v15864_v46  ;;  %v1326_v23 = vsel %vm15282_vm9, %v15864_v46, %v9056_v5  ;;  %v15867_v35 = vld [vmem:[#allocation179_spill] sm:$0xff] }
 0x2dd   :  { %1779 = vrot.lane.b32.xlu0 %v15860_v63, %s6912_s19  ;;  %v15865_v27 = vld [vmem:[#allocation125_spill] sm:$0xff]  ;;  %1781 = vrot.lane.b32.xlu1 %v15867_v35, %s6912_s19  ;;  %v9280_v38 = vadd.f32 %v9097_v59, %v1336_v57  ;;  %v1517_v43 = vadd.f32 %v9104_v60, %v1332_v50  ;;  %v9285_v46 = vadd.f32 %v9107_v24, %v1333_v2  ;;  %v1312_v59 = vpop.permute.xlu0 %1311 }
 0x2de   :  { %v1330_v32 = vsel %vm15282_vm9, %v15862_v30, %v15865_v27  ;;  %v15866_v63 = vld [vmem:[#allocation61_spill] sm:$0xff]  ;;  %v1327_v1 = vsel %vm15282_vm9, %v15865_v27, %v9086_v40  ;;  %v1508_v30 = vadd.f32 %v9091_v11, %v1334_v7  ;;  %v1510_v13 = vadd.f32 %v9110_v28, %v1328_v22 }
 0x2df   :  { %v1325_v9 = vsel %vm15282_vm9, %v15863_v6, %v15866_v63  ;;  %v1509_v6 = vadd.f32 %v9100_v10, %v1331_v4  ;;  %v1518_v27 = vadd.f32 %v1494_v51, %v1329_v52  ;;  %v15868_v3 = vld [vmem:[#allocation181_spill] sm:$0xff]  ;;  %v9290_v35 = vadd.f32 %v1502_v58, %v1330_v32  ;;  %v15869_v51 = vld [vmem:[#allocation183_spill] sm:$0xff] }
 0x2e0   :  { %v1511_v11 = vadd.f32 %v1487_v61, %v1325_v9  ;;  %v1519_v45 = vadd.f32 %v1495_v25, %v1326_v23  ;;  %v9292_v7 = vadd.f32 %v1503_v62, %v1327_v1  ;;  %v1322_v10 = vsel %vm15282_vm9, %v15866_v63, %v9114_v29 }
 0x2e1   :  { %1783 = vrot.lane.b32.xlu0 %v15868_v3, %s6912_s19  ;;  %v1323_v60 = vsel %vm15282_vm9, %v9056_v5, %v9151_v31  ;;  %v1324_v24 = vsel %vm15282_vm9, %v9086_v40, %v9171_v42  ;;  %v1319_v28 = vsel %vm15282_vm9, %v9114_v29, %v9191_v37  ;;  %1785 = vrot.lane.b32.xlu1 %v15869_v51, %s6912_s19  ;;  %v1538_v32 = vpop.permute.xlu0 %1537 }
 0x2e2   :  { %v1320_v58 = vsel %vm15282_vm9, %v9151_v31, %v9193_v55  ;;  %v1321_v5 = vsel %vm15282_vm9, %v9171_v42, %v1308_v16  ;;  %v1316_v40 = vsel %vm15282_vm9, %v9191_v37, %v1310_v48  ;;  %v1337_v29 = vsel %vm15282_vm9, %v1310_v48, %v15854_v18  ;;  %v15870_v37 = vld [vmem:[#allocation185_spill] sm:$0xff] }
 0x2e3   :  { %v1317_v61 = vsel %vm15282_vm9, %v9193_v55, %v1312_v59  ;;  %v1338_v31 = vsel %vm15282_vm9, %v1312_v59, %v15856_v26  ;;  %v1318_v25 = vsel %vm15282_vm9, %v1308_v16, %v1314_v15  ;;  %v1339_v42 = vsel %vm15282_vm9, %v1314_v15, %v15858_v49  ;;  %v15871_v26 = vld [vmem:[#allocation187_spill] sm:$0xff]  ;;  %v15873_v59 = vld [vmem:[#allocation25_spill] sm:$0xff] }
 0x2e4   :  { %v1512_v62 = vadd.f32 %v1488_v53, %v1322_v10  ;;  %v1520_v48 = vadd.f32 %v1496_v47, %v1323_v60  ;;  %v1528_v18 = vadd.f32 %v1504_v44, %v1324_v24  ;;  %v1513_v57 = vadd.f32 %v1489_v39, %v1319_v28  ;;  %v15875_v10 = vld [vmem:[#allocation167_spill] sm:$0xff]  ;;  %v15877_v24 = vld [vmem:[#allocation169_spill] sm:$0xff] }
 0x2e5   :  { %1787 = vrot.lane.b32.xlu0 %v15870_v37, %s6912_s19  ;;  %v1521_v4 = vadd.f32 %v1497_v0, %v1320_v58  ;;  %v1529_v55 = vadd.f32 %v1505_v36, %v1321_v5  ;;  %v1514_v63 = vadd.f32 %v1490_v21, %v1316_v40  ;;  %v1515_v50 = vadd.f32 %v1491_v17, %v1337_v29  ;;  %v1543_v0 = vpop.permute.xlu1 %1542  ;;  %v15879_v58 = vld [vmem:[#allocation171_spill] sm:$0xff]  ;;  %v15881_v40 = vld [vmem:[#allocation173_spill] sm:$0xff] }
 0x2e6   :  { %1789 = vrot.lane.b32.xlu1 %v15871_v26, %s6912_s19  ;;  %v1522_v2 = vadd.f32 %v1498_v19, %v1317_v61  ;;  %v1523_v16 = vadd.f32 %v1499_v8, %v1338_v31  ;;  %v1530_v22 = vadd.f32 %v1506_v20, %v1318_v25  ;;  %v1531_v52 = vadd.f32 %v1507_v14, %v1339_v42  ;;  %v1548_v20 = vpop.permute.xlu0 %1547  ;;  %v15883_v61 = vld [vmem:[#allocation175_spill] sm:$0xff]  ;;  %v15885_v25 = vld [vmem:[#allocation177_spill] sm:$0xff] }
 0x2e7   :  { %v1550_v49 = vadd.f32 %v1538_v32, %v1508_v30  ;;  %v1551_v9 = vadd.f32 %v1538_v32, %v1509_v6  ;;  %v1552_v23 = vadd.f32 %v1538_v32, %v1510_v13  ;;  %v1553_v1 = vadd.f32 %v1538_v32, %v1511_v11 }
 0x2e8   :  { %v1554_v53 = vadd.f32 %v1538_v32, %v1512_v62  ;;  %v1555_v47 = vadd.f32 %v1538_v32, %v1513_v57  ;;  %v1556_v44 = vadd.f32 %v1538_v32, %v1514_v63  ;;  %v1557_v39 = vadd.f32 %v1538_v32, %v1515_v50  ;;  %v15887_v62 = vld [vmem:[#allocation179_spill] sm:$0xff] }
 0x2e9   :  { %1791 = vrot.lane.b32.xlu0 %v8160_v54, %s6912_s19  ;;  %6745 = vst [vmem:[%s14812_s11 + $0x200] sm:$0xff] %v1550_v49  ;;  %6746 = vst [vmem:[%s14812_s11 + $0x208] sm:$0xff] %v1551_v9  ;;  %v1558_v13 = vadd.f32 %v1543_v0, %v1516_v56  ;;  %v1559_v36 = vadd.f32 %v1543_v0, %v1517_v43  ;;  %v1560_v21 = vadd.f32 %v1543_v0, %v1518_v27 }
 0x2ea   :  { %6747 = vst [vmem:[%s14812_s11 + $0x210] sm:$0xff] %v1552_v23  ;;  %6748 = vst [vmem:[%s14812_s11 + $0x218] sm:$0xff] %v1553_v1  ;;  %v1561_v17 = vadd.f32 %v1543_v0, %v1519_v45  ;;  %1793 = vrot.lane.b32.xlu1 %v15675_v34, %s6912_s19  ;;  %v1562_v43 = vadd.f32 %v1543_v0, %v1520_v48  ;;  %v1563_v56 = vadd.f32 %v1543_v0, %v1521_v4  ;;  %v9398_v45 = vpop.permute.xlu1 %1574 }
 0x2eb   :  { %6749 = vst [vmem:[%s14812_s11 + $0x220] sm:$0xff] %v1554_v53  ;;  %6750 = vst [vmem:[%s14812_s11 + $0x228] sm:$0xff] %v1555_v47  ;;  %v1564_v19 = vadd.f32 %v1543_v0, %v1522_v2  ;;  %v1565_v8 = vadd.f32 %v1543_v0, %v1523_v16  ;;  %v1566_v14 = vadd.f32 %v1548_v20, %v9280_v38 }
 0x2ec   :  { %6751 = vst [vmem:[%s14812_s11 + $0x230] sm:$0xff] %v1556_v44  ;;  %6752 = vst [vmem:[%s14812_s11 + $0x238] sm:$0xff] %v1557_v39  ;;  %v1567_v30 = vadd.f32 %v1548_v20, %v9285_v46  ;;  %v1568_v6 = vadd.f32 %v1548_v20, %v9290_v35  ;;  %v1569_v27 = vadd.f32 %v1548_v20, %v9292_v7  ;;  %v9426_v7 = vpop.permute.xlu0 %1576 }
 0x2ed   :  { %6753 = vst [vmem:[%s14812_s11 + $0x240] sm:$0xff] %v1558_v13  ;;  %6754 = vst [vmem:[%s14812_s11 + $0x248] sm:$0xff] %v1559_v36  ;;  %1795 = vrot.lane.b32.xlu0 %v15685_v12, %s6912_s19  ;;  %v1570_v38 = vadd.f32 %v1548_v20, %v1528_v18  ;;  %v1571_v35 = vadd.f32 %v1548_v20, %v1529_v55  ;;  %v1572_v46 = vadd.f32 %v1548_v20, %v1530_v22 }
 0x2ee   :  { %6755 = vst [vmem:[%s14812_s11 + $0x250] sm:$0xff] %v1560_v21  ;;  %6756 = vst [vmem:[%s14812_s11 + $0x258] sm:$0xff] %v1561_v17  ;;  %v1573_v11 = vadd.f32 %v1548_v20, %v1531_v52  ;;  %1797 = vrot.lane.b32.xlu1 %v15689_v41, %s6912_s19  ;;  %v9430_v15 = vpop.permute.xlu1 %1578 }
 0x2ef   :  { %6757 = vst [vmem:[%s14812_s11 + $0x260] sm:$0xff] %v1562_v43  ;;  %6758 = vst [vmem:[%s14812_s11 + $0x268] sm:$0xff] %v1563_v56 }
 0x2f0   :  { %6759 = vst [vmem:[%s14812_s11 + $0x270] sm:$0xff] %v1564_v19  ;;  %6760 = vst [vmem:[%s14812_s11 + $0x278] sm:$0xff] %v1565_v8  ;;  %v9434_v60 = vpop.permute.xlu0 %1580 }
 0x2f1   :  { %15872 = vst [vmem:[#allocation132_spill] sm:$0xff] %v9398_v45  ;;  %6761 = vst [vmem:[%s14812_s11 + $0x280] sm:$0xff] %v1566_v14  ;;  %1799 = vrot.lane.b32.xlu0 %v15873_v59, %s6912_s19  ;;  %s6914_s19 = smov 22  }
 0x2f2   :  { %6762 = vst [vmem:[%s14812_s11 + $0x288] sm:$0xff] %v1567_v30  ;;  %6763 = vst [vmem:[%s14812_s11 + $0x290] sm:$0xff] %v1568_v6  ;;  %1834 = vrot.lane.b32.xlu1 %v15875_v10, %s6913_s23  ;;  %v9438_v28 = vpop.permute.xlu1 %1582 }
 0x2f3   :  { %6764 = vst [vmem:[%s14812_s11 + $0x298] sm:$0xff] %v1569_v27  ;;  %6765 = vst [vmem:[%s14812_s11 + $0x2a0] sm:$0xff] %v1570_v38 }
 0x2f4   :  { %6766 = vst [vmem:[%s14812_s11 + $0x2a8] sm:$0xff] %v1571_v35  ;;  %6767 = vst [vmem:[%s14812_s11 + $0x2b0] sm:$0xff] %v1572_v46  ;;  %v9442_v5 = vpop.permute.xlu0 %1584 }
 0x2f5   :  { %6768 = vst [vmem:[%s14812_s11 + $0x2b8] sm:$0xff] %v1573_v11  ;;  %15874 = vst [vmem:[#allocation133_spill] sm:$0xff] %v9430_v15  ;;  %1836 = vrot.lane.b32.xlu0 %v15877_v24, %s6913_s23 }
 0x2f6   :  { %15876 = vst [vmem:[#allocation126_spill] sm:$0xff] %v9434_v60  ;;  %15878 = vst [vmem:[#allocation127_spill] sm:$0xff] %v9438_v28  ;;  %1838 = vrot.lane.b32.xlu1 %v15879_v58, %s6913_s23  ;;  %v9446_v29 = vpop.permute.xlu1 %1586 }
 0x2f7   :  { %15880 = vst [vmem:[#allocation60_spill] sm:$0xff] %v9442_v5  ;;  %15882 = vst [vmem:[#allocation56_spill] sm:$0xff] %v9446_v29 }
 0x2f8   :  { %v9450_v31 = vpop.permute.xlu0 %1588 }
 0x2f9   :  { %1840 = vrot.lane.b32.xlu0 %v15881_v40, %s6913_s23  ;;  %15884 = vst [vmem:[#allocation128_spill] sm:$0xff] %v9450_v31 }
 0x2fa   :  { %1842 = vrot.lane.b32.xlu1 %v15883_v61, %s6913_s23  ;;  %v9454_v42 = vpop.permute.xlu1 %1590 }
 0x2fb   :  { %15886 = vst [vmem:[#allocation129_spill] sm:$0xff] %v9454_v42 }
 0x2fc   :  { %v9458_v48 = vpop.permute.xlu0 %1592 }
 0x2fd   :  { %1844 = vrot.lane.b32.xlu0 %v15885_v25, %s6913_s23  ;;  %15888 = vst [vmem:[#allocation134_spill] sm:$0xff] %v9458_v48 }
 0x2fe   :  { %1846 = vrot.lane.b32.xlu1 %v15887_v62, %s6913_s23  ;;  %v9462_v18 = vpop.permute.xlu1 %1594 }
 0x2ff   :  { %15889 = vst [vmem:[#allocation135_spill] sm:$0xff] %v9462_v18 }
 0x300   :  { %v9466_v57 = vpop.permute.xlu0 %1596 }
 0x301   :  { %1848 = vrot.lane.b32.xlu0 %v15868_v3, %s6913_s23  ;;  %15890 = vst [vmem:[#allocation136_spill] sm:$0xff] %v9466_v57 }
 0x302   :  { %1850 = vrot.lane.b32.xlu1 %v15869_v51, %s6913_s23  ;;  %v9470_v4 = vpop.permute.xlu1 %1598 }
 0x303   :  { %15891 = vst [vmem:[#allocation137_spill] sm:$0xff] %v9470_v4 }
 0x304   :  { %v9474_v55 = vpop.permute.xlu0 %1600 }
 0x305   :  { %1852 = vrot.lane.b32.xlu0 %v15870_v37, %s6913_s23  ;;  %15892 = vst [vmem:[#allocation36_spill] sm:$0xff] %v9474_v55 }
 0x306   :  { %1854 = vrot.lane.b32.xlu1 %v15871_v26, %s6913_s23  ;;  %v9478_v63 = vpop.permute.xlu1 %1602 }
 0x307   :  { %15893 = vst [vmem:[#allocation142_spill] sm:$0xff] %v9478_v63 }
 0x308   :  { %v9482_v50 = vpop.permute.xlu0 %1604 }
 0x309   :  { %1856 = vrot.lane.b32.xlu0 %v8160_v54, %s6913_s23  ;;  %15894 = vst [vmem:[#allocation15_spill] sm:$0xff] %v9482_v50 }
 0x30a   :  { %1858 = vrot.lane.b32.xlu1 %v15675_v34, %s6913_s23  ;;  %v9486_v2 = vpop.permute.xlu1 %1639 }
 0x30c   :  { %v9490_v16 = vpop.permute.xlu0 %1641 }
 0x30d   :  { %1860 = vrot.lane.b32.xlu0 %v15685_v12, %s6913_s23 }
 0x30e   :  { %1862 = vrot.lane.b32.xlu1 %v15689_v41, %s6913_s23  ;;  %v9494_v22 = vpop.permute.xlu1 %1643 }
 0x30f   :  { %15895 = vst [vmem:[#allocation51_spill] sm:$0xff] %v9494_v22 }
 0x310   :  { %v9498_v52 = vpop.permute.xlu0 %1645 }
 0x311   :  { %1864 = vrot.lane.b32.xlu0 %v15873_v59, %s6913_s23  ;;  %15896 = vst [vmem:[#allocation58_spill] sm:$0xff] %v9498_v52 }
 0x312   :  { %1899 = vrot.lane.b32.xlu1 %v15875_v10, %s6914_s19  ;;  %v9502_v32 = vpop.permute.xlu1 %1647 }
 0x313   :  { %15897 = vst [vmem:[#allocation54_spill] sm:$0xff] %v9502_v32 }
 0x314   :  { %v9506_v49 = vpop.permute.xlu0 %1649 }
 0x315   :  { %1901 = vrot.lane.b32.xlu0 %v15877_v24, %s6914_s19  ;;  %15898 = vst [vmem:[#allocation55_spill] sm:$0xff] %v9506_v49 }
 0x316   :  { %1903 = vrot.lane.b32.xlu1 %v15879_v58, %s6914_s19  ;;  %v9510_v9 = vpop.permute.xlu1 %1651 }
 0x317   :  { %15899 = vst [vmem:[#allocation138_spill] sm:$0xff] %v9510_v9 }
 0x318   :  { %v9514_v23 = vpop.permute.xlu0 %1653 }
 0x319   :  { %1905 = vrot.lane.b32.xlu0 %v15881_v40, %s6914_s19  ;;  %15900 = vst [vmem:[#allocation139_spill] sm:$0xff] %v9514_v23 }
 0x31a   :  { %1907 = vrot.lane.b32.xlu1 %v15883_v61, %s6914_s19  ;;  %v9518_v1 = vpop.permute.xlu1 %1655 }
 0x31b   :  { %15901 = vst [vmem:[#allocation140_spill] sm:$0xff] %v9518_v1 }
 0x31c   :  { %v9522_v53 = vpop.permute.xlu0 %1657 }
 0x31d   :  { %1909 = vrot.lane.b32.xlu0 %v15885_v25, %s6914_s19  ;;  %15902 = vst [vmem:[#allocation141_spill] sm:$0xff] %v9522_v53 }
 0x31e   :  { %1911 = vrot.lane.b32.xlu1 %v15887_v62, %s6914_s19  ;;  %v9526_v47 = vpop.permute.xlu1 %1659 }
 0x31f   :  { %15903 = vst [vmem:[#allocation143_spill] sm:$0xff] %v9526_v47 }
 0x320   :  { %v9530_v44 = vpop.permute.xlu0 %1661 }
 0x321   :  { %1913 = vrot.lane.b32.xlu0 %v15868_v3, %s6914_s19  ;;  %15904 = vst [vmem:[#allocation150_spill] sm:$0xff] %v9530_v44 }
 0x322   :  { %1915 = vrot.lane.b32.xlu1 %v15869_v51, %s6914_s19  ;;  %v9534_v39 = vpop.permute.xlu1 %1663 }
 0x323   :  { %15905 = vst [vmem:[#allocation91_spill] sm:$0xff] %v9534_v39 }
 0x324   :  { %v9538_v0 = vpop.permute.xlu0 %1665 }
 0x325   :  { %1917 = vrot.lane.b32.xlu0 %v15870_v37, %s6914_s19  ;;  %15906 = vst [vmem:[#allocation144_spill] sm:$0xff] %v9538_v0 }
 0x326   :  { %1919 = vrot.lane.b32.xlu1 %v15871_v26, %s6914_s19  ;;  %v9542_v13 = vpop.permute.xlu1 %1667 }
 0x327   :  { %15907 = vst [vmem:[#allocation145_spill] sm:$0xff] %v9542_v13 }
 0x328   :  { %v9546_v36 = vpop.permute.xlu0 %1669 }
 0x329   :  { %1921 = vrot.lane.b32.xlu0 %v8160_v54, %s6914_s19  ;;  %15908 = vst [vmem:[#allocation152_spill] sm:$0xff] %v9546_v36 }
 0x32a   :  { %1923 = vrot.lane.b32.xlu1 %v15675_v34, %s6914_s19  ;;  %v9550_v21 = vpop.permute.xlu1 %1704 }
 0x32c   :  { %v9554_v17 = vpop.permute.xlu0 %1706 }
 0x32d   :  { %1925 = vrot.lane.b32.xlu0 %v15685_v12, %s6914_s19 }
 0x32e   :  { %1927 = vrot.lane.b32.xlu1 %v15689_v41, %s6914_s19  ;;  %v9558_v43 = vpop.permute.xlu1 %1708 }
 0x32f   :  { %15909 = vst [vmem:[#allocation153_spill] sm:$0xff] %v9558_v43 }
 0x330   :  { %v9562_v56 = vpop.permute.xlu0 %1710 }
 0x331   :  { %1929 = vrot.lane.b32.xlu0 %v15873_v59, %s6914_s19  ;;  %15910 = vst [vmem:[#allocation146_spill] sm:$0xff] %v9562_v56 }
 0x332   :  { %1964 = vrot.lane.b32.xlu1 %v15875_v10, %s6901_s29  ;;  %v9566_v19 = vpop.permute.xlu1 %1712 }
 0x333   :  { %15911 = vst [vmem:[#allocation87_spill] sm:$0xff] %v9566_v19 }
 0x334   :  { %v9570_v8 = vpop.permute.xlu0 %1714 }
 0x335   :  { %1966 = vrot.lane.b32.xlu0 %v15877_v24, %s6901_s29  ;;  %15912 = vst [vmem:[#allocation147_spill] sm:$0xff] %v9570_v8 }
 0x336   :  { %1968 = vrot.lane.b32.xlu1 %v15879_v58, %s6901_s29  ;;  %v9574_v20 = vpop.permute.xlu1 %1716 }
 0x337   :  { %15913 = vst [vmem:[#allocation155_spill] sm:$0xff] %v9574_v20 }
 0x338   :  { %v9578_v14 = vpop.permute.xlu0 %1718 }
 0x339   :  { %1970 = vrot.lane.b32.xlu0 %v15881_v40, %s6901_s29  ;;  %15914 = vst [vmem:[#allocation88_spill] sm:$0xff] %v9578_v14 }
 0x33a   :  { %1972 = vrot.lane.b32.xlu1 %v15883_v61, %s6901_s29  ;;  %v9582_v30 = vpop.permute.xlu1 %1720 }
 0x33b   :  { %15915 = vst [vmem:[#allocation76_spill] sm:$0xff] %v9582_v30 }
 0x33c   :  { %v9586_v6 = vpop.permute.xlu0 %1722 }
 0x33d   :  { %1974 = vrot.lane.b32.xlu0 %v15885_v25, %s6901_s29  ;;  %15916 = vst [vmem:[#allocation148_spill] sm:$0xff] %v9586_v6 }
 0x33e   :  { %1976 = vrot.lane.b32.xlu1 %v15887_v62, %s6901_s29  ;;  %v9590_v27 = vpop.permute.xlu1 %1724 }
 0x33f   :  { %15917 = vst [vmem:[#allocation149_spill] sm:$0xff] %v9590_v27 }
 0x340   :  { %v9594_v38 = vpop.permute.xlu0 %1726 }
 0x341   :  { %1978 = vrot.lane.b32.xlu0 %v15868_v3, %s6901_s29  ;;  %15918 = vst [vmem:[#allocation151_spill] sm:$0xff] %v9594_v38 }
 0x342   :  { %1980 = vrot.lane.b32.xlu1 %v15869_v51, %s6901_s29  ;;  %v9598_v35 = vpop.permute.xlu1 %1728 }
 0x343   :  { %15919 = vst [vmem:[#allocation83_spill] sm:$0xff] %v9598_v35 }
 0x344   :  { %v9602_v46 = vpop.permute.xlu0 %1730 }
 0x345   :  { %1982 = vrot.lane.b32.xlu0 %v15870_v37, %s6901_s29  ;;  %15920 = vst [vmem:[#allocation72_spill] sm:$0xff] %v9602_v46 }
 0x346   :  { %1984 = vrot.lane.b32.xlu1 %v15871_v26, %s6901_s29  ;;  %v9606_v11 = vpop.permute.xlu1 %1732 }
 0x347   :  { %15921 = vst [vmem:[#allocation154_spill] sm:$0xff] %v9606_v11 }
 0x348   :  { %v9610_v4 = vpop.permute.xlu0 %1734 }
 0x349   :  { %1986 = vrot.lane.b32.xlu0 %v8160_v54, %s6901_s29  ;;  %15922 = vst [vmem:[#allocation156_spill] sm:$0xff] %v9610_v4 }
 0x34a   :  { %1988 = vrot.lane.b32.xlu1 %v15675_v34, %s6901_s29  ;;  %v9614_v55 = vpop.permute.xlu1 %1769 }
 0x34c   :  { %v9618_v39 = vpop.permute.xlu0 %1771 }
 0x34d   :  { %1990 = vrot.lane.b32.xlu0 %v15685_v12, %s6901_s29 }
 0x34e   :  { %1992 = vrot.lane.b32.xlu1 %v15689_v41, %s6901_s29  ;;  %v9622_v0 = vpop.permute.xlu1 %1773 }
 0x34f   :  { %15923 = vst [vmem:[#allocation157_spill] sm:$0xff] %v9622_v0 }
 0x350   :  { %v9626_v35 = vpop.permute.xlu0 %1775 }
 0x351   :  { %1994 = vrot.lane.b32.xlu0 %v15873_v59, %s6901_s29  ;;  %15924 = vst [vmem:[#allocation159_spill] sm:$0xff] %v9626_v35 }
 0x352   :  { %2028 = vrot.lane.b32.xlu1 %v15875_v10, %s6902_s30  ;;  %v9630_v46 = vpop.permute.xlu1 %1777 }
 0x353   :  { %15925 = vst [vmem:[#allocation16_spill] sm:$0xff] %v9630_v46 }
 0x354   :  { %v9634_v42 = vpop.permute.xlu0 %1779 }
 0x355   :  { %2030 = vrot.lane.b32.xlu0 %v15877_v24, %s6902_s30  ;;  %15926 = vst [vmem:[#allocation77_spill] sm:$0xff] %v9634_v42 }
 0x356   :  { %2032 = vrot.lane.b32.xlu1 %v15879_v58, %s6902_s30  ;;  %v9638_v18 = vpop.permute.xlu1 %1781 }
 0x357   :  { %15927 = vst [vmem:[#allocation82_spill] sm:$0xff] %v9638_v18 }
 0x358   :  { %v9642_v48 = vpop.permute.xlu0 %1783 }
 0x359   :  { %2034 = vrot.lane.b32.xlu0 %v15881_v40, %s6902_s30  ;;  %15928 = vst [vmem:[#allocation158_spill] sm:$0xff] %v9642_v48 }
 0x35a   :  { %2036 = vrot.lane.b32.xlu1 %v15883_v61, %s6902_s30  ;;  %v9646_v57 = vpop.permute.xlu1 %1785 }
 0x35b   :  { %15929 = vst [vmem:[#allocation80_spill] sm:$0xff] %v9646_v57 }
 0x35c   :  { %v9650_v1 = vpop.permute.xlu0 %1787 }
 0x35d   :  { %2038 = vrot.lane.b32.xlu0 %v15885_v25, %s6902_s30  ;;  %15930 = vst [vmem:[#allocation85_spill] sm:$0xff] %v9650_v1 }
 0x35e   :  { %2040 = vrot.lane.b32.xlu1 %v15887_v62, %s6902_s30  ;;  %v9654_v47 = vpop.permute.xlu1 %1789 }
 0x35f   :  { %15931 = vst [vmem:[#allocation160_spill] sm:$0xff] %v9654_v47 }
 0x360   :  { %v9658_v53 = vpop.permute.xlu0 %1791 }
 0x361   :  { %2042 = vrot.lane.b32.xlu0 %v15868_v3, %s6902_s30  ;;  %15932 = vst [vmem:[#allocation71_spill] sm:$0xff] %v9658_v53 }
 0x362   :  { %2044 = vrot.lane.b32.xlu1 %v15869_v51, %s6902_s30  ;;  %v9662_v44 = vpop.permute.xlu1 %1793 }
 0x363   :  { %15933 = vst [vmem:[#allocation188_spill] sm:$0xff] %v9662_v44 }
 0x364   :  { %v9666_v30 = vpop.permute.xlu0 %1795 }
 0x365   :  { %2046 = vrot.lane.b32.xlu0 %v15870_v37, %s6902_s30  ;;  %15934 = vst [vmem:[#allocation182_spill] sm:$0xff] %v9666_v30 }
 0x366   :  { %2048 = vrot.lane.b32.xlu1 %v15871_v26, %s6902_s30  ;;  %v9670_v27 = vpop.permute.xlu1 %1797 }
 0x367   :  { %15935 = vst [vmem:[#allocation190_spill] sm:$0xff] %v9670_v27 }
 0x368   :  { %v9674_v6 = vpop.permute.xlu0 %1799 }
 0x369   :  { %2050 = vrot.lane.b32.xlu0 %v8160_v54, %s6902_s30  ;;  %15936 = vst [vmem:[#allocation184_spill] sm:$0xff] %v9674_v6 }
 0x36a   :  { %2052 = vrot.lane.b32.xlu1 %v15675_v34, %s6902_s30  ;;  %v9678_v38 = vpop.permute.xlu1 %1834 }
 0x36c   :  { %v9682_v44 = vpop.permute.xlu0 %1836 }
 0x36d   :  { %2054 = vrot.lane.b32.xlu0 %v15685_v12, %s6902_s30 }
 0x36e   :  { %2056 = vrot.lane.b32.xlu1 %v15689_v41, %s6902_s30  ;;  %v9686_v30 = vpop.permute.xlu1 %1838 }
 0x36f   :  { %15937 = vst [vmem:[#allocation192_spill] sm:$0xff] %v9686_v30 }
 0x370   :  { %v9690_v57 = vpop.permute.xlu0 %1840 }
 0x371   :  { %2058 = vrot.lane.b32.xlu0 %v15873_v59, %s6902_s30  ;;  %15938 = vst [vmem:[#allocation186_spill] sm:$0xff] %v9690_v57 }
 0x372   :  { %2092 = vrot.lane.b32.xlu1 %v15875_v10, %s6903_s12  ;;  %v9694_v47 = vpop.permute.xlu1 %1842 }
 0x373   :  { %15939 = vst [vmem:[#allocation24_spill] sm:$0xff] %v9694_v47 }
 0x374   :  { %v9698_v1 = vpop.permute.xlu0 %1844 }
 0x375   :  { %2094 = vrot.lane.b32.xlu0 %v15877_v24, %s6903_s12  ;;  %15940 = vst [vmem:[#allocation161_spill] sm:$0xff] %v9698_v1 }
 0x376   :  { %2096 = vrot.lane.b32.xlu1 %v15879_v58, %s6903_s12  ;;  %v9702_v53 = vpop.permute.xlu1 %1846 }
 0x377   :  { %15941 = vst [vmem:[#allocation35_spill] sm:$0xff] %v9702_v53 }
 0x378   :  { %v9706_v28 = vpop.permute.xlu0 %1848 }
 0x379   :  { %2098 = vrot.lane.b32.xlu0 %v15881_v40, %s6903_s12  ;;  %15942 = vst [vmem:[#allocation62_spill] sm:$0xff] %v9706_v28 }
 0x37a   :  { %2100 = vrot.lane.b32.xlu1 %v15883_v61, %s6903_s12  ;;  %v9710_v29 = vpop.permute.xlu1 %1850 }
 0x37b   :  { %15943 = vst [vmem:[#allocation39_spill] sm:$0xff] %v9710_v29 }
 0x37c   :  { %v9714_v5 = vpop.permute.xlu0 %1852 }
 0x37d   :  { %2102 = vrot.lane.b32.xlu0 %v15885_v25, %s6903_s12  ;;  %15944 = vst [vmem:[#allocation162_spill] sm:$0xff] %v9714_v5 }
 0x37e   :  { %2104 = vrot.lane.b32.xlu1 %v15887_v62, %s6903_s12  ;;  %v9718_v31 = vpop.permute.xlu1 %1854 }
 0x37f   :  { %15945 = vst [vmem:[#allocation163_spill] sm:$0xff] %v9718_v31 }
 0x380   :  { %v9722_v32 = vpop.permute.xlu0 %1856 }
 0x381   :  { %2106 = vrot.lane.b32.xlu0 %v15868_v3, %s6903_s12  ;;  %15946 = vst [vmem:[#allocation164_spill] sm:$0xff] %v9722_v32 }
 0x382   :  { %2108 = vrot.lane.b32.xlu1 %v15869_v51, %s6903_s12  ;;  %v9726_v9 = vpop.permute.xlu1 %1858 }
 0x383   :  { %15947 = vst [vmem:[#allocation165_spill] sm:$0xff] %v9726_v9 }
 0x384   :  { %v9730_v29 = vpop.permute.xlu0 %1860 }
 0x385   :  { %2110 = vrot.lane.b32.xlu0 %v15870_v37, %s6903_s12  ;;  %15948 = vst [vmem:[#allocation52_spill] sm:$0xff] %v9730_v29 }
 0x386   :  { %2112 = vrot.lane.b32.xlu1 %v15871_v26, %s6903_s12  ;;  %v9734_v5 = vpop.permute.xlu1 %1862 }
 0x387   :  { %15949 = vst [vmem:[#allocation90_spill] sm:$0xff] %v9734_v5 }
 0x388   :  { %v9738_v31 = vpop.permute.xlu0 %1864 }
 0x389   :  { %2114 = vrot.lane.b32.xlu0 %v8160_v54, %s6903_s12  ;;  %15950 = vst [vmem:[#allocation57_spill] sm:$0xff] %v9738_v31 }
 0x38a   :  { %2116 = vrot.lane.b32.xlu1 %v15675_v34, %s6903_s12  ;;  %v9742_v32 = vpop.permute.xlu1 %1899 }
 0x38c   :  { %v9746_v9 = vpop.permute.xlu0 %1901 }
 0x38d   :  { %2118 = vrot.lane.b32.xlu0 %v15685_v12, %s6903_s12 }
 0x38e   :  { %2120 = vrot.lane.b32.xlu1 %v15689_v41, %s6903_s12  ;;  %v9750_v29 = vpop.permute.xlu1 %1903 }
 0x38f   :  { %15951 = vst [vmem:[#allocation166_spill] sm:$0xff] %v9750_v29 }
 0x390   :  { %v9754_v49 = vpop.permute.xlu0 %1905 }
 0x391   :  { %2122 = vrot.lane.b32.xlu0 %v15873_v59, %s6903_s12  ;;  %15952 = vst [vmem:[#allocation66_spill] sm:$0xff] %v9754_v49 }
 0x392   :  { %2156 = vrot.lane.b32.xlu1 %v15875_v10, %s6915_s24  ;;  %v9758_v23 = vpop.permute.xlu1 %1907 }
 0x393   :  { %15953 = vst [vmem:[#allocation168_spill] sm:$0xff] %v9758_v23 }
 0x394   :  { %v9762_v19 = vpop.permute.xlu0 %1909 }
 0x395   :  { %2158 = vrot.lane.b32.xlu0 %v15877_v24, %s6915_s24  ;;  %15954 = vst [vmem:[#allocation170_spill] sm:$0xff] %v9762_v19 }
 0x396   :  { %2160 = vrot.lane.b32.xlu1 %v15879_v58, %s6915_s24  ;;  %v9766_v20 = vpop.permute.xlu1 %1911 }
 0x397   :  { %15955 = vst [vmem:[#allocation172_spill] sm:$0xff] %v9766_v20 }
 0x398   :  { %v9770_v8 = vpop.permute.xlu0 %1913 }
 0x399   :  { %2162 = vrot.lane.b32.xlu0 %v15881_v40, %s6915_s24  ;;  %15956 = vst [vmem:[#allocation50_spill] sm:$0xff] %v9770_v8 }
 0x39a   :  { %2164 = vrot.lane.b32.xlu1 %v15883_v61, %s6915_s24  ;;  %v9774_v14 = vpop.permute.xlu1 %1915 }
 0x39b   :  { %15957 = vst [vmem:[#allocation174_spill] sm:$0xff] %v9774_v14 }
 0x39c   :  { %v9778_v46 = vpop.permute.xlu0 %1917 }
 0x39d   :  { %2166 = vrot.lane.b32.xlu0 %v15885_v25, %s6915_s24  ;;  %15958 = vst [vmem:[#allocation176_spill] sm:$0xff] %v9778_v46 }
 0x39e   :  { %2168 = vrot.lane.b32.xlu1 %v15887_v62, %s6915_s24  ;;  %v9782_v18 = vpop.permute.xlu1 %1919 }
 0x39f   :  { %15959 = vst [vmem:[#allocation42_spill] sm:$0xff] %v9782_v18 }
 0x3a0   :  { %v9786_v42 = vpop.permute.xlu0 %1921 }
 0x3a1   :  { %2170 = vrot.lane.b32.xlu0 %v15868_v3, %s6915_s24  ;;  %15960 = vst [vmem:[#allocation46_spill] sm:$0xff] %v9786_v42 }
 0x3a2   :  { %2172 = vrot.lane.b32.xlu1 %v15869_v51, %s6915_s24  ;;  %v9790_v48 = vpop.permute.xlu1 %1923 }
 0x3a3   :  { %15961 = vst [vmem:[#allocation63_spill] sm:$0xff] %v9790_v48 }
 0x3a4   :  { %v9794_v14 = vpop.permute.xlu0 %1925 }
 0x3a5   :  { %2174 = vrot.lane.b32.xlu0 %v15870_v37, %s6915_s24  ;;  %15962 = vst [vmem:[#allocation48_spill] sm:$0xff] %v9794_v14 }
 0x3a6   :  { %2176 = vrot.lane.b32.xlu1 %v15871_v26, %s6915_s24  ;;  %v9798_v46 = vpop.permute.xlu1 %1927 }
 0x3a7   :  { %15963 = vst [vmem:[#allocation78_spill] sm:$0xff] %v9798_v46 }
 0x3a8   :  { %v9802_v18 = vpop.permute.xlu0 %1929 }
 0x3a9   :  { %2178 = vrot.lane.b32.xlu0 %v8160_v54, %s6915_s24  ;;  %15964 = vst [vmem:[#allocation40_spill] sm:$0xff] %v9802_v18 }
 0x3aa   :  { %2180 = vrot.lane.b32.xlu1 %v15675_v34, %s6915_s24  ;;  %v9806_v42 = vpop.permute.xlu1 %1964 }
 0x3ac   :  { %v9810_v48 = vpop.permute.xlu0 %1966 }
 0x3ad   :  { %2182 = vrot.lane.b32.xlu0 %v15685_v12, %s6915_s24 }
 0x3ae   :  { %2184 = vrot.lane.b32.xlu1 %v15689_v41, %s6915_s24  ;;  %v9814_v14 = vpop.permute.xlu1 %1968 }
 0x3af   :  { %15965 = vst [vmem:[#allocation43_spill] sm:$0xff] %v9814_v14 }
 0x3b0   :  { %v9818_v47 = vpop.permute.xlu0 %1970 }
 0x3b1   :  { %2186 = vrot.lane.b32.xlu0 %v15873_v59, %s6915_s24  ;;  %15966 = vst [vmem:[#allocation79_spill] sm:$0xff] %v9818_v47 }
 0x3b2   :  { %2221 = vrot.lane.b32.xlu1 %v15875_v10, %s6916_s3  ;;  %v9822_v53 = vpop.permute.xlu1 %1972 }
 0x3b3   :  { %15967 = vst [vmem:[#allocation49_spill] sm:$0xff] %v9822_v53 }
 0x3b4   :  { %v9826_v1 = vpop.permute.xlu0 %1974 }
 0x3b5   :  { %2223 = vrot.lane.b32.xlu0 %v15877_v24, %s6916_s3  ;;  %15968 = vst [vmem:[#allocation178_spill] sm:$0xff] %v9826_v1 }
 0x3b6   :  { %2225 = vrot.lane.b32.xlu1 %v15879_v58, %s6916_s3  ;;  %v9830_v28 = vpop.permute.xlu1 %1976 }
 0x3b7   :  { %15969 = vst [vmem:[#allocation69_spill] sm:$0xff] %v9830_v28 }
 0x3b8   :  { %v9834_v23 = vpop.permute.xlu0 %1978 }
 0x3b9   :  { %2227 = vrot.lane.b32.xlu0 %v15881_v40, %s6916_s3  ;;  %15970 = vst [vmem:[#allocation180_spill] sm:$0xff] %v9834_v23 }
 0x3ba   :  { %2229 = vrot.lane.b32.xlu1 %v15883_v61, %s6916_s3  ;;  %v9838_v20 = vpop.permute.xlu1 %1980 }
 0x3bb   :  { %15971 = vst [vmem:[#allocation45_spill] sm:$0xff] %v9838_v20 }
 0x3bc   :  { %v9842_v19 = vpop.permute.xlu0 %1982 }
 0x3bd   :  { %2231 = vrot.lane.b32.xlu0 %v15885_v25, %s6916_s3  ;;  %15972 = vst [vmem:[#allocation47_spill] sm:$0xff] %v9842_v19 }
 0x3be   :  { %2233 = vrot.lane.b32.xlu1 %v15887_v62, %s6916_s3  ;;  %v9846_v8 = vpop.permute.xlu1 %1984 }
 0x3bf   :  { %15973 = vst [vmem:[#allocation89_spill] sm:$0xff] %v9846_v8 }
 0x3c0   :  { %v9850_v53 = vpop.permute.xlu0 %1986 }
 0x3c1   :  { %2235 = vrot.lane.b32.xlu0 %v15868_v3, %s6916_s3  ;;  %15974 = vst [vmem:[#allocation27_spill] sm:$0xff] %v9850_v53 }
 0x3c2   :  { %2237 = vrot.lane.b32.xlu1 %v15869_v51, %s6916_s3  ;;  %v9854_v28 = vpop.permute.xlu1 %1988 }
 0x3c3   :  { %15975 = vst [vmem:[#allocation44_spill] sm:$0xff] %v9854_v28 }
 0x3c4   :  { %v9858_v20 = vpop.permute.xlu0 %1990 }
 0x3c5   :  { %2239 = vrot.lane.b32.xlu0 %v15870_v37, %s6916_s3  ;;  %15976 = vst [vmem:[#allocation53_spill] sm:$0xff] %v9858_v20 }
 0x3c6   :  { %2241 = vrot.lane.b32.xlu1 %v15871_v26, %s6916_s3  ;;  %v9862_v19 = vpop.permute.xlu1 %1992 }
 0x3c7   :  { %15977 = vst [vmem:[#allocation65_spill] sm:$0xff] %v9862_v19 }
 0x3c8   :  { %v9866_v8 = vpop.permute.xlu0 %1994 }
 0x3c9   :  { %2243 = vrot.lane.b32.xlu0 %v8160_v54, %s6916_s3  ;;  %15978 = vst [vmem:[#allocation37_spill] sm:$0xff] %v9866_v8 }
 0x3ca   :  { %2245 = vrot.lane.b32.xlu1 %v15675_v34, %s6916_s3  ;;  %v2029_v53 = vpop.permute.xlu1 %2028 }
 0x3cc   :  { %v2031_v28 = vpop.permute.xlu0 %2030 }
 0x3cd   :  { %2247 = vrot.lane.b32.xlu0 %v15685_v12, %s6916_s3 }
 0x3ce   :  { %2249 = vrot.lane.b32.xlu1 %v15689_v41, %s6916_s3  ;;  %v9874_v20 = vpop.permute.xlu1 %2032 }
 0x3cf   :  { %15979 = vst [vmem:[#allocation84_spill] sm:$0xff] %v9874_v20 }
 0x3d0   :  { %v9878_v1 = vpop.permute.xlu0 %2034 }
 0x3d1   :  { %2251 = vrot.lane.b32.xlu0 %v15873_v59, %s6916_s3  ;;  %15980 = vst [vmem:[#allocation86_spill] sm:$0xff] %v9878_v1  ;;  %v2073_v23 = vsel %vm877_vm3, %v2031_v28, %v9878_v1 }
 0x3d2   :  { %2286 = vrot.lane.b32.xlu1 %v15875_v10, %s6904_s25  ;;  %3582 = vmatprep.subr.mxu0 %v2073_v23  ;;  %v9885_v63 = vpop.permute.xlu1 %2036 }
 0x3d3   :  { %15981 = vst [vmem:[#allocation81_spill] sm:$0xff] %v9885_v63 }
 0x3d4   :  { %v9889_v45 = vpop.permute.xlu0 %2038 }
 0x3d5   :  { %2288 = vrot.lane.b32.xlu0 %v15877_v24, %s6904_s25  ;;  %15982 = vst [vmem:[#allocation93_spill] sm:$0xff] %v9889_v45 }
 0x3d6   :  { %2290 = vrot.lane.b32.xlu1 %v15879_v58, %s6904_s25  ;;  %v9893_v15 = vpop.permute.xlu1 %2040 }
 0x3d7   :  { %15983 = vst [vmem:[#allocation99_spill] sm:$0xff] %v9893_v15 }
 0x3d8   :  { %v9897_v50 = vpop.permute.xlu0 %2042 }
 0x3d9   :  { %2292 = vrot.lane.b32.xlu0 %v15881_v40, %s6904_s25  ;;  %15984 = vst [vmem:[#allocation100_spill] sm:$0xff] %v9897_v50 }
 0x3da   :  { %2294 = vrot.lane.b32.xlu1 %v15883_v61, %s6904_s25  ;;  %v9901_v23 = vpop.permute.xlu1 %2044 }
 0x3db   :  { %15985 = vst [vmem:[#allocation101_spill] sm:$0xff] %v9901_v23 }
 0x3dc   :  { %v9905_v63 = vpop.permute.xlu0 %2046 }
 0x3dd   :  { %2296 = vrot.lane.b32.xlu0 %v15885_v25, %s6904_s25  ;;  %15986 = vst [vmem:[#allocation94_spill] sm:$0xff] %v9905_v63 }
 0x3de   :  { %2298 = vrot.lane.b32.xlu1 %v15887_v62, %s6904_s25  ;;  %v9909_v1 = vpop.permute.xlu1 %2048 }
 0x3df   :  { %15987 = vst [vmem:[#allocation59_spill] sm:$0xff] %v9909_v1 }
 0x3e0   :  { %v9913_v15 = vpop.permute.xlu0 %2050 }
 0x3e1   :  { %2300 = vrot.lane.b32.xlu0 %v15868_v3, %s6904_s25  ;;  %15988 = vst [vmem:[#allocation70_spill] sm:$0xff] %v9913_v15 }
 0x3e2   :  { %2302 = vrot.lane.b32.xlu1 %v15869_v51, %s6904_s25  ;;  %v9917_v45 = vpop.permute.xlu1 %2052 }
 0x3e3   :  { %15989 = vst [vmem:[#allocation106_spill] sm:$0xff] %v9917_v45 }
 0x3e4   :  { %v9921_v23 = vpop.permute.xlu0 %2054 }
 0x3e5   :  { %2304 = vrot.lane.b32.xlu0 %v15870_v37, %s6904_s25  ;;  %15990 = vst [vmem:[#allocation121_spill] sm:$0xff] %v9921_v23  ;;  %v2072_v23 = vsel %vm877_vm3, %v2029_v53, %v9874_v20 }
 0x3e6   :  { %2306 = vrot.lane.b32.xlu1 %v15871_v26, %s6904_s25  ;;  %v9925_v63 = vpop.permute.xlu1 %2056 }
 0x3e7   :  { %15991 = vst [vmem:[#allocation95_spill] sm:$0xff] %v9925_v63  ;;  %v2074_v50 = vsel %vm877_vm3, %v9925_v63, %v2029_v53  ;;  %v2010_v53 = vsel %vm804_vm5, %v9862_v19, %v9806_v42 }
 0x3e8   :  { %v9929_v1 = vpop.permute.xlu0 %2058 }
 0x3e9   :  { %2308 = vrot.lane.b32.xlu0 %v8160_v54, %s6904_s25  ;;  %15992 = vst [vmem:[#allocation108_spill] sm:$0xff] %v9929_v1  ;;  %v2075_v45 = vsel %vm877_vm3, %v9929_v1, %v2031_v28  ;;  %v2011_v28 = vsel %vm804_vm5, %v9866_v8, %v9810_v48 }
 0x3ea   :  { %2310 = vrot.lane.b32.xlu1 %v15675_v34, %s6904_s25  ;;  %3583 = vmatpush1.msra.mxu0 %v2075_v45  ;;  %v9936_v15 = vpop.permute.xlu1 %2092  ;;  %v2009_v45 = vsel %vm804_vm5, %v9810_v48, %v9818_v47 }
 0x3eb   :  { %3584 = vmatprep.subr.mxu0 %v2072_v23 }
 0x3ec   :  { %3585 = vmatpush1.msra.mxu0 %v2074_v50  ;;  %v2008_v50 = vsel %vm804_vm5, %v9806_v42, %v9814_v14 }
 0x3ed   :  { %2312 = vrot.lane.b32.xlu0 %v15685_v12, %s6904_s25  ;;  %v9946_v12 = vpop.permute.xlu0 %2094  ;;  %3586 = vmatprep.subr.mxu0 %v2009_v45  ;;  %v1945_v45 = vsel %vm1931_vm10, %v9746_v9, %v9754_v49 }
 0x3ee   :  { %2314 = vrot.lane.b32.xlu1 %v15689_v41, %s6904_s25  ;;  %3587 = vmatpush1.msra.mxu0 %v2011_v28  ;;  %v9958_v23 = vpop.permute.xlu1 %2096  ;;  %v1947_v28 = vsel %vm1931_vm10, %v9802_v18, %v9746_v9 }
 0x3ef   :  { %15993 = vst [vmem:[#allocation122_spill] sm:$0xff] %v9958_v23  ;;  %3588 = vmatprep.subr.mxu0 %v2008_v50  ;;  %v1944_v50 = vsel %vm1931_vm10, %v9742_v32, %v9750_v29 }
 0x3f0   :  { %3589 = vmatpush1.msra.mxu0 %v2010_v53  ;;  %v1946_v53 = vsel %vm1931_vm10, %v9798_v46, %v9742_v32 }
 0x3f1   :  { %2316 = vrot.lane.b32.xlu0 %v15873_v59, %s6904_s25  ;;  %v9971_v48 = vpop.permute.xlu0 %2098  ;;  %3590 = vmatprep.subr.mxu0 %v1945_v45  ;;  %v1880_v45 = vsel %vm1866_vm11, %v9682_v44, %v9690_v57 }
 0x3f2   :  { %2366 = vrot.lane.b32.xlu1 %v15875_v10, %s6905_s26  ;;  %15994 = vst [vmem:[#allocation98_spill] sm:$0xff] %v9971_v48  ;;  %3591 = vmatpush1.msra.mxu0 %v1947_v28  ;;  %v9983_v42 = vpop.permute.xlu1 %2100  ;;  %v1882_v28 = vsel %vm1866_vm11, %v9738_v31, %v9682_v44 }
 0x3f3   :  { %15995 = vst [vmem:[#allocation104_spill] sm:$0xff] %v9983_v42  ;;  %3592 = vmatprep.subr.mxu0 %v1944_v50  ;;  %v1879_v50 = vsel %vm1866_vm11, %v9678_v38, %v9686_v30 }
 0x3f4   :  { %3593 = vmatpush1.msra.mxu0 %v1946_v53  ;;  %v1881_v53 = vsel %vm1866_vm11, %v9734_v5, %v9678_v38 }
 0x3f5   :  { %2368 = vrot.lane.b32.xlu0 %v15877_v24, %s6905_s26  ;;  %v9996_v9 = vpop.permute.xlu0 %2102  ;;  %3594 = vmatprep.subr.mxu0 %v1880_v45  ;;  %v1815_v45 = vsel %vm1801_vm12, %v9618_v39, %v9626_v35 }
 0x3f6   :  { %2370 = vrot.lane.b32.xlu1 %v15879_v58, %s6905_s26  ;;  %15996 = vst [vmem:[#allocation109_spill] sm:$0xff] %v9996_v9  ;;  %3595 = vmatpush1.msra.mxu0 %v1882_v28  ;;  %v10008_v32 = vpop.permute.xlu1 %2104  ;;  %v1817_v28 = vsel %vm1801_vm12, %v9674_v6, %v9618_v39 }
 0x3f7   :  { %15997 = vst [vmem:[#allocation107_spill] sm:$0xff] %v10008_v32  ;;  %3596 = vmatprep.subr.mxu0 %v1879_v50  ;;  %v1814_v50 = vsel %vm1801_vm12, %v9614_v55, %v9622_v0 }
 0x3f8   :  { %3597 = vmatpush1.msra.mxu0 %v1881_v53  ;;  %v1816_v53 = vsel %vm1801_vm12, %v9670_v27, %v9614_v55 }
 0x3f9   :  { %2372 = vrot.lane.b32.xlu0 %v15881_v40, %s6905_s26  ;;  %v10021_v44 = vpop.permute.xlu0 %2106  ;;  %3598 = vmatprep.subr.mxu0 %v1815_v45  ;;  %v1750_v45 = vsel %vm15311_vm13, %v9554_v17, %v9562_v56 }
 0x3fa   :  { %2374 = vrot.lane.b32.xlu1 %v15883_v61, %s6905_s26  ;;  %15998 = vst [vmem:[#allocation124_spill] sm:$0xff] %v10021_v44  ;;  %3599 = vmatpush1.msra.mxu0 %v1817_v28  ;;  %v10033_v38 = vpop.permute.xlu1 %2108  ;;  %v1752_v28 = vsel %vm15311_vm13, %v9610_v4, %v9554_v17 }
 0x3fb   :  { %15999 = vst [vmem:[#allocation130_spill] sm:$0xff] %v10033_v38  ;;  %3600 = vmatprep.subr.mxu0 %v1814_v50  ;;  %v1749_v50 = vsel %vm15311_vm13, %v9550_v21, %v9558_v43 }
 0x3fc   :  { %3601 = vmatpush1.msra.mxu0 %v1816_v53  ;;  %v1751_v53 = vsel %vm15311_vm13, %v9606_v11, %v9550_v21 }
 0x3fd   :  { %2376 = vrot.lane.b32.xlu0 %v15885_v25, %s6905_s26  ;;  %v10046_v39 = vpop.permute.xlu0 %2110  ;;  %3602 = vmatprep.subr.mxu0 %v1750_v45  ;;  %v1685_v45 = vsel %vm15309_vm14, %v9490_v16, %v9498_v52 }
 0x3fe   :  { %2378 = vrot.lane.b32.xlu1 %v15887_v62, %s6905_s26  ;;  %16000 = vst [vmem:[#allocation67_spill] sm:$0xff] %v10046_v39  ;;  %3603 = vmatpush1.msra.mxu0 %v1752_v28  ;;  %v10058_v55 = vpop.permute.xlu1 %2112  ;;  %v1687_v28 = vsel %vm15309_vm14, %v9546_v36, %v9490_v16 }
 0x3ff   :  { %16001 = vst [vmem:[#allocation38_spill] sm:$0xff] %v10058_v55  ;;  %3604 = vmatprep.subr.mxu0 %v1749_v50  ;;  %v1684_v50 = vsel %vm15309_vm14, %v9486_v2, %v9494_v22 }
 0x400   :  { %3605 = vmatpush1.msra.mxu0 %v1751_v53  ;;  %v1686_v53 = vsel %vm15309_vm14, %v9542_v13, %v9486_v2  ;;  %v16009_v13 = vld [vmem:[#allocation142_spill] sm:$0xff] }
 0x401   :  { %2380 = vrot.lane.b32.xlu0 %v15868_v3, %s6905_s26  ;;  %v10071_v17 = vpop.permute.xlu0 %2114  ;;  %3606 = vmatprep.subr.mxu0 %v1685_v45  ;;  %v1620_v45 = vsel %vm15310_vm15, %v9426_v7, %v9434_v60 }
 0x402   :  { %2382 = vrot.lane.b32.xlu1 %v15869_v51, %s6905_s26  ;;  %16002 = vst [vmem:[#allocation41_spill] sm:$0xff] %v10071_v17  ;;  %3607 = vmatpush1.msra.mxu0 %v1687_v28  ;;  %v10083_v21 = vpop.permute.xlu1 %2116  ;;  %v16005_v28 = vld [vmem:[#allocation15_spill] sm:$0xff] }
 0x403   :  { %16003 = vst [vmem:[#allocation68_spill] sm:$0xff] %v10083_v21  ;;  %3608 = vmatprep.subr.mxu0 %v1684_v50  ;;  %v1622_v50 = vsel %vm15310_vm15, %v16005_v28, %v9426_v7  ;;  %v16007_v21 = vld [vmem:[#allocation133_spill] sm:$0xff] }
 0x404   :  { %3609 = vmatpush1.msra.mxu0 %v1686_v53  ;;  %v16011_v7 = vld [vmem:[#allocation193_spill] sm:$0xff] }
 0x405   :  { %2384 = vrot.lane.b32.xlu0 %v15870_v37, %s6905_s26  ;;  %v10096_v16 = vpop.permute.xlu0 %2118  ;;  %3610 = vmatprep.subr.mxu0 %v1620_v45 }
 0x406   :  { %2386 = vrot.lane.b32.xlu1 %v15871_v26, %s6905_s26  ;;  %16004 = vst [vmem:[#allocation73_spill] sm:$0xff] %v10096_v16  ;;  %3611 = vmatpush1.msra.mxu0 %v1622_v50  ;;  %v10108_v2 = vpop.permute.xlu1 %2120  ;;  %v16008_v16 = vld [vmem:[#allocation132_spill] sm:$0xff] }
 0x407   :  { %16006 = vst [vmem:[#allocation110_spill] sm:$0xff] %v10108_v2  ;;  %v1619_v53 = vsel %vm15310_vm15, %v16008_v16, %v16007_v21  ;;  %v1621_v45 = vsel %vm15310_vm15, %v16009_v13, %v16008_v16 }
 0x408   :  { %3612 = vmatprep.subr.mxu0 %v1619_v53 }
 0x409   :  { %2388 = vrot.lane.b32.xlu0 %v8160_v54, %s6905_s26  ;;  %v10120_v36 = vpop.permute.xlu0 %2122  ;;  %3613 = vmatpush1.msra.mxu0 %v1621_v45 }
 0x40a   :  { %2390 = vrot.lane.b32.xlu1 %v15675_v34, %s6905_s26  ;;  %16010 = vst [vmem:[#allocation117_spill] sm:$0xff] %v10120_v36  ;;  %v10124_v50 = vpop.permute.xlu1 %2156 }
 0x40d   :  { %2392 = vrot.lane.b32.xlu0 %v16011_v7, %s6905_s26  ;;  %v10128_v28 = vpop.permute.xlu0 %2158 }
 0x40e   :  { %2394 = vrot.lane.b32.xlu1 %v15689_v41, %s6905_s26  ;;  %v10132_v53 = vpop.permute.xlu1 %2160 }
 0x40f   :  { %16012 = vst [vmem:[#allocation74_spill] sm:$0xff] %v10132_v53 }
 0x411   :  { %2396 = vrot.lane.b32.xlu0 %v15873_v59, %s6905_s26  ;;  %v10136_v16 = vpop.permute.xlu0 %2162 }
 0x412   :  { %2430 = vrot.lane.b32.xlu1 %v15875_v10, %s6917_s14  ;;  %16013 = vst [vmem:[#allocation111_spill] sm:$0xff] %v10136_v16  ;;  %v10140_v45 = vpop.permute.xlu1 %2164 }
 0x413   :  { %16014 = vst [vmem:[#allocation118_spill] sm:$0xff] %v10140_v45 }
 0x415   :  { %2432 = vrot.lane.b32.xlu0 %v15877_v24, %s6917_s14  ;;  %v10144_v13 = vpop.permute.xlu0 %2166 }
 0x416   :  { %2434 = vrot.lane.b32.xlu1 %v15879_v58, %s6917_s14  ;;  %16015 = vst [vmem:[#allocation75_spill] sm:$0xff] %v10144_v13  ;;  %v10148_v11 = vpop.permute.xlu1 %2168 }
 0x417   :  { %16016 = vst [vmem:[#allocation92_spill] sm:$0xff] %v10148_v11 }
 0x419   :  { %2436 = vrot.lane.b32.xlu0 %v15881_v40, %s6917_s14  ;;  %v10152_v4 = vpop.permute.xlu0 %2170 }
 0x41a   :  { %2438 = vrot.lane.b32.xlu1 %v15883_v61, %s6917_s14  ;;  %16017 = vst [vmem:[#allocation112_spill] sm:$0xff] %v10152_v4  ;;  %v10156_v27 = vpop.permute.xlu1 %2172 }
 0x41b   :  { %16018 = vst [vmem:[#allocation113_spill] sm:$0xff] %v10156_v27 }
 0x41d   :  { %2440 = vrot.lane.b32.xlu0 %v15885_v25, %s6917_s14  ;;  %v10160_v6 = vpop.permute.xlu0 %2174 }
 0x41e   :  { %2442 = vrot.lane.b32.xlu1 %v15887_v62, %s6917_s14  ;;  %16019 = vst [vmem:[#allocation119_spill] sm:$0xff] %v10160_v6  ;;  %v10164_v5 = vpop.permute.xlu1 %2176 }
 0x41f   :  { %16020 = vst [vmem:[#allocation120_spill] sm:$0xff] %v10164_v5 }
 0x421   :  { %2444 = vrot.lane.b32.xlu0 %v15868_v3, %s6917_s14  ;;  %v10168_v31 = vpop.permute.xlu0 %2178 }
 0x422   :  { %2446 = vrot.lane.b32.xlu1 %v15869_v51, %s6917_s14  ;;  %16021 = vst [vmem:[#allocation114_spill] sm:$0xff] %v10168_v31  ;;  %v10172_v46 = vpop.permute.xlu1 %2180 }
 0x423   :  { %16022 = vst [vmem:[#allocation102_spill] sm:$0xff] %v10172_v46 }
 0x425   :  { %2448 = vrot.lane.b32.xlu0 %v15870_v37, %s6917_s14  ;;  %v10176_v18 = vpop.permute.xlu0 %2182 }
 0x426   :  { %2450 = vrot.lane.b32.xlu1 %v15871_v26, %s6917_s14  ;;  %16023 = vst [vmem:[#allocation115_spill] sm:$0xff] %v10176_v18  ;;  %v10180_v38 = vpop.permute.xlu1 %2184 }
 0x427   :  { %16024 = vst [vmem:[#allocation103_spill] sm:$0xff] %v10180_v38 }
 0x429   :  { %2452 = vrot.lane.b32.xlu0 %v8160_v54, %s6917_s14  ;;  %v10184_v55 = vpop.permute.xlu0 %2186 }
 0x42a   :  { %2454 = vrot.lane.b32.xlu1 %v15675_v34, %s6917_s14  ;;  %16025 = vst [vmem:[#allocation116_spill] sm:$0xff] %v10184_v55  ;;  %v10188_v19 = vpop.permute.xlu1 %2221 }
 0x42d   :  { %2456 = vrot.lane.b32.xlu0 %v16011_v7, %s6917_s14  ;;  %v10192_v46 = vpop.permute.xlu0 %2223 }
 0x42e   :  { %2458 = vrot.lane.b32.xlu1 %v15689_v41, %s6917_s14  ;;  %v10196_v18 = vpop.permute.xlu1 %2225 }
 0x431   :  { %2460 = vrot.lane.b32.xlu0 %v15873_v59, %s6917_s14  ;;  %v10200_v8 = vpop.permute.xlu0 %2227 }
 0x432   :  { %2495 = vrot.lane.b32.xlu1 %v15875_v10, %s6918_s2  ;;  %v10204_v39 = vpop.permute.xlu1 %2229 }
 0x433   :  { %16026 = vst [vmem:[#allocation105_spill] sm:$0xff] %v10204_v39 }
 0x435   :  { %2497 = vrot.lane.b32.xlu0 %v15877_v24, %s6918_s2  ;;  %v10208_v17 = vpop.permute.xlu0 %2231 }
 0x436   :  { %2499 = vrot.lane.b32.xlu1 %v15879_v58, %s6918_s2  ;;  %16027 = vst [vmem:[#allocation97_spill] sm:$0xff] %v10208_v17  ;;  %v10212_v63 = vpop.permute.xlu1 %2233 }
 0x437   :  { %16028 = vst [vmem:[#allocation96_spill] sm:$0xff] %v10212_v63 }
 0x439   :  { %2501 = vrot.lane.b32.xlu0 %v15881_v40, %s6918_s2  ;;  %v10216_v27 = vpop.permute.xlu0 %2235 }
 0x43a   :  { %2503 = vrot.lane.b32.xlu1 %v15883_v61, %s6918_s2  ;;  %16029 = vst [vmem:[#allocation123_spill] sm:$0xff] %v10216_v27  ;;  %v10220_v5 = vpop.permute.xlu1 %2237 }
 0x43b   :  { %16030 = vst [vmem:[#allocation131_spill] sm:$0xff] %v10220_v5 }
 0x43d   :  { %2505 = vrot.lane.b32.xlu0 %v15885_v25, %s6918_s2  ;;  %v10224_v1 = vpop.permute.xlu0 %2239 }
 0x43e   :  { %2507 = vrot.lane.b32.xlu1 %v15887_v62, %s6918_s2  ;;  %16031 = vst [vmem:[#allocation64_spill] sm:$0xff] %v10224_v1  ;;  %v10228_v6 = vpop.permute.xlu1 %2241 }
 0x43f   :  { %16032 = vst [vmem:[#allocation125_spill] sm:$0xff] %v10228_v6 }
 0x441   :  { %2509 = vrot.lane.b32.xlu0 %v15868_v3, %s6918_s2  ;;  %v10232_v31 = vpop.permute.xlu0 %2243 }
 0x442   :  { %2511 = vrot.lane.b32.xlu1 %v15869_v51, %s6918_s2  ;;  %16033 = vst [vmem:[#allocation61_spill] sm:$0xff] %v10232_v31  ;;  %v10236_v42 = vpop.permute.xlu1 %2245 }
 0x443   :  { %16034 = vst [vmem:[#allocation181_spill] sm:$0xff] %v10236_v42 }
 0x445   :  { %2513 = vrot.lane.b32.xlu0 %v15870_v37, %s6918_s2  ;;  %v10240_v5 = vpop.permute.xlu0 %2247 }
 0x446   :  { %2515 = vrot.lane.b32.xlu1 %v15871_v26, %s6918_s2  ;;  %16035 = vst [vmem:[#allocation167_spill] sm:$0xff] %v10240_v5  ;;  %v10244_v1 = vpop.permute.xlu1 %2249 }
 0x447   :  { %16036 = vst [vmem:[#allocation169_spill] sm:$0xff] %v10244_v1 }
 0x449   :  { %2517 = vrot.lane.b32.xlu0 %v8160_v54, %s6918_s2  ;;  %v10248_v6 = vpop.permute.xlu0 %2251 }
 0x44a   :  { %2519 = vrot.lane.b32.xlu1 %v15675_v34, %s6918_s2  ;;  %16037 = vst [vmem:[#allocation171_spill] sm:$0xff] %v10248_v6  ;;  %v10252_v31 = vpop.permute.xlu1 %2286 }
 0x44d   :  { %2521 = vrot.lane.b32.xlu0 %v16011_v7, %s6918_s2  ;;  %v10256_v42 = vpop.permute.xlu0 %2288 }
 0x44e   :  { %2523 = vrot.lane.b32.xlu1 %v15689_v41, %s6918_s2  ;;  %v10260_v5 = vpop.permute.xlu1 %2290 }
 0x451   :  { %2525 = vrot.lane.b32.xlu0 %v15873_v59, %s6918_s2  ;;  %v10264_v32 = vpop.permute.xlu0 %2292 }
 0x452   :  { %2560 = vrot.lane.b32.xlu1 %v15875_v10, %s6906_s27  ;;  %v10268_v9 = vpop.permute.xlu1 %2294 }
 0x453   :  { %16038 = vst [vmem:[#allocation173_spill] sm:$0xff] %v10268_v9 }
 0x455   :  { %2562 = vrot.lane.b32.xlu0 %v15877_v24, %s6906_s27  ;;  %v10272_v44 = vpop.permute.xlu0 %2296 }
 0x456   :  { %2564 = vrot.lane.b32.xlu1 %v15879_v58, %s6906_s27  ;;  %16039 = vst [vmem:[#allocation175_spill] sm:$0xff] %v10272_v44  ;;  %v10276_v45 = vpop.permute.xlu1 %2298 }
 0x457   :  { %16040 = vst [vmem:[#allocation177_spill] sm:$0xff] %v10276_v45 }
 0x459   :  { %2566 = vrot.lane.b32.xlu0 %v15881_v40, %s6906_s27  ;;  %v10280_v11 = vpop.permute.xlu0 %2300 }
 0x45a   :  { %2568 = vrot.lane.b32.xlu1 %v15883_v61, %s6906_s27  ;;  %16041 = vst [vmem:[#allocation179_spill] sm:$0xff] %v10280_v11  ;;  %v10284_v13 = vpop.permute.xlu1 %2302 }
 0x45b   :  { %16042 = vst [vmem:[#allocation132_spill] sm:$0xff] %v10284_v13 }
 0x45d   :  { %2570 = vrot.lane.b32.xlu0 %v15885_v25, %s6906_s27  ;;  %v10288_v4 = vpop.permute.xlu0 %2304 }
 0x45e   :  { %2572 = vrot.lane.b32.xlu1 %v15887_v62, %s6906_s27  ;;  %16043 = vst [vmem:[#allocation194_spill] sm:$0xff] %v10288_v4  ;;  %v10292_v39 = vpop.permute.xlu1 %2306 }
 0x45f   :  { %16044 = vst [vmem:[#allocation195_spill] sm:$0xff] %v10292_v39 }
 0x461   :  { %2574 = vrot.lane.b32.xlu0 %v15868_v3, %s6906_s27  ;;  %v10296_v63 = vpop.permute.xlu0 %2308 }
 0x462   :  { %2576 = vrot.lane.b32.xlu1 %v15869_v51, %s6906_s27  ;;  %16045 = vst [vmem:[#allocation196_spill] sm:$0xff] %v10296_v63  ;;  %v10300_v17 = vpop.permute.xlu1 %2310 }
 0x463   :  { %16046 = vst [vmem:[#allocation197_spill] sm:$0xff] %v10300_v17 }
 0x465   :  { %2578 = vrot.lane.b32.xlu0 %v15870_v37, %s6906_s27  ;;  %v10304_v13 = vpop.permute.xlu0 %2312 }
 0x466   :  { %2580 = vrot.lane.b32.xlu1 %v15871_v26, %s6906_s27  ;;  %16047 = vst [vmem:[#allocation198_spill] sm:$0xff] %v10304_v13  ;;  %v10308_v4 = vpop.permute.xlu1 %2314 }
 0x467   :  { %16048 = vst [vmem:[#allocation199_spill] sm:$0xff] %v10308_v4 }
 0x469   :  { %2582 = vrot.lane.b32.xlu0 %v8160_v54, %s6906_s27  ;;  %v10312_v39 = vpop.permute.xlu0 %2316 }
 0x46a   :  { %2584 = vrot.lane.b32.xlu1 %v15675_v34, %s6906_s27  ;;  %16049 = vst [vmem:[#allocation200_spill] sm:$0xff] %v10312_v39  ;;  %v10316_v63 = vpop.permute.xlu1 %2366 }
 0x46b   :  { %16050 = vst [vmem:[#allocation201_spill] sm:$0xff] %v10316_v63 }
 0x46d   :  { %2586 = vrot.lane.b32.xlu0 %v16011_v7, %s6906_s27  ;;  %v10320_v17 = vpop.permute.xlu0 %2368 }
 0x46e   :  { %2588 = vrot.lane.b32.xlu1 %v15689_v41, %s6906_s27  ;;  %16051 = vst [vmem:[#allocation202_spill] sm:$0xff] %v10320_v17  ;;  %v10324_v13 = vpop.permute.xlu1 %2370 }
 0x471   :  { %2590 = vrot.lane.b32.xlu0 %v15873_v59, %s6906_s27  ;;  %v10328_v27 = vpop.permute.xlu0 %2372 }
 0x472   :  { %2624 = vrot.lane.b32.xlu1 %v15875_v10, %s6907_s28  ;;  %v10332_v9 = vpop.permute.xlu1 %2374 }
 0x475   :  { %2626 = vrot.lane.b32.xlu0 %v15877_v24, %s6907_s28  ;;  %v10336_v45 = vpop.permute.xlu0 %2376 }
 0x476   :  { %2628 = vrot.lane.b32.xlu1 %v15879_v58, %s6907_s28  ;;  %v10340_v44 = vpop.permute.xlu1 %2378 }
 0x477   :  { %16052 = vst [vmem:[#allocation203_spill] sm:$0xff] %v10340_v44 }
 0x479   :  { %2630 = vrot.lane.b32.xlu0 %v15881_v40, %s6907_s28  ;;  %v10344_v11 = vpop.permute.xlu0 %2380 }
 0x47a   :  { %2632 = vrot.lane.b32.xlu1 %v15883_v61, %s6907_s28  ;;  %16053 = vst [vmem:[#allocation204_spill] sm:$0xff] %v10344_v11  ;;  %v10348_v21 = vpop.permute.xlu1 %2382 }
 0x47b   :  { %16054 = vst [vmem:[#allocation205_spill] sm:$0xff] %v10348_v21 }
 0x47d   :  { %2634 = vrot.lane.b32.xlu0 %v15885_v25, %s6907_s28  ;;  %v10352_v60 = vpop.permute.xlu0 %2384 }
 0x47e   :  { %2636 = vrot.lane.b32.xlu1 %v15887_v62, %s6907_s28  ;;  %16055 = vst [vmem:[#allocation206_spill] sm:$0xff] %v10352_v60  ;;  %v10356_v22 = vpop.permute.xlu1 %2386 }
 0x47f   :  { %16056 = vst [vmem:[#allocation207_spill] sm:$0xff] %v10356_v22 }
 0x481   :  { %2638 = vrot.lane.b32.xlu0 %v15868_v3, %s6907_s28  ;;  %v10360_v44 = vpop.permute.xlu0 %2388 }
 0x482   :  { %2640 = vrot.lane.b32.xlu1 %v15869_v51, %s6907_s28  ;;  %16057 = vst [vmem:[#allocation208_spill] sm:$0xff] %v10360_v44  ;;  %v10364_v11 = vpop.permute.xlu1 %2390 }
 0x483   :  { %16058 = vst [vmem:[#allocation209_spill] sm:$0xff] %v10364_v11 }
 0x485   :  { %2642 = vrot.lane.b32.xlu0 %v15870_v37, %s6907_s28  ;;  %v10368_v21 = vpop.permute.xlu0 %2392 }
 0x486   :  { %2644 = vrot.lane.b32.xlu1 %v15871_v26, %s6907_s28  ;;  %16059 = vst [vmem:[#allocation210_spill] sm:$0xff] %v10368_v21  ;;  %v10372_v60 = vpop.permute.xlu1 %2394 }
 0x487   :  { %16060 = vst [vmem:[#allocation211_spill] sm:$0xff] %v10372_v60 }
 0x489   :  { %2646 = vrot.lane.b32.xlu0 %v8160_v54, %s6907_s28  ;;  %v10376_v22 = vpop.permute.xlu0 %2396 }
 0x48a   :  { %2648 = vrot.lane.b32.xlu1 %v15675_v34, %s6907_s28  ;;  %16061 = vst [vmem:[#allocation212_spill] sm:$0xff] %v10376_v22  ;;  %v10380_v44 = vpop.permute.xlu1 %2430 }
 0x48b   :  { %16062 = vst [vmem:[#allocation213_spill] sm:$0xff] %v10380_v44 }
 0x48d   :  { %2650 = vrot.lane.b32.xlu0 %v16011_v7, %s6907_s28  ;;  %v10384_v11 = vpop.permute.xlu0 %2432 }
 0x48e   :  { %2652 = vrot.lane.b32.xlu1 %v15689_v41, %s6907_s28  ;;  %16063 = vst [vmem:[#allocation214_spill] sm:$0xff] %v10384_v11  ;;  %v10388_v21 = vpop.permute.xlu1 %2434 }
 0x491   :  { %2654 = vrot.lane.b32.xlu0 %v15873_v59, %s6907_s28  ;;  %v2437_v60 = vpop.permute.xlu0 %2436 }
 0x492   :  { %3018 = vrot.lane.b32.xlu1 %v15881_v40, %s6919_s15  ;;  %v10394_v22 = vpop.permute.xlu1 %2438 }
 0x495   :  { %3022 = vrot.lane.b32.xlu0 %v15885_v25, %s6919_s15  ;;  %v10398_v52 = vpop.permute.xlu0 %2440 }
 0x496   :  { %3014 = vrot.lane.b32.xlu1 %v15877_v24, %s6919_s15  ;;  %v10402_v43 = vpop.permute.xlu1 %2442 }
 0x497   :  { %16064 = vst [vmem:[#allocation215_spill] sm:$0xff] %v10402_v43 }
 0x499   :  { %3016 = vrot.lane.b32.xlu0 %v15879_v58, %s6919_s15  ;;  %v10406_v56 = vpop.permute.xlu0 %2444 }
 0x49a   :  { %3020 = vrot.lane.b32.xlu1 %v15883_v61, %s6919_s15  ;;  %16065 = vst [vmem:[#allocation216_spill] sm:$0xff] %v10406_v56  ;;  %v10410_v0 = vpop.permute.xlu1 %2446 }
 0x49b   :  { %16066 = vst [vmem:[#allocation217_spill] sm:$0xff] %v10410_v0 }
 0x49d   :  { %3012 = vrot.lane.b32.xlu0 %v15875_v10, %s6919_s15  ;;  %v10414_v35 = vpop.permute.xlu0 %2448 }
 0x49e   :  { %2953 = vrot.lane.b32.xlu1 %v15881_v40, %s6920_s1  ;;  %16067 = vst [vmem:[#allocation218_spill] sm:$0xff] %v10414_v35  ;;  %v10418_v43 = vpop.permute.xlu1 %2450 }
 0x49f   :  { %16068 = vst [vmem:[#allocation219_spill] sm:$0xff] %v10418_v43 }
 0x4a1   :  { %2957 = vrot.lane.b32.xlu0 %v15885_v25, %s6920_s1  ;;  %v10422_v56 = vpop.permute.xlu0 %2452 }
 0x4a2   :  { %2949 = vrot.lane.b32.xlu1 %v15877_v24, %s6920_s1  ;;  %16069 = vst [vmem:[#allocation220_spill] sm:$0xff] %v10422_v56  ;;  %v10426_v0 = vpop.permute.xlu1 %2454 }
 0x4a3   :  { %16070 = vst [vmem:[#allocation221_spill] sm:$0xff] %v10426_v0 }
 0x4a5   :  { %2951 = vrot.lane.b32.xlu0 %v15879_v58, %s6920_s1  ;;  %v10430_v30 = vpop.permute.xlu0 %2456 }
 0x4a6   :  { %2955 = vrot.lane.b32.xlu1 %v15883_v61, %s6920_s1  ;;  %16071 = vst [vmem:[#allocation222_spill] sm:$0xff] %v10430_v30  ;;  %v10434_v35 = vpop.permute.xlu1 %2458 }
 0x4a7   :  { %16072 = vst [vmem:[#allocation223_spill] sm:$0xff] %v10434_v35 }
 0x4a9   :  { %2947 = vrot.lane.b32.xlu0 %v15875_v10, %s6920_s1  ;;  %v10438_v43 = vpop.permute.xlu0 %2460 }
 0x4aa   :  { %2888 = vrot.lane.b32.xlu1 %v15881_v40, %s6921_s16  ;;  %16073 = vst [vmem:[#allocation224_spill] sm:$0xff] %v10438_v43  ;;  %v10442_v0 = vpop.permute.xlu1 %2495 }
 0x4ab   :  { %16074 = vst [vmem:[#allocation225_spill] sm:$0xff] %v10442_v0 }
 0x4ad   :  { %2892 = vrot.lane.b32.xlu0 %v15885_v25, %s6921_s16  ;;  %v10446_v56 = vpop.permute.xlu0 %2497 }
 0x4ae   :  { %2884 = vrot.lane.b32.xlu1 %v15877_v24, %s6921_s16  ;;  %16075 = vst [vmem:[#allocation226_spill] sm:$0xff] %v10446_v56  ;;  %v2500_v35 = vpop.permute.xlu1 %2499 }
 0x4b1   :  { %2886 = vrot.lane.b32.xlu0 %v15879_v58, %s6921_s16  ;;  %v2502_v30 = vpop.permute.xlu0 %2501 }
 0x4b2   :  { %2890 = vrot.lane.b32.xlu1 %v15883_v61, %s6921_s16  ;;  %v10454_v43 = vpop.permute.xlu1 %2503  ;;  %v2541_v14 = vsel %vm15271_vm0, %v10446_v56, %v2502_v30 }
 0x4b3   :  { %v2538_v47 = vsel %vm15271_vm0, %v2500_v35, %v10454_v43 }
 0x4b5   :  { %2882 = vrot.lane.b32.xlu0 %v15875_v10, %s6921_s16  ;;  %v10458_v57 = vpop.permute.xlu0 %2505 }
 0x4b6   :  { %2823 = vrot.lane.b32.xlu1 %v15881_v40, %s6922_s17  ;;  %v2539_v29 = vsel %vm15271_vm0, %v2502_v30, %v10458_v57  ;;  %v10466_v49 = vpop.permute.xlu1 %2507 }
 0x4b7   :  { %3614 = vmatprep.subr.mxu0 %v2539_v29  ;;  %v2540_v29 = vsel %vm15271_vm0, %v10442_v0, %v2500_v35  ;;  %v2473_v35 = vsel %vm15266_vm1, %v10388_v21, %v10394_v22  ;;  %vm15312_vm0 = vcmp.lt.s32.totalorder %v8114_v33, 106 }
 0x4b8   :  { %3615 = vmatpush2.msra.mxu0 %v2541_v14  ;;  %v2474_v14 = vsel %vm15266_vm1, %v2437_v60, %v10398_v52 }
 0x4b9   :  { %2827 = vrot.lane.b32.xlu0 %v15885_v25, %s6922_s17  ;;  %v10476_v20 = vpop.permute.xlu0 %2509  ;;  %3616 = vmatprep.subr.mxu0 %v2538_v47  ;;  %v2476_v47 = vsel %vm15266_vm1, %v10384_v11, %v2437_v60  ;;  %v2409_v60 = vsel %vm15227_vm6, %v10328_v27, %v10336_v45 }
 0x4ba   :  { %2819 = vrot.lane.b32.xlu1 %v15877_v24, %s6922_s17  ;;  %3617 = vmatpush2.msra.mxu0 %v2540_v29  ;;  %v10487_v30 = vpop.permute.xlu1 %2511 }
 0x4bb   :  { %3618 = vmatprep.subr.mxu0 %v2474_v14  ;;  %v2475_v14 = vsel %vm15266_vm1, %v10380_v44, %v10388_v21  ;;  %v2408_v21 = vsel %vm15227_vm6, %v10324_v13, %v10332_v9  ;;  %vm2849_vm1 = vcmp.lt.s32.totalorder %v8114_v33, 90 }
 0x4bc   :  { %3619 = vmatpush2.msra.mxu0 %v2476_v47 }
 0x4bd   :  { %2821 = vrot.lane.b32.xlu0 %v15879_v58, %s6922_s17  ;;  %v10498_v29 = vpop.permute.xlu0 %2513  ;;  %3620 = vmatprep.subr.mxu0 %v2473_v35  ;;  %v2411_v35 = vsel %vm15227_vm6, %v10320_v17, %v10328_v27 }
 0x4be   :  { %2825 = vrot.lane.b32.xlu1 %v15883_v61, %s6922_s17  ;;  %3621 = vmatpush2.msra.mxu0 %v2475_v14  ;;  %v10510_v47 = vpop.permute.xlu1 %2515 }
 0x4bf   :  { %3622 = vmatprep.subr.mxu0 %v2409_v60  ;;  %16076 = vst [vmem:[#allocation227_spill] sm:$0xff] %v10510_v47  ;;  %v2410_v60 = vsel %vm15227_vm6, %v10316_v63, %v10324_v13  ;;  %v2331_v13 = vsel %vm15228_vm2, %v10256_v42, %v10264_v32  ;;  %v2330_v63 = vsel %vm15228_vm2, %v10252_v31, %v10260_v5  ;;  %vm15258_vm6 = vcmp.lt.s32.totalorder %v8114_v33, 2 }
 0x4c0   :  { %3623 = vmatpush2.msra.mxu0 %v2411_v35 }
 0x4c1   :  { %2817 = vrot.lane.b32.xlu0 %v15875_v10, %s6922_s17  ;;  %v10522_v14 = vpop.permute.xlu0 %2517  ;;  %3624 = vmatprep.subr.mxu0 %v2408_v21 }
 0x4c2   :  { %2758 = vrot.lane.b32.xlu1 %v15881_v40, %s6923_s10  ;;  %16077 = vst [vmem:[#allocation228_spill] sm:$0xff] %v10522_v14  ;;  %3625 = vmatpush2.msra.mxu0 %v2410_v60  ;;  %v10531_v27 = vpop.permute.xlu1 %2519  ;;  %v2333_v60 = vsel %vm15228_vm2, %v10312_v39, %v10256_v42  ;;  %v2267_v42 = vsel %vm15258_vm6, %v10192_v46, %v10200_v8 }
 0x4c3   :  { %3626 = vmatprep.subr.mxu0 %v15881_v40  ;;  %16078 = vst [vmem:[#allocation229_spill] sm:$0xff] %v10531_v27 }
 0x4c4   :  { %3627 = vmatpush2.msra.mxu0 %v15877_v24 }
 0x4c5   :  { %2762 = vrot.lane.b32.xlu0 %v15885_v25, %s6923_s10  ;;  %v10536_v35 = vpop.permute.xlu0 %2521  ;;  %3628 = vmatprep.subr.mxu0 %v15879_v58 }
 0x4c6   :  { %2754 = vrot.lane.b32.xlu1 %v15877_v24, %s6923_s10  ;;  %16079 = vst [vmem:[#allocation230_spill] sm:$0xff] %v10536_v35  ;;  %3629 = vmatpush2.msra.mxu0 %v15875_v10  ;;  %v10546_v21 = vpop.permute.xlu1 %2523 }
 0x4c7   :  { %3630 = vmatprep.subr.mxu0 %v2331_v13  ;;  %16080 = vst [vmem:[#allocation231_spill] sm:$0xff] %v10546_v21  ;;  %v2332_v13 = vsel %vm15228_vm2, %v10308_v4, %v10252_v31  ;;  %v2266_v31 = vsel %vm15258_vm6, %v10188_v19, %v10196_v18  ;;  %vm15249_vm2 = vcmp.lt.s32.totalorder %v8114_v33, 18 }
 0x4c8   :  { %3631 = vmatpush2.msra.mxu0 %v2333_v60 }
 0x4c9   :  { %2756 = vrot.lane.b32.xlu0 %v15879_v58, %s6923_s10  ;;  %v10558_v17 = vpop.permute.xlu0 %2525  ;;  %3632 = vmatprep.subr.mxu0 %v2330_v63  ;;  %v2269_v63 = vsel %vm15258_vm6, %v10248_v6, %v10192_v46  ;;  %v2202_v46 = vsel %vm15249_vm2, %v10128_v28, %v10136_v16  ;;  %v16175_v16 = vld [vmem:[#allocation8_spill] sm:$0xff] }
 0x4ca   :  { %2760 = vrot.lane.b32.xlu1 %v15883_v61, %s6923_s10  ;;  %16081 = vst [vmem:[#allocation232_spill] sm:$0xff] %v10558_v17  ;;  %3633 = vmatpush2.msra.mxu0 %v2332_v13  ;;  %v10571_v60 = vpop.permute.xlu1 %2560 }
 0x4cb   :  { %3634 = vmatprep.subr.mxu0 %v2267_v42  ;;  %16082 = vst [vmem:[#allocation233_spill] sm:$0xff] %v10571_v60  ;;  %v2268_v42 = vsel %vm15258_vm6, %v10244_v1, %v10188_v19  ;;  %v2201_v19 = vsel %vm15249_vm2, %v10124_v50, %v10132_v53  ;;  %vm2979_vm6 = vcmp.lt.s32.totalorder %v8114_v33, 88 }
 0x4cc   :  { %3635 = vmatpush2.msra.mxu0 %v2269_v63 }
 0x4cd   :  { %2752 = vrot.lane.b32.xlu0 %v15875_v10, %s6923_s10  ;;  %v10583_v13 = vpop.permute.xlu0 %2562  ;;  %3636 = vmatprep.subr.mxu0 %v2266_v31  ;;  %v2204_v31 = vsel %vm15249_vm2, %v10184_v55, %v10128_v28  ;;  %v2137_v28 = vsel %vm15229_vm4, %v9946_v12, %v9971_v48 }
 0x4ce   :  { %2694 = vrot.lane.b32.xlu1 %v15881_v40, %s6908_s13  ;;  %16083 = vst [vmem:[#allocation234_spill] sm:$0xff] %v10583_v13  ;;  %3637 = vmatpush2.msra.mxu0 %v2268_v42  ;;  %v10596_v63 = vpop.permute.xlu1 %2564 }
 0x4cf   :  { %3638 = vmatprep.subr.mxu0 %v2202_v46  ;;  %v2203_v46 = vsel %vm15249_vm2, %v10180_v38, %v10124_v50  ;;  %v2136_v50 = vsel %vm15229_vm4, %v9936_v15, %v9958_v23  ;;  %vm3044_vm2 = vcmp.lt.s32.totalorder %v8114_v33, 87 }
 0x4d0   :  { %3639 = vmatpush2.msra.mxu0 %v2204_v31 }
 0x4d1   :  { %2698 = vrot.lane.b32.xlu0 %v15885_v25, %s6908_s13  ;;  %v10608_v42 = vpop.permute.xlu0 %2566  ;;  %3640 = vmatprep.subr.mxu0 %v2201_v19  ;;  %v2139_v19 = vsel %vm15229_vm4, %v10120_v36, %v9946_v12  ;;  %v3142_v36 = vld [vmem:[%s14814_s4] sm:$0xff] }
 0x4d2   :  { %2690 = vrot.lane.b32.xlu1 %v15877_v24, %s6908_s13  ;;  %3641 = vmatpush2.msra.mxu0 %v2203_v46  ;;  %v10620_v31 = vpop.permute.xlu1 %2568 }
 0x4d3   :  { %3642 = vmatprep.subr.mxu0 %v2137_v28  ;;  %v2138_v28 = vsel %vm15229_vm4, %v10108_v2, %v9936_v15  ;;  %vm15262_vm4 = vcmask 130048  }
 0x4d4   :  { %3643 = vmatpush2.msra.mxu0 %v2139_v19 }
 0x4d5   :  { %2692 = vrot.lane.b32.xlu0 %v15879_v58, %s6908_s13  ;;  %v10632_v46 = vpop.permute.xlu0 %2570  ;;  %3644 = vmatprep.subr.mxu0 %v2136_v50 }
 0x4d6   :  { %2696 = vrot.lane.b32.xlu1 %v15883_v61, %s6908_s13  ;;  %3645 = vmatpush2.msra.mxu0 %v2138_v28  ;;  %v10640_v12 = vpop.permute.xlu1 %2572 }
 0x4d9   :  { %2688 = vrot.lane.b32.xlu0 %v15875_v10, %s6908_s13  ;;  %v10644_v19 = vpop.permute.xlu0 %2574 }
 0x4da   :  { %3083 = vrot.lane.b32.xlu1 %v15881_v40, %s6924_s0  ;;  %v10648_v50 = vpop.permute.xlu1 %2576  ;;  %v10663_v40 = vld [vmem:[%s14814_s4 + $0x18] sm:$0xff] }
 0x4db   :  { %6817 = vmatprep.mubr.msk.f32.mxu1 %vm15262_vm4, %v10663_v40 }
 0x4dd   :  { %3087 = vrot.lane.b32.xlu0 %v15885_v25, %s6924_s0  ;;  %v10652_v15 = vpop.permute.xlu0 %2578 }
 0x4de   :  { %3079 = vrot.lane.b32.xlu1 %v15877_v24, %s6924_s0  ;;  %v10656_v28 = vpop.permute.xlu1 %2580 }
 0x4df   :  { %16084 = vst [vmem:[#allocation235_spill] sm:$0xff] %v10656_v28 }
 0x4e1   :  { %3081 = vrot.lane.b32.xlu0 %v15879_v58, %s6924_s0  ;;  %v10665_v2 = vpop.permute.xlu0 %2582  ;;  %v3143_v58 = vld [vmem:[%s14814_s4 + $0x8] sm:$0xff] }
 0x4e2   :  { %3085 = vrot.lane.b32.xlu1 %v15883_v61, %s6924_s0  ;;  %16085 = vst [vmem:[#allocation236_spill] sm:$0xff] %v10665_v2  ;;  %v10671_v24 = vpop.permute.xlu1 %2584  ;;  %3646 = vmatprep.mubr.f32.mxu0 %v3143_v58 }
 0x4e3   :  { %16086 = vst [vmem:[#allocation237_spill] sm:$0xff] %v10671_v24  ;;  %3647 = vmatmul.mubr.f32.vlgmr.msra.gmra.mxu0 %v3142_v36 }
 0x4e5   :  { %3077 = vrot.lane.b32.xlu0 %v15875_v10, %s6924_s0  ;;  %v10681_v38 = vpop.permute.xlu0 %2586 }
 0x4e6   :  { %3026 = vrot.lane.b32.xlu1 %v15868_v3, %s6919_s15  ;;  %16087 = vst [vmem:[#allocation238_spill] sm:$0xff] %v10681_v38  ;;  %v10685_v10 = vpop.permute.xlu1 %2588 }
 0x4e7   :  { %16088 = vst [vmem:[#allocation239_spill] sm:$0xff] %v10685_v10 }
 0x4e9   :  { %3030 = vrot.lane.b32.xlu0 %v15870_v37, %s6919_s15  ;;  %v10689_v55 = vpop.permute.xlu0 %2590 }
 0x4ea   :  { %3024 = vrot.lane.b32.xlu1 %v15887_v62, %s6919_s15  ;;  %16089 = vst [vmem:[#allocation240_spill] sm:$0xff] %v10689_v55  ;;  %v10693_v58 = vpop.permute.xlu1 %2624 }
 0x4eb   :  { %16090 = vst [vmem:[#allocation241_spill] sm:$0xff] %v10693_v58 }
 0x4ed   :  { %3028 = vrot.lane.b32.xlu0 %v15869_v51, %s6919_s15  ;;  %v10697_v1 = vpop.permute.xlu0 %2626 }
 0x4ee   :  { %2961 = vrot.lane.b32.xlu1 %v15868_v3, %s6920_s1  ;;  %16091 = vst [vmem:[#allocation242_spill] sm:$0xff] %v10697_v1  ;;  %v10701_v36 = vpop.permute.xlu1 %2628 }
 0x4f1   :  { %2965 = vrot.lane.b32.xlu0 %v15870_v37, %s6920_s1  ;;  %v10705_v6 = vpop.permute.xlu0 %2630 }
 0x4f2   :  { %2959 = vrot.lane.b32.xlu1 %v15887_v62, %s6920_s1  ;;  %v10709_v4 = vpop.permute.xlu1 %2632 }
 0x4f5   :  { %2963 = vrot.lane.b32.xlu0 %v15869_v51, %s6920_s1  ;;  %v10713_v39 = vpop.permute.xlu0 %2634 }
 0x4f6   :  { %2896 = vrot.lane.b32.xlu1 %v15868_v3, %s6921_s16  ;;  %v10717_v10 = vpop.permute.xlu1 %2636 }
 0x4f9   :  { %2900 = vrot.lane.b32.xlu0 %v15870_v37, %s6921_s16  ;;  %v10721_v44 = vpop.permute.xlu0 %2638 }
 0x4fa   :  { %2894 = vrot.lane.b32.xlu1 %v15887_v62, %s6921_s16  ;;  %v10725_v55 = vpop.permute.xlu1 %2640 }
 0x4fd   :  { %2898 = vrot.lane.b32.xlu0 %v15869_v51, %s6921_s16  ;;  %v10729_v11 = vpop.permute.xlu0 %2642 }
 0x4fe   :  { %2831 = vrot.lane.b32.xlu1 %v15868_v3, %s6922_s17  ;;  %v10733_v21 = vpop.permute.xlu1 %2644 }
 0x4ff   :  { %16092 = vst [vmem:[#allocation243_spill] sm:$0xff] %v10733_v21 }
 0x501   :  { %2835 = vrot.lane.b32.xlu0 %v15870_v37, %s6922_s17  ;;  %v10737_v0 = vpop.permute.xlu0 %2646 }
 0x502   :  { %2829 = vrot.lane.b32.xlu1 %v15887_v62, %s6922_s17  ;;  %16093 = vst [vmem:[#allocation244_spill] sm:$0xff] %v10737_v0  ;;  %v10741_v17 = vpop.permute.xlu1 %2648 }
 0x503   :  { %16094 = vst [vmem:[#allocation245_spill] sm:$0xff] %v10741_v17 }
 0x505   :  { %2833 = vrot.lane.b32.xlu0 %v15869_v51, %s6922_s17  ;;  %v10745_v56 = vpop.permute.xlu0 %2650 }
 0x506   :  { %2766 = vrot.lane.b32.xlu1 %v15868_v3, %s6923_s10  ;;  %16095 = vst [vmem:[#allocation246_spill] sm:$0xff] %v10745_v56  ;;  %v10749_v28 = vpop.permute.xlu1 %2652 }
 0x507   :  { %16096 = vst [vmem:[#allocation247_spill] sm:$0xff] %v10749_v28 }
 0x509   :  { %2770 = vrot.lane.b32.xlu0 %v15870_v37, %s6923_s10  ;;  %v10753_v24 = vpop.permute.xlu0 %2654 }
 0x50a   :  { %2764 = vrot.lane.b32.xlu1 %v15887_v62, %s6923_s10  ;;  %16097 = vst [vmem:[#allocation248_spill] sm:$0xff] %v10753_v24  ;;  %v3019_v2 = vpop.permute.xlu1 %3018 }
 0x50d   :  { %2768 = vrot.lane.b32.xlu0 %v15869_v51, %s6923_s10  ;;  %v10760_v38 = vpop.permute.xlu0 %3022 }
 0x50e   :  { %2702 = vrot.lane.b32.xlu1 %v15868_v3, %s6908_s13  ;;  %v3056_v28 = vsel %vm3044_vm2, %v3019_v2, %v10760_v38  ;;  %v10767_v24 = vpop.permute.xlu1 %3014 }
 0x50f   :  { %3665 = vmatprep.subr.mxu1 %v3056_v28  ;;  %16098 = vst [vmem:[#allocation249_spill] sm:$0xff] %v10767_v24  ;;  %v3058_v21 = vsel %vm3044_vm2, %v10767_v24, %v3019_v2 }
 0x510   :  { %3666 = vmatpush1.msra.mxu1 %v3058_v21  ;;  %v3147_v21 = vld [vmem:[%s14814_s4 + $0x28] sm:$0xff] }
 0x511   :  { %2706 = vrot.lane.b32.xlu0 %v15870_v37, %s6908_s13  ;;  %v3017_v17 = vpop.permute.xlu0 %3016  ;;  %3652 = vmatprep.mubr.f32.mxu0 %v3147_v21 }
 0x512   :  { %2700 = vrot.lane.b32.xlu1 %v15887_v62, %s6908_s13  ;;  %v10776_v0 = vpop.permute.xlu1 %3020 }
 0x513   :  { %v3055_v28 = vsel %vm3044_vm2, %v3017_v17, %v10776_v0 }
 0x514   :  { %3667 = vmatprep.subr.mxu1 %v3055_v28  ;;  %v3146_v28 = vld [vmem:[%s14814_s4 + $0x20] sm:$0xff] }
 0x515   :  { %2704 = vrot.lane.b32.xlu0 %v15869_v51, %s6908_s13  ;;  %v10783_v56 = vpop.permute.xlu0 %3012  ;;  %3653 = vmatmul.mubr.f32.gmra.mxu0 %v3146_v28  ;;  %v3151_v28 = vld [vmem:[%s14814_s4 + $0x48] sm:$0xff] }
 0x516   :  { %3091 = vrot.lane.b32.xlu1 %v15868_v3, %s6924_s0  ;;  %16099 = vst [vmem:[#allocation250_spill] sm:$0xff] %v10783_v56  ;;  %v3057_v2 = vsel %vm3044_vm2, %v10783_v56, %v3017_v17  ;;  %v2954_v24 = vpop.permute.xlu1 %2953  ;;  %3658 = vmatprep.mubr.f32.mxu0 %v3151_v28 }
 0x517   :  { %3668 = vmatpush1.msra.mxu1 %v3057_v2 }
 0x519   :  { %3095 = vrot.lane.b32.xlu0 %v15870_v37, %s6924_s0  ;;  %v10799_v37 = vpop.permute.xlu0 %2957 }
 0x51a   :  { %3089 = vrot.lane.b32.xlu1 %v15887_v62, %s6924_s0  ;;  %v2991_v17 = vsel %vm2979_vm6, %v2954_v24, %v10799_v37  ;;  %v10806_v2 = vpop.permute.xlu1 %2949 }
 0x51b   :  { %3669 = vmatprep.subr.mxu1 %v2991_v17  ;;  %16100 = vst [vmem:[#allocation251_spill] sm:$0xff] %v10806_v2  ;;  %v2993_v21 = vsel %vm2979_vm6, %v10806_v2, %v2954_v24  ;;  %v3150_v17 = vld [vmem:[%s14814_s4 + $0x40] sm:$0xff] }
 0x51c   :  { %3670 = vmatpush1.msra.mxu1 %v2993_v21  ;;  %3659 = vmatmul.mubr.f32.gmra.mxu0 %v3150_v17 }
 0x51d   :  { %3093 = vrot.lane.b32.xlu0 %v15869_v51, %s6924_s0  ;;  %v2952_v56 = vpop.permute.xlu0 %2951  ;;  %6820 = vmatprep.mubr.msk.f32.mxu0 %vm15262_vm4, %v10663_v40  ;;  %vm2914_vm4 = vcmp.lt.s32.totalorder %v8114_v33, 89 }
 0x51e   :  { %3034 = vrot.lane.b32.xlu1 %v8160_v54, %s6919_s15  ;;  %v10821_v51 = vpop.permute.xlu1 %2955 }
 0x51f   :  { %v2990_v24 = vsel %vm2979_vm6, %v2952_v56, %v10821_v51 }
 0x520   :  { %3671 = vmatprep.subr.mxu1 %v2990_v24 }
 0x521   :  { %3038 = vrot.lane.b32.xlu0 %v16011_v7, %s6919_s15  ;;  %v10830_v21 = vpop.permute.xlu0 %2947 }
 0x522   :  { %3032 = vrot.lane.b32.xlu1 %v15871_v26, %s6919_s15  ;;  %16101 = vst [vmem:[#allocation252_spill] sm:$0xff] %v10830_v21  ;;  %v2992_v28 = vsel %vm2979_vm6, %v10830_v21, %v2952_v56  ;;  %v2889_v17 = vpop.permute.xlu1 %2888 }
 0x523   :  { %3672 = vmatpush1.msra.mxu1 %v2992_v28 }
 0x525   :  { %3036 = vrot.lane.b32.xlu0 %v15675_v34, %s6919_s15  ;;  %v10840_v40 = vpop.permute.xlu0 %2892 }
 0x526   :  { %2969 = vrot.lane.b32.xlu1 %v8160_v54, %s6920_s1  ;;  %v2926_v24 = vsel %vm2914_vm4, %v2889_v17, %v10840_v40  ;;  %v10847_v2 = vpop.permute.xlu1 %2884 }
 0x527   :  { %3673 = vmatprep.subr.mxu1 %v2926_v24  ;;  %16102 = vst [vmem:[#allocation253_spill] sm:$0xff] %v10847_v2  ;;  %v2928_v56 = vsel %vm2914_vm4, %v10847_v2, %v2889_v17 }
 0x528   :  { %3674 = vmatpush1.msra.mxu1 %v2928_v56 }
 0x529   :  { %2973 = vrot.lane.b32.xlu0 %v16011_v7, %s6920_s1  ;;  %v2887_v28 = vpop.permute.xlu0 %2886 }
 0x52a   :  { %2967 = vrot.lane.b32.xlu1 %v15871_v26, %s6920_s1  ;;  %v10856_v21 = vpop.permute.xlu1 %2890 }
 0x52b   :  { %v2925_v24 = vsel %vm2914_vm4, %v2887_v28, %v10856_v21 }
 0x52c   :  { %3675 = vmatprep.subr.mxu1 %v2925_v24 }
 0x52d   :  { %2971 = vrot.lane.b32.xlu0 %v15675_v34, %s6920_s1  ;;  %v10863_v47 = vpop.permute.xlu0 %2882 }
 0x52e   :  { %2904 = vrot.lane.b32.xlu1 %v8160_v54, %s6921_s16  ;;  %16103 = vst [vmem:[#allocation254_spill] sm:$0xff] %v10863_v47  ;;  %v2927_v17 = vsel %vm2914_vm4, %v10863_v47, %v2887_v28  ;;  %v2824_v56 = vpop.permute.xlu1 %2823 }
 0x52f   :  { %3676 = vmatpush1.msra.mxu1 %v2927_v17 }
 0x531   :  { %2908 = vrot.lane.b32.xlu0 %v16011_v7, %s6921_s16  ;;  %v10873_v2 = vpop.permute.xlu0 %2827 }
 0x532   :  { %2902 = vrot.lane.b32.xlu1 %v15871_v26, %s6921_s16  ;;  %v2861_v24 = vsel %vm2849_vm1, %v2824_v56, %v10873_v2  ;;  %v10880_v27 = vpop.permute.xlu1 %2819 }
 0x533   :  { %3677 = vmatprep.subr.mxu1 %v2861_v24  ;;  %16104 = vst [vmem:[#allocation255_spill] sm:$0xff] %v10880_v27  ;;  %v2863_v28 = vsel %vm2849_vm1, %v10880_v27, %v2824_v56 }
 0x534   :  { %3678 = vmatpush1.msra.mxu1 %v2863_v28 }
 0x535   :  { %2906 = vrot.lane.b32.xlu0 %v15675_v34, %s6921_s16  ;;  %v2822_v17 = vpop.permute.xlu0 %2821 }
 0x536   :  { %2839 = vrot.lane.b32.xlu1 %v8160_v54, %s6922_s17  ;;  %v10889_v47 = vpop.permute.xlu1 %2825 }
 0x537   :  { %v2860_v24 = vsel %vm2849_vm1, %v2822_v17, %v10889_v47 }
 0x538   :  { %3679 = vmatprep.subr.mxu1 %v2860_v24 }
 0x539   :  { %2843 = vrot.lane.b32.xlu0 %v16011_v7, %s6922_s17  ;;  %v10896_v14 = vpop.permute.xlu0 %2817 }
 0x53a   :  { %2837 = vrot.lane.b32.xlu1 %v15871_v26, %s6922_s17  ;;  %16105 = vst [vmem:[#allocation256_spill] sm:$0xff] %v10896_v14  ;;  %v2862_v56 = vsel %vm2849_vm1, %v10896_v14, %v2822_v17  ;;  %v2759_v28 = vpop.permute.xlu1 %2758 }
 0x53b   :  { %3680 = vmatpush1.msra.mxu1 %v2862_v56 }
 0x53d   :  { %2841 = vrot.lane.b32.xlu0 %v15675_v34, %s6922_s17  ;;  %v10906_v27 = vpop.permute.xlu0 %2762 }
 0x53e   :  { %2774 = vrot.lane.b32.xlu1 %v8160_v54, %s6923_s10  ;;  %v2796_v24 = vsel %vm15312_vm0, %v2759_v28, %v10906_v27  ;;  %v10913_v35 = vpop.permute.xlu1 %2754 }
 0x53f   :  { %3681 = vmatprep.subr.mxu1 %v2796_v24  ;;  %16106 = vst [vmem:[#allocation257_spill] sm:$0xff] %v10913_v35  ;;  %v2798_v17 = vsel %vm15312_vm0, %v10913_v35, %v2759_v28 }
 0x540   :  { %3682 = vmatpush1.msra.mxu1 %v2798_v17 }
 0x541   :  { %2778 = vrot.lane.b32.xlu0 %v16011_v7, %s6923_s10  ;;  %v2757_v56 = vpop.permute.xlu0 %2756 }
 0x542   :  { %2772 = vrot.lane.b32.xlu1 %v15871_v26, %s6923_s10  ;;  %v10922_v14 = vpop.permute.xlu1 %2760 }
 0x543   :  { %v2795_v24 = vsel %vm15312_vm0, %v2757_v56, %v10922_v14 }
 0x544   :  { %3683 = vmatprep.subr.mxu1 %v2795_v24 }
 0x545   :  { %2776 = vrot.lane.b32.xlu0 %v15675_v34, %s6923_s10  ;;  %v10929_v23 = vpop.permute.xlu0 %2752 }
 0x546   :  { %2710 = vrot.lane.b32.xlu1 %v8160_v54, %s6908_s13  ;;  %16107 = vst [vmem:[#allocation258_spill] sm:$0xff] %v10929_v23  ;;  %v2797_v28 = vsel %vm15312_vm0, %v10929_v23, %v2757_v56  ;;  %v2695_v17 = vpop.permute.xlu1 %2694 }
 0x547   :  { %3684 = vmatpush1.msra.mxu1 %v2797_v28 }
 0x549   :  { %2714 = vrot.lane.b32.xlu0 %v16011_v7, %s6908_s13  ;;  %v10938_v35 = vpop.permute.xlu0 %2698 }
 0x54a   :  { %2708 = vrot.lane.b32.xlu1 %v15871_v26, %s6908_s13  ;;  %v2731_v24 = vsel %vm15282_vm9, %v2695_v17, %v10938_v35  ;;  %v10945_v48 = vpop.permute.xlu1 %2690 }
 0x54b   :  { %3685 = vmatprep.subr.mxu1 %v2731_v24  ;;  %16108 = vst [vmem:[#allocation259_spill] sm:$0xff] %v10945_v48  ;;  %v2733_v56 = vsel %vm15282_vm9, %v10945_v48, %v2695_v17 }
 0x54c   :  { %3686 = vmatpush1.msra.mxu1 %v2733_v56 }
 0x54d   :  { %2712 = vrot.lane.b32.xlu0 %v15675_v34, %s6908_s13  ;;  %v2693_v28 = vpop.permute.xlu0 %2692 }
 0x54e   :  { %3099 = vrot.lane.b32.xlu1 %v8160_v54, %s6924_s0  ;;  %v10954_v23 = vpop.permute.xlu1 %2696 }
 0x54f   :  { %v2730_v24 = vsel %vm15282_vm9, %v2693_v28, %v10954_v23 }
 0x550   :  { %3687 = vmatprep.subr.mxu1 %v2730_v24  ;;  %v2669_v24 = vsel %vm1242_vm8, %v10697_v1, %v10705_v6  ;;  %v16121_v1 = vld [vmem:[#allocation84_spill] sm:$0xff] }
 0x551   :  { %3103 = vrot.lane.b32.xlu0 %v16011_v7, %s6924_s0  ;;  %v10961_v53 = vpop.permute.xlu0 %2688  ;;  %v2667_v7 = vsel %vm1242_vm8, %v10705_v6, %v10713_v39  ;;  %v2603_v6 = vsel %vm1169_vm7, %v10608_v42, %v10632_v46 }
 0x552   :  { %3097 = vrot.lane.b32.xlu1 %v15871_v26, %s6924_s0  ;;  %16109 = vst [vmem:[#allocation260_spill] sm:$0xff] %v10961_v53  ;;  %v2732_v17 = vsel %vm15282_vm9, %v10961_v53, %v2693_v28  ;;  %v3084_v56 = vpop.permute.xlu1 %3083  ;;  %v2666_v28 = vsel %vm1242_vm8, %v10701_v36, %v10709_v4  ;;  %vm3109_vm9 = vcmp.lt.s32.totalorder %v8114_v33, 86 }
 0x553   :  { %3688 = vmatpush1.msra.mxu1 %v2732_v17 }
 0x554   :  { %3689 = vmatprep.subr.mxu1 %v2667_v7  ;;  %v2668_v7 = vsel %vm1242_vm8, %v10693_v58, %v10701_v36 }
 0x555   :  { %3101 = vrot.lane.b32.xlu0 %v15675_v34, %s6924_s0  ;;  %v10978_v34 = vpop.permute.xlu0 %3087  ;;  %3690 = vmatpush1.msra.mxu1 %v2669_v24  ;;  %v2605_v24 = vsel %vm1169_vm7, %v10583_v13, %v10608_v42  ;;  %v16120_v13 = vld [vmem:[#allocation81_spill] sm:$0xff] }
 0x556   :  { %3042 = vrot.lane.b32.xlu1 %v15873_v59, %s6919_s15  ;;  %16110 = vst [vmem:[#allocation261_spill] sm:$0xff] %v10978_v34  ;;  %3691 = vmatprep.subr.mxu1 %v2666_v28  ;;  %v10990_v17 = vpop.permute.xlu1 %3079  ;;  %v2602_v28 = vsel %vm1169_vm7, %v10596_v63, %v10620_v31  ;;  %v2070_v53 = vsel %vm877_vm3, %v16121_v1, %v16120_v13  ;;  %v16125_v1 = vld [vmem:[#allocation79_spill] sm:$0xff] }
 0x557   :  { %3692 = vmatpush1.msra.mxu1 %v2668_v7  ;;  %16111 = vst [vmem:[#allocation262_spill] sm:$0xff] %v10990_v17  ;;  %v2604_v7 = vsel %vm1169_vm7, %v10571_v60, %v10596_v63  ;;  %v16116_v60 = vld [vmem:[#allocation93_spill] sm:$0xff] }
 0x558   :  { %3693 = vmatprep.subr.mxu1 %v2603_v6  ;;  %v3121_v6 = vsel %vm3109_vm9, %v3084_v56, %v10978_v34 }
 0x559   :  { %3040 = vrot.lane.b32.xlu0 %v15689_v41, %s6919_s15  ;;  %v3082_v36 = vpop.permute.xlu0 %3081  ;;  %3694 = vmatpush1.msra.mxu1 %v2605_v24  ;;  %v3123_v24 = vsel %vm3109_vm9, %v10990_v17, %v3084_v56  ;;  %v16115_v17 = vld [vmem:[#allocation100_spill] sm:$0xff] }
 0x55a   :  { %2977 = vrot.lane.b32.xlu1 %v15873_v59, %s6920_s1  ;;  %3695 = vmatprep.subr.mxu1 %v2602_v28  ;;  %v11013_v42 = vpop.permute.xlu1 %3085 }
 0x55b   :  { %3696 = vmatpush1.msra.mxu1 %v2604_v7  ;;  %16112 = vst [vmem:[#allocation263_spill] sm:$0xff] %v11013_v42  ;;  %v3120_v28 = vsel %vm3109_vm9, %v3082_v36, %v11013_v42  ;;  %v16165_v42 = vld [vmem:[#allocation3_spill] sm:$0xff] }
 0x55c   :  { %3725 = vmatprep.subr.mxu1 %v3121_v6  ;;  %v11036_v6 = vld [vmem:[%s14814_s4 + $0x10] sm:$0xff] }
 0x55d   :  { %2975 = vrot.lane.b32.xlu0 %v15689_v41, %s6920_s1  ;;  %v11026_v63 = vpop.permute.xlu0 %3077  ;;  %3726 = vmatpush2.msra.mxu1 %v3123_v24  ;;  %16114 = vst [vmem:[#allocation265_spill] sm:$0xff] %v11036_v6  ;;  %v2069_v24 = vsel %vm877_vm3, %v16116_v60, %v16115_v17 }
 0x55e   :  { %2912 = vrot.lane.b32.xlu1 %v15873_v59, %s6921_s16  ;;  %16113 = vst [vmem:[#allocation264_spill] sm:$0xff] %v11026_v63  ;;  %3727 = vmatprep.subr.mxu1 %v3120_v28  ;;  %v3122_v7 = vsel %vm3109_vm9, %v11026_v63, %v3082_v36  ;;  %v3027_v56 = vpop.permute.xlu1 %3026  ;;  %v16118_v36 = vld [vmem:[#allocation86_spill] sm:$0xff] }
 0x55f   :  { %3728 = vmatpush2.msra.mxu1 %v3122_v7  ;;  %v2071_v63 = vsel %vm877_vm3, %v16118_v36, %v16116_v60  ;;  %v16119_v7 = vld [vmem:[#allocation99_spill] sm:$0xff]  ;;  %v16123_v36 = vld [vmem:[#allocation178_spill] sm:$0xff] }
 0x560   :  { %3748 = vmatprep.subr.mxu1 %v2069_v24  ;;  %3730 = vmatmul.mubr.f32.vlgmr.msra.gmra.mxu1 %v11036_v6  ;;  %v2068_v58 = vsel %vm877_vm3, %v16120_v13, %v16119_v7  ;;  %v16126_v13 = vld [vmem:[#allocation69_spill] sm:$0xff]  ;;  %v16153_v7 = vld [vmem:[#allocation11_spill] sm:$0xff] }
 0x561   :  { %2910 = vrot.lane.b32.xlu0 %v15689_v41, %s6921_s16  ;;  %v11044_v28 = vpop.permute.xlu0 %3030  ;;  %3749 = vmatpush1.msra.mxu1 %v2071_v63  ;;  %v16122_v63 = vld [vmem:[#allocation180_spill] sm:$0xff] }
 0x562   :  { %2847 = vrot.lane.b32.xlu1 %v15873_v59, %s6922_s17  ;;  %16117 = vst [vmem:[#allocation93_spill] sm:$0xff] %v11044_v28  ;;  %v3052_v24 = vsel %vm3044_vm2, %v3027_v56, %v11044_v28  ;;  %3750 = vmatprep.subr.mxu1 %v2068_v58  ;;  %v3025_v60 = vpop.permute.xlu1 %3024  ;;  %v2005_v48 = vsel %vm804_vm5, %v16123_v36, %v16122_v63  ;;  %v16136_v63 = vld [vmem:[#allocation168_spill] sm:$0xff]  ;;  %v16141_v28 = vld [vmem:[#allocation13_spill] sm:$0xff] }
 0x563   :  { %3831 = vmatprep.subr.mxu0 %v3052_v24  ;;  %3751 = vmatpush1.msra.mxu1 %v2070_v53  ;;  %v3054_v58 = vsel %vm3044_vm2, %v10760_v38, %v3027_v56  ;;  %v2007_v53 = vsel %vm804_vm5, %v16125_v1, %v16123_v36  ;;  %v16127_v24 = vld [vmem:[#allocation49_spill] sm:$0xff]  ;;  %v16128_v38 = vld [vmem:[#allocation43_spill] sm:$0xff]  ;;  %v16130_v1 = vld [vmem:[#allocation170_spill] sm:$0xff] }
 0x564   :  { %3752 = vmatprep.subr.mxu1 %v2005_v48  ;;  %3832 = vmatpush1.msra.mxu0 %v3054_v58  ;;  %v2004_v54 = vsel %vm804_vm5, %v16127_v24, %v16126_v13  ;;  %v2006_v56 = vsel %vm804_vm5, %v16128_v38, %v16127_v24  ;;  %v16129_v58 = vld [vmem:[#allocation50_spill] sm:$0xff] }
 0x565   :  { %2845 = vrot.lane.b32.xlu0 %v15689_v41, %s6922_s17  ;;  %v11073_v26 = vpop.permute.xlu0 %3028  ;;  %3753 = vmatpush1.msra.mxu1 %v2007_v53  ;;  %v1941_v53 = vsel %vm1931_vm10, %v16130_v1, %v16129_v58  ;;  %v16132_v24 = vld [vmem:[#allocation66_spill] sm:$0xff]  ;;  %v16135_v58 = vld [vmem:[#allocation172_spill] sm:$0xff] }
 0x566   :  { %2782 = vrot.lane.b32.xlu1 %v15873_v59, %s6923_s10  ;;  %16124 = vst [vmem:[#allocation86_spill] sm:$0xff] %v11073_v26  ;;  %v3051_v48 = vsel %vm3044_vm2, %v3025_v60, %v11073_v26  ;;  %3754 = vmatprep.subr.mxu1 %v2004_v54  ;;  %v2962_v36 = vpop.permute.xlu1 %2961  ;;  %v3053_v54 = vsel %vm3044_vm2, %v10776_v0, %v3025_v60  ;;  %v16133_v38 = vld [vmem:[#allocation14_spill] sm:$0xff] }
 0x567   :  { %3833 = vmatprep.subr.mxu0 %v3051_v48  ;;  %3755 = vmatpush1.msra.mxu1 %v2006_v56  ;;  %v1943_v48 = vsel %vm1931_vm10, %v16132_v24, %v16130_v1  ;;  %v16134_v56 = vld [vmem:[#allocation22_spill] sm:$0xff]  ;;  %v1940_v0 = vsel %vm1931_vm10, %v16136_v63, %v16135_v58  ;;  %v16138_v24 = vld [vmem:[#allocation31_spill] sm:$0xff]  ;;  %v16140_v58 = vld [vmem:[#allocation161_spill] sm:$0xff] }
 0x568   :  { %3756 = vmatprep.subr.mxu1 %v1941_v53  ;;  %3834 = vmatpush1.msra.mxu0 %v3053_v54  ;;  %v660_v26 = vadd.f32 %v16134_v56, %v16133_v38  ;;  %v16137_v53 = vld [vmem:[#allocation166_spill] sm:$0xff] }
 0x569   :  { %2780 = vrot.lane.b32.xlu0 %v15689_v41, %s6923_s10  ;;  %v11101_v13 = vpop.permute.xlu0 %2965  ;;  %3757 = vmatpush1.msra.mxu1 %v1943_v48  ;;  %v1942_v1 = vsel %vm1931_vm10, %v16137_v53, %v16136_v63  ;;  %v661_v48 = vadd.f32 %v16134_v56, %v16138_v24  ;;  %v16139_v38 = vld [vmem:[#allocation62_spill] sm:$0xff]  ;;  %v658_v63 = vadd.f32 %v16134_v56, %v16141_v28 }
 0x56a   :  { %2718 = vrot.lane.b32.xlu1 %v15873_v59, %s6908_s13  ;;  %16131 = vst [vmem:[#allocation81_spill] sm:$0xff] %v11101_v13  ;;  %v2987_v60 = vsel %vm2979_vm6, %v2962_v36, %v11101_v13  ;;  %3758 = vmatprep.subr.mxu1 %v1940_v0  ;;  %v2960_v54 = vpop.permute.xlu1 %2959  ;;  %v1876_v13 = vsel %vm1866_vm11, %v16140_v58, %v16139_v38  ;;  %v16143_v53 = vld [vmem:[#allocation186_spill] sm:$0xff] }
 0x56b   :  { %3835 = vmatprep.subr.mxu0 %v2987_v60  ;;  %3759 = vmatpush1.msra.mxu1 %v1942_v1  ;;  %v2989_v0 = vsel %vm2979_vm6, %v10799_v37, %v2962_v36  ;;  %v1878_v1 = vsel %vm1866_vm11, %v16143_v53, %v16140_v58  ;;  %v16144_v24 = vld [vmem:[#allocation6_spill] sm:$0xff]  ;;  %v16145_v37 = vld [vmem:[#allocation35_spill] sm:$0xff]  ;;  %v16146_v36 = vld [vmem:[#allocation24_spill] sm:$0xff] }
 0x56c   :  { %3760 = vmatprep.subr.mxu1 %v1876_v13  ;;  %3836 = vmatpush1.msra.mxu0 %v2989_v0  ;;  %v1875_v28 = vsel %vm1866_vm11, %v16146_v36, %v16145_v37  ;;  %v16147_v0 = vld [vmem:[#allocation12_spill] sm:$0xff]  ;;  %v16151_v37 = vld [vmem:[#allocation158_spill] sm:$0xff] }
 0x56d   :  { %2716 = vrot.lane.b32.xlu0 %v15689_v41, %s6908_s13  ;;  %v11135_v60 = vpop.permute.xlu0 %2963  ;;  %3761 = vmatpush1.msra.mxu1 %v1878_v1  ;;  %v659_v38 = vadd.f32 %v16134_v56, %v16147_v0  ;;  %v16149_v1 = vld [vmem:[#allocation17_spill] sm:$0xff] }
 0x56e   :  { %3107 = vrot.lane.b32.xlu1 %v15873_v59, %s6924_s0  ;;  %16142 = vst [vmem:[#allocation84_spill] sm:$0xff] %v11135_v60  ;;  %v11142_v59 = vmul.f32 %v16144_v24, %v660_v26  ;;  %v2986_v13 = vsel %vm2979_vm6, %v2960_v54, %v11135_v60  ;;  %3762 = vmatprep.subr.mxu1 %v1875_v28  ;;  %v16148_v26 = vld [vmem:[#allocation192_spill] sm:$0xff]  ;;  %v2897_v53 = vpop.permute.xlu1 %2896  ;;  %v16152_v60 = vld [vmem:[#allocation77_spill] sm:$0xff] }
 0x56f   :  { %v1877_v58 = vsel %vm1866_vm11, %v16148_v26, %v16146_v36  ;;  %3837 = vmatprep.subr.mxu0 %v2986_v13  ;;  %v1811_v0 = vsel %vm1801_vm12, %v16152_v60, %v16151_v37  ;;  %v2988_v28 = vsel %vm2979_vm6, %v10821_v51, %v2960_v54  ;;  %v657_v36 = vadd.f32 %v16134_v56, %v16153_v7  ;;  %v16155_v13 = vld [vmem:[#allocation159_spill] sm:$0xff]  ;;  %v16157_v51 = vld [vmem:[#allocation82_spill] sm:$0xff]  ;;  %v16158_v54 = vld [vmem:[#allocation16_spill] sm:$0xff] }
 0x570   :  { %3763 = vmatpush1.msra.mxu1 %v1877_v58  ;;  %3838 = vmatpush1.msra.mxu0 %v2988_v28  ;;  %v1813_v26 = vsel %vm1801_vm12, %v16155_v13, %v16152_v60  ;;  %v16156_v58 = vld [vmem:[#allocation5_spill] sm:$0xff]  ;;  %v1810_v7 = vsel %vm1801_vm12, %v16158_v54, %v16157_v51  ;;  %v16159_v28 = vld [vmem:[#allocation10_spill] sm:$0xff]  ;;  %v16163_v51 = vld [vmem:[#allocation88_spill] sm:$0xff] }
 0x571   :  { %3105 = vrot.lane.b32.xlu0 %v15689_v41, %s6924_s0  ;;  %v11160_v41 = vmul.f32 %v16149_v1, %v661_v48  ;;  %3764 = vmatprep.subr.mxu1 %v1811_v0  ;;  %v11173_v48 = vpop.permute.xlu0 %2900  ;;  %v11180_v17 = vmul.f32 %v16156_v58, %v658_v63  ;;  %v16160_v56 = vld [vmem:[#allocation21_spill] sm:$0xff] }
 0x572   :  { %4660 = vrot.lane.b32.xlu1 %v11142_v59, %s6907_s28  ;;  %16154 = vst [vmem:[#allocation79_spill] sm:$0xff] %v11173_v48  ;;  %3765 = vmatpush1.msra.mxu1 %v1813_v26  ;;  %v2922_v0 = vsel %vm2914_vm4, %v2897_v53, %v11173_v48  ;;  %v652_v37 = vadd.f32 %v16160_v56, %v16159_v28  ;;  %v16161_v63 = vld [vmem:[#allocation157_spill] sm:$0xff]  ;;  %v2895_v13 = vpop.permute.xlu1 %2894  ;;  %v16162_v26 = vld [vmem:[#allocation4_spill] sm:$0xff]  ;;  %v16164_v48 = vld [vmem:[#allocation147_spill] sm:$0xff] }
 0x573   :  { %16150 = vst [vmem:[#allocation178_spill] sm:$0xff] %v11160_v41  ;;  %3766 = vmatprep.subr.mxu1 %v1810_v7  ;;  %v1812_v60 = vsel %vm1801_vm12, %v16161_v63, %v16158_v54  ;;  %3839 = vmatprep.subr.mxu0 %v2922_v0  ;;  %v11198_v6 = vmul.f32 %v16162_v26, %v659_v38  ;;  %v16167_v0 = vld [vmem:[#allocation146_spill] sm:$0xff] }
 0x574   :  { %3767 = vmatpush1.msra.mxu1 %v1812_v60  ;;  %v1746_v28 = vsel %vm15311_vm13, %v16164_v48, %v16163_v51  ;;  %v2924_v7 = vsel %vm2914_vm4, %v10840_v40, %v2897_v53  ;;  %v11210_v54 = vmul.f32 %v16165_v42, %v657_v36  ;;  %v1748_v63 = vsel %vm15311_vm13, %v16167_v0, %v16164_v48  ;;  %v16168_v60 = vld [vmem:[#allocation26_spill] sm:$0xff]  ;;  %v16169_v40 = vld [vmem:[#allocation155_spill] sm:$0xff]  ;;  %v16172_v48 = vld [vmem:[#allocation153_spill] sm:$0xff] }
 0x575   :  { %4664 = vrot.lane.b32.xlu0 %v11160_v41, %s6907_s28  ;;  %3768 = vmatprep.subr.mxu1 %v1746_v28  ;;  %v11212_v38 = vpop.permute.xlu0 %2898  ;;  %v653_v34 = vadd.f32 %v16160_v56, %v16168_v60  ;;  %v16170_v53 = vld [vmem:[#allocation87_spill] sm:$0xff]  ;;  %v11236_v60 = vmul.f32 %v16144_v24, %v652_v37 }
 0x576   :  { %4652 = vrot.lane.b32.xlu1 %v11180_v17, %s6907_s28  ;;  %3840 = vmatpush1.msra.mxu0 %v2924_v7  ;;  %16166 = vst [vmem:[#allocation49_spill] sm:$0xff] %v11212_v38  ;;  %v1745_v36 = vsel %vm15311_vm13, %v16170_v53, %v16169_v40  ;;  %v2921_v28 = vsel %vm2914_vm4, %v2895_v13, %v11212_v38  ;;  %v16171_v7 = vld [vmem:[#allocation9_spill] sm:$0xff]  ;;  %v16173_v40 = vld [vmem:[#allocation139_spill] sm:$0xff] }
 0x577   :  { %3769 = vmatpush1.msra.mxu1 %v1748_v63  ;;  %v650_v51 = vadd.f32 %v16160_v56, %v16171_v7  ;;  %v1747_v0 = vsel %vm15311_vm13, %v16172_v48, %v16170_v53  ;;  %3841 = vmatprep.subr.mxu0 %v2921_v28  ;;  %v2832_v63 = vpop.permute.xlu1 %2831  ;;  %v16174_v38 = vld [vmem:[#allocation55_spill] sm:$0xff]  ;;  %v651_v53 = vadd.f32 %v16160_v56, %v16175_v16  ;;  %v16176_v28 = vld [vmem:[#allocation58_spill] sm:$0xff] }
 0x578   :  { %3770 = vmatprep.subr.mxu1 %v1745_v36  ;;  %v1681_v7 = vsel %vm15309_vm14, %v16174_v38, %v16173_v40  ;;  %v2923_v36 = vsel %vm2914_vm4, %v10856_v21, %v2895_v13  ;;  %v1683_v48 = vsel %vm15309_vm14, %v16176_v28, %v16174_v38  ;;  %v16178_v21 = vld [vmem:[#allocation138_spill] sm:$0xff] }
 0x579   :  { %4656 = vrot.lane.b32.xlu0 %v11198_v6, %s6907_s28  ;;  %3771 = vmatpush1.msra.mxu1 %v1747_v0  ;;  %v11249_v37 = vpop.permute.xlu0 %2835  ;;  %v11256_v0 = vmul.f32 %v16149_v1, %v653_v34  ;;  %v16179_v13 = vld [vmem:[#allocation54_spill] sm:$0xff]  ;;  %v11272_v28 = vmul.f32 %v16156_v58, %v650_v51  ;;  %v16182_v1 = vld [vmem:[#allocation60_spill] sm:$0xff]  ;;  %v16185_v58 = vld [vmem:[#allocation127_spill] sm:$0xff] }
 0x57a   :  { %4648 = vrot.lane.b32.xlu1 %v11210_v54, %s6907_s28  ;;  %3772 = vmatprep.subr.mxu1 %v1681_v7  ;;  %v1680_v16 = vsel %vm15309_vm14, %v16179_v13, %v16178_v21  ;;  %v2857_v7 = vsel %vm2849_vm1, %v2832_v63, %v11249_v37  ;;  %v16183_v51 = vld [vmem:[#allocation126_spill] sm:$0xff] }
 0x57b   :  { %3842 = vmatpush1.msra.mxu0 %v2923_v36  ;;  %16177 = vst [vmem:[#allocation43_spill] sm:$0xff] %v11256_v0  ;;  %3773 = vmatpush1.msra.mxu1 %v1683_v48  ;;  %v16180_v36 = vld [vmem:[#allocation51_spill] sm:$0xff]  ;;  %v2830_v38 = vpop.permute.xlu1 %2829  ;;  %v16181_v48 = vld [vmem:[#allocation128_spill] sm:$0xff] }
 0x57c   :  { %3774 = vmatprep.subr.mxu1 %v1680_v16  ;;  %v1682_v34 = vsel %vm15309_vm14, %v16180_v36, %v16179_v13  ;;  %3843 = vmatprep.subr.mxu0 %v2857_v7  ;;  %v1616_v24 = vsel %vm15310_vm15, %v16182_v1, %v16181_v48  ;;  %v2859_v16 = vsel %vm2849_vm1, %v10873_v2, %v2832_v63  ;;  %v16186_v63 = vld [vmem:[#allocation133_spill] sm:$0xff]  ;;  %vm16188_vm14 = vcmp.lt.s32.totalorder %v8114_v33, 110 }
 0x57d   :  { %4658 = vrot.lane.b32.xlu0 %v11236_v60, %s6907_s28  ;;  %3775 = vmatpush1.msra.mxu1 %v1682_v34  ;;  %v11283_v13 = vpop.permute.xlu0 %2833  ;;  %v1618_v7 = vsel %vm15310_vm15, %v16183_v51, %v16182_v1  ;;  %v11290_v36 = vmul.f32 %v16162_v26, %v651_v53  ;;  %v16184_v34 = vld [vmem:[#allocation56_spill] sm:$0xff]  ;;  %v1617_v1 = vsel %vm15310_vm15, %v16186_v63, %v16185_v58  ;;  %vm16190_vm13 = vmmov %vm16188_vm14 }
 0x57e   :  { %4662 = vrot.lane.b32.xlu1 %v11256_v0, %s6907_s28  ;;  %3776 = vmatprep.subr.mxu1 %v1616_v24  ;;  %v1615_v2 = vsel %vm15310_vm15, %v16185_v58, %v16184_v34  ;;  %v2856_v24 = vsel %vm2849_vm1, %v2830_v38, %v11283_v13  ;;  %vm16189_vm15 = vmmov %vm16188_vm14  ;;  %v2534_v63 = vsel %vm16188_vm14, %v10466_v49, %v10487_v30 }
 0x57f   :  { %3844 = vmatpush1.msra.mxu0 %v2859_v16  ;;  %3777 = vmatpush1.msra.mxu1 %v1618_v7  ;;  %v2767_v53 = vpop.permute.xlu1 %2766  ;;  %v16187_v16 = vld [vmem:[#allocation7_spill] sm:$0xff]  ;;  %v2535_v7 = vsel %vm16188_vm14, %v10476_v20, %v10498_v29 }
 0x580   :  { %3778 = vmatprep.subr.mxu1 %v1615_v2  ;;  %3845 = vmatprep.subr.mxu0 %v2856_v24  ;;  %v649_v51 = vadd.f32 %v16160_v56, %v16187_v16  ;;  %v2858_v2 = vsel %vm2849_vm1, %v10889_v47, %v2830_v38  ;;  %v2537_v24 = vsel %vm16189_vm15, %v10458_v57, %v10476_v20  ;;  %v16192_v16 = vld [vmem:[#allocation216_spill] sm:$0xff]  ;;  %vm16193_vm15 = vcmp.lt.s32.totalorder %v8114_v33, 126 }
 0x581   :  { %4650 = vrot.lane.b32.xlu0 %v11272_v28, %s6907_s28  ;;  %3779 = vmatpush1.msra.mxu1 %v1617_v1  ;;  %v11316_v58 = vpop.permute.xlu0 %2770  ;;  %v2536_v38 = vsel %vm16190_vm13, %v10454_v43, %v10466_v49  ;;  %v16191_v1 = vld [vmem:[#allocation218_spill] sm:$0xff]  ;;  %vm16194_vm13 = vmmov %vm16193_vm15 }
 0x582   :  { %4654 = vrot.lane.b32.xlu1 %v11290_v36, %s6907_s28  ;;  %3780 = vmatprep.subr.mxu1 %v2535_v7  ;;  %v2792_v47 = vsel %vm15312_vm0, %v2767_v53, %v11316_v58  ;;  %v11336_v20 = vmul.f32 %v16165_v42, %v649_v51  ;;  %v2470_v7 = vsel %vm16193_vm15, %v16192_v16, %v16191_v1  ;;  %v16195_v51 = vld [vmem:[#allocation217_spill] sm:$0xff]  ;;  %vm16197_vm14 = vmmov %vm16194_vm13  ;;  %v16259_v42 = vld [vmem:[#allocation59_spill] sm:$0xff] }
 0x583   :  { %3846 = vmatpush1.msra.mxu0 %v2858_v2  ;;  %3781 = vmatpush2.msra.mxu1 %v2537_v24  ;;  %v2765_v57 = vpop.permute.xlu1 %2764  ;;  %v2794_v2 = vsel %vm15312_vm0, %v10906_v27, %v2767_v53  ;;  %v2472_v43 = vsel %vm16194_vm13, %v10398_v52, %v16192_v16  ;;  %v16196_v24 = vld [vmem:[#allocation215_spill] sm:$0xff]  ;;  %vm16198_vm15 = vmmov %vm16194_vm13  ;;  %vm16201_vm13 = vcmp.lt.s32.totalorder %v8114_v33, 127 }
 0x584   :  { %3782 = vmatprep.subr.mxu1 %v2534_v63  ;;  %3847 = vmatprep.subr.mxu0 %v2792_v47  ;;  %v2469_v63 = vsel %vm16197_vm14, %v16196_v24, %v16195_v51  ;;  %v2471_v53 = vsel %vm16198_vm15, %v10394_v22, %v16196_v24  ;;  %v16199_v47 = vld [vmem:[#allocation206_spill] sm:$0xff]  ;;  %vm16202_vm14 = vmmov %vm16201_vm13  ;;  %v16204_v24 = vld [vmem:[#allocation203_spill] sm:$0xff] }
 0x585   :  { %4596 = vrot.lane.b32.xlu0 %v11142_v59, %s6906_s27  ;;  %3783 = vmatpush2.msra.mxu1 %v2536_v38  ;;  %v11347_v49 = vpop.permute.xlu0 %2768  ;;  %v16200_v38 = vld [vmem:[#allocation204_spill] sm:$0xff]  ;;  %vm16205_vm15 = vmmov %vm16201_vm13 }
 0x586   :  { %4600 = vrot.lane.b32.xlu1 %v11160_v41, %s6906_s27  ;;  %3784 = vmatprep.subr.mxu1 %v2470_v7  ;;  %v2791_v27 = vsel %vm15312_vm0, %v2765_v57, %v11347_v49  ;;  %v2405_v16 = vsel %vm16201_vm13, %v16200_v38, %v16199_v47  ;;  %v2793_v7 = vsel %vm15312_vm0, %v10922_v14, %v2765_v57  ;;  %vm16206_vm13 = vcmp.lt.s32.totalorder %v8114_v33, 107  ;;  %vm16207_vm0 = vmmov %vm16202_vm14 }
 0x587   :  { %3848 = vmatpush1.msra.mxu0 %v2794_v2  ;;  %3785 = vmatpush2.msra.mxu1 %v2472_v43  ;;  %v2703_v52 = vpop.permute.xlu1 %2702  ;;  %v2407_v22 = vsel %vm16202_vm14, %v10336_v45, %v16200_v38  ;;  %v16203_v43 = vld [vmem:[#allocation205_spill] sm:$0xff]  ;;  %v2406_v57 = vsel %vm16207_vm0, %v10332_v9, %v16204_v24  ;;  %vm16208_vm14 = vmmov %vm16206_vm13 }
 0x588   :  { %3786 = vmatprep.subr.mxu1 %v2469_v63  ;;  %3849 = vmatprep.subr.mxu0 %v2791_v27  ;;  %v2404_v63 = vsel %vm16205_vm15, %v16204_v24, %v16203_v43  ;;  %v2729_v27 = vsel %vm16208_vm14, %v10938_v35, %v2703_v52  ;;  %vm16209_vm0 = vmmov %vm16206_vm13  ;;  %v16211_v35 = vld [vmem:[#allocation175_spill] sm:$0xff]  ;;  %vm16212_vm15 = vcmp.lt.s32.totalorder %v8114_v33, 1 }
 0x589   :  { %4646 = vrot.lane.b32.xlu0 %v11336_v20, %s6907_s28  ;;  %3787 = vmatpush2.msra.mxu1 %v2471_v53  ;;  %v11375_v2 = vpop.permute.xlu0 %2706  ;;  %vm16214_vm14 = vmmov %vm16212_vm15 }
 0x58a   :  { %4588 = vrot.lane.b32.xlu1 %v11180_v17, %s6906_s27  ;;  %3788 = vmatprep.subr.mxu1 %v2405_v16  ;;  %v2727_v14 = vsel %vm16206_vm13, %v2703_v52, %v11375_v2  ;;  %vm16213_vm13 = vmmov %vm16209_vm0 }
 0x58b   :  { %3850 = vmatpush1.msra.mxu0 %v2793_v7  ;;  %3789 = vmatpush2.msra.mxu1 %v2407_v22  ;;  %v2701_v45 = vpop.permute.xlu1 %2700  ;;  %v16215_v7 = vld [vmem:[#allocation177_spill] sm:$0xff] }
 0x58c   :  { %3790 = vmatprep.subr.mxu1 %v2404_v63  ;;  %3851 = vmatprep.subr.mxu0 %v2727_v14  ;;  %v2728_v52 = vsel %vm16213_vm13, %v10954_v23, %v2701_v45  ;;  %v16216_v22 = vld [vmem:[#allocation173_spill] sm:$0xff]  ;;  %v2662_v14 = vsel %vm1242_vm8, %v10717_v10, %v10725_v55  ;;  %vm16221_vm13 = vcmp.lt.s32.totalorder %v8114_v33, 2 }
 0x58d   :  { %4592 = vrot.lane.b32.xlu0 %v11198_v6, %s6906_s27  ;;  %3791 = vmatpush2.msra.mxu1 %v2406_v57  ;;  %v11400_v53 = vpop.permute.xlu0 %2704  ;;  %v16219_v57 = vld [vmem:[#allocation123_spill] sm:$0xff] }
 0x58e   :  { %4584 = vrot.lane.b32.xlu1 %v11210_v54, %s6906_s27  ;;  %3792 = vmatprep.subr.mxu1 %v15868_v3  ;;  %v2726_v9 = vsel %vm16209_vm0, %v2701_v45, %v11400_v53  ;;  %v16210_v3 = vld [vmem:[#allocation179_spill] sm:$0xff]  ;;  %vm16217_vm0 = vmmov %vm16214_vm14  ;;  %v16220_v45 = vld [vmem:[#allocation97_spill] sm:$0xff] }
 0x58f   :  { %3852 = vmatpush1.msra.mxu0 %v2729_v27  ;;  %3793 = vmatpush2.msra.mxu1 %v15885_v25  ;;  %v3092_v38 = vpop.permute.xlu1 %3091  ;;  %v2327_v25 = vsel %vm16212_vm15, %v16211_v35, %v16210_v3  ;;  %v2326_v23 = vsel %vm16217_vm0, %v16216_v22, %v16215_v7  ;;  %vm16218_vm15 = vmmov %vm16217_vm0 }
 0x590   :  { %3794 = vmatprep.subr.mxu1 %v15887_v62  ;;  %3853 = vmatprep.subr.mxu0 %v2726_v9  ;;  %v2663_v62 = vsel %vm1242_vm8, %v10721_v44, %v10729_v11  ;;  %v2328_v24 = vsel %vm16218_vm15, %v10260_v5, %v16216_v22  ;;  %v2664_v5 = vsel %vm1242_vm8, %v10709_v4, %v10717_v10  ;;  %vm16225_vm0 = vmmov %vm16221_vm13 }
 0x591   :  { %4594 = vrot.lane.b32.xlu0 %v11236_v60, %s6906_s27  ;;  %3795 = vmatpush2.msra.mxu1 %v15883_v61  ;;  %v11419_v16 = vpop.permute.xlu0 %3095  ;;  %v2329_v61 = vsel %vm16214_vm14, %v10264_v32, %v16211_v35  ;;  %v2665_v32 = vsel %vm1242_vm8, %v10713_v39, %v10721_v44  ;;  %v2263_v44 = vsel %vm16221_vm13, %v16220_v45, %v16219_v57  ;;  %vm16222_vm14 = vmmov %vm16221_vm13  ;;  %v16223_v35 = vld [vmem:[#allocation96_spill] sm:$0xff]  ;;  %vm16230_vm13 = vcmp.lt.s32.totalorder %v8114_v33, 18 }
 0x592   :  { %4598 = vrot.lane.b32.xlu1 %v11256_v0, %s6906_s27  ;;  %3796 = vmatprep.subr.mxu1 %v2327_v25  ;;  %v2265_v27 = vsel %vm16222_vm14, %v10200_v8, %v16220_v45  ;;  %v2599_v9 = vsel %vm1169_vm7, %v10644_v19, %v10652_v15  ;;  %v16224_v25 = vld [vmem:[#allocation105_spill] sm:$0xff]  ;;  %v2601_v8 = vsel %vm1169_vm7, %v10632_v46, %v10644_v19  ;;  %vm16226_vm15 = vmmov %vm16225_vm0  ;;  %v16229_v19 = vld [vmem:[#allocation75_spill] sm:$0xff]  ;;  %vm16231_vm14 = vcmask 130048  }
 0x593   :  { %3854 = vmatpush1.msra.mxu0 %v2728_v52  ;;  %3797 = vmatpush2.msra.mxu1 %v2329_v61  ;;  %v3090_v63 = vpop.permute.xlu1 %3089  ;;  %v2262_v4 = vsel %vm16225_vm0, %v16224_v25, %v16223_v35  ;;  %v2264_v52 = vsel %vm16226_vm15, %v10196_v18, %v16224_v25  ;;  %v11486_v61 = vld [vmem:[%s14814_s4 + $0x38] sm:$0xff]  ;;  %v11497_v46 = vld [vmem:[%s14814_s4 + $0x30] sm:$0xff]  ;;  %v16228_v18 = vld [vmem:[#allocation112_spill] sm:$0xff] }
 0x594   :  { %3855 = vmatprep.subr.mxu0 %v2663_v62  ;;  %3798 = vmatprep.subr.mxu1 %v2326_v23  ;;  %v2598_v62 = vsel %vm1169_vm7, %v10640_v12, %v10648_v50  ;;  %v2198_v23 = vsel %vm16230_vm13, %v16229_v19, %v16228_v18  ;;  %vm16233_vm0 = vmmov %vm16230_vm13 }
 0x595   :  { %4586 = vrot.lane.b32.xlu0 %v11272_v28, %s6906_s27  ;;  %3856 = vmatpush1.msra.mxu0 %v2665_v32  ;;  %v11457_v39 = vpop.permute.xlu0 %3093  ;;  %v2600_v32 = vsel %vm1169_vm7, %v10620_v31, %v10640_v12  ;;  %vm16236_vm15 = vmmov %vm16233_vm0 }
 0x596   :  { %3799 = vmatpush2.msra.mxu1 %v2328_v24  ;;  %3857 = vmatprep.subr.mxu0 %v2662_v14  ;;  %v16232_v14 = vld [vmem:[#allocation111_spill] sm:$0xff]  ;;  %vm16240_vm13 = vmmov %vm16233_vm0 }
 0x597   :  { %4590 = vrot.lane.b32.xlu1 %v11290_v36, %s6906_s27  ;;  %3800 = vmatprep.subr.mxu1 %v2263_v44  ;;  %v11471_v10 = vpop.permute.xlu1 %3034  ;;  %v2200_v45 = vsel %vm16233_vm0, %v16232_v14, %v16229_v19  ;;  %v3117_v44 = vsel %vm3109_vm9, %v3092_v38, %v11419_v16  ;;  %vm16244_vm0 = vcmask 130048  }
 0x598   :  { %3858 = vmatpush1.msra.mxu0 %v2664_v5  ;;  %3801 = vmatpush2.msra.mxu1 %v2265_v27  ;;  %v16234_v5 = vld [vmem:[#allocation92_spill] sm:$0xff]  ;;  %v16235_v27 = vld [vmem:[#allocation118_spill] sm:$0xff] }
 0x599   :  { %3859 = vmatprep.subr.mxu0 %v2599_v9  ;;  %4532 = vrot.lane.b32.xlu0 %v11142_v59, %s6905_s26  ;;  %v11492_v22 = vpop.permute.xlu0 %3038  ;;  %v2197_v31 = vsel %vm16236_vm15, %v16235_v27, %v16234_v5  ;;  %v16238_v9 = vld [vmem:[#allocation261_spill] sm:$0xff] }
 0x59a   :  { %3802 = vmatprep.subr.mxu1 %v2262_v4  ;;  %3860 = vmatpush1.msra.mxu0 %v2601_v8  ;;  %16227 = vst [vmem:[#allocation170_spill] sm:$0xff] %v11492_v22  ;;  %v3119_v25 = vsel %vm3109_vm9, %v16238_v9, %v3092_v38  ;;  %v16239_v4 = vld [vmem:[#allocation74_spill] sm:$0xff]  ;;  %v11547_v38 = vld [vmem:[%s14814_s4 + $0x50] sm:$0xff] }
 0x59b   :  { %3803 = vmatpush2.msra.mxu1 %v2264_v52  ;;  %3861 = vmatprep.subr.mxu0 %v2598_v62  ;;  %v11511_v24 = vpop.permute.xlu1 %3032  ;;  %v2199_v8 = vsel %vm16240_vm13, %v16239_v4, %v16235_v27  ;;  %v11539_v52 = vld [vmem:[%s14814_s4 + $0x58] sm:$0xff]  ;;  %v3116_v62 = vsel %vm3109_vm9, %v3090_v63, %v11457_v39 }
 0x59c   :  { %4536 = vrot.lane.b32.xlu1 %v11160_v41, %s6905_s26  ;;  %6818 = vmatprep.mubr.msk.f32.mxu1 %vm16231_vm14, %v11486_v61  ;;  %vm16243_vm14 = vcmp.lt.s32.totalorder %v8114_v33, 19  ;;  %v16250_v4 = vld [vmem:[#allocation94_spill] sm:$0xff]  ;;  %v16260_v41 = vld [vmem:[#allocation101_spill] sm:$0xff] }
 0x59d   :  { %3804 = vmatprep.subr.mxu1 %v2198_v23  ;;  %3862 = vmatpush1.msra.mxu0 %v2600_v32  ;;  %v11525_v12 = vpop.permute.xlu0 %3036  ;;  %v16241_v23 = vld [vmem:[#allocation124_spill] sm:$0xff]  ;;  %v16242_v32 = vld [vmem:[#allocation109_spill] sm:$0xff]  ;;  %vm16248_vm15 = vmmov %vm16243_vm14 }
 0x59e   :  { %3736 = vmatmul.mubr.f32.gmra.mxu1 %v11497_v46  ;;  %3891 = vmatprep.subr.mxu0 %v3117_v44  ;;  %16237 = vst [vmem:[#allocation66_spill] sm:$0xff] %v11525_v12  ;;  %v2133_v14 = vsel %vm16243_vm14, %v16242_v32, %v16241_v23  ;;  %vm16253_vm13 = vmmov %vm16243_vm14 }
 0x59f   :  { %3805 = vmatpush2.msra.mxu1 %v2200_v45  ;;  %4582 = vrot.lane.b32.xlu0 %v11336_v20, %s6906_s27  ;;  %v2970_v19 = vpop.permute.xlu1 %2969  ;;  %v16245_v45 = vld [vmem:[#allocation263_spill] sm:$0xff]  ;;  %vm16255_vm14 = vmmov %vm16253_vm13 }
 0x5a0   :  { %3806 = vmatprep.subr.mxu1 %v2197_v31  ;;  %3892 = vmatpush2.msra.mxu0 %v3119_v25  ;;  %v3118_v44 = vsel %vm3109_vm9, %v16245_v45, %v3090_v63  ;;  %v16247_v31 = vld [vmem:[#allocation98_spill] sm:$0xff] }
 0x5a1   :  { %3807 = vmatpush2.msra.mxu1 %v2199_v8  ;;  %3893 = vmatprep.subr.mxu0 %v3116_v62  ;;  %v11560_v27 = vpop.permute.xlu0 %2973  ;;  %v2135_v9 = vsel %vm16248_vm15, %v16247_v31, %v16242_v32  ;;  %v16249_v25 = vld [vmem:[#allocation70_spill] sm:$0xff]  ;;  %v16251_v62 = vld [vmem:[#allocation107_spill] sm:$0xff]  ;;  %v16256_v31 = vld [vmem:[#allocation265_spill] sm:$0xff] }
 0x5a2   :  { %4524 = vrot.lane.b32.xlu1 %v11180_v17, %s6905_s26  ;;  %6819 = vmatprep.mubr.msk.f32.mxu1 %vm16244_vm0, %v11539_v52  ;;  %16246 = vst [vmem:[#allocation14_spill] sm:$0xff] %v11560_v27  ;;  %v2065_v8 = vsel %vm877_vm3, %v16250_v4, %v16249_v25  ;;  %vm16299_vm0 = vcmp.lt.s32.totalorder %v8114_v33, 40 }
 0x5a3   :  { %3808 = vmatprep.subr.mxu1 %v2133_v14  ;;  %3894 = vmatpush2.msra.mxu0 %v3118_v44  ;;  %v16252_v14 = vld [vmem:[#allocation104_spill] sm:$0xff]  ;;  %v2968_v45 = vpop.permute.xlu1 %2967  ;;  %v16254_v44 = vld [vmem:[#allocation122_spill] sm:$0xff]  ;;  %vm16303_vm15 = vmmov %vm16299_vm0 }
 0x5a4   :  { %3742 = vmatmul.mubr.f32.gmra.mxu1 %v11547_v38  ;;  %3914 = vmatprep.subr.mxu0 %v2065_v8  ;;  %v2132_v63 = vsel %vm16253_vm13, %v16252_v14, %v16251_v62  ;;  %v2134_v32 = vsel %vm16255_vm14, %v16254_v44, %v16252_v14  ;;  %v11597_v14 = vld [vmem:[%s14814_s4 + $0x8] sm:$0xff]  ;;  %vm16306_vm13 = vmmov %vm16299_vm0 }
 0x5a5   :  { %3809 = vmatpush2.msra.mxu1 %v2135_v9  ;;  %4528 = vrot.lane.b32.xlu0 %v11198_v6, %s6905_s26  ;;  %v16257_v9 = vld [vmem:[#allocation100_spill] sm:$0xff]  ;;  %v11586_v26 = vpop.permute.xlu0 %2971  ;;  %16261 = vst [vmem:[#allocation166_spill] sm:$0xff] %v11597_v14  ;;  %vm16308_vm14 = vmmov %vm16299_vm0 }
 0x5a6   :  { %3810 = vmatprep.subr.mxu1 %v2132_v63  ;;  %3896 = vmatmul.mubr.f32.vlgmr.msra.gmra.mxu0 %v16256_v31  ;;  %v2067_v8 = vsel %vm877_vm3, %v16257_v9, %v16250_v4  ;;  %16258 = vst [vmem:[#allocation168_spill] sm:$0xff] %v11586_v26  ;;  %v2064_v63 = vsel %vm877_vm3, %v16260_v41, %v16259_v42  ;;  %v16262_v4 = vld [vmem:[#allocation99_spill] sm:$0xff] }
 0x5a7   :  { %3811 = vmatpush2.msra.mxu1 %v2134_v32  ;;  %3915 = vmatpush1.msra.mxu0 %v2067_v8  ;;  %v2066_v44 = vsel %vm877_vm3, %v16262_v4, %v16260_v41  ;;  %v3048_v32 = vsel %vm3044_vm2, %v11471_v10, %v11492_v22  ;;  %v2905_v31 = vpop.permute.xlu1 %2904  ;;  %v16263_v9 = vld [vmem:[#allocation27_spill] sm:$0xff]  ;;  %v16266_v41 = vld [vmem:[#allocation93_spill] sm:$0xff] }
 0x5a8   :  { %4520 = vrot.lane.b32.xlu1 %v11210_v54, %s6905_s26  ;;  %3916 = vmatprep.subr.mxu0 %v2064_v63  ;;  %v16264_v8 = vld [vmem:[#allocation47_spill] sm:$0xff]  ;;  %v3050_v4 = vsel %vm3044_vm2, %v16266_v41, %v11471_v10  ;;  %v16270_v10 = vld [vmem:[#allocation45_spill] sm:$0xff] }
 0x5a9   :  { %3812 = vmatprep.mubr.f32.mxu1 %v11597_v14  ;;  %3917 = vmatpush1.msra.mxu0 %v2066_v44  ;;  %v2001_v63 = vsel %vm804_vm5, %v16264_v8, %v16263_v9  ;;  %v11615_v14 = vld [vmem:[%s14814_s4] sm:$0xff]  ;;  %v11622_v44 = vpop.permute.xlu0 %2908 }
 0x5aa   :  { %3997 = vmatprep.subr.mxu1 %v3048_v32  ;;  %16265 = vst [vmem:[#allocation31_spill] sm:$0xff] %v11615_v14  ;;  %3813 = vmatmul.mubr.f32.vlgmr.msra.gmra.mxu1 %v11615_v14  ;;  %16267 = vst [vmem:[#allocation161_spill] sm:$0xff] %v11622_v44  ;;  %v16268_v32 = vld [vmem:[#allocation180_spill] sm:$0xff]  ;;  %v16269_v14 = vld [vmem:[#allocation89_spill] sm:$0xff] }
 0x5ab   :  { %3918 = vmatprep.subr.mxu0 %v2001_v63  ;;  %3998 = vmatpush1.msra.mxu1 %v3050_v4  ;;  %v2003_v22 = vsel %vm804_vm5, %v16268_v32, %v16264_v8  ;;  %v3047_v63 = vsel %vm3044_vm2, %v11511_v24, %v11525_v12  ;;  %v2000_v41 = vsel %vm804_vm5, %v16270_v10, %v16269_v14  ;;  %v16271_v4 = vld [vmem:[#allocation86_spill] sm:$0xff]  ;;  %v2903_v32 = vpop.permute.xlu1 %2902  ;;  %v16274_v14 = vld [vmem:[#allocation176_spill] sm:$0xff] }
 0x5ac   :  { %4530 = vrot.lane.b32.xlu0 %v11236_v60, %s6905_s26  ;;  %3919 = vmatpush1.msra.mxu0 %v2003_v22  ;;  %v3049_v62 = vsel %vm3044_vm2, %v16271_v4, %v11511_v24  ;;  %v2983_v8 = vsel %vm2979_vm6, %v2970_v19, %v11560_v27  ;;  %v16272_v22 = vld [vmem:[#allocation69_spill] sm:$0xff]  ;;  %v16273_v12 = vld [vmem:[#allocation46_spill] sm:$0xff]  ;;  %v2982_v4 = vsel %vm2979_vm6, %v2968_v45, %v11586_v26 }
 0x5ad   :  { %3999 = vmatprep.subr.mxu1 %v3047_v63  ;;  %3920 = vmatprep.subr.mxu0 %v2000_v41  ;;  %v2002_v63 = vsel %vm804_vm5, %v16272_v22, %v16270_v10  ;;  %v1937_v24 = vsel %vm1931_vm10, %v16274_v14, %v16273_v12  ;;  %v11658_v41 = vpop.permute.xlu0 %2906  ;;  %v16277_v22 = vld [vmem:[#allocation50_spill] sm:$0xff] }
 0x5ae   :  { %4000 = vmatpush1.msra.mxu1 %v3049_v62  ;;  %4534 = vrot.lane.b32.xlu1 %v11256_v0, %s6905_s26  ;;  %16275 = vst [vmem:[#allocation13_spill] sm:$0xff] %v11658_v41  ;;  %v16276_v62 = vld [vmem:[#allocation81_spill] sm:$0xff]  ;;  %v16278_v26 = vld [vmem:[#allocation42_spill] sm:$0xff] }
 0x5af   :  { %3921 = vmatpush1.msra.mxu0 %v2002_v63  ;;  %4001 = vmatprep.subr.mxu1 %v2983_v8  ;;  %v2985_v10 = vsel %vm2979_vm6, %v16276_v62, %v2970_v19  ;;  %v1939_v63 = vsel %vm1931_vm10, %v16277_v22, %v16274_v14  ;;  %v2840_v0 = vpop.permute.xlu1 %2839  ;;  %v16279_v27 = vld [vmem:[#allocation174_spill] sm:$0xff]  ;;  %v16280_v19 = vld [vmem:[#allocation172_spill] sm:$0xff] }
 0x5b0   :  { %3922 = vmatprep.subr.mxu0 %v1937_v24  ;;  %4002 = vmatpush1.msra.mxu1 %v2985_v10  ;;  %v1936_v8 = vsel %vm1931_vm10, %v16279_v27, %v16278_v26  ;;  %v1938_v24 = vsel %vm1931_vm10, %v16280_v19, %v16279_v27  ;;  %v16281_v62 = vld [vmem:[#allocation84_spill] sm:$0xff]  ;;  %v2918_v10 = vsel %vm2914_vm4, %v2905_v31, %v11622_v44  ;;  %v16285_v27 = vld [vmem:[#allocation62_spill] sm:$0xff]  ;;  %v16287_v44 = vld [vmem:[#allocation39_spill] sm:$0xff] }
 0x5b1   :  { %4522 = vrot.lane.b32.xlu0 %v11272_v28, %s6905_s26  ;;  %3923 = vmatpush1.msra.mxu0 %v1939_v63  ;;  %v2984_v14 = vsel %vm2979_vm6, %v16281_v62, %v2968_v45  ;;  %v11685_v22 = vpop.permute.xlu0 %2843  ;;  %v16284_v63 = vld [vmem:[#allocation162_spill] sm:$0xff]  ;;  %v16286_v62 = vld [vmem:[#allocation163_spill] sm:$0xff] }
 0x5b2   :  { %4003 = vmatprep.subr.mxu1 %v2982_v4  ;;  %3924 = vmatprep.subr.mxu0 %v1936_v8  ;;  %16282 = vst [vmem:[#allocation186_spill] sm:$0xff] %v11685_v22  ;;  %v16283_v4 = vld [vmem:[#allocation164_spill] sm:$0xff]  ;;  %v1874_v45 = vsel %vm1866_vm11, %v16285_v27, %v16284_v63  ;;  %v2917_v27 = vsel %vm2914_vm4, %v2903_v32, %v11658_v41  ;;  %v16300_v26 = vld [vmem:[#allocation34_spill] sm:$0xff] }
 0x5b3   :  { %4526 = vrot.lane.b32.xlu1 %v11290_v36, %s6905_s26  ;;  %3925 = vmatpush1.msra.mxu0 %v1938_v24  ;;  %v1872_v8 = vsel %vm1866_vm11, %v16284_v63, %v16283_v4  ;;  %v2838_v19 = vpop.permute.xlu1 %2837  ;;  %v1871_v24 = vsel %vm1866_vm11, %v16287_v44, %v16286_v62  ;;  %v16289_v4 = vld [vmem:[#allocation79_spill] sm:$0xff]  ;;  %v16294_v41 = vld [vmem:[#allocation80_spill] sm:$0xff]  ;;  %v16301_v12 = vld [vmem:[#allocation22_spill] sm:$0xff] }
 0x5b4   :  { %4004 = vmatpush1.msra.mxu1 %v2984_v14  ;;  %3926 = vmatprep.subr.mxu0 %v1872_v8  ;;  %v16288_v14 = vld [vmem:[#allocation35_spill] sm:$0xff]  ;;  %v2920_v63 = vsel %vm2914_vm4, %v16289_v4, %v2905_v31 }
 0x5b5   :  { %4518 = vrot.lane.b32.xlu0 %v11336_v20, %s6905_s26  ;;  %3927 = vmatpush1.msra.mxu0 %v1874_v45  ;;  %v1873_v8 = vsel %vm1866_vm11, %v16288_v14, %v16287_v44  ;;  %v11713_v45 = vpop.permute.xlu0 %2841  ;;  %v16292_v44 = vld [vmem:[#allocation158_spill] sm:$0xff]  ;;  %v16293_v14 = vld [vmem:[#allocation160_spill] sm:$0xff] }
 0x5b6   :  { %4005 = vmatprep.subr.mxu1 %v2918_v10  ;;  %3928 = vmatprep.subr.mxu0 %v1871_v24  ;;  %v16290_v10 = vld [vmem:[#allocation71_spill] sm:$0xff]  ;;  %v16291_v24 = vld [vmem:[#allocation85_spill] sm:$0xff] }
 0x5b7   :  { %4448 = vrot.lane.b32.xlu1 %v11198_v6, %s6904_s25  ;;  %3929 = vmatpush1.msra.mxu0 %v1873_v8  ;;  %v1807_v62 = vsel %vm1801_vm12, %v16291_v24, %v16290_v10  ;;  %v1809_v31 = vsel %vm1801_vm12, %v16292_v44, %v16291_v24  ;;  %v2775_v4 = vpop.permute.xlu1 %2774  ;;  %v1806_v8 = vsel %vm1801_vm12, %v16294_v41, %v16293_v14  ;;  %v16296_v10 = vld [vmem:[#allocation49_spill] sm:$0xff] }
 0x5b8   :  { %4006 = vmatpush1.msra.mxu1 %v2920_v63  ;;  %3930 = vmatprep.subr.mxu0 %v1807_v62  ;;  %v16295_v62 = vld [vmem:[#allocation82_spill] sm:$0xff]  ;;  %v2919_v24 = vsel %vm2914_vm4, %v16296_v10, %v2903_v32  ;;  %v2853_v44 = vsel %vm2849_vm1, %v2840_v0, %v11685_v22  ;;  %v16302_v32 = vld [vmem:[#allocation88_spill] sm:$0xff] }
 0x5b9   :  { %4452 = vrot.lane.b32.xlu0 %v11142_v59, %s6904_s25  ;;  %3931 = vmatpush1.msra.mxu0 %v1809_v31  ;;  %v1808_v63 = vsel %vm1801_vm12, %v16295_v62, %v16294_v41  ;;  %v11741_v31 = vpop.permute.xlu0 %2778  ;;  %v664_v41 = vadd.f32 %v16301_v12, %v16300_v26  ;;  %v16307_v26 = vld [vmem:[#allocation155_spill] sm:$0xff] }
 0x5ba   :  { %4007 = vmatprep.subr.mxu1 %v2917_v27  ;;  %3932 = vmatprep.subr.mxu0 %v1806_v8  ;;  %v16297_v27 = vld [vmem:[#allocation151_spill] sm:$0xff]  ;;  %v16298_v8 = vld [vmem:[#allocation148_spill] sm:$0xff] }
 0x5bb   :  { %4440 = vrot.lane.b32.xlu1 %v11210_v54, %s6904_s25  ;;  %3933 = vmatpush1.msra.mxu0 %v1808_v63  ;;  %v1742_v14 = vsel %vm16299_vm0, %v16298_v8, %v16297_v27  ;;  %v1744_v10 = vsel %vm16303_vm15, %v16302_v32, %v16298_v8  ;;  %v2773_v62 = vpop.permute.xlu1 %2772  ;;  %v16304_v63 = vld [vmem:[#allocation149_spill] sm:$0xff]  ;;  %v2855_v8 = vsel %vm2849_vm1, %v11249_v37, %v2840_v0  ;;  %vm16311_vm0 = vcmp.lt.s32.totalorder %v8114_v33, 41 }
 0x5bc   :  { %4008 = vmatpush1.msra.mxu1 %v2919_v24  ;;  %3934 = vmatprep.subr.mxu0 %v1742_v14  ;;  %v16305_v24 = vld [vmem:[#allocation76_spill] sm:$0xff]  ;;  %v2852_v32 = vsel %vm2849_vm1, %v2838_v19, %v11713_v45  ;;  %vm16313_vm15 = vmmov %vm16311_vm0 }
 0x5bd   :  { %4444 = vrot.lane.b32.xlu0 %v11180_v17, %s6904_s25  ;;  %3935 = vmatpush1.msra.mxu0 %v1744_v10  ;;  %v1741_v22 = vsel %vm16306_vm13, %v16305_v24, %v16304_v63  ;;  %v1743_v14 = vsel %vm16308_vm14, %v16307_v26, %v16305_v24  ;;  %v11771_v10 = vpop.permute.xlu0 %2776  ;;  %v16312_v63 = vld [vmem:[#allocation20_spill] sm:$0xff]  ;;  %v16314_v24 = vld [vmem:[#allocation143_spill] sm:$0xff]  ;;  %vm16316_vm13 = vmmov %vm16311_vm0 }
 0x5be   :  { %4009 = vmatprep.subr.mxu1 %v2853_v44  ;;  %3936 = vmatprep.subr.mxu0 %v1741_v22  ;;  %v16309_v22 = vld [vmem:[#allocation150_spill] sm:$0xff]  ;;  %v16310_v44 = vld [vmem:[#allocation141_spill] sm:$0xff]  ;;  %v11778_v27 = vmul.f32 %v16312_v63, %v664_v41  ;;  %v16315_v26 = vld [vmem:[#allocation140_spill] sm:$0xff] }
 0x5bf   :  { %4446 = vrot.lane.b32.xlu1 %v11290_v36, %s6904_s25  ;;  %3937 = vmatpush1.msra.mxu0 %v1743_v14  ;;  %v1677_v12 = vsel %vm16311_vm0, %v16310_v44, %v16309_v22  ;;  %v1679_v37 = vsel %vm16313_vm15, %v16173_v40, %v16310_v44  ;;  %v2711_v0 = vpop.permute.xlu1 %2710  ;;  %v1676_v14 = vsel %vm16316_vm13, %v16315_v26, %v16314_v24  ;;  %vm16317_vm14 = vmmov %vm16311_vm0  ;;  %vm16318_vm0 = vcmp.lt.s32.totalorder %v8114_v33, 106  ;;  %v16320_v44 = vld [vmem:[#allocation134_spill] sm:$0xff] }
 0x5c0   :  { %4010 = vmatpush1.msra.mxu1 %v2855_v8  ;;  %3938 = vmatprep.subr.mxu0 %v1677_v12  ;;  %v1678_v12 = vsel %vm16317_vm14, %v16178_v21, %v16315_v26  ;;  %v2854_v40 = vsel %vm2849_vm1, %v11283_v13, %v2838_v19  ;;  %v2788_v41 = vsel %vm16318_vm0, %v2775_v4, %v11741_v31  ;;  %vm16321_vm15 = vcmp.lt.s32.totalorder %v8114_v33, 42  ;;  %v16323_v19 = vld [vmem:[#allocation30_spill] sm:$0xff] }
 0x5c1   :  { %4450 = vrot.lane.b32.xlu0 %v11236_v60, %s6904_s25  ;;  %3939 = vmatpush1.msra.mxu0 %v1679_v37  ;;  %v11802_v8 = vpop.permute.xlu0 %2714  ;;  %vm16322_vm13 = vmmov %vm16321_vm15  ;;  %v656_v26 = vadd.f32 %v16160_v56, %v16323_v19  ;;  %v16331_v19 = vld [vmem:[#allocation228_spill] sm:$0xff]  ;;  %v16370_v56 = vld [vmem:[#allocation238_spill] sm:$0xff] }
 0x5c2   :  { %4011 = vmatprep.subr.mxu1 %v2852_v32  ;;  %3940 = vmatprep.subr.mxu0 %v1676_v14  ;;  %v16319_v32 = vld [vmem:[#allocation136_spill] sm:$0xff]  ;;  %v1614_v21 = vsel %vm16322_vm13, %v16181_v48, %v16320_v44  ;;  %v16324_v14 = vld [vmem:[#allocation135_spill] sm:$0xff]  ;;  %vm16326_vm14 = vmmov %vm16322_vm13 }
 0x5c3   :  { %4468 = vrot.lane.b32.xlu1 %v11778_v27, %s6904_s25  ;;  %3941 = vmatpush1.msra.mxu0 %v1678_v12  ;;  %v1612_v37 = vsel %vm16321_vm15, %v16320_v44, %v16319_v32  ;;  %v2709_v13 = vpop.permute.xlu1 %2708  ;;  %v16325_v12 = vld [vmem:[#allocation129_spill] sm:$0xff]  ;;  %vm16327_vm0 = vmmov %vm16322_vm13  ;;  %vm16328_vm15 = vcmp.lt.s32.totalorder %v8114_v33, 106 }
 0x5c4   :  { %4012 = vmatpush1.msra.mxu1 %v2854_v40  ;;  %3942 = vmatprep.subr.mxu0 %v1612_v37  ;;  %v1611_v40 = vsel %vm16326_vm14, %v16325_v12, %v16324_v14  ;;  %v1613_v48 = vsel %vm16327_vm0, %v16184_v34, %v16325_v12  ;;  %v2790_v44 = vsel %vm16328_vm15, %v11316_v58, %v2775_v4  ;;  %vm16329_vm13 = vmmov %vm16328_vm15  ;;  %vm16332_vm14 = vcmp.lt.s32.totalorder %v8114_v33, 110  ;;  %v16334_v12 = vld [vmem:[#allocation229_spill] sm:$0xff] }
 0x5c5   :  { %4438 = vrot.lane.b32.xlu0 %v11336_v20, %s6904_s25  ;;  %3943 = vmatpush1.msra.mxu0 %v1614_v21  ;;  %v2787_v37 = vsel %vm16329_vm13, %v2773_v62, %v11771_v10  ;;  %v11832_v21 = vpop.permute.xlu0 %2712  ;;  %vm16333_vm0 = vmmov %vm16332_vm14  ;;  %v11847_v4 = vmul.f32 %v16312_v63, %v656_v26 }
 0x5c6   :  { %4013 = vmatprep.subr.mxu1 %v2788_v41  ;;  %3944 = vmatprep.subr.mxu0 %v1611_v40  ;;  %v16330_v41 = vld [vmem:[#allocation230_spill] sm:$0xff]  ;;  %v2533_v34 = vsel %vm16333_vm0, %v10498_v29, %v16331_v19  ;;  %vm16336_vm15 = vmmov %vm16333_vm0 }
 0x5c7   :  { %4442 = vrot.lane.b32.xlu1 %v11272_v28, %s6904_s25  ;;  %3945 = vmatpush1.msra.mxu0 %v1613_v48  ;;  %v2531_v40 = vsel %vm16332_vm14, %v16331_v19, %v16330_v41  ;;  %v11844_v58 = vpop.permute.xlu1 %3099  ;;  %v16335_v48 = vld [vmem:[#allocation227_spill] sm:$0xff]  ;;  %vm16337_vm13 = vmmov %vm16333_vm0  ;;  %vm16338_vm14 = vcmp.lt.s32.totalorder %v8114_v33, 106  ;;  %vm16339_vm0 = vcmp.lt.s32.totalorder %v8114_v33, 107 }
 0x5c8   :  { %4014 = vmatpush1.msra.mxu1 %v2790_v44  ;;  %3946 = vmatprep.subr.mxu0 %v2531_v40  ;;  %v2530_v44 = vsel %vm16336_vm15, %v16335_v48, %v16334_v12  ;;  %v2532_v29 = vsel %vm16337_vm13, %v10487_v30, %v16335_v48  ;;  %v2789_v26 = vsel %vm16338_vm14, %v11347_v49, %v2773_v62  ;;  %vm16342_vm15 = vcmp.lt.s32.totalorder %v8114_v33, 126  ;;  %v16344_v62 = vld [vmem:[#allocation221_spill] sm:$0xff]  ;;  %v16345_v48 = vld [vmem:[#allocation219_spill] sm:$0xff] }
 0x5c9   :  { %4384 = vrot.lane.b32.xlu0 %v11198_v6, %s6903_s12  ;;  %3947 = vmatpush2.msra.mxu0 %v2533_v34  ;;  %v2723_v19 = vsel %vm16339_vm0, %v2711_v0, %v11802_v8  ;;  %v11865_v40 = vpop.permute.xlu0 %3103  ;;  %v16341_v34 = vld [vmem:[#allocation220_spill] sm:$0xff]  ;;  %vm16343_vm13 = vmmov %vm16342_vm15 }
 0x5ca   :  { %4015 = vmatprep.subr.mxu1 %v2787_v37  ;;  %3948 = vmatprep.subr.mxu0 %v2530_v44  ;;  %v16340_v37 = vld [vmem:[#allocation222_spill] sm:$0xff]  ;;  %v2468_v30 = vsel %vm16343_vm13, %v16191_v1, %v16341_v34  ;;  %vm16346_vm14 = vmmov %vm16343_vm13 }
 0x5cb   :  { %4388 = vrot.lane.b32.xlu1 %v11142_v59, %s6903_s12  ;;  %3949 = vmatpush2.msra.mxu0 %v2532_v29  ;;  %v2466_v44 = vsel %vm16342_vm15, %v16341_v34, %v16340_v37  ;;  %v11877_v49 = vpop.permute.xlu1 %3097  ;;  %v2465_v29 = vsel %vm16346_vm14, %v16345_v48, %v16344_v62  ;;  %vm16347_vm0 = vmmov %vm16343_vm13  ;;  %vm16348_vm15 = vcmp.lt.s32.totalorder %v8114_v33, 107  ;;  %vm16352_vm14 = vcmp.lt.s32.totalorder %v8114_v33, 127 }
 0x5cc   :  { %4016 = vmatpush1.msra.mxu1 %v2789_v26  ;;  %3950 = vmatprep.subr.mxu0 %v2466_v44  ;;  %v2467_v26 = vsel %vm16347_vm0, %v16195_v51, %v16345_v48  ;;  %v2725_v1 = vsel %vm16348_vm15, %v11375_v2, %v2711_v0  ;;  %vm16349_vm13 = vmmov %vm16348_vm15  ;;  %v16354_v0 = vld [vmem:[#allocation209_spill] sm:$0xff]  ;;  %v16355_v48 = vld [vmem:[#allocation207_spill] sm:$0xff] }
 0x5cd   :  { %4466 = vrot.lane.b32.xlu0 %v11847_v4, %s6904_s25  ;;  %3951 = vmatpush2.msra.mxu0 %v2468_v30  ;;  %v2722_v34 = vsel %vm16349_vm13, %v2709_v13, %v11832_v21  ;;  %v11895_v44 = vpop.permute.xlu0 %3101  ;;  %v16351_v30 = vld [vmem:[#allocation208_spill] sm:$0xff]  ;;  %vm16353_vm0 = vmmov %vm16352_vm14 }
 0x5ce   :  { %4017 = vmatprep.subr.mxu1 %v2723_v19  ;;  %3952 = vmatprep.subr.mxu0 %v2465_v29  ;;  %v16350_v19 = vld [vmem:[#allocation210_spill] sm:$0xff]  ;;  %v2403_v51 = vsel %vm16353_vm0, %v16199_v47, %v16351_v30  ;;  %vm16356_vm15 = vmmov %vm16353_vm0 }
 0x5cf   :  { %4376 = vrot.lane.b32.xlu1 %v11210_v54, %s6903_s12  ;;  %3953 = vmatpush2.msra.mxu0 %v2467_v26  ;;  %v2401_v29 = vsel %vm16352_vm14, %v16351_v30, %v16350_v19  ;;  %v11907_v2 = vpop.permute.xlu1 %3042  ;;  %v2400_v26 = vsel %vm16356_vm15, %v16355_v48, %v16354_v0  ;;  %vm16357_vm13 = vmmov %vm16353_vm0  ;;  %vm16358_vm14 = vcmp.lt.s32.totalorder %v8114_v33, 107  ;;  %vm16369_vm0 = vcmp.lt.s32.totalorder %v8114_v33, 1  ;;  %v16374_v0 = vld [vmem:[#allocation132_spill] sm:$0xff]  ;;  %v16377_v19 = vld [vmem:[#allocation235_spill] sm:$0xff] }
 0x5d0   :  { %4018 = vmatpush1.msra.mxu1 %v2725_v1  ;;  %3954 = vmatprep.subr.mxu0 %v2401_v29  ;;  %v2402_v1 = vsel %vm16357_vm13, %v16203_v43, %v16355_v48  ;;  %v2724_v47 = vsel %vm16358_vm14, %v11400_v53, %v2709_v13  ;;  %v16359_v29 = vld [vmem:[#allocation246_spill] sm:$0xff]  ;;  %v16362_v43 = vld [vmem:[#allocation185_spill] sm:$0xff]  ;;  %v16363_v13 = vld [vmem:[#allocation187_spill] sm:$0xff] }
 0x5d1   :  { %4380 = vrot.lane.b32.xlu0 %v11180_v17, %s6903_s12  ;;  %3955 = vmatpush2.msra.mxu0 %v2403_v51  ;;  %v11922_v30 = vpop.permute.xlu0 %3040  ;;  %v16360_v51 = vld [vmem:[#allocation244_spill] sm:$0xff]  ;;  %v16364_v48 = vld [vmem:[#allocation245_spill] sm:$0xff]  ;;  %vm16372_vm15 = vmmov %vm16369_vm0 }
 0x5d2   :  { %4019 = vmatprep.subr.mxu1 %v2722_v34  ;;  %3956 = vmatprep.subr.mxu0 %v2400_v26  ;;  %v2659_v34 = vsel %vm1242_vm8, %v16360_v51, %v16359_v29  ;;  %v16361_v26 = vld [vmem:[#allocation189_spill] sm:$0xff]  ;;  %v2661_v53 = vsel %vm1242_vm8, %v10729_v11, %v16360_v51  ;;  %v16366_v11 = vld [vmem:[#allocation183_spill] sm:$0xff]  ;;  %v16367_v51 = vld [vmem:[#allocation196_spill] sm:$0xff] }
 0x5d3   :  { %4382 = vrot.lane.b32.xlu1 %v11290_v36, %s6903_s12  ;;  %3957 = vmatpush2.msra.mxu0 %v2402_v1  ;;  %v11929_v63 = vpop.permute.xlu1 %2977  ;;  %v16365_v1 = vld [vmem:[#allocation243_spill] sm:$0xff]  ;;  %vm16375_vm13 = vmmov %vm16369_vm0 }
 0x5d4   :  { %4020 = vmatpush1.msra.mxu1 %v2724_v47  ;;  %3958 = vmatprep.subr.mxu0 %v16361_v26  ;;  %v2658_v47 = vsel %vm1242_vm8, %v16365_v1, %v16364_v48  ;;  %v2660_v26 = vsel %vm1242_vm8, %v10725_v55, %v16365_v1  ;;  %v16371_v55 = vld [vmem:[#allocation236_spill] sm:$0xff]  ;;  %vm16378_vm14 = vmmov %vm16369_vm0 }
 0x5d5   :  { %4021 = vmatprep.subr.mxu1 %v2659_v34  ;;  %4386 = vrot.lane.b32.xlu0 %v11236_v60, %s6903_s12  ;;  %v11943_v34 = vpop.permute.xlu0 %2975  ;;  %v2595_v1 = vsel %vm1169_vm7, %v16371_v55, %v16370_v56 }
 0x5d6   :  { %3959 = vmatpush2.msra.mxu0 %v16362_v43  ;;  %4022 = vmatpush1.msra.mxu1 %v2661_v53  ;;  %v16368_v43 = vld [vmem:[#allocation194_spill] sm:$0xff] }
 0x5d7   :  { %3960 = vmatprep.subr.mxu0 %v16363_v13  ;;  %4023 = vmatprep.subr.mxu1 %v2658_v47  ;;  %v2323_v53 = vsel %vm16369_vm0, %v16368_v43, %v16367_v51  ;;  %v11956_v13 = vpop.permute.xlu1 %2912  ;;  %v11961_v47 = vld [vmem:[%s14814_s4 + $0x28] sm:$0xff]  ;;  %v16373_v51 = vld [vmem:[#allocation195_spill] sm:$0xff]  ;;  %vm16381_vm0 = vcmp.lt.s32.totalorder %v8114_v33, 2 }
 0x5d8   :  { %4404 = vrot.lane.b32.xlu1 %v11778_v27, %s6903_s12  ;;  %3961 = vmatpush2.msra.mxu0 %v16366_v11 }
 0x5d9   :  { %4024 = vmatpush1.msra.mxu1 %v2660_v26  ;;  %3818 = vmatprep.mubr.f32.mxu1 %v11961_v47  ;;  %v2325_v26 = vsel %vm16372_vm15, %v16210_v3, %v16368_v43  ;;  %v11974_v11 = vpop.permute.xlu0 %2910  ;;  %v2322_v3 = vsel %vm16375_vm13, %v16374_v0, %v16373_v51  ;;  %v16376_v43 = vld [vmem:[#allocation237_spill] sm:$0xff]  ;;  %v12015_v51 = vld [vmem:[%s14814_s4 + $0x48] sm:$0xff]  ;;  %vm16382_vm15 = vmmov %vm16381_vm0 }
 0x5da   :  { %3962 = vmatprep.subr.mxu0 %v2323_v53  ;;  %4025 = vmatprep.subr.mxu1 %v2595_v1  ;;  %v11979_v53 = vld [vmem:[%s14814_s4 + $0x20] sm:$0xff]  ;;  %v2597_v1 = vsel %vm1169_vm7, %v10652_v15, %v16371_v55  ;;  %v2594_v62 = vsel %vm1169_vm7, %v16377_v19, %v16376_v43  ;;  %v2324_v15 = vsel %vm16378_vm14, %v16215_v7, %v16374_v0  ;;  %vm16385_vm13 = vmmov %vm16381_vm0 }
 0x5db   :  { %4374 = vrot.lane.b32.xlu0 %v11336_v20, %s6903_s12  ;;  %3819 = vmatmul.mubr.f32.gmra.mxu1 %v11979_v53  ;;  %v11994_v56 = vpop.permute.xlu1 %2847  ;;  %v2596_v55 = vsel %vm1169_vm7, %v10648_v50, %v16377_v19  ;;  %v3113_v50 = vsel %vm3109_vm9, %v11844_v58, %v11865_v40  ;;  %v12033_v0 = vld [vmem:[%s14814_s4 + $0x40] sm:$0xff]  ;;  %vm16386_vm14 = vmmov %vm16381_vm0 }
 0x5dc   :  { %3963 = vmatpush2.msra.mxu0 %v2325_v26  ;;  %4026 = vmatpush1.msra.mxu1 %v2597_v1  ;;  %v16379_v26 = vld [vmem:[#allocation61_spill] sm:$0xff]  ;;  %v16380_v1 = vld [vmem:[#allocation64_spill] sm:$0xff] }
 0x5dd   :  { %3964 = vmatprep.subr.mxu0 %v2322_v3  ;;  %4027 = vmatprep.subr.mxu1 %v2594_v62  ;;  %v2259_v62 = vsel %vm16381_vm0, %v16380_v1, %v16379_v26  ;;  %v12010_v3 = vpop.permute.xlu0 %2845  ;;  %v2261_v7 = vsel %vm16382_vm15, %v16219_v57, %v16380_v1  ;;  %v3112_v1 = vsel %vm3109_vm9, %v11877_v49, %v11895_v44  ;;  %vm16389_vm0 = vcmp.lt.s32.totalorder %v8114_v33, 18 }
 0x5de   :  { %4378 = vrot.lane.b32.xlu1 %v11272_v28, %s6903_s12  ;;  %3965 = vmatpush2.msra.mxu0 %v2324_v15  ;;  %v3115_v15 = vsel %vm3109_vm9, %v11419_v16, %v11844_v58  ;;  %v3114_v58 = vsel %vm3109_vm9, %v11457_v39, %v11877_v49  ;;  %vm16390_vm15 = vcmask 130048   ;;  %v12075_v39 = vld [vmem:[%s14814_s4 + $0x18] sm:$0xff] }
 0x5df   :  { %4028 = vmatpush1.msra.mxu1 %v2596_v55  ;;  %3824 = vmatprep.mubr.f32.mxu1 %v12015_v51  ;;  %v12028_v19 = vpop.permute.xlu1 %2782  ;;  %v16383_v55 = vld [vmem:[#allocation125_spill] sm:$0xff] }
 0x5e0   :  { %3966 = vmatprep.subr.mxu0 %v2259_v62  ;;  %4057 = vmatprep.subr.mxu1 %v3113_v50  ;;  %v16384_v62 = vld [vmem:[#allocation131_spill] sm:$0xff] }
 0x5e1   :  { %4320 = vrot.lane.b32.xlu0 %v11198_v6, %s6902_s30  ;;  %3825 = vmatmul.mubr.f32.gmra.mxu1 %v12033_v0  ;;  %v2258_v57 = vsel %vm16385_vm13, %v16384_v62, %v16383_v55  ;;  %v12048_v50 = vpop.permute.xlu0 %2780  ;;  %v2260_v16 = vsel %vm16386_vm14, %v16223_v35, %v16384_v62  ;;  %v16391_v55 = vld [vmem:[#allocation108_spill] sm:$0xff]  ;;  %v16392_v35 = vld [vmem:[#allocation121_spill] sm:$0xff]  ;;  %vm16393_vm13 = vmmov %vm16390_vm15 }
 0x5e2   :  { %3967 = vmatpush2.msra.mxu0 %v2261_v7  ;;  %4058 = vmatpush2.msra.mxu1 %v3115_v15  ;;  %v16387_v7 = vld [vmem:[#allocation114_spill] sm:$0xff]  ;;  %v16388_v15 = vld [vmem:[#allocation119_spill] sm:$0xff]  ;;  %v2061_v62 = vsel %vm877_vm3, %v16392_v35, %v16391_v55  ;;  %vm16394_vm14 = vmmov %vm16389_vm0 }
 0x5e3   :  { %3968 = vmatprep.subr.mxu0 %v2258_v57  ;;  %4059 = vmatprep.subr.mxu1 %v3112_v1  ;;  %v2194_v57 = vsel %vm16389_vm0, %v16388_v15, %v16387_v7  ;;  %v12064_v1 = vpop.permute.xlu1 %2718  ;;  %v12091_v55 = vld [vmem:[%s14814_s4 + $0x10] sm:$0xff] }
 0x5e4   :  { %4324 = vrot.lane.b32.xlu1 %v11142_v59, %s6902_s30  ;;  %3969 = vmatpush2.msra.mxu0 %v2260_v16  ;;  %v2063_v16 = vsel %vm877_vm3, %v16249_v25, %v16392_v35 }
 0x5e5   :  { %4060 = vmatpush2.msra.mxu1 %v3114_v58  ;;  %6821 = vmatprep.mubr.msk.f32.mxu0 %vm16390_vm15, %v11486_v61  ;;  %v12079_v49 = vpop.permute.xlu0 %2716  ;;  %v2196_v61 = vsel %vm16394_vm14, %v16228_v18, %v16388_v15  ;;  %v16395_v58 = vld [vmem:[#allocation120_spill] sm:$0xff]  ;;  %v16397_v18 = vld [vmem:[#allocation95_spill] sm:$0xff]  ;;  %v16398_v15 = vld [vmem:[#allocation106_spill] sm:$0xff]  ;;  %vm16403_vm14 = vcmask 130048  }
 0x5e6   :  { %3970 = vmatprep.subr.mxu0 %v2194_v57  ;;  %6823 = vmatprep.mubr.msk.f32.mxu1 %vm16393_vm13, %v12075_v39  ;;  %vm16399_vm15 = vmmov %vm16389_vm0  ;;  %v2062_v35 = vsel %vm877_vm3, %v16259_v42, %v16398_v15  ;;  %vm16402_vm13 = vcmp.lt.s32.totalorder %v8114_v33, 19 }
 0x5e7   :  { %4080 = vmatprep.subr.mxu1 %v2061_v62  ;;  %4402 = vrot.lane.b32.xlu0 %v11847_v4, %s6903_s12  ;;  %v12102_v62 = vpop.permute.xlu1 %3107 }
 0x5e8   :  { %3902 = vmatmul.mubr.f32.gmra.mxu0 %v11497_v46  ;;  %4062 = vmatmul.mubr.f32.vlgmr.msra.gmra.mxu1 %v12091_v55  ;;  %v16396_v46 = vld [vmem:[#allocation113_spill] sm:$0xff] }
 0x5e9   :  { %3971 = vmatpush2.msra.mxu0 %v2196_v61  ;;  %v2193_v57 = vsel %vm16389_vm0, %v16396_v46, %v16395_v58  ;;  %4081 = vmatpush1.msra.mxu1 %v2063_v16  ;;  %v2060_v61 = vsel %vm877_vm3, %v16398_v15, %v16397_v18  ;;  %v2195_v25 = vsel %vm16399_vm15, %v16234_v5, %v16396_v46  ;;  %v12118_v16 = vpop.permute.xlu0 %3105  ;;  %v16401_v18 = vld [vmem:[#allocation67_spill] sm:$0xff]  ;;  %v16404_v58 = vld [vmem:[#allocation37_spill] sm:$0xff]  ;;  %vm16407_vm0 = vmmov %vm16402_vm13 }
 0x5ea   :  { %3972 = vmatprep.subr.mxu0 %v2193_v57  ;;  %4082 = vmatprep.subr.mxu1 %v2060_v61  ;;  %v16400_v57 = vld [vmem:[#allocation41_spill] sm:$0xff]  ;;  %v16409_v15 = vld [vmem:[#allocation44_spill] sm:$0xff]  ;;  %vm16413_vm15 = vmmov %vm16407_vm0 }
 0x5eb   :  { %4312 = vrot.lane.b32.xlu1 %v11210_v54, %s6902_s30  ;;  %3973 = vmatpush2.msra.mxu0 %v2195_v25  ;;  %v2129_v61 = vsel %vm16402_vm13, %v16401_v18, %v16400_v57  ;;  %v16405_v5 = vld [vmem:[#allocation53_spill] sm:$0xff]  ;;  %v12130_v7 = vpop.permute.xlu1 %4660  ;;  %vm16415_vm13 = vmmov %vm16407_vm0 }
 0x5ec   :  { %4083 = vmatpush1.msra.mxu1 %v2062_v35  ;;  %6822 = vmatprep.mubr.msk.f32.mxu0 %vm16403_vm14, %v11539_v52  ;;  %v1997_v46 = vsel %vm804_vm5, %v16405_v5, %v16404_v58  ;;  %16406 = vst [vmem:[#allocation24_spill] sm:$0xff] %v12130_v7  ;;  %v1999_v42 = vsel %vm804_vm5, %v16263_v9, %v16405_v5  ;;  %v16408_v58 = vld [vmem:[#allocation65_spill] sm:$0xff] }
 0x5ed   :  { %3974 = vmatprep.subr.mxu0 %v2129_v61  ;;  %4084 = vmatprep.subr.mxu1 %v1997_v46  ;;  %v2131_v52 = vsel %vm16407_vm0, %v16241_v23, %v16401_v18  ;;  %v1996_v25 = vsel %vm804_vm5, %v16409_v15, %v16408_v58  ;;  %v12147_v35 = vpop.permute.xlu0 %4664  ;;  %v16411_v61 = vld [vmem:[#allocation38_spill] sm:$0xff]  ;;  %v16416_v18 = vld [vmem:[#allocation89_spill] sm:$0xff]  ;;  %v16418_v58 = vld [vmem:[#allocation48_spill] sm:$0xff] }
 0x5ee   :  { %4316 = vrot.lane.b32.xlu0 %v11180_v17, %s6902_s30  ;;  %3908 = vmatmul.mubr.f32.gmra.mxu0 %v11547_v38  ;;  %16410 = vst [vmem:[#allocation12_spill] sm:$0xff] %v12147_v35  ;;  %v16412_v46 = vld [vmem:[#allocation130_spill] sm:$0xff]  ;;  %v16414_v38 = vld [vmem:[#allocation107_spill] sm:$0xff]  ;;  %v1998_v5 = vsel %vm804_vm5, %v16416_v18, %v16409_v15 }
 0x5ef   :  { %4085 = vmatpush1.msra.mxu1 %v1999_v42  ;;  %3975 = vmatpush2.msra.mxu0 %v2131_v52  ;;  %v2128_v9 = vsel %vm16413_vm15, %v16412_v46, %v16411_v61  ;;  %v2130_v23 = vsel %vm16415_vm13, %v16414_v38, %v16412_v46  ;;  %v12163_v42 = vpop.permute.xlu1 %4652  ;;  %v16417_v52 = vld [vmem:[#allocation40_spill] sm:$0xff]  ;;  %v16420_v46 = vld [vmem:[#allocation249_spill] sm:$0xff]  ;;  %v16421_v15 = vld [vmem:[#allocation46_spill] sm:$0xff] }
 0x5f0   :  { %4086 = vmatprep.subr.mxu1 %v1996_v25  ;;  %3976 = vmatprep.subr.mxu0 %v2128_v9  ;;  %v1933_v25 = vsel %vm1931_vm10, %v16418_v58, %v16417_v52  ;;  %v16419_v9 = vld [vmem:[#allocation166_spill] sm:$0xff]  ;;  %v3060_v38 = vsel %vm3044_vm2, %v11907_v2, %v16420_v46  ;;  %v16422_v18 = vld [vmem:[#allocation31_spill] sm:$0xff] }
 0x5f1   :  { %4318 = vrot.lane.b32.xlu1 %v11290_v36, %s6902_s30  ;;  %3977 = vmatpush2.msra.mxu0 %v2130_v23  ;;  %v12174_v7 = vpop.permute.xlu0 %4656  ;;  %v1935_v23 = vsel %vm1931_vm10, %v16421_v15, %v16418_v58  ;;  %v16426_v35 = vld [vmem:[#allocation250_spill] sm:$0xff] }
 0x5f2   :  { %4087 = vmatpush1.msra.mxu1 %v1998_v5  ;;  %3978 = vmatprep.mubr.f32.mxu0 %v16419_v9  ;;  %v16423_v5 = vld [vmem:[#allocation170_spill] sm:$0xff]  ;;  %v16425_v9 = vld [vmem:[#allocation63_spill] sm:$0xff]  ;;  %v3059_v58 = vsel %vm3044_vm2, %v11922_v30, %v16426_v35  ;;  %v16431_v35 = vld [vmem:[#allocation52_spill] sm:$0xff] }
 0x5f3   :  { %4088 = vmatprep.subr.mxu1 %v1933_v25  ;;  %4163 = vmatprep.subr.mxu0 %v3060_v38  ;;  %v3046_v52 = vsel %vm3044_vm2, %v16423_v5, %v11907_v2  ;;  %v16424_v25 = vld [vmem:[#allocation78_spill] sm:$0xff]  ;;  %v12191_v38 = vpop.permute.xlu1 %4648 }
 0x5f4   :  { %4322 = vrot.lane.b32.xlu0 %v11236_v60, %s6902_s30  ;;  %3979 = vmatmul.mubr.f32.vlgmr.msra.gmra.mxu0 %v16422_v18  ;;  %v1932_v46 = vsel %vm1931_vm10, %v16425_v9, %v16424_v25  ;;  %v16427_v2 = vld [vmem:[#allocation42_spill] sm:$0xff] }
 0x5f5   :  { %4089 = vmatpush1.msra.mxu1 %v1935_v23  ;;  %4164 = vmatpush1.msra.mxu0 %v3046_v52  ;;  %v1934_v15 = vsel %vm1931_vm10, %v16427_v2, %v16425_v9  ;;  %v16428_v23 = vld [vmem:[#allocation66_spill] sm:$0xff]  ;;  %v12207_v5 = vpop.permute.xlu0 %4658  ;;  %v16430_v52 = vld [vmem:[#allocation57_spill] sm:$0xff]  ;;  %v16433_v9 = vld [vmem:[#allocation164_spill] sm:$0xff] }
 0x5f6   :  { %4090 = vmatprep.subr.mxu1 %v1932_v46  ;;  %4165 = vmatprep.subr.mxu0 %v3059_v58  ;;  %v3045_v18 = vsel %vm3044_vm2, %v16428_v23, %v11922_v30  ;;  %16429 = vst [vmem:[#allocation192_spill] sm:$0xff] %v12207_v5  ;;  %v1868_v25 = vsel %vm1866_vm11, %v16431_v35, %v16430_v52  ;;  %v16432_v46 = vld [vmem:[#allocation251_spill] sm:$0xff]  ;;  %v16436_v52 = vld [vmem:[#allocation165_spill] sm:$0xff]  ;;  %vm16452_vm2 = vcmp.lt.s32.totalorder %v8114_v33, 40 }
 0x5f7   :  { %4340 = vrot.lane.b32.xlu1 %v11778_v27, %s6902_s30  ;;  %4091 = vmatpush1.msra.mxu1 %v1934_v15  ;;  %v2995_v58 = vsel %vm2979_vm6, %v11929_v63, %v16432_v46  ;;  %v1870_v30 = vsel %vm1866_vm11, %v16433_v9, %v16431_v35  ;;  %v12221_v2 = vpop.permute.xlu1 %4662  ;;  %v16434_v15 = vld [vmem:[#allocation14_spill] sm:$0xff]  ;;  %v16437_v46 = vld [vmem:[#allocation252_spill] sm:$0xff]  ;;  %vm16463_vm10 = vmmov %vm16452_vm2 }
 0x5f8   :  { %4166 = vmatpush1.msra.mxu0 %v3045_v18  ;;  %4092 = vmatprep.subr.mxu1 %v1868_v25  ;;  %v2981_v23 = vsel %vm2979_vm6, %v16434_v15, %v11929_v63  ;;  %v16435_v18 = vld [vmem:[#allocation90_spill] sm:$0xff]  ;;  %v2994_v35 = vsel %vm2979_vm6, %v11943_v34, %v16437_v46  ;;  %v16438_v63 = vld [vmem:[#allocation163_spill] sm:$0xff]  ;;  %v16442_v46 = vld [vmem:[#allocation253_spill] sm:$0xff] }
 0x5f9   :  { %4167 = vmatprep.subr.mxu0 %v2995_v58  ;;  %4310 = vrot.lane.b32.xlu0 %v11336_v20, %s6902_s30  ;;  %v1867_v25 = vsel %vm1866_vm11, %v16436_v52, %v16435_v18  ;;  %v12237_v58 = vpop.permute.xlu0 %4650  ;;  %v1869_v9 = vsel %vm1866_vm11, %v16438_v63, %v16436_v52  ;;  %v16441_v18 = vld [vmem:[#allocation182_spill] sm:$0xff]  ;;  %v16443_v52 = vld [vmem:[#allocation71_spill] sm:$0xff]  ;;  %v16444_v63 = vld [vmem:[#allocation161_spill] sm:$0xff]  ;;  %vm16466_vm11 = vcmp.lt.s32.totalorder %v8114_v33, 41 }
 0x5fa   :  { %4093 = vmatpush1.msra.mxu1 %v1870_v30  ;;  %4168 = vmatpush1.msra.mxu0 %v2981_v23  ;;  %v16439_v30 = vld [vmem:[#allocation168_spill] sm:$0xff] }
 0x5fb   :  { %4094 = vmatprep.subr.mxu1 %v1867_v25  ;;  %4169 = vmatprep.subr.mxu0 %v2994_v35  ;;  %v2980_v15 = vsel %vm2979_vm6, %v16439_v30, %v11943_v34  ;;  %v16440_v23 = vld [vmem:[#allocation184_spill] sm:$0xff]  ;;  %v2930_v35 = vsel %vm2914_vm4, %v11956_v13, %v16442_v46  ;;  %v12257_v5 = vpop.permute.xlu1 %4654  ;;  %v1805_v34 = vsel %vm1801_vm12, %v16443_v52, %v16441_v18  ;;  %v16445_v30 = vld [vmem:[#allocation190_spill] sm:$0xff]  ;;  %v16449_v52 = vld [vmem:[#allocation13_spill] sm:$0xff] }
 0x5fc   :  { %4314 = vrot.lane.b32.xlu1 %v11272_v28, %s6902_s30  ;;  %4095 = vmatpush1.msra.mxu1 %v1869_v9  ;;  %v1803_v25 = vsel %vm1801_vm12, %v16441_v18, %v16440_v23  ;;  %v2916_v9 = vsel %vm2914_vm4, %v16444_v63, %v11956_v13  ;;  %v16447_v46 = vld [vmem:[#allocation254_spill] sm:$0xff]  ;;  %v16448_v13 = vld [vmem:[#allocation160_spill] sm:$0xff]  ;;  %vm16460_vm6 = vmmov %vm16452_vm2 }
 0x5fd   :  { %4170 = vmatpush1.msra.mxu0 %v2980_v15  ;;  %4096 = vmatprep.subr.mxu1 %v1803_v25  ;;  %v16446_v15 = vld [vmem:[#allocation188_spill] sm:$0xff]  ;;  %v12273_v25 = vpop.permute.xlu0 %4596  ;;  %v2929_v18 = vsel %vm2914_vm4, %v11974_v11, %v16447_v46  ;;  %v16453_v46 = vld [vmem:[#allocation255_spill] sm:$0xff] }
 0x5fe   :  { %4171 = vmatprep.subr.mxu0 %v2930_v35  ;;  %4256 = vrot.lane.b32.xlu0 %v11198_v6, %s6901_s29  ;;  %v1802_v23 = vsel %vm1801_vm12, %v16446_v15, %v16445_v30  ;;  %v1804_v35 = vsel %vm1801_vm12, %v16448_v13, %v16446_v15  ;;  %v16451_v30 = vld [vmem:[#allocation72_spill] sm:$0xff]  ;;  %v16454_v15 = vld [vmem:[#allocation151_spill] sm:$0xff]  ;;  %vm16468_vm12 = vcmp.lt.s32.totalorder %v8114_v33, 106 }
 0x5ff   :  { %4097 = vmatpush1.msra.mxu1 %v1805_v34  ;;  %4172 = vmatpush1.msra.mxu0 %v2916_v9  ;;  %v2915_v34 = vsel %vm2914_vm4, %v16449_v52, %v11974_v11  ;;  %v12289_v63 = vpop.permute.xlu1 %4600  ;;  %v16450_v9 = vld [vmem:[#allocation156_spill] sm:$0xff]  ;;  %vm16455_vm4 = vmmov %vm16452_vm2 }
 0x600   :  { %4098 = vmatprep.subr.mxu1 %v1802_v23  ;;  %4173 = vmatprep.subr.mxu0 %v2929_v18  ;;  %v1738_v23 = vsel %vm16452_vm2, %v16451_v30, %v16450_v9  ;;  %v2865_v18 = vsel %vm2849_vm1, %v11994_v56, %v16453_v46  ;;  %v1740_v11 = vsel %vm16455_vm4, %v16454_v15, %v16451_v30  ;;  %v16459_v9 = vld [vmem:[#allocation83_spill] sm:$0xff]  ;;  %v16461_v46 = vld [vmem:[#allocation256_spill] sm:$0xff]  ;;  %vm16470_vm14 = vmmov %vm16468_vm12  ;;  %vm16481_vm4 = vcmp.lt.s32.totalorder %v8114_v33, 42 }
 0x601   :  { %4260 = vrot.lane.b32.xlu1 %v11142_v59, %s6901_s29  ;;  %4099 = vmatpush1.msra.mxu1 %v1804_v35  ;;  %v12303_v13 = vpop.permute.xlu0 %4646  ;;  %v16457_v35 = vld [vmem:[#allocation186_spill] sm:$0xff]  ;;  %v2864_v30 = vsel %vm2849_vm1, %v12010_v3, %v16461_v46  ;;  %vm16476_vm15 = vmmov %vm16468_vm12 }
 0x602   :  { %4174 = vmatpush1.msra.mxu0 %v2915_v34  ;;  %4100 = vmatprep.subr.mxu1 %v1738_v23  ;;  %16456 = vst [vmem:[#allocation77_spill] sm:$0xff] %v12303_v13  ;;  %v2851_v52 = vsel %vm2849_vm1, %v16457_v35, %v11994_v56  ;;  %v16458_v34 = vld [vmem:[#allocation154_spill] sm:$0xff]  ;;  %v16462_v56 = vld [vmem:[#allocation149_spill] sm:$0xff]  ;;  %v16464_v35 = vld [vmem:[#allocation152_spill] sm:$0xff] }
 0x603   :  { %4175 = vmatprep.subr.mxu0 %v2865_v18  ;;  %4338 = vrot.lane.b32.xlu0 %v11847_v4, %s6902_s30  ;;  %v1737_v23 = vsel %vm16460_vm6, %v16459_v9, %v16458_v34  ;;  %v12319_v18 = vpop.permute.xlu1 %4588  ;;  %v1739_v15 = vsel %vm16463_vm10, %v16462_v56, %v16459_v9  ;;  %v16471_v9 = vld [vmem:[#allocation145_spill] sm:$0xff]  ;;  %v16472_v56 = vld [vmem:[#allocation91_spill] sm:$0xff]  ;;  %vm16478_vm2 = vmmov %vm16468_vm12  ;;  %vm16483_vm6 = vcmp.lt.s32.totalorder %v8114_v33, 107 }
 0x604   :  { %4101 = vmatpush1.msra.mxu1 %v1740_v11  ;;  %4176 = vmatpush1.msra.mxu0 %v2851_v52  ;;  %v2850_v11 = vsel %vm2849_vm1, %v11713_v45, %v12010_v3  ;;  %v16465_v52 = vld [vmem:[#allocation144_spill] sm:$0xff]  ;;  %vm16469_vm1 = vmmov %vm16466_vm11  ;;  %v2786_v3 = vsel %vm16470_vm14, %v11741_v31, %v12028_v19 }
 0x605   :  { %4102 = vmatprep.subr.mxu1 %v1737_v23  ;;  %4177 = vmatprep.subr.mxu0 %v2864_v30  ;;  %v1673_v34 = vsel %vm16466_vm11, %v16465_v52, %v16464_v35  ;;  %v16467_v23 = vld [vmem:[#allocation257_spill] sm:$0xff]  ;;  %v12339_v30 = vpop.permute.xlu0 %4592  ;;  %v1675_v45 = vsel %vm16469_vm1, %v16309_v22, %v16465_v52  ;;  %vm16473_vm0 = vmmov %vm16469_vm1  ;;  %v16475_v35 = vld [vmem:[#allocation258_spill] sm:$0xff] }
 0x606   :  { %4248 = vrot.lane.b32.xlu1 %v11210_v54, %s6901_s29  ;;  %4103 = vmatpush1.msra.mxu1 %v1739_v15  ;;  %v2800_v46 = vsel %vm16468_vm12, %v12028_v19, %v16467_v23  ;;  %v1672_v15 = vsel %vm16473_vm0, %v16472_v56, %v16471_v9  ;;  %v2799_v22 = vsel %vm16476_vm15, %v12048_v50, %v16475_v35  ;;  %vm16477_vm13 = vmmov %vm16473_vm0  ;;  %v16480_v23 = vld [vmem:[#allocation36_spill] sm:$0xff]  ;;  %v16486_v9 = vld [vmem:[#allocation142_spill] sm:$0xff]  ;;  %vm16495_vm15 = vcmp.lt.s32.totalorder %v8114_v33, 110 }
 0x607   :  { %4178 = vmatpush1.msra.mxu0 %v2850_v11  ;;  %4104 = vmatprep.subr.mxu1 %v1673_v34  ;;  %v12355_v11 = vpop.permute.xlu1 %4584  ;;  %v1674_v31 = vsel %vm16477_vm13, %v16314_v24, %v16472_v56  ;;  %v2785_v19 = vsel %vm16478_vm2, %v11771_v10, %v12048_v50  ;;  %v16479_v34 = vld [vmem:[#allocation15_spill] sm:$0xff]  ;;  %vm16484_vm10 = vmmov %vm16481_vm4  ;;  %v16487_v56 = vld [vmem:[#allocation137_spill] sm:$0xff] }
 0x608   :  { %4179 = vmatprep.subr.mxu0 %v2800_v46  ;;  %4252 = vrot.lane.b32.xlu0 %v11180_v17, %s6901_s29  ;;  %16474 = vst [vmem:[#allocation11_spill] sm:$0xff] %v12355_v11  ;;  %v1608_v46 = vsel %vm16481_vm4, %v16480_v23, %v16479_v34  ;;  %v1610_v10 = vsel %vm16484_vm10, %v16319_v32, %v16480_v23  ;;  %vm16485_vm11 = vmmov %vm16483_vm6  ;;  %v16489_v35 = vld [vmem:[#allocation260_spill] sm:$0xff]  ;;  %v16496_v23 = vld [vmem:[#allocation242_spill] sm:$0xff] }
 0x609   :  { %4105 = vmatpush1.msra.mxu1 %v1675_v45  ;;  %4180 = vmatpush1.msra.mxu0 %v2786_v3  ;;  %v12371_v52 = vpop.permute.xlu0 %4594  ;;  %v16482_v45 = vld [vmem:[#allocation259_spill] sm:$0xff]  ;;  %v2721_v50 = vsel %vm16485_vm11, %v11802_v8, %v12064_v1  ;;  %vm16488_vm12 = vmmov %vm16481_vm4 }
 0x60a   :  { %4106 = vmatprep.subr.mxu1 %v1672_v15  ;;  %4181 = vmatprep.subr.mxu0 %v2799_v22  ;;  %v2735_v3 = vsel %vm16483_vm6, %v12064_v1, %v16482_v45  ;;  %v1607_v15 = vsel %vm16488_vm12, %v16487_v56, %v16486_v9  ;;  %vm16490_vm1 = vmmov %vm16483_vm6  ;;  %vm16507_vm6 = vcmp.lt.s32.totalorder %v8114_v33, 126 }
 0x60b   :  { %4254 = vrot.lane.b32.xlu1 %v11290_v36, %s6901_s29  ;;  %4107 = vmatpush1.msra.mxu1 %v1674_v31  ;;  %v12385_v24 = vpop.permute.xlu1 %4598  ;;  %v2734_v32 = vsel %vm16490_vm1, %v12079_v49, %v16489_v35  ;;  %vm16491_vm14 = vmmov %vm16481_vm4  ;;  %v16493_v31 = vld [vmem:[#allocation226_spill] sm:$0xff] }
 0x60c   :  { %4182 = vmatpush1.msra.mxu0 %v2785_v19  ;;  %4108 = vmatprep.subr.mxu1 %v1608_v46  ;;  %v1609_v8 = vsel %vm16491_vm14, %v16324_v14, %v16487_v56  ;;  %vm16492_vm0 = vmmov %vm16490_vm1  ;;  %v16494_v19 = vld [vmem:[#allocation232_spill] sm:$0xff]  ;;  %v16502_v56 = vld [vmem:[#allocation241_spill] sm:$0xff]  ;;  %vm16522_vm1 = vcmp.lt.s32.totalorder %v8114_v33, 127 }
 0x60d   :  { %4183 = vmatprep.subr.mxu0 %v2735_v3  ;;  %4258 = vrot.lane.b32.xlu0 %v11236_v60, %s6901_s29  ;;  %v12401_v22 = vpop.permute.xlu0 %4586  ;;  %v2720_v1 = vsel %vm16492_vm0, %v11832_v21, %v12079_v49  ;;  %v2543_v34 = vsel %vm16495_vm15, %v16494_v19, %v16493_v31  ;;  %v16497_v46 = vld [vmem:[#allocation248_spill] sm:$0xff]  ;;  %vm16498_vm13 = vmmov %vm16495_vm15  ;;  %v16499_v49 = vld [vmem:[#allocation225_spill] sm:$0xff] }
 0x60e   :  { %4109 = vmatpush1.msra.mxu1 %v1610_v10  ;;  %4184 = vmatpush1.msra.mxu0 %v2721_v50  ;;  %v2671_v45 = vsel %vm1242_vm8, %v16497_v46, %v16496_v23  ;;  %v2529_v14 = vsel %vm16498_vm13, %v16330_v41, %v16494_v19  ;;  %v2657_v21 = vsel %vm1242_vm8, %v16359_v29, %v16497_v46  ;;  %v16500_v10 = vld [vmem:[#allocation231_spill] sm:$0xff]  ;;  %vm16501_vm2 = vmmov %vm16498_vm13  ;;  %v16508_v19 = vld [vmem:[#allocation234_spill] sm:$0xff]  ;;  %vm16534_vm13 = vcmask 130048  }
 0x60f   :  { %4110 = vmatprep.subr.mxu1 %v1607_v15  ;;  %4185 = vmatprep.subr.mxu0 %v2734_v32  ;;  %v12421_v3 = vpop.permute.xlu1 %4590  ;;  %v2542_v50 = vsel %vm16501_vm2, %v16500_v10, %v16499_v49  ;;  %v16503_v41 = vld [vmem:[#allocation247_spill] sm:$0xff]  ;;  %vm16504_vm4 = vmmov %vm16501_vm2  ;;  %v16512_v46 = vld [vmem:[#allocation238_spill] sm:$0xff] }
 0x610   :  { %4276 = vrot.lane.b32.xlu1 %v11778_v27, %s6901_s29  ;;  %4111 = vmatpush1.msra.mxu1 %v1609_v8  ;;  %v2670_v15 = vsel %vm1242_vm8, %v16503_v41, %v16502_v56  ;;  %v2528_v29 = vsel %vm16504_vm4, %v16334_v12, %v16500_v10  ;;  %v2656_v35 = vsel %vm1242_vm8, %v16364_v48, %v16503_v41  ;;  %v16505_v8 = vld [vmem:[#allocation214_spill] sm:$0xff]  ;;  %vm16511_vm10 = vmmov %vm16507_vm6  ;;  %v16517_v56 = vld [vmem:[#allocation239_spill] sm:$0xff] }
 0x611   :  { %4186 = vmatpush1.msra.mxu0 %v2720_v1  ;;  %4112 = vmatprep.subr.mxu1 %v2543_v34  ;;  %v12437_v9 = vpop.permute.xlu0 %4532  ;;  %v16506_v1 = vld [vmem:[#allocation224_spill] sm:$0xff]  ;;  %vm16515_vm11 = vmmov %vm16507_vm6  ;;  %v16518_v41 = vld [vmem:[#allocation221_spill] sm:$0xff] }
 0x612   :  { %4187 = vmatprep.subr.mxu0 %v2671_v45  ;;  %4246 = vrot.lane.b32.xlu0 %v11336_v20, %s6901_s29  ;;  %v2478_v31 = vsel %vm16507_vm6, %v16506_v1, %v16505_v8  ;;  %v16509_v34 = vld [vmem:[#allocation240_spill] sm:$0xff]  ;;  %v2464_v48 = vsel %vm16511_vm10, %v16340_v37, %v16506_v1  ;;  %vm16519_vm12 = vmmov %vm16507_vm6  ;;  %v16520_v8 = vld [vmem:[#allocation202_spill] sm:$0xff]  ;;  %vm16551_vm10 = vcmp.lt.s32.totalorder %v8114_v33, 2 }
 0x613   :  { %4113 = vmatpush2.msra.mxu1 %v2529_v14  ;;  %4188 = vmatpush1.msra.mxu0 %v2657_v21  ;;  %v12453_v32 = vpop.permute.xlu1 %4536  ;;  %v2607_v12 = vsel %vm1169_vm7, %v16509_v34, %v16508_v19  ;;  %v2593_v45 = vsel %vm1169_vm7, %v16512_v46, %v16509_v34  ;;  %v16513_v14 = vld [vmem:[#allocation213_spill] sm:$0xff]  ;;  %v16514_v21 = vld [vmem:[#allocation223_spill] sm:$0xff]  ;;  %v16521_v1 = vld [vmem:[#allocation212_spill] sm:$0xff] }
 0x614   :  { %4114 = vmatprep.subr.mxu1 %v2542_v50  ;;  %4189 = vmatprep.subr.mxu0 %v2670_v15  ;;  %v2477_v49 = vsel %vm16515_vm11, %v16514_v21, %v16513_v14  ;;  %v16516_v50 = vld [vmem:[#allocation233_spill] sm:$0xff]  ;;  %v2463_v15 = vsel %vm16519_vm12, %v16518_v41, %v16514_v21  ;;  %v16523_v19 = vld [vmem:[#allocation262_spill] sm:$0xff]  ;;  %vm16526_vm14 = vmmov %vm16522_vm1  ;;  %v3110_v41 = vsel %vm3109_vm9, %v11895_v44, %v12118_v16 }
 0x615   :  { %4250 = vrot.lane.b32.xlu1 %v11272_v28, %s6901_s29  ;;  %4115 = vmatpush2.msra.mxu1 %v2528_v29  ;;  %v12464_v23 = vpop.permute.xlu0 %4582  ;;  %v2606_v37 = vsel %vm1169_vm7, %v16517_v56, %v16516_v50  ;;  %v2592_v29 = vsel %vm1169_vm7, %v16376_v43, %v16517_v56  ;;  %v3125_v34 = vsel %vm3109_vm9, %v12102_v62, %v16523_v19  ;;  %v16524_v43 = vld [vmem:[#allocation178_spill] sm:$0xff]  ;;  %v16527_v14 = vld [vmem:[#allocation201_spill] sm:$0xff]  ;;  %v16528_v21 = vld [vmem:[#allocation211_spill] sm:$0xff] }
 0x616   :  { %4190 = vmatpush1.msra.mxu0 %v2656_v35  ;;  %3984 = vmatprep.mubr.f32.mxu0 %v11961_v47  ;;  %16510 = vst [vmem:[#allocation159_spill] sm:$0xff] %v12464_v23  ;;  %vm16529_vm0 = vmmov %vm16522_vm1  ;;  %v16530_v56 = vld [vmem:[#allocation264_spill] sm:$0xff]  ;;  %v16535_v44 = vld [vmem:[#allocation193_spill] sm:$0xff] }
 0x617   :  { %4116 = vmatprep.subr.mxu1 %v2478_v31  ;;  %4191 = vmatprep.subr.mxu0 %v2607_v12  ;;  %v12481_v10 = vpop.permute.xlu1 %4524  ;;  %v2413_v31 = vsel %vm16522_vm1, %v16521_v1, %v16520_v8  ;;  %vm16532_vm15 = vmmov %vm16529_vm0  ;;  %v4689_v8 = vsel %vm1242_vm8, %v12163_v42, %v12174_v7  ;;  %v16536_v19 = vld [vmem:[#allocation23_spill] sm:$0xff] }
 0x618   :  { %4274 = vrot.lane.b32.xlu0 %v11847_v4, %s6901_s29  ;;  %3985 = vmatmul.mubr.f32.gmra.mxu0 %v11979_v53  ;;  %vm16552_vm11 = vmmov %vm16551_vm10 }
 0x619   :  { %4117 = vmatpush2.msra.mxu1 %v2464_v48  ;;  %4192 = vmatpush1.msra.mxu0 %v2593_v45  ;;  %v12497_v35 = vpop.permute.xlu0 %4528  ;;  %v16525_v48 = vld [vmem:[#allocation210_spill] sm:$0xff]  ;;  %v3111_v45 = vsel %vm3109_vm9, %v11865_v40, %v12102_v62  ;;  %v16531_v40 = vld [vmem:[#allocation209_spill] sm:$0xff]  ;;  %vm16555_vm12 = vmmov %vm16551_vm10 }
 0x61a   :  { %4118 = vmatprep.subr.mxu1 %v2477_v49  ;;  %4193 = vmatprep.subr.mxu0 %v2606_v37  ;;  %v2399_v46 = vsel %vm16526_vm14, %v16525_v48, %v16521_v1  ;;  %v2412_v49 = vsel %vm16529_vm0, %v16528_v21, %v16527_v14  ;;  %v3124_v37 = vsel %vm3109_vm9, %v12118_v16, %v16530_v56  ;;  %v16537_v48 = vld [vmem:[#allocation191_spill] sm:$0xff]  ;;  %vm16540_vm9 = vcmp.lt.s32.totalorder %v8114_v33, 1  ;;  %vm16556_vm1 = vmmov %vm16534_vm13 }
 0x61b   :  { %4724 = vrot.lane.b32.xlu1 %v11142_v59, %s6908_s13  ;;  %4119 = vmatpush2.msra.mxu1 %v2463_v15  ;;  %v12508_v12 = vpop.permute.xlu1 %4520  ;;  %v2398_v62 = vsel %vm16532_vm15, %v16531_v40, %v16528_v21  ;;  %v4690_v16 = vsel %vm1242_vm8, %v12303_v13, %v12237_v58  ;;  %vm16542_vm2 = vmmov %vm16540_vm9  ;;  %v16544_v40 = vld [vmem:[#allocation197_spill] sm:$0xff]  ;;  %vm16563_vm0 = vcmp.lt.s32.totalorder %v8114_v33, 18 }
 0x61c   :  { %4194 = vmatpush1.msra.mxu0 %v2592_v29  ;;  %3990 = vmatprep.mubr.f32.mxu0 %v12015_v51  ;;  %v16533_v29 = vld [vmem:[#allocation25_spill] sm:$0xff]  ;;  %vm16545_vm4 = vmmov %vm16542_vm2 }
 0x61d   :  { %4120 = vmatprep.subr.mxu1 %v2413_v31  ;;  %4223 = vmatprep.subr.mxu0 %v3125_v34  ;;  %vm16548_vm6 = vmmov %vm16542_vm2 }
 0x61e   :  { %4728 = vrot.lane.b32.xlu0 %v16524_v43, %s6908_s13  ;;  %3991 = vmatmul.mubr.f32.gmra.mxu0 %v12033_v0  ;;  %v12525_v50 = vpop.permute.xlu0 %4530  ;;  %vm16560_vm14 = vmmov %vm16551_vm10 }
 0x61f   :  { %4121 = vmatpush2.msra.mxu1 %v2399_v46  ;;  %4224 = vmatpush2.msra.mxu0 %v3111_v45  ;;  %v16538_v46 = vld [vmem:[#allocation200_spill] sm:$0xff]  ;;  %v16539_v45 = vld [vmem:[#allocation198_spill] sm:$0xff]  ;;  %vm16566_vm15 = vmmov %vm16563_vm0 }
 0x620   :  { %4122 = vmatprep.subr.mxu1 %v2412_v49  ;;  %4225 = vmatprep.subr.mxu0 %v3124_v37  ;;  %v12541_v15 = vpop.permute.xlu1 %4534  ;;  %v2319_v14 = vsel %vm16540_vm9, %v16539_v45, %v16538_v46  ;;  %v4627_v49 = vsel %vm1169_vm7, %v12355_v11, %v12319_v18  ;;  %v16543_v37 = vld [vmem:[#allocation199_spill] sm:$0xff]  ;;  %v16554_v46 = vld [vmem:[#allocation181_spill] sm:$0xff]  ;;  %vm16572_vm9 = vmmov %vm16563_vm0 }
 0x621   :  { %4716 = vrot.lane.b32.xlu1 %v11180_v17, %s6908_s13  ;;  %4123 = vmatpush2.msra.mxu1 %v2398_v62  ;;  %v2318_v62 = vsel %vm16545_vm4, %v16544_v40, %v16543_v37  ;;  %vm16579_vm4 = vcmp.lt.s32.totalorder %v8114_v33, 19  ;;  %v16583_v11 = vld [vmem:[#allocation68_spill] sm:$0xff] }
 0x622   :  { %4226 = vmatpush2.msra.mxu0 %v3110_v41  ;;  %4124 = vmatprep.subr.mxu1 %v16533_v29  ;;  %v16546_v41 = vld [vmem:[#allocation43_spill] sm:$0xff] }
 0x623   :  { %6826 = vmatprep.mubr.msk.f32.mxu0 %vm16534_vm13, %v12075_v39  ;;  %v12550_v1 = vpop.permute.xlu0 %4522  ;;  %4951 = vmatprep.subr.mxu0 %v4689_v8  ;;  %v4691_v39 = vsel %vm1242_vm8, %v12191_v38, %v12163_v42  ;;  %v4625_v42 = vsel %vm1169_vm7, %v12319_v18, %v12339_v30  ;;  %v16547_v29 = vld [vmem:[#allocation195_spill] sm:$0xff]  ;;  %vm16570_vm13 = vmmov %vm16563_vm0 }
 0x624   :  { %4720 = vrot.lane.b32.xlu0 %v11198_v6, %s6908_s13  ;;  %4125 = vmatpush2.msra.mxu1 %v16535_v44  ;;  %v2320_v8 = vsel %vm16548_vm6, %v16547_v29, %v16544_v40  ;;  %v16549_v18 = vld [vmem:[#allocation171_spill] sm:$0xff]  ;;  %v4626_v40 = vsel %vm1169_vm7, %v12464_v23, %v12401_v22  ;;  %v16561_v29 = vld [vmem:[#allocation116_spill] sm:$0xff]  ;;  %v12707_v23 = vld [vmem:[%s14814_s4 + $0x50] sm:$0xff] }
 0x625   :  { %4228 = vmatmul.mubr.f32.vlgmr.msra.gmra.mxu0 %v12091_v55  ;;  %v12564_v31 = vpop.permute.xlu1 %4526  ;;  %4126 = vmatprep.subr.mxu1 %v16536_v19  ;;  %v4688_v55 = vsel %vm1242_vm8, %v12237_v58, %v12257_v5  ;;  %v16541_v58 = vld [vmem:[#allocation196_spill] sm:$0xff]  ;;  %vm16580_vm6 = vmmov %vm16579_vm4 }
 0x626   :  { %4952 = vmatpush1.msra.mxu0 %v4691_v39  ;;  %4712 = vrot.lane.b32.xlu1 %v11210_v54, %s6908_s13  ;;  %v2321_v21 = vsel %vm16542_vm2, %v16541_v58, %v16539_v45  ;;  %v16550_v39 = vld [vmem:[#allocation167_spill] sm:$0xff]  ;;  %v16558_v58 = vld [vmem:[#allocation22_spill] sm:$0xff]  ;;  %vm16573_vm2 = vmmov %vm16556_vm1 }
 0x627   :  { %4953 = vmatprep.subr.mxu0 %v4688_v55  ;;  %v12577_v34 = vpop.permute.xlu0 %4518  ;;  %4127 = vmatpush2.msra.mxu1 %v16537_v48  ;;  %v2257_v19 = vsel %vm16552_vm11, %v16379_v26, %v16550_v39  ;;  %v4624_v55 = vsel %vm1169_vm7, %v12401_v22, %v12421_v3  ;;  %v16553_v48 = vld [vmem:[#allocation169_spill] sm:$0xff]  ;;  %vm16585_vm11 = vmmov %vm16579_vm4 }
 0x628   :  { %4954 = vmatpush1.msra.mxu0 %v4690_v16  ;;  %4128 = vmatprep.subr.mxu1 %v2319_v14  ;;  %v2255_v16 = vsel %vm16551_vm10, %v16550_v39, %v16549_v18  ;;  %v2254_v45 = vsel %vm16555_vm12, %v16554_v46, %v16553_v48  ;;  %v12631_v14 = vld [vmem:[%s14814_s4 + $0x38] sm:$0xff]  ;;  %v16557_v26 = vld [vmem:[#allocation33_spill] sm:$0xff]  ;;  %v16564_v39 = vld [vmem:[#allocation32_spill] sm:$0xff]  ;;  %vm16588_vm12 = vcmp.lt.s32.totalorder %v8114_v33, 127 }
 0x629   :  { %4722 = vrot.lane.b32.xlu0 %v11236_v60, %s6908_s13  ;;  %v12594_v56 = vpop.permute.xlu1 %4448  ;;  %4129 = vmatpush2.msra.mxu1 %v2321_v21  ;;  %v662_v21 = vadd.f32 %v16558_v58, %v16557_v26  ;;  %v12662_v22 = vld [vmem:[%s14814_s4 + $0x30] sm:$0xff]  ;;  %v16565_v48 = vld [vmem:[#allocation114_spill] sm:$0xff]  ;;  %v16568_v26 = vld [vmem:[#allocation103_spill] sm:$0xff] }
 0x62a   :  { %4955 = vmatprep.subr.mxu0 %v4625_v42  ;;  %4130 = vmatprep.subr.mxu1 %v2318_v62  ;;  %vm16584_vm10 = vmmov %vm16579_vm4 }
 0x62b   :  { %4726 = vrot.lane.b32.xlu1 %v16546_v41, %s6908_s13  ;;  %v12606_v44 = vpop.permute.xlu0 %4452  ;;  %4131 = vmatpush2.msra.mxu1 %v2320_v8  ;;  %v16562_v8 = vld [vmem:[#allocation115_spill] sm:$0xff] }
 0x62c   :  { %4956 = vmatpush1.msra.mxu0 %v4627_v49  ;;  %4132 = vmatprep.subr.mxu1 %v2255_v16  ;;  %v16559_v49 = vld [vmem:[#allocation125_spill] sm:$0xff]  ;;  %v2190_v18 = vsel %vm16563_vm0, %v16562_v8, %v16561_v29  ;;  %v663_v16 = vadd.f32 %v16558_v58, %v16564_v39  ;;  %v16569_v58 = vld [vmem:[#allocation102_spill] sm:$0xff]  ;;  %v16571_v29 = vld [vmem:[#allocation120_spill] sm:$0xff] }
 0x62d   :  { %4714 = vrot.lane.b32.xlu0 %v11272_v28, %s6908_s13  ;;  %v12622_v42 = vpop.permute.xlu1 %4440  ;;  %4133 = vmatpush2.msra.mxu1 %v2257_v19  ;;  %v2256_v37 = vsel %vm16560_vm14, %v16559_v49, %v16554_v46  ;;  %v16567_v46 = vld [vmem:[#allocation19_spill] sm:$0xff]  ;;  %v2189_v49 = vsel %vm16570_vm13, %v16569_v58, %v16568_v26  ;;  %v16577_v26 = vld [vmem:[#allocation117_spill] sm:$0xff] }
 0x62e   :  { %6824 = vmatprep.mubr.msk.f32.mxu1 %vm16556_vm1, %v12631_v14  ;;  %4134 = vmatprep.subr.mxu1 %v2254_v45  ;;  %v12670_v45 = vmul.f32 %v16567_v46, %v662_v21  ;;  %v12687_v21 = vld [vmem:[%s14814_s4 + $0x58] sm:$0xff]  ;;  %vm16590_vm1 = vmmov %vm16588_vm12 }
 0x62f   :  { %4718 = vrot.lane.b32.xlu1 %v11290_v36, %s6908_s13  ;;  %v12647_v62 = vpop.permute.xlu0 %4444  ;;  %4135 = vmatpush2.msra.mxu1 %v2256_v37  ;;  %vm16591_vm14 = vmmov %vm16590_vm1 }
 0x630   :  { %4957 = vmatprep.subr.mxu0 %v4624_v55  ;;  %4136 = vmatprep.subr.mxu1 %v2190_v18  ;;  %v2192_v55 = vsel %vm16566_vm15, %v16565_v48, %v16562_v8  ;;  %v16574_v8 = vld [vmem:[#allocation29_spill] sm:$0xff]  ;;  %v16576_v48 = vld [vmem:[#allocation18_spill] sm:$0xff]  ;;  %vm16592_vm0 = vmmov %vm16590_vm1 }
 0x631   :  { %4676 = vrot.lane.b32.xlu0 %v11778_v27, %s6907_s28  ;;  %v12657_v19 = vpop.permute.xlu1 %4446  ;;  %4068 = vmatmul.mubr.f32.gmra.mxu1 %v12662_v22  ;;  %v16575_v18 = vld [vmem:[#allocation21_spill] sm:$0xff]  ;;  %vm16593_vm15 = vmmov %vm16592_vm0 }
 0x632   :  { %4958 = vmatpush1.msra.mxu0 %v4626_v40  ;;  %4137 = vmatpush2.msra.mxu1 %v2192_v55  ;;  %v2191_v40 = vsel %vm16572_vm9, %v16571_v29, %v16569_v58  ;;  %v654_v39 = vadd.f32 %v16575_v18, %v16574_v8  ;;  %v12694_v55 = vmul.f32 %v16576_v48, %v663_v16  ;;  %vm16594_vm13 = vmmov %vm16592_vm0 }
 0x633   :  { %4710 = vrot.lane.b32.xlu1 %v11336_v20, %s6908_s13  ;;  %v12678_v37 = vpop.permute.xlu0 %4450  ;;  %4138 = vmatprep.subr.mxu1 %v2189_v49  ;;  %v16578_v49 = vld [vmem:[#allocation73_spill] sm:$0xff]  ;;  %vm16595_vm9 = vmmov %vm16592_vm0 }
 0x634   :  { %6825 = vmatprep.mubr.msk.f32.mxu1 %vm16573_vm2, %v12687_v21  ;;  %4139 = vmatpush2.msra.mxu1 %v2191_v40  ;;  %v2125_v58 = vsel %vm16579_vm4, %v16578_v49, %v16577_v26  ;;  %v2127_v16 = vsel %vm16580_vm6, %v16400_v57, %v16578_v49  ;;  %v16581_v40 = vld [vmem:[#allocation28_spill] sm:$0xff]  ;;  %v16582_v26 = vld [vmem:[#allocation110_spill] sm:$0xff]  ;;  %v2126_v57 = vsel %vm16585_vm11, %v16411_v61, %v16583_v11  ;;  %vm16596_vm2 = vmmov %vm16592_vm0  ;;  %vm16597_vm4 = vcmp.lt.s32.totalorder %v8114_v33, 1 }
 0x635   :  { %4668 = vrot.lane.b32.xlu0 %v12670_v45, %s6907_s28  ;;  %v12702_v29 = vpop.permute.xlu1 %4468  ;;  %4140 = vmatprep.subr.mxu1 %v2125_v58  ;;  %v655_v8 = vadd.f32 %v16575_v18, %v16581_v40  ;;  %v2124_v58 = vsel %vm16584_vm10, %v16583_v11, %v16582_v26  ;;  %v6897_v18 = vld [vmem:[%s14814_s4 + $0x8] sm:$0xff]  ;;  %v12732_v49 = vmul.f32 %v16567_v46, %v654_v39  ;;  %v6898_v39 = vld [vmem:[%s14814_s4] sm:$0xff]  ;;  %vm16598_vm6 = vmmov %vm16597_vm4 }
 0x636   :  { %4074 = vmatmul.mubr.f32.gmra.mxu1 %v12707_v23  ;;  %v16587_v40 = vld [vmem:[#allocation24_spill] sm:$0xff]  ;;  %v4561_v61 = vsel %vm16588_vm12, %v12481_v10, %v12497_v35  ;;  %vm16599_vm10 = vmmov %vm16597_vm4  ;;  %vm16601_vm12 = vcmask 130048  }
 0x637   :  { %4141 = vmatpush2.msra.mxu1 %v2127_v16  ;;  %4672 = vrot.lane.b32.xlu1 %v12694_v55, %s6907_s28  ;;  %v12722_v13 = vpop.permute.xlu0 %4438  ;;  %v16586_v16 = vld [vmem:[#allocation12_spill] sm:$0xff]  ;;  %vm16600_vm11 = vmmov %vm16597_vm4 }
 0x638   :  { %4142 = vmatprep.subr.mxu1 %v2124_v58  ;;  %4144 = vmatprep.mubr.f32.mxu1 %v6897_v18  ;;  %v4685_v26 = vsel %vm1242_vm8, %v16587_v40, %v16586_v16  ;;  %v4687_v58 = vsel %vm1242_vm8, %v12174_v7, %v16587_v40  ;;  %v16589_v18 = vld [vmem:[#allocation192_spill] sm:$0xff]  ;;  %v4620_v40 = vsel %vm1169_vm7, %v12371_v52, %v12385_v24 }
 0x639   :  { %4143 = vmatpush2.msra.mxu1 %v2126_v57  ;;  %4674 = vrot.lane.b32.xlu0 %v11847_v4, %s6907_s28  ;;  %v12744_v11 = vpop.permute.xlu1 %4442  ;;  %v12754_v57 = vmul.f32 %v16576_v48, %v655_v8  ;;  %v4684_v46 = vsel %vm1242_vm8, %v16589_v18, %v12221_v2  ;;  %v4686_v7 = vsel %vm1242_vm8, %v12257_v5, %v16589_v18 }
 0x63a   :  { %5034 = vmatprep.subr.mxu1 %v4685_v26  ;;  %4145 = vmatmul.mubr.f32.vlgmr.msra.gmra.mxu1 %v6898_v39  ;;  %v4563_v26 = vsel %vm16590_vm1, %v12508_v12, %v12481_v10  ;;  %v4621_v8 = vsel %vm1169_vm7, %v12273_v25, %v12289_v63  ;;  %v4560_v10 = vsel %vm16591_vm14, %v12550_v1, %v12564_v31  ;;  %vm16602_vm1 = vmmov %vm16597_vm4 }
 0x63b   :  { %5035 = vmatpush1.msra.mxu1 %v4687_v58  ;;  %4666 = vrot.lane.b32.xlu1 %v12732_v49, %s6907_s28  ;;  %v12766_v39 = vpop.permute.xlu0 %4384  ;;  %v4623_v5 = vsel %vm1169_vm7, %v12339_v30, %v12273_v25  ;;  %v4622_v25 = vsel %vm1169_vm7, %v12421_v3, %v12371_v52  ;;  %v4557_v30 = vsel %vm16593_vm15, %v12437_v9, %v12453_v32  ;;  %vm16603_vm14 = vmmov %vm16602_vm1 }
 0x63c   :  { %5036 = vmatprep.subr.mxu1 %v4684_v46  ;;  %4959 = vmatprep.subr.mxu0 %v4561_v61  ;;  %v4562_v61 = vsel %vm16592_vm0, %v12577_v34, %v12550_v1  ;;  %v4556_v1 = vsel %vm16594_vm13, %v12525_v50, %v12541_v15  ;;  %v4559_v52 = vsel %vm16595_vm9, %v12497_v35, %v12437_v9  ;;  %vm16604_vm0 = vmmov %vm16601_vm12  ;;  %vm16606_vm13 = vcmp.lt.s32.totalorder %v8114_v33, 19 }
 0x63d   :  { %5037 = vmatpush1.msra.mxu1 %v4686_v7  ;;  %4670 = vrot.lane.b32.xlu0 %v12754_v57, %s6907_s28  ;;  %v12782_v46 = vpop.permute.xlu1 %4388  ;;  %v4558_v3 = vsel %vm16596_vm2, %v12564_v31, %v12525_v50  ;;  %v4479_v9 = vsel %vm16597_vm4, %v12594_v56, %v12606_v44  ;;  %vm16605_vm15 = vmmov %vm16602_vm1 }
 0x63e   :  { %5038 = vmatprep.subr.mxu1 %v4621_v8  ;;  %4960 = vmatpush1.msra.mxu0 %v4563_v26  ;;  %vm16607_vm9 = vmmov %vm16602_vm1 }
 0x63f   :  { %5039 = vmatpush1.msra.mxu1 %v4623_v5  ;;  %4612 = vrot.lane.b32.xlu1 %v11778_v27, %s6906_s27  ;;  %v12798_v58 = vpop.permute.xlu0 %4466  ;;  %vm16608_vm2 = vmmov %vm16606_vm13 }
 0x640   :  { %5040 = vmatprep.subr.mxu1 %v4620_v40  ;;  %4961 = vmatprep.subr.mxu0 %v4560_v10  ;;  %vm16609_vm4 = vmmov %vm16608_vm2 }
 0x641   :  { %5041 = vmatpush1.msra.mxu1 %v4622_v25  ;;  %4604 = vrot.lane.b32.xlu0 %v12670_v45, %s6906_s27  ;;  %v12814_v18 = vpop.permute.xlu1 %4376 }
 0x642   :  { %5042 = vmatprep.subr.mxu1 %v4557_v30  ;;  %4962 = vmatpush1.msra.mxu0 %v4562_v61 }
 0x643   :  { %5043 = vmatpush1.msra.mxu1 %v4559_v52  ;;  %4608 = vrot.lane.b32.xlu1 %v12694_v55, %s6906_s27  ;;  %v4381_v26 = vpop.permute.xlu0 %4380 }
 0x644   :  { %5044 = vmatprep.subr.mxu1 %v4556_v1  ;;  %4963 = vmatprep.subr.mxu0 %v11180_v17  ;;  %v4419_v35 = vsel %vm16608_vm2, %v12814_v18, %v4381_v26  ;;  %v4417_v50 = vsel %vm16609_vm4, %v4381_v26, %v12766_v39 }
 0x645   :  { %4610 = vrot.lane.b32.xlu0 %v11847_v4, %s6906_s27  ;;  %5045 = vmatpush1.msra.mxu1 %v4558_v3  ;;  %v4383_v7 = vpop.permute.xlu1 %4382 }
 0x646   :  { %5046 = vmatprep.subr.mxu1 %v11142_v59  ;;  %4964 = vmatpush1.msra.mxu0 %v11210_v54  ;;  %v4483_v59 = vsel %vm16598_vm6, %v12622_v42, %v12647_v62  ;;  %vm16610_vm6 = vmmov %vm16608_vm2 }
 0x647   :  { %4602 = vrot.lane.b32.xlu1 %v12732_v49, %s6906_s27  ;;  %5047 = vmatpush1.msra.mxu1 %v11198_v6  ;;  %v12840_v17 = vpop.permute.xlu0 %4386  ;;  %v4481_v6 = vsel %vm16599_vm10, %v12647_v62, %v12594_v56  ;;  %vm16611_vm10 = vmmov %vm16608_vm2 }
 0x648   :  { %5048 = vmatprep.subr.mxu1 %v11236_v60  ;;  %4965 = vmatprep.subr.mxu0 %v11272_v28  ;;  %v4478_v60 = vsel %vm16600_vm11, %v12657_v19, %v12678_v37  ;;  %v4414_v31 = vsel %vm16610_vm6, %v4383_v7, %v12840_v17  ;;  %vm16612_vm11 = vmmov %vm16608_vm2 }
 0x649   :  { %4606 = vrot.lane.b32.xlu0 %v12754_v57, %s6906_s27  ;;  %5049 = vmatpush1.msra.mxu1 %v11290_v36  ;;  %v4485_v36 = vsel %vm16602_vm1, %v12702_v29, %v12622_v42  ;;  %vm16614_vm1 = vmmov %vm16604_vm0 }
 0x64a   :  { %4966 = vmatpush1.msra.mxu0 %v11336_v20  ;;  %5050 = vmatprep.subr.mxu1 %v4479_v9  ;;  %v12854_v54 = vpop.permute.xlu1 %4404  ;;  %v4480_v20 = vsel %vm16603_vm14, %v12744_v11, %v12657_v19  ;;  %v12929_v19 = vld [vmem:[%s14815_s6 + $0x8] sm:$0xff]  ;;  %vm16615_vm14 = vmmov %vm16608_vm2 }
 0x64b   :  { %4548 = vrot.lane.b32.xlu1 %v11778_v27, %s6905_s26  ;;  %4150 = vmatprep.mubr.f32.mxu1 %v11961_v47  ;;  %v4482_v47 = vsel %vm16605_vm15, %v12722_v13, %v12744_v11  ;;  %vm16616_vm15 = vcmp.lt.s32.totalorder %v8114_v33, 107 }
 0x64c   :  { %4151 = vmatmul.mubr.f32.gmra.mxu1 %v11979_v53  ;;  %4967 = vmatprep.subr.mxu0 %v4483_v59  ;;  %v4415_v53 = vsel %vm16606_vm13, %v12766_v39, %v12782_v46  ;;  %vm16617_vm13 = vmmov %vm16616_vm15 }
 0x64d   :  { %4540 = vrot.lane.b32.xlu0 %v12670_v45, %s6905_s26  ;;  %5051 = vmatpush1.msra.mxu1 %v4481_v6  ;;  %v4375_v28 = vpop.permute.xlu0 %4374 }
 0x64e   :  { %6827 = vmatprep.mubr.msk.f32.mxu0 %vm16601_vm12, %v12631_v14  ;;  %4156 = vmatprep.mubr.f32.mxu1 %v12015_v51  ;;  %vm16613_vm12 = vmmov %vm16608_vm2 }
 0x64f   :  { %4544 = vrot.lane.b32.xlu1 %v12694_v55, %s6905_s26  ;;  %4234 = vmatmul.mubr.f32.gmra.mxu0 %v12662_v22 }
 0x650   :  { %4157 = vmatmul.mubr.f32.gmra.mxu1 %v12033_v0  ;;  %5052 = vmatprep.subr.mxu1 %v4478_v60  ;;  %v4379_v51 = vpop.permute.xlu1 %4378  ;;  %v4484_v0 = vsel %vm16607_vm9, %v12798_v58, %v12722_v13  ;;  %vm16618_vm9 = vmmov %vm16617_vm13 }
 0x651   :  { %4546 = vrot.lane.b32.xlu0 %v11847_v4, %s6905_s26  ;;  %6828 = vmatprep.mubr.msk.f32.mxu0 %vm16604_vm0, %v12687_v21  ;;  %v4416_v56 = vsel %vm16612_vm11, %v4379_v51, %v4383_v7  ;;  %v4418_v42 = vsel %vm16613_vm12, %v4375_v28, %v4379_v51  ;;  %vm16619_vm2 = vmmov %vm16618_vm9 }
 0x652   :  { %4968 = vmatpush1.msra.mxu0 %v4485_v36  ;;  %5053 = vmatpush1.msra.mxu1 %v4480_v20  ;;  %vm16620_vm4 = vmmov %vm16619_vm2 }
 0x653   :  { %4538 = vrot.lane.b32.xlu1 %v12732_v49, %s6905_s26  ;;  %4240 = vmatmul.mubr.f32.gmra.mxu0 %v12707_v23  ;;  %v4321_v13 = vpop.permute.xlu0 %4320  ;;  %v4421_v23 = vsel %vm16611_vm10, %v12854_v54, %v12814_v18  ;;  %vm16621_vm6 = vmmov %vm16619_vm2 }
 0x654   :  { %4969 = vmatprep.subr.mxu0 %v4482_v47  ;;  %5054 = vmatprep.subr.mxu1 %v4415_v53  ;;  %vm16622_vm10 = vmmov %vm16619_vm2 }
 0x655   :  { %4542 = vrot.lane.b32.xlu0 %v12754_v57, %s6905_s26  ;;  %4970 = vmatpush1.msra.mxu0 %v4484_v0  ;;  %vm16623_vm11 = vmmov %vm16604_vm0 }
 0x656   :  { %4971 = vmatprep.subr.mxu0 %v4419_v35  ;;  %5055 = vmatpush1.msra.mxu1 %v4417_v50  ;;  %v12919_v14 = vpop.permute.xlu1 %4324  ;;  %vm16624_vm12 = vmmov %vm16619_vm2 }
 0x657   :  { %4464 = vrot.lane.b32.xlu1 %v12694_v55, %s6904_s25  ;;  %5056 = vmatprep.subr.mxu1 %v4414_v31  ;;  %v4351_v62 = vsel %vm877_vm3, %v4321_v13, %v12919_v14 }
 0x658   :  { %4972 = vmatpush1.msra.mxu0 %v4421_v23  ;;  %5057 = vmatpush1.msra.mxu1 %v4416_v56 }
 0x659   :  { %4456 = vrot.lane.b32.xlu0 %v16524_v43, %s6904_s25  ;;  %4973 = vmatprep.subr.mxu0 %v4418_v42  ;;  %v12933_v22 = vpop.permute.xlu0 %4402 }
 0x65a   :  { %5058 = vmatprep.subr.mxu1 %v4351_v62  ;;  %6832 = vmatprep.mubr.msk.f32.mxu1 %vm16614_vm1, %v12929_v19  ;;  %v4420_v21 = vsel %vm16615_vm14, %v12933_v22, %v4375_v28  ;;  %vm16625_vm1 = vmmov %vm16604_vm0 }
 0x65b   :  { %4460 = vrot.lane.b32.xlu1 %v12670_v45, %s6904_s25  ;;  %6829 = vmatprep.mubr.msk.f32.mxu0 %vm16604_vm0, %v12929_v19  ;;  %vm16626_vm14 = vmmov %vm16604_vm0 }
 0x65c   :  { %4974 = vmatpush1.msra.mxu0 %v4420_v21  ;;  %v4924_v21 = vld [vmem:[%s14816_s7] sm:$0xff] }
 0x65d   :  { %4462 = vrot.lane.b32.xlu0 %v12754_v57, %s6904_s25  ;;  %v4313_v11 = vpop.permute.xlu1 %4312 }
 0x65f   :  { %4454 = vrot.lane.b32.xlu1 %v16546_v41, %s6904_s25 }
 0x660   :  { %v4317_v39 = vpop.permute.xlu0 %4316 }
 0x661   :  { %4458 = vrot.lane.b32.xlu0 %v12732_v49, %s6904_s25  ;;  %v4355_v8 = vsel %vm877_vm3, %v4313_v11, %v4317_v39  ;;  %v4353_v10 = vsel %vm877_vm3, %v4317_v39, %v4321_v13 }
 0x662   :  { %4975 = vmatprep.subr.mxu0 %v4355_v8  ;;  %5059 = vmatpush1.msra.mxu1 %v4353_v10  ;;  %v4926_v8 = vld [vmem:[%s14816_s7 + $0x10] sm:$0xff] }
 0x663   :  { %4400 = vrot.lane.b32.xlu1 %v12694_v55, %s6903_s12  ;;  %v4319_v5 = vpop.permute.xlu1 %4318 }
 0x665   :  { %4392 = vrot.lane.b32.xlu0 %v16524_v43, %s6903_s12 }
 0x666   :  { %v12958_v40 = vpop.permute.xlu0 %4322 }
 0x667   :  { %4396 = vrot.lane.b32.xlu1 %v12670_v45, %s6903_s12  ;;  %v4350_v61 = vsel %vm877_vm3, %v4319_v5, %v12958_v40 }
 0x668   :  { %5060 = vmatprep.subr.mxu1 %v4350_v61  ;;  %v3554_v61 = vld [vmem:[%s14817_s5] sm:$0xff] }
 0x669   :  { %4398 = vrot.lane.b32.xlu0 %v12754_v57, %s6903_s12  ;;  %v12967_v25 = vpop.permute.xlu1 %4340 }
 0x66a   :  { %v4357_v30 = vsel %vm877_vm3, %v12967_v25, %v4313_v11 }
 0x66b   :  { %4390 = vrot.lane.b32.xlu1 %v16546_v41, %s6903_s12  ;;  %4976 = vmatpush1.msra.mxu0 %v4357_v30  ;;  %v4311_v1 = vpop.permute.xlu0 %4310 }
 0x66d   :  { %4394 = vrot.lane.b32.xlu0 %v12732_v49, %s6903_s12 }
 0x66e   :  { %v4315_v18 = vpop.permute.xlu1 %4314 }
 0x66f   :  { %4336 = vrot.lane.b32.xlu1 %v12694_v55, %s6902_s30  ;;  %v4354_v52 = vsel %vm877_vm3, %v4311_v1, %v4315_v18  ;;  %v4352_v3 = vsel %vm877_vm3, %v4315_v18, %v4319_v5  ;;  %v4925_v5 = vld [vmem:[%s14816_s7 + $0x8] sm:$0xff] }
 0x670   :  { %4977 = vmatprep.subr.mxu0 %v4354_v52  ;;  %5061 = vmatpush1.msra.mxu1 %v4352_v3  ;;  %v4257_v26 = vpop.permute.xlu0 %4256  ;;  %v3555_v52 = vld [vmem:[%s14817_s5 + $0x8] sm:$0xff] }
 0x671   :  { %4328 = vrot.lane.b32.xlu0 %v16524_v43, %s6902_s30 }
 0x673   :  { %4332 = vrot.lane.b32.xlu1 %v12670_v45, %s6902_s30  ;;  %v12986_v7 = vpop.permute.xlu1 %4260 }
 0x674   :  { %v4287_v9 = vsel %vm804_vm5, %v4257_v26, %v12986_v7 }
 0x675   :  { %4334 = vrot.lane.b32.xlu0 %v12754_v57, %s6902_s30  ;;  %5062 = vmatprep.subr.mxu1 %v4287_v9  ;;  %v12993_v59 = vpop.permute.xlu0 %4338 }
 0x676   :  { %v4356_v6 = vsel %vm877_vm3, %v12993_v59, %v4311_v1 }
 0x677   :  { %4326 = vrot.lane.b32.xlu1 %v16546_v41, %s6902_s30  ;;  %4978 = vmatpush1.msra.mxu0 %v4356_v6 }
 0x678   :  { %v4249_v60 = vpop.permute.xlu1 %4248 }
 0x679   :  { %4330 = vrot.lane.b32.xlu0 %v12732_v49, %s6902_s30 }
 0x67a   :  { %v4253_v28 = vpop.permute.xlu0 %4252 }
 0x67b   :  { %4272 = vrot.lane.b32.xlu1 %v12694_v55, %s6901_s29  ;;  %v4291_v36 = vsel %vm804_vm5, %v4249_v60, %v4253_v28  ;;  %v4289_v20 = vsel %vm804_vm5, %v4253_v28, %v4257_v26  ;;  %v3556_v26 = vld [vmem:[%s14817_s5 + $0x10] sm:$0xff] }
 0x67c   :  { %4979 = vmatprep.subr.mxu0 %v4291_v36  ;;  %5063 = vmatpush1.msra.mxu1 %v4289_v20 }
 0x67d   :  { %4264 = vrot.lane.b32.xlu0 %v16524_v43, %s6901_s29  ;;  %v4255_v51 = vpop.permute.xlu1 %4254 }
 0x67f   :  { %4268 = vrot.lane.b32.xlu1 %v12670_v45, %s6901_s29  ;;  %v13012_v47 = vpop.permute.xlu0 %4258 }
 0x680   :  { %v4286_v53 = vsel %vm804_vm5, %v4255_v51, %v13012_v47 }
 0x681   :  { %4270 = vrot.lane.b32.xlu0 %v12754_v57, %s6901_s29  ;;  %5064 = vmatprep.subr.mxu1 %v4286_v53 }
 0x682   :  { %v13019_v0 = vpop.permute.xlu1 %4276 }
 0x683   :  { %4262 = vrot.lane.b32.xlu1 %v16546_v41, %s6901_s29  ;;  %v4293_v35 = vsel %vm804_vm5, %v13019_v0, %v4249_v60 }
 0x684   :  { %4980 = vmatpush1.msra.mxu0 %v4293_v35  ;;  %v4247_v50 = vpop.permute.xlu0 %4246 }
 0x685   :  { %4266 = vrot.lane.b32.xlu0 %v12732_v49, %s6901_s29 }
 0x687   :  { %4740 = vrot.lane.b32.xlu1 %v11778_v27, %s6908_s13  ;;  %v4251_v31 = vpop.permute.xlu1 %4250 }
 0x688   :  { %v4290_v13 = vsel %vm804_vm5, %v4247_v50, %v4251_v31  ;;  %v4288_v23 = vsel %vm804_vm5, %v4251_v31, %v4255_v51  ;;  %v13089_v51 = vld [vmem:[%s14815_s6] sm:$0xff] }
 0x689   :  { %4732 = vrot.lane.b32.xlu0 %v12670_v45, %s6908_s13  ;;  %4981 = vmatprep.subr.mxu0 %v4290_v13 }
 0x68a   :  { %v13036_v56 = vpop.permute.xlu0 %4274  ;;  %5065 = vmatpush1.msra.mxu1 %v4288_v23 }
 0x68b   :  { %4736 = vrot.lane.b32.xlu1 %v12694_v55, %s6908_s13  ;;  %v4292_v42 = vsel %vm804_vm5, %v13036_v56, %v4247_v50  ;;  %v13098_v50 = vld [vmem:[%s14815_s6 + $0x18] sm:$0xff] }
 0x68c   :  { %4982 = vmatpush1.msra.mxu0 %v4292_v42  ;;  %v13111_v42 = vld [vmem:[%s14815_s6 + $0x10] sm:$0xff] }
 0x68d   :  { %4738 = vrot.lane.b32.xlu0 %v11847_v4, %s6908_s13  ;;  %v4725_v62 = vpop.permute.xlu1 %4724 }
 0x68f   :  { %4730 = vrot.lane.b32.xlu1 %v12732_v49, %s6908_s13 }
 0x690   :  { %v13050_v11 = vpop.permute.xlu0 %4728 }
 0x691   :  { %4734 = vrot.lane.b32.xlu0 %v12754_v57, %s6908_s13  ;;  %v4749_v39 = vsel %vm16616_vm15, %v4725_v62, %v13050_v11  ;;  %vm16628_vm15 = vmmov %vm16604_vm0 }
 0x692   :  { %5094 = vmatprep.subr.mxu1 %v4749_v39 }
 0x693   :  { %4929 = vperm.xlu1 %6880, %v4924_v21   ;;  %v4717_v10 = vpop.permute.xlu1 %4716  ;;  %v13119_v21 = vld [vmem:[%s14815_s6 + $0x28] sm:$0xff] }
 0x695   :  { %4939 = vperm.xlu0 %6879, %v4926_v8   ;;  %v13130_v8 = vld [vmem:[%s14815_s6 + $0x20] sm:$0xff] }
 0x696   :  { %v4721_v30 = vpop.permute.xlu0 %4720 }
 0x697   :  { %4934 = vperm.xlu1 %6880, %v4925_v5   ;;  %v4753_v1 = vsel %vm16617_vm13, %v4717_v10, %v4721_v30  ;;  %v4751_v18 = vsel %vm16618_vm9, %v4721_v30, %v4725_v62  ;;  %vm16630_vm13 = vmmov %vm16604_vm0  ;;  %vm16632_vm9 = vcmp.lt.s32.totalorder %v8114_v33, 127 }
 0x698   :  { %5011 = vmatprep.subr.mxu0 %v4753_v1  ;;  %5095 = vmatpush2.msra.mxu1 %v4751_v18  ;;  %v13073_v3 = vpop.permute.xlu1 %4712  ;;  %v16627_v1 = vld [vmem:[#allocation77_spill] sm:$0xff] }
 0x699   :  { %3559 = vperm.xlu0 %6879, %v3554_v61   ;;  %v4755_v9 = vsel %vm16619_vm2, %v13073_v3, %v4717_v10  ;;  %vm16633_vm2 = vmmov %vm16632_vm9 }
 0x69a   :  { %5012 = vmatpush2.msra.mxu0 %v4755_v9 }
 0x69b   :  { %3564 = vperm.xlu1 %6880, %v3555_v52   ;;  %v4723_v6 = vpop.permute.xlu0 %4722 }
 0x69d   :  { %3569 = vperm.xlu0 %6879, %v3556_v26   ;;  %v13081_v60 = vpop.permute.xlu1 %4726 }
 0x69e   :  { %v4748_v28 = vsel %vm16620_vm4, %v4723_v6, %v13081_v60  ;;  %vm16634_vm4 = vmmov %vm16633_vm2 }
 0x69f   :  { %v4715_v36 = vpop.permute.xlu0 %4714  ;;  %5096 = vmatprep.subr.mxu1 %v4748_v28 }
 0x6a1   :  { %v4719_v20 = vpop.permute.xlu1 %4718 }
 0x6a2   :  { %v4752_v53 = vsel %vm16621_vm6, %v4715_v36, %v4719_v20  ;;  %v4750_v35 = vsel %vm16622_vm10, %v4719_v20, %v4723_v6  ;;  %vm16635_vm6 = vmmov %vm16633_vm2 }
 0x6a3   :  { %v4677_v31 = vpop.permute.xlu0 %4676  ;;  %5013 = vmatprep.subr.mxu0 %v4752_v53  ;;  %5097 = vmatpush2.msra.mxu1 %v4750_v35  ;;  %vm16636_vm10 = vmmov %vm16633_vm2 }
 0x6a4   :  { %5099 = vmatmul.mubr.f32.vlgmr.msra.gmra.mxu1 %v13089_v51  ;;  %v4693_v13 = vsel %vm1242_vm8, %v4677_v31, %v12191_v38 }
 0x6a5   :  { %5200 = vmatprep.subr.mxu1 %v4693_v13  ;;  %v13104_v23 = vpop.permute.xlu1 %4710  ;;  %6833 = vmatprep.mubr.msk.f32.mxu1 %vm16623_vm11, %v13098_v50  ;;  %vm16637_vm11 = vmmov %vm16633_vm2 }
 0x6a6   :  { %v4754_v62 = vsel %vm16624_vm12, %v13104_v23, %v4715_v36  ;;  %v16629_v36 = vld [vmem:[#allocation11_spill] sm:$0xff]  ;;  %vm16638_vm12 = vmmov %vm16633_vm2 }
 0x6a7   :  { %v4669_v38 = vpop.permute.xlu0 %4668  ;;  %5014 = vmatpush2.msra.mxu0 %v4754_v62 }
 0x6a8   :  { %5016 = vmatmul.mubr.f32.vlgmr.msra.gmra.mxu0 %v13089_v51  ;;  %5105 = vmatmul.mubr.f32.gmra.mxu1 %v13111_v42  ;;  %v4683_v30 = vsel %vm1242_vm8, %v16586_v16, %v4669_v38 }
 0x6a9   :  { %v4673_v39 = vpop.permute.xlu1 %4672  ;;  %6830 = vmatprep.mubr.msk.f32.mxu0 %vm16625_vm1, %v13098_v50  ;;  %6834 = vmatprep.mubr.msk.f32.mxu1 %vm16626_vm14, %v13119_v21  ;;  %vm16639_vm1 = vmmov %vm16633_vm2  ;;  %vm16640_vm14 = vcmp.lt.s32.totalorder %v8114_v33, 1 }
 0x6aa   :  { %v4681_v10 = vsel %vm1242_vm8, %v4669_v38, %v4673_v39  ;;  %v4679_v5 = vsel %vm1242_vm8, %v4673_v39, %v4677_v31  ;;  %v16631_v38 = vld [vmem:[#allocation159_spill] sm:$0xff] }
 0x6ab   :  { %v4675_v61 = vpop.permute.xlu0 %4674  ;;  %5117 = vmatprep.subr.mxu0 %v4681_v10  ;;  %5201 = vmatpush1.msra.mxu1 %v4679_v5 }
 0x6ac   :  { %5022 = vmatmul.mubr.f32.gmra.mxu0 %v13111_v42  ;;  %5111 = vmatmul.mubr.f32.gmra.mxu1 %v13130_v8  ;;  %v4692_v18 = vsel %vm1242_vm8, %v4675_v61, %v16627_v1 }
 0x6ad   :  { %5118 = vmatpush1.msra.mxu0 %v4683_v30  ;;  %5202 = vmatprep.subr.mxu1 %v4692_v18  ;;  %v4667_v52 = vpop.permute.xlu1 %4666 }
 0x6ae   :  { %6831 = vmatprep.mubr.msk.f32.mxu0 %vm16604_vm0, %v13119_v21  ;;  %6838 = vmatprep.mubr.msk.f32.mxu1 %vm16628_vm15, %v12929_v19  ;;  %v4682_v28 = vsel %vm1242_vm8, %v12221_v2, %v4667_v52  ;;  %vm16641_vm0 = vmmov %vm16640_vm14 }
 0x6af   :  { %v4671_v26 = vpop.permute.xlu0 %4670  ;;  %vm16642_vm15 = vmmov %vm16641_vm0 }
 0x6b0   :  { %5028 = vmatmul.mubr.f32.gmra.mxu0 %v13130_v8  ;;  %v4680_v9 = vsel %vm1242_vm8, %v4667_v52, %v4671_v26  ;;  %v4678_v16 = vsel %vm1242_vm8, %v4671_v26, %v4675_v61  ;;  %v13181_v52 = vpop.f32.mrf.mxu1 }
 0x6b1   :  { %5119 = vmatprep.subr.mxu0 %v4680_v9  ;;  %5203 = vmatpush1.msra.mxu1 %v4678_v16  ;;  %v4613_v6 = vpop.permute.xlu1 %4612  ;;  %v13183_v9 = vpop.f32.mrf.mxu0 }
 0x6b2   :  { %5120 = vmatpush1.msra.mxu0 %v4682_v28  ;;  %v4629_v20 = vsel %vm1169_vm7, %v4613_v6, %v16629_v36  ;;  %6835 = vmatprep.mubr.msk.f32.mxu0 %vm16630_vm13, %v12929_v19  ;;  %v13195_v36 = vpop.f32.mrf.mxu1  ;;  %vm16643_vm13 = vmmov %vm16641_vm0 }
 0x6b3   :  { %v4605_v53 = vpop.permute.xlu0 %4604  ;;  %5204 = vmatprep.subr.mxu1 %v4629_v20 }
 0x6b4   :  { %v4619_v2 = vsel %vm1169_vm7, %v12289_v63, %v4605_v53 }
 0x6b5   :  { %v4609_v35 = vpop.permute.xlu1 %4608 }
 0x6b6   :  { %v4617_v31 = vsel %vm1169_vm7, %v4605_v53, %v4609_v35  ;;  %v4615_v13 = vsel %vm1169_vm7, %v4609_v35, %v4613_v6  ;;  %v13197_v53 = vpop.f32.mrf.mxu0 }
 0x6b7   :  { %v4611_v62 = vpop.permute.xlu0 %4610  ;;  %5121 = vmatprep.subr.mxu0 %v4617_v31  ;;  %5205 = vmatpush1.msra.mxu1 %v4615_v13  ;;  %v13199_v31 = vpop.f32.mrf.mxu1 }
 0x6b8   :  { %5122 = vmatpush1.msra.mxu0 %v4619_v2  ;;  %v4628_v19 = vsel %vm1169_vm7, %v4611_v62, %v16631_v38  ;;  %v13208_v2 = vpop.f32.mrf.mxu0 }
 0x6b9   :  { %5206 = vmatprep.subr.mxu1 %v4628_v19  ;;  %v4603_v39 = vpop.permute.xlu1 %4602  ;;  %v13213_v19 = vpop.f32.mrf.mxu1 }
 0x6ba   :  { %v4618_v63 = vsel %vm1169_vm7, %v12385_v24, %v4603_v39 }
 0x6bb   :  { %v4607_v10 = vpop.permute.xlu0 %4606 }
 0x6bc   :  { %v4616_v5 = vsel %vm1169_vm7, %v4603_v39, %v4607_v10  ;;  %v4614_v61 = vsel %vm1169_vm7, %v4607_v10, %v4611_v62  ;;  %v13222_v39 = vpop.f32.mrf.mxu0 }
 0x6bd   :  { %5123 = vmatprep.subr.mxu0 %v4616_v5  ;;  %5207 = vmatpush1.msra.mxu1 %v4614_v61  ;;  %v4549_v30 = vpop.permute.xlu1 %4548 }
 0x6be   :  { %5124 = vmatpush1.msra.mxu0 %v4618_v63  ;;  %v4565_v1 = vsel %vm16632_vm9, %v4549_v30, %v12508_v12  ;;  %vm16644_vm9 = vmmov %vm16641_vm0 }
 0x6bf   :  { %v4541_v18 = vpop.permute.xlu0 %4540  ;;  %5208 = vmatprep.subr.mxu1 %v4565_v1 }
 0x6c0   :  { %v4555_v24 = vsel %vm16635_vm6, %v12453_v32, %v4541_v18  ;;  %vm16647_vm6 = vmmov %vm16641_vm0 }
 0x6c1   :  { %v4545_v26 = vpop.permute.xlu1 %4544 }
 0x6c2   :  { %v4553_v16 = vsel %vm16633_vm2, %v4541_v18, %v4545_v26  ;;  %v4551_v6 = vsel %vm16634_vm4, %v4545_v26, %v4549_v30  ;;  %vm16645_vm2 = vmmov %vm16641_vm0 }
 0x6c3   :  { %v4547_v28 = vpop.permute.xlu0 %4546  ;;  %5125 = vmatprep.subr.mxu0 %v4553_v16  ;;  %5209 = vmatpush1.msra.mxu1 %v4551_v6  ;;  %vm16646_vm4 = vmmov %vm16641_vm0 }
 0x6c4   :  { %5126 = vmatpush1.msra.mxu0 %v4555_v24  ;;  %v4564_v12 = vsel %vm16636_vm10, %v4547_v28, %v12577_v34  ;;  %vm16648_vm10 = vcmp.lt.s32.totalorder %v8114_v33, 19 }
 0x6c5   :  { %5210 = vmatprep.subr.mxu1 %v4564_v12  ;;  %v4539_v20 = vpop.permute.xlu1 %4538 }
 0x6c6   :  { %v4554_v34 = vsel %vm16639_vm1, %v12541_v15, %v4539_v20  ;;  %vm16651_vm1 = vmmov %vm16648_vm10 }
 0x6c7   :  { %v4543_v35 = vpop.permute.xlu0 %4542 }
 0x6c8   :  { %v4552_v13 = vsel %vm16637_vm11, %v4539_v20, %v4543_v35  ;;  %v4550_v32 = vsel %vm16638_vm12, %v4543_v35, %v4547_v28  ;;  %vm16649_vm11 = vmmov %vm16648_vm10 }
 0x6c9   :  { %5127 = vmatprep.subr.mxu0 %v4552_v13  ;;  %5211 = vmatpush1.msra.mxu1 %v4550_v32  ;;  %v4465_v62 = vpop.permute.xlu1 %4464  ;;  %vm16650_vm12 = vmmov %vm16648_vm10 }
 0x6ca   :  { %5128 = vmatpush1.msra.mxu0 %v4554_v34  ;;  %5212 = vmatprep.subr.mxu1 %v11778_v27  ;;  %v4471_v27 = vsel %vm16640_vm14, %v4465_v62, %v12702_v29  ;;  %vm16652_vm14 = vmmov %vm16651_vm1 }
 0x6cb   :  { %v4457_v38 = vpop.permute.xlu0 %4456  ;;  %5129 = vmatprep.subr.mxu0 %v12670_v45  ;;  %5213 = vmatpush1.msra.mxu1 %v12694_v55 }
 0x6cc   :  { %5130 = vmatpush1.msra.mxu0 %v16524_v43  ;;  %5214 = vmatprep.subr.mxu1 %v11847_v4  ;;  %v4477_v55 = vsel %vm16643_vm13, %v12606_v44, %v4457_v38 }
 0x6cd   :  { %5131 = vmatprep.subr.mxu0 %v12732_v49  ;;  %5215 = vmatpush1.msra.mxu1 %v12754_v57  ;;  %v4461_v15 = vpop.permute.xlu1 %4460  ;;  %v13232_v49 = vpop.f32.mrf.mxu1 }
 0x6ce   :  { %5132 = vmatpush1.msra.mxu0 %v16546_v41  ;;  %5216 = vmatprep.subr.mxu1 %v4471_v27  ;;  %v4475_v45 = vsel %vm16641_vm0, %v4457_v38, %v4461_v15  ;;  %v4473_v4 = vsel %vm16642_vm15, %v4461_v15, %v4465_v62  ;;  %v13237_v57 = vpop.f32.mrf.mxu0  ;;  %vm16653_vm0 = vmmov %vm16651_vm1 }
 0x6cf   :  { %v4463_v43 = vpop.permute.xlu0 %4462  ;;  %5133 = vmatprep.subr.mxu0 %v4475_v45  ;;  %5217 = vmatpush1.msra.mxu1 %v4473_v4  ;;  %v13239_v5 = vpop.f32.mrf.mxu1  ;;  %vm16654_vm15 = vmmov %vm16653_vm0 }
 0x6d0   :  { %5134 = vmatpush1.msra.mxu0 %v4477_v55  ;;  %v4470_v41 = vsel %vm16644_vm9, %v4463_v43, %v12798_v58  ;;  %v13248_v63 = vpop.f32.mrf.mxu0  ;;  %vm16655_vm13 = vmmov %vm16653_vm0  ;;  %vm16656_vm9 = vcmp.lt.s32.totalorder %v8114_v33, 107 }
 0x6d1   :  { %5218 = vmatprep.subr.mxu1 %v4470_v41  ;;  %v4455_v29 = vpop.permute.xlu1 %4454  ;;  %v13253_v26 = vpop.f32.mrf.mxu1 }
 0x6d2   :  { %v4476_v58 = vsel %vm16647_vm6, %v12678_v37, %v4455_v29  ;;  %v13255_v6 = vpop.f32.mrf.mxu0 }
 0x6d3   :  { %v4459_v10 = vpop.permute.xlu0 %4458  ;;  %v13264_v12 = vpop.f32.mrf.mxu1 }
 0x6d4   :  { %v4474_v61 = vsel %vm16645_vm2, %v4455_v29, %v4459_v10  ;;  %v4472_v44 = vsel %vm16646_vm4, %v4459_v10, %v4463_v43  ;;  %v13269_v13 = vpop.f32.mrf.mxu0  ;;  %vm16657_vm2 = vmmov %vm16656_vm9 }
 0x6d5   :  { %5135 = vmatprep.subr.mxu0 %v4474_v61  ;;  %5219 = vmatpush1.msra.mxu1 %v4472_v44  ;;  %v4401_v30 = vpop.permute.xlu1 %4400  ;;  %v13271_v62 = vpop.f32.mrf.mxu1  ;;  %vm16658_vm4 = vmmov %vm16657_vm2 }
 0x6d6   :  { %5136 = vmatpush1.msra.mxu0 %v4476_v58  ;;  %v4407_v1 = vsel %vm16648_vm10, %v4401_v30, %v12854_v54  ;;  %v13280_v15 = vpop.f32.mrf.mxu0  ;;  %vm16659_vm6 = vmmov %vm16657_vm2 }
 0x6d7   :  { %v4393_v18 = vpop.permute.xlu0 %4392  ;;  %5220 = vmatprep.subr.mxu1 %v4407_v1  ;;  %v13285_v4 = vpop.f32.mrf.mxu1  ;;  %vm16660_vm10 = vmmov %vm16657_vm2 }
 0x6d8   :  { %v4413_v54 = vsel %vm16651_vm1, %v12782_v46, %v4393_v18  ;;  %v13287_v55 = vpop.f32.mrf.mxu0  ;;  %vm16663_vm1 = vmmov %vm16657_vm2 }
 0x6d9   :  { %v4397_v16 = vpop.permute.xlu1 %4396  ;;  %v13296_v10 = vpop.f32.mrf.mxu1 }
 0x6da   :  { %v4411_v28 = vsel %vm16649_vm11, %v4393_v18, %v4397_v16  ;;  %v4409_v37 = vsel %vm16650_vm12, %v4397_v16, %v4401_v30  ;;  %v13301_v30 = vpop.f32.mrf.mxu0  ;;  %vm16661_vm11 = vmmov %vm16657_vm2 }
 0x6db   :  { %v4399_v24 = vpop.permute.xlu0 %4398  ;;  %5137 = vmatprep.subr.mxu0 %v4411_v28  ;;  %5221 = vmatpush1.msra.mxu1 %v4409_v37  ;;  %v13303_v1 = vpop.f32.mrf.mxu1  ;;  %vm16662_vm12 = vmmov %vm16657_vm2 }
 0x6dc   :  { %5138 = vmatpush1.msra.mxu0 %v4413_v54  ;;  %v4406_v20 = vsel %vm16652_vm14, %v4399_v24, %v12933_v22  ;;  %v13312_v28 = vpop.f32.mrf.mxu0  ;;  %vm16664_vm14 = vcmask 130048  }
 0x6dd   :  { %5222 = vmatprep.subr.mxu1 %v4406_v20  ;;  %v4391_v35 = vpop.permute.xlu1 %4390  ;;  %v13317_v54 = vpop.f32.mrf.mxu1 }
 0x6de   :  { %v4412_v22 = vsel %vm16655_vm13, %v12840_v17, %v4391_v35 }
 0x6df   :  { %v4395_v32 = vpop.permute.xlu0 %4394 }
 0x6e0   :  { %v4410_v34 = vsel %vm16653_vm0, %v4391_v35, %v4395_v32  ;;  %v4408_v46 = vsel %vm16654_vm15, %v4395_v32, %v4399_v24  ;;  %v13319_v35 = vpop.f32.mrf.mxu0  ;;  %vm16665_vm0 = vmmov %vm16664_vm14 }
 0x6e1   :  { %5139 = vmatprep.subr.mxu0 %v4410_v34  ;;  %5223 = vmatpush1.msra.mxu1 %v4408_v46  ;;  %v4337_v38 = vpop.permute.xlu1 %4336  ;;  %v13328_v46 = vpop.f32.mrf.mxu1  ;;  %vm16666_vm15 = vmmov %vm16665_vm0 }
 0x6e2   :  { %5140 = vmatpush1.msra.mxu0 %v4412_v22  ;;  %v4343_v27 = vsel %vm877_vm3, %v4337_v38, %v12967_v25  ;;  %vm16667_vm13 = vmmov %vm16665_vm0 }
 0x6e3   :  { %v4329_v45 = vpop.permute.xlu0 %4328  ;;  %5224 = vmatprep.subr.mxu1 %v4343_v27  ;;  %v13333_v27 = vpop.f32.mrf.mxu0 }
 0x6e4   :  { %v4349_v25 = vsel %vm877_vm3, %v12919_v14, %v4329_v45 }
 0x6e5   :  { %v4333_v43 = vpop.permute.xlu1 %4332 }
 0x6e6   :  { %v4347_v41 = vsel %vm877_vm3, %v4329_v45, %v4333_v43  ;;  %v4345_v17 = vsel %vm877_vm3, %v4333_v43, %v4337_v38 }
 0x6e7   :  { %v4335_v29 = vpop.permute.xlu0 %4334  ;;  %5141 = vmatprep.subr.mxu0 %v4347_v41  ;;  %5225 = vmatpush1.msra.mxu1 %v4345_v17 }
 0x6e8   :  { %5142 = vmatpush1.msra.mxu0 %v4349_v25  ;;  %v4342_v61 = vsel %vm877_vm3, %v4335_v29, %v12993_v59 }
 0x6e9   :  { %5226 = vmatprep.subr.mxu1 %v4342_v61  ;;  %v4327_v44 = vpop.permute.xlu1 %4326 }
 0x6ea   :  { %v4348_v59 = vsel %vm877_vm3, %v12958_v40, %v4327_v44 }
 0x6eb   :  { %v4331_v58 = vpop.permute.xlu0 %4330 }
 0x6ec   :  { %v4346_v18 = vsel %vm877_vm3, %v4327_v44, %v4331_v58  ;;  %v4344_v14 = vsel %vm877_vm3, %v4331_v58, %v4335_v29  ;;  %v13344_v29 = vpop.f32.mrf.mxu0 }
 0x6ed   :  { %5143 = vmatprep.subr.mxu0 %v4346_v18  ;;  %5227 = vmatpush1.msra.mxu1 %v4344_v14  ;;  %v4273_v16 = vpop.permute.xlu1 %4272 }
 0x6ee   :  { %5144 = vmatpush1.msra.mxu0 %v4348_v59  ;;  %v4279_v37 = vsel %vm804_vm5, %v4273_v16, %v13019_v0  ;;  %v13351_v18 = vpop.f32.mrf.mxu0 }
 0x6ef   :  { %v4265_v24 = vpop.permute.xlu0 %4264  ;;  %5228 = vmatprep.subr.mxu1 %v4279_v37 }
 0x6f0   :  { %v4285_v0 = vsel %vm804_vm5, %v12986_v7, %v4265_v24 }
 0x6f1   :  { %v4269_v20 = vpop.permute.xlu1 %4268  ;;  %v13335_v43 = vpop.f32.mrf.mxu1 }
 0x6f2   :  { %v4283_v32 = vsel %vm804_vm5, %v4265_v24, %v4269_v20  ;;  %v4281_v40 = vsel %vm804_vm5, %v4269_v20, %v4273_v16  ;;  %v13365_v24 = vpop.f32.mrf.mxu0 }
 0x6f3   :  { %v4271_v34 = vpop.permute.xlu0 %4270  ;;  %5145 = vmatprep.subr.mxu0 %v4283_v32  ;;  %5229 = vmatpush1.msra.mxu1 %v4281_v40  ;;  %v13349_v44 = vpop.f32.mrf.mxu1 }
 0x6f4   :  { %5146 = vmatpush1.msra.mxu0 %v4285_v0  ;;  %v4278_v38 = vsel %vm804_vm5, %v4271_v34, %v13036_v56  ;;  %v13373_v0 = vpop.f32.mrf.mxu0 }
 0x6f5   :  { %5230 = vmatprep.subr.mxu1 %v4278_v38  ;;  %v4263_v22 = vpop.permute.xlu1 %4262 }
 0x6f6   :  { %v4284_v56 = vsel %vm804_vm5, %v13012_v47, %v4263_v22  ;;  %v13360_v59 = vpop.f32.mrf.mxu1 }
 0x6f7   :  { %v4267_v45 = vpop.permute.xlu0 %4266 }
 0x6f8   :  { %v4282_v41 = vsel %vm804_vm5, %v4263_v22, %v4267_v45  ;;  %v4280_v7 = vsel %vm804_vm5, %v4267_v45, %v4271_v34  ;;  %v13367_v40 = vpop.f32.mrf.mxu1  ;;  %v4229_v22 = vpop.f32.mrf.mxu0 }
 0x6f9   :  { %5147 = vmatprep.subr.mxu0 %v4282_v41  ;;  %5231 = vmatpush1.msra.mxu1 %v4280_v7  ;;  %v4741_v17 = vpop.permute.xlu1 %4740 }
 0x6fa   :  { %5148 = vmatpush1.msra.mxu0 %v4284_v56  ;;  %v4757_v25 = vsel %vm16656_vm9, %v4741_v17, %v13073_v3  ;;  %v4146_v38 = vpop.f32.mrf.mxu1  ;;  %vm16674_vm9 = vcmp.lt.s32.totalorder %v8114_v33, 127 }
 0x6fb   :  { %v4733_v61 = vpop.permute.xlu0 %4732  ;;  %5260 = vmatprep.subr.mxu1 %v4757_v25 }
 0x6fc   :  { %v4747_v3 = vsel %vm16659_vm6, %v13050_v11, %v4733_v61  ;;  %v4148_v45 = vpop.f32.mrf.mxu1 }
 0x6fd   :  { %v4737_v58 = vpop.permute.xlu1 %4736 }
 0x6fe   :  { %v4745_v14 = vsel %vm16657_vm2, %v4733_v61, %v4737_v58  ;;  %v4743_v47 = vsel %vm16658_vm4, %v4737_v58, %v4741_v17  ;;  %vm16675_vm2 = vmmov %vm16674_vm9 }
 0x6ff   :  { %v4739_v16 = vpop.permute.xlu0 %4738  ;;  %5177 = vmatprep.subr.mxu0 %v4745_v14  ;;  %5261 = vmatpush2.msra.mxu1 %v4743_v47  ;;  %vm16676_vm4 = vmmov %vm16675_vm2 }
 0x700   :  { %5178 = vmatpush2.msra.mxu0 %v4747_v3  ;;  %v4756_v37 = vsel %vm16660_vm10, %v4739_v16, %v13104_v23  ;;  %vm16677_vm6 = vmmov %vm16675_vm2  ;;  %vm16678_vm10 = vcmp.lt.s32.totalorder %v8114_v33, 1 }
 0x701   :  { %5262 = vmatprep.subr.mxu1 %v4756_v37  ;;  %v4731_v20 = vpop.permute.xlu1 %4730 }
 0x702   :  { %v4746_v23 = vsel %vm16663_vm1, %v13081_v60, %v4731_v20  ;;  %v4231_v60 = vpop.f32.mrf.mxu0  ;;  %vm16681_vm1 = vmmov %vm16678_vm10 }
 0x703   :  { %v4735_v32 = vpop.permute.xlu0 %4734 }
 0x704   :  { %v4744_v34 = vsel %vm16661_vm11, %v4731_v20, %v4735_v32  ;;  %v4742_v11 = vsel %vm16662_vm12, %v4735_v32, %v4739_v16  ;;  %vm16679_vm11 = vmmov %vm16678_vm10 }
 0x705   :  { %5179 = vmatprep.subr.mxu0 %v4744_v34  ;;  %5263 = vmatpush2.msra.mxu1 %v4742_v11  ;;  %vm16680_vm12 = vmmov %vm16678_vm10 }
 0x706   :  { %5180 = vmatpush2.msra.mxu0 %v4746_v23  ;;  %5265 = vmatmul.mubr.f32.vlgmr.msra.gmra.mxu1 %v13089_v51 }
 0x707   :  { %5182 = vmatmul.mubr.f32.vlgmr.msra.gmra.mxu0 %v13089_v51  ;;  %6839 = vmatprep.mubr.msk.f32.mxu1 %vm16664_vm14, %v13098_v50  ;;  %vm16682_vm14 = vmmov %vm16681_vm1 }
 0x708   :  { %6836 = vmatprep.mubr.msk.f32.mxu0 %vm16665_vm0, %v13098_v50  ;;  %vm16683_vm0 = vmmov %vm16681_vm1 }
 0x70a   :  { %5271 = vmatmul.mubr.f32.gmra.mxu1 %v13111_v42 }
 0x70b   :  { %5188 = vmatmul.mubr.f32.gmra.mxu0 %v13111_v42  ;;  %6840 = vmatprep.mubr.msk.f32.mxu1 %vm16666_vm15, %v13119_v21  ;;  %vm16684_vm15 = vmmov %vm16683_vm0 }
 0x70c   :  { %6837 = vmatprep.mubr.msk.f32.mxu0 %vm16667_vm13, %v13119_v21  ;;  %v4152_v41 = vpop.f32.mrf.mxu1  ;;  %vm16685_vm13 = vmmov %vm16683_vm0 }
 0x70e   :  { %v13390_v51 = vpop.permute.xlu1 %4929  ;;  %5277 = vmatmul.mubr.f32.gmra.mxu1 %v13130_v8  ;;  %v4154_v42 = vpop.f32.mrf.mxu1 }
 0x70f   :  { %5194 = vmatmul.mubr.f32.gmra.mxu0 %v13130_v8  ;;  %v4235_v7 = vpop.f32.mrf.mxu0 }
 0x710   :  { %v13394_v50 = vpop.permute.xlu0 %4939  ;;  %v4158_v34 = vpop.f32.mrf.mxu1 }
 0x711   :  { %v4237_v14 = vpop.f32.mrf.mxu0 }
 0x712   :  { %v13396_v17 = vpop.permute.xlu1 %4934 }
 0x714   :  { %v3560_v56 = vpop.permute.xlu0 %3559 }
 0x715   :  { %v3649_v25 = vadd.f32 %v13183_v9, %v3560_v56  ;;  %v3651_v61 = vadd.f32 %v13197_v53, %v3560_v56  ;;  %v3815_v21 = vadd.f32 %v13253_v26, %v3560_v56  ;;  %v3817_v58 = vadd.f32 %v13264_v12, %v3560_v56 }
 0x716   :  { %v3981_v47 = vadd.f32 %v13319_v35, %v3560_v56  ;;  %v3983_v8 = vadd.f32 %v13333_v27, %v3560_v56  ;;  %v4147_v16 = vadd.f32 %v4146_v38, %v3560_v56  ;;  %v4149_v3 = vadd.f32 %v4148_v45, %v3560_v56  ;;  %v3565_v37 = vpop.permute.xlu1 %3564  ;;  %v4160_v45 = vpop.f32.mrf.mxu1 }
 0x717   :  { %v3732_v20 = vadd.f32 %v13181_v52, %v3649_v25  ;;  %v3734_v32 = vadd.f32 %v13195_v36, %v3651_v61  ;;  %v3898_v9 = vadd.f32 %v13255_v6, %v3815_v21  ;;  %v3900_v53 = vadd.f32 %v13269_v13, %v3817_v58 }
 0x718   :  { %v4064_v26 = vadd.f32 %v13317_v54, %v3981_v47  ;;  %v4066_v12 = vadd.f32 %v13328_v46, %v3983_v8  ;;  %v4230_v11 = vadd.f32 %v4229_v22, %v4147_v16  ;;  %v4232_v35 = vadd.f32 %v4231_v60, %v4149_v3  ;;  %v4241_v54 = vpop.f32.mrf.mxu0  ;;  %v3570_v46 = vpop.permute.xlu0 %3569 }
 0x719   :  { %6697 = vst [vmem:[%s14812_s11 + $0x80] sm:$0xff] %v3732_v20  ;;  %6698 = vst [vmem:[%s14812_s11 + $0x88] sm:$0xff] %v3734_v32  ;;  %v3655_v52 = vadd.f32 %v13208_v2, %v3565_v37  ;;  %v3657_v36 = vadd.f32 %v13222_v39, %v3565_v37  ;;  %v3821_v6 = vadd.f32 %v13271_v62, %v3565_v37 }
 0x71a   :  { %6699 = vst [vmem:[%s14812_s11 + $0x90] sm:$0xff] %v3898_v9  ;;  %6700 = vst [vmem:[%s14812_s11 + $0x98] sm:$0xff] %v3900_v53  ;;  %v3823_v13 = vadd.f32 %v13285_v4, %v3565_v37  ;;  %v3987_v2 = vadd.f32 %v13344_v29, %v3565_v37  ;;  %v3989_v39 = vadd.f32 %v13351_v18, %v3565_v37  ;;  %v16669_v9 = vld [vmem:[#allocation5_spill] sm:$0xff] }
 0x71b   :  { %6701 = vst [vmem:[%s14812_s11 + $0xa0] sm:$0xff] %v4064_v26  ;;  %6702 = vst [vmem:[%s14812_s11 + $0xa8] sm:$0xff] %v4066_v12  ;;  %v4153_v62 = vadd.f32 %v4152_v41, %v3565_v37  ;;  %v4155_v4 = vadd.f32 %v4154_v42, %v3565_v37  ;;  %v3738_v27 = vadd.f32 %v13199_v31, %v3655_v52 }
 0x71c   :  { %6703 = vst [vmem:[%s14812_s11 + $0xb0] sm:$0xff] %v4230_v11  ;;  %6704 = vst [vmem:[%s14812_s11 + $0xb8] sm:$0xff] %v4232_v35  ;;  %v3740_v23 = vadd.f32 %v13213_v19, %v3657_v36  ;;  %v3904_v38 = vadd.f32 %v13280_v15, %v3821_v6  ;;  %v3906_v22 = vadd.f32 %v13287_v55, %v3823_v13 }
 0x71d   :  { %v4070_v60 = vadd.f32 %v13335_v43, %v3987_v2  ;;  %v4072_v56 = vadd.f32 %v13349_v44, %v3989_v39  ;;  %v4236_v25 = vadd.f32 %v4235_v7, %v4153_v62  ;;  %v4238_v29 = vadd.f32 %v4237_v14, %v4155_v4  ;;  %6705 = vst [vmem:[%s14812_s11 + $0xc0] sm:$0xff] %v3738_v27  ;;  %v4243_v43 = vpop.f32.mrf.mxu0  ;;  %v16671_v27 = vld [vmem:[#allocation6_spill] sm:$0xff] }
 0x71e   :  { %6706 = vst [vmem:[%s14812_s11 + $0xc8] sm:$0xff] %v3740_v23  ;;  %6707 = vst [vmem:[%s14812_s11 + $0xd0] sm:$0xff] %v3904_v38  ;;  %v3661_v31 = vadd.f32 %v13237_v57, %v3570_v46  ;;  %v3663_v19 = vadd.f32 %v13248_v63, %v3570_v46  ;;  %v3827_v15 = vadd.f32 %v13296_v10, %v3570_v46 }
 0x71f   :  { %6708 = vst [vmem:[%s14812_s11 + $0xd8] sm:$0xff] %v3906_v22  ;;  %v3829_v55 = vadd.f32 %v13303_v1, %v3570_v46  ;;  %6709 = vst [vmem:[%s14812_s11 + $0xe0] sm:$0xff] %v4070_v60  ;;  %v3993_v57 = vadd.f32 %v13365_v24, %v3570_v46  ;;  %v3995_v63 = vadd.f32 %v13373_v0, %v3570_v46 }
 0x720   :  { %6710 = vst [vmem:[%s14812_s11 + $0xe8] sm:$0xff] %v4072_v56  ;;  %6711 = vst [vmem:[%s14812_s11 + $0xf0] sm:$0xff] %v4236_v25  ;;  %v4161_v10 = vadd.f32 %v4160_v45, %v3570_v46  ;;  %v4159_v1 = vadd.f32 %v4158_v34, %v3570_v46  ;;  %v3744_v44 = vadd.f32 %v13232_v49, %v3661_v31 }
 0x721   :  { %6712 = vst [vmem:[%s14812_s11 + $0xf8] sm:$0xff] %v4238_v29  ;;  %v3746_v18 = vadd.f32 %v13239_v5, %v3663_v19  ;;  %v3910_v41 = vadd.f32 %v13301_v30, %v3827_v15  ;;  %v3912_v7 = vadd.f32 %v13312_v28, %v3829_v55  ;;  %v4076_v42 = vadd.f32 %v13360_v59, %v3993_v57  ;;  %v16668_v59 = vld [vmem:[#allocation3_spill] sm:$0xff]  ;;  %v16672_v15 = vld [vmem:[#allocation17_spill] sm:$0xff] }
 0x722   :  { %v4078_v61 = vadd.f32 %v13367_v40, %v3995_v63  ;;  %v4242_v21 = vadd.f32 %v4241_v54, %v4159_v1  ;;  %v4244_v58 = vadd.f32 %v4243_v43, %v4161_v10  ;;  %6713 = vst [vmem:[%s14812_s11 + $0x100] sm:$0xff] %v3744_v44  ;;  %v16670_v54 = vld [vmem:[#allocation4_spill] sm:$0xff] }
 0x723   :  { %6714 = vst [vmem:[%s14812_s11 + $0x108] sm:$0xff] %v3746_v18  ;;  %6715 = vst [vmem:[%s14812_s11 + $0x110] sm:$0xff] %v3910_v41  ;;  %v16673_v1 = vld [vmem:[#allocation20_spill] sm:$0xff] }
 0x724   :  { %6716 = vst [vmem:[%s14812_s11 + $0x118] sm:$0xff] %v3912_v7  ;;  %6717 = vst [vmem:[%s14812_s11 + $0x120] sm:$0xff] %v4076_v42 }
 0x725   :  { %6718 = vst [vmem:[%s14812_s11 + $0x128] sm:$0xff] %v4078_v61  ;;  %6719 = vst [vmem:[%s14812_s11 + $0x130] sm:$0xff] %v4242_v21 }
 0x726   :  { %6720 = vst [vmem:[%s14812_s11 + $0x138] sm:$0xff] %v4244_v58 }
 0x764   :  { %v5100_v49 = vpop.f32.mrf.mxu1 }
 0x765   :  { %v5101_v35 = vadd.f32 %v5100_v49, %v13390_v51 }
 0x766   :  { %v5102_v40 = vpop.f32.mrf.mxu1 }
 0x767   :  { %v13545_v2 = vmul.f32 %v5101_v35, %v16670_v54  ;;  %v5103_v39 = vadd.f32 %v5102_v40, %v13390_v51 }
 0x768   :  { %v5017_v5 = vpop.f32.mrf.mxu0  ;;  %v5106_v3 = vpop.f32.mrf.mxu1 }
 0x769   :  { %v5018_v30 = vadd.f32 %v5017_v5, %v13390_v51  ;;  %v5107_v52 = vadd.f32 %v5106_v3, %v13396_v17  ;;  %v13557_v23 = vmul.f32 %v5103_v39, %v16671_v27 }
 0x76a   :  { %v5019_v28 = vpop.f32.mrf.mxu0  ;;  %v5108_v11 = vpop.f32.mrf.mxu1 }
 0x76b   :  { %v13508_v24 = vmul.f32 %v5018_v30, %v16668_v59  ;;  %v5020_v8 = vadd.f32 %v5019_v28, %v13390_v51  ;;  %v13549_v62 = vmul.f32 %v5107_v52, %v16670_v54  ;;  %v5109_v38 = vadd.f32 %v5108_v11, %v13396_v17 }
 0x76c   :  { %v5023_v0 = vpop.f32.mrf.mxu0  ;;  %v5112_v13 = vpop.f32.mrf.mxu1 }
 0x76d   :  { %v5024_v14 = vadd.f32 %v5023_v0, %v13396_v17  ;;  %5307 = vrot.lane.b32.xlu1 %v13508_v24, %s6901_s29  ;;  %v13521_v53 = vmul.f32 %v5020_v8, %v16669_v9  ;;  %v5113_v4 = vadd.f32 %v5112_v13, %v13394_v50  ;;  %v13569_v60 = vmul.f32 %v5109_v38, %v16671_v27 }
 0x76e   :  { %v5025_v47 = vpop.f32.mrf.mxu0  ;;  %v5114_v46 = vpop.f32.mrf.mxu1 }
 0x76f   :  { %v13515_v16 = vmul.f32 %v5024_v14, %v16668_v59  ;;  %v5026_v34 = vadd.f32 %v5025_v47, %v13396_v17  ;;  %v13561_v22 = vmul.f32 %v5113_v4, %v16670_v54  ;;  %v5115_v45 = vadd.f32 %v5114_v46, %v13394_v50 }
 0x770   :  { %v5029_v37 = vpop.f32.mrf.mxu0 }
 0x771   :  { %v5030_v20 = vadd.f32 %v5029_v37, %v13394_v50  ;;  %5309 = vrot.lane.b32.xlu0 %v13515_v16, %s6901_s29  ;;  %v13535_v36 = vmul.f32 %v5026_v34, %v16669_v9  ;;  %v13572_v56 = vmul.f32 %v5115_v45, %v16671_v27 }
 0x772   :  { %v5031_v32 = vpop.f32.mrf.mxu0 }
 0x773   :  { %v13525_v26 = vmul.f32 %v5030_v20, %v16668_v59  ;;  %v5032_v12 = vadd.f32 %v5031_v32, %v13394_v50 }
 0x775   :  { %5311 = vrot.lane.b32.xlu1 %v13525_v26, %s6901_s29  ;;  %5313 = vrot.lane.b32.xlu0 %v13521_v53, %s6901_s29  ;;  %v13538_v6 = vmul.f32 %v5032_v12, %v16669_v9 }
 0x779   :  { %5315 = vrot.lane.b32.xlu1 %v13535_v36, %s6901_s29  ;;  %5317 = vrot.lane.b32.xlu0 %v13538_v6, %s6901_s29 }
 0x77d   :  { %5319 = vrot.lane.b32.xlu1 %v13545_v2, %s6901_s29  ;;  %5321 = vrot.lane.b32.xlu0 %v13549_v62, %s6901_s29 }
 0x781   :  { %5323 = vrot.lane.b32.xlu1 %v13561_v22, %s6901_s29  ;;  %5325 = vrot.lane.b32.xlu0 %v13557_v23, %s6901_s29 }
 0x785   :  { %5327 = vrot.lane.b32.xlu1 %v13569_v60, %s6901_s29  ;;  %5329 = vrot.lane.b32.xlu0 %v13572_v56, %s6901_s29 }
 0x789   :  { %5721 = vrot.lane.b32.xlu1 %v13521_v53, %s6905_s26  ;;  %5727 = vrot.lane.b32.xlu0 %v13545_v2, %s6905_s26 }
 0x78d   :  { %5733 = vrot.lane.b32.xlu1 %v13557_v23, %s6905_s26 }
 0x791   :  { %5715 = vrot.lane.b32.xlu1 %v13508_v24, %s6905_s26 }
 0x795   :  { %5605 = vrot.lane.b32.xlu1 %v13538_v6, %s6904_s25 }
 0x799   :  { %5617 = vrot.lane.b32.xlu1 %v13572_v56, %s6904_s25 }
 0x79d   :  { %5597 = vrot.lane.b32.xlu1 %v13515_v16, %s6904_s25 }
 0x7a1   :  { %5609 = vrot.lane.b32.xlu1 %v13549_v62, %s6904_s25 }
 0x7c6   :  { %v13594_v25 = vpop.f32.mrf.mxu1 }
 0x7c7   :  { %v5183_v29 = vpop.f32.mrf.mxu0 }
 0x7c8   :  { %v5184_v31 = vadd.f32 %v5183_v29, %v13390_v51  ;;  %v5268_v19 = vpop.f32.mrf.mxu1 }
 0x7c9   :  { %v5269_v21 = vadd.f32 %v5268_v19, %v13390_v51  ;;  %v13722_v12 = vpop.f32.mrf.mxu0 }
 0x7ca   :  { %v13598_v55 = vmul.f32 %v5184_v31, %v16672_v15  ;;  %v13600_v43 = vpop.f32.mrf.mxu1 }
 0x7cb   :  { %v13652_v5 = vmul.f32 %v5269_v21, %v16673_v1  ;;  %v5189_v11 = vpop.f32.mrf.mxu0 }
 0x7cc   :  { %v5274_v57 = vpop.f32.mrf.mxu1  ;;  %5739 = vrot.lane.b32.xlu0 %v13598_v55, %s6905_s26  ;;  %v5190_v27 = vadd.f32 %v5189_v11, %v13396_v17 }
 0x7cd   :  { %v5275_v63 = vadd.f32 %v5274_v57, %v13396_v17  ;;  %v13732_v35 = vpop.f32.mrf.mxu0 }
 0x7ce   :  { %v13605_v10 = vpop.f32.mrf.mxu1  ;;  %v13782_v38 = vmul.f32 %v5190_v27, %v16672_v15 }
 0x7cf   :  { %v13608_v44 = vmul.f32 %v5275_v63, %v16673_v1  ;;  %v5195_v52 = vpop.f32.mrf.mxu0 }
 0x7d0   :  { %v5280_v18 = vpop.f32.mrf.mxu1  ;;  %5599 = vrot.lane.b32.xlu0 %v13525_v26, %s6904_s25  ;;  %v5196_v13 = vadd.f32 %v5195_v52, %v13394_v50 }
 0x7d1   :  { %5639 = vrot.lane.b32.xlu1 %v13608_v44, %s6904_s25  ;;  %v5281_v41 = vadd.f32 %v5280_v18, %v13394_v50 }
 0x7d2   :  { %v13748_v54 = vmul.f32 %v5196_v13, %v16672_v15 }
 0x7d3   :  { %v13620_v7 = vmul.f32 %v5281_v41, %v16673_v1 }
 0x7d4   :  { %5611 = vrot.lane.b32.xlu0 %v13561_v22, %s6904_s25 }
 0x7d5   :  { %5601 = vrot.lane.b32.xlu1 %v13521_v53, %s6904_s25 }
 0x7d8   :  { %5641 = vrot.lane.b32.xlu0 %v13620_v7, %s6904_s25 }
 0x7d9   :  { %5613 = vrot.lane.b32.xlu1 %v13557_v23, %s6904_s25 }
 0x7dc   :  { %5603 = vrot.lane.b32.xlu0 %v13535_v36, %s6904_s25 }
 0x7dd   :  { %5503 = vrot.lane.b32.xlu1 %v13525_v26, %s6903_s12 }
 0x7df   :  { %v13634_v42 = vpop.permute.xlu1 %5307 }
 0x7e0   :  { %5615 = vrot.lane.b32.xlu0 %v13569_v60, %s6904_s25 }
 0x7e1   :  { %5515 = vrot.lane.b32.xlu1 %v13561_v22, %s6903_s12 }
 0x7e3   :  { %v13636_v61 = vpop.permute.xlu0 %5309 }
 0x7e4   :  { %5595 = vrot.lane.b32.xlu0 %v13508_v24, %s6904_s25 }
 0x7e5   :  { %5545 = vrot.lane.b32.xlu1 %v13620_v7, %s6903_s12 }
 0x7e7   :  { %v13643_v58 = vpop.permute.xlu0 %5313  ;;  %v13645_v49 = vpop.permute.xlu1 %5311 }
 0x7e8   :  { %5607 = vrot.lane.b32.xlu0 %v13545_v2, %s6904_s25 }
 0x7e9   :  { %5507 = vrot.lane.b32.xlu1 %v13535_v36, %s6903_s12 }
 0x7eb   :  { %v13654_v30 = vpop.permute.xlu0 %5317  ;;  %v13656_v28 = vpop.permute.xlu1 %5315 }
 0x7ec   :  { %5637 = vrot.lane.b32.xlu0 %v13652_v5, %s6904_s25 }
 0x7ed   :  { %5519 = vrot.lane.b32.xlu1 %v13569_v60, %s6903_s12 }
 0x7ef   :  { %v13662_v59 = vpop.permute.xlu0 %5321  ;;  %v13664_v40 = vpop.permute.xlu1 %5319 }
 0x7f0   :  { %5509 = vrot.lane.b32.xlu0 %v13538_v6, %s6903_s12 }
 0x7f1   :  { %5499 = vrot.lane.b32.xlu1 %v13508_v24, %s6903_s12 }
 0x7f3   :  { %v13670_v0 = vpop.permute.xlu0 %5325  ;;  %v13672_v14 = vpop.permute.xlu1 %5323 }
 0x7f4   :  { %5521 = vrot.lane.b32.xlu0 %v13572_v56, %s6903_s12 }
 0x7f5   :  { %5511 = vrot.lane.b32.xlu1 %v13545_v2, %s6903_s12 }
 0x7f7   :  { %v13678_v47 = vpop.permute.xlu0 %5329  ;;  %v13680_v8 = vpop.permute.xlu1 %5327 }
 0x7f8   :  { %5501 = vrot.lane.b32.xlu0 %v13515_v16, %s6903_s12 }
 0x7f9   :  { %5541 = vrot.lane.b32.xlu1 %v13652_v5, %s6903_s12 }
 0x7fb   :  { %v13686_v3 = vpop.permute.xlu0 %5727  ;;  %v5722_v37 = vpop.permute.xlu1 %5721 }
 0x7fc   :  { %5513 = vrot.lane.b32.xlu0 %v13549_v62, %s6903_s12  ;;  %v5778_v20 = vsel %vm16674_vm9, %v5722_v37, %v13686_v3  ;;  %vm16686_vm9 = vmmov %vm16683_vm0 }
 0x7fd   :  { %5413 = vrot.lane.b32.xlu1 %v13538_v6, %s6902_s30  ;;  %6349 = vmatprep.subr.mxu0 %v5778_v20 }
 0x7ff   :  { %v5734_v32 = vpop.permute.xlu1 %5733 }
 0x800   :  { %5543 = vrot.lane.b32.xlu0 %v13608_v44, %s6903_s12  ;;  %v5775_v19 = vsel %vm16677_vm6, %v13686_v3, %v5734_v32  ;;  %vm16689_vm6 = vmmov %vm16683_vm0 }
 0x801   :  { %5425 = vrot.lane.b32.xlu1 %v13572_v56, %s6902_s30 }
 0x803   :  { %v13699_v9 = vpop.permute.xlu1 %5715 }
 0x804   :  { %5505 = vrot.lane.b32.xlu0 %v13521_v53, %s6903_s12  ;;  %v5781_v34 = vsel %vm16675_vm2, %v13699_v9, %v5722_v37  ;;  %vm16687_vm2 = vmmov %vm16683_vm0 }
 0x805   :  { %5405 = vrot.lane.b32.xlu1 %v13515_v16, %s6902_s30  ;;  %6350 = vmatpush1.msra.mxu0 %v5781_v34 }
 0x806   :  { %6351 = vmatprep.subr.mxu0 %v13538_v6 }
 0x807   :  { %6352 = vmatpush1.msra.mxu0 %v13525_v26  ;;  %v5606_v39 = vpop.permute.xlu1 %5605 }
 0x808   :  { %5517 = vrot.lane.b32.xlu0 %v13557_v23, %s6903_s12  ;;  %6353 = vmatprep.subr.mxu0 %v13535_v36 }
 0x809   :  { %5417 = vrot.lane.b32.xlu1 %v13549_v62, %s6902_s30  ;;  %6354 = vmatpush1.msra.mxu0 %v13515_v16 }
 0x80a   :  { %6355 = vmatprep.subr.mxu0 %v13521_v53 }
 0x80b   :  { %6356 = vmatpush1.msra.mxu0 %v13508_v24  ;;  %v13766_v4 = vpop.permute.xlu1 %5617 }
 0x80c   :  { %5407 = vrot.lane.b32.xlu0 %v13525_v26, %s6902_s30 }
 0x80d   :  { %5447 = vrot.lane.b32.xlu1 %v13608_v44, %s6902_s30 }
 0x80f   :  { %v5598_v46 = vpop.permute.xlu1 %5597 }
 0x810   :  { %5419 = vrot.lane.b32.xlu0 %v13561_v22, %s6902_s30 }
 0x811   :  { %5409 = vrot.lane.b32.xlu1 %v13521_v53, %s6902_s30 }
 0x813   :  { %v5610_v29 = vpop.permute.xlu1 %5609 }
 0x814   :  { %5449 = vrot.lane.b32.xlu0 %v13620_v7, %s6902_s30 }
 0x815   :  { %5421 = vrot.lane.b32.xlu1 %v13557_v23, %s6902_s30 }
 0x818   :  { %5411 = vrot.lane.b32.xlu0 %v13535_v36, %s6902_s30 }
 0x819   :  { %5353 = vrot.lane.b32.xlu1 %v13620_v7, %s6901_s29 }
 0x81c   :  { %5423 = vrot.lane.b32.xlu0 %v13569_v60, %s6902_s30 }
 0x81d   :  { %5349 = vrot.lane.b32.xlu1 %v13652_v5, %s6901_s29 }
 0x820   :  { %5403 = vrot.lane.b32.xlu0 %v13508_v24, %s6902_s30 }
 0x821   :  { %6019 = vrot.lane.b32.xlu1 %v13561_v22, %s6908_s13 }
 0x824   :  { %5415 = vrot.lane.b32.xlu0 %v13545_v2, %s6902_s30 }
 0x825   :  { %6031 = vrot.lane.b32.xlu1 %v13748_v54, %s6908_s13 }
 0x828   :  { %5445 = vrot.lane.b32.xlu0 %v13652_v5, %s6902_s30 }
 0x829   :  { %6011 = vrot.lane.b32.xlu1 %v13535_v36, %s6908_s13 }
 0x82c   :  { %5351 = vrot.lane.b32.xlu0 %v13608_v44, %s6901_s29 }
 0x82d   :  { %6023 = vrot.lane.b32.xlu1 %v13569_v60, %s6908_s13 }
 0x830   :  { %6013 = vrot.lane.b32.xlu0 %v13538_v6, %s6908_s13 }
 0x831   :  { %6005 = vrot.lane.b32.xlu1 %v13515_v16, %s6908_s13 }
 0x834   :  { %6025 = vrot.lane.b32.xlu0 %v13572_v56, %s6908_s13 }
 0x835   :  { %6015 = vrot.lane.b32.xlu1 %v13545_v2, %s6908_s13 }
 0x838   :  { %6007 = vrot.lane.b32.xlu0 %v13525_v26, %s6908_s13 }
 0x839   :  { %6027 = vrot.lane.b32.xlu1 %v13598_v55, %s6908_s13 }
 0x83c   :  { %6017 = vrot.lane.b32.xlu0 %v13549_v62, %s6908_s13 }
 0x83d   :  { %5917 = vrot.lane.b32.xlu1 %v13538_v6, %s6907_s28 }
 0x83e   :  { %v13784_v45 = vpop.permute.xlu0 %5739 }
 0x83f   :  { %v5772_v31 = vsel %vm16676_vm4, %v5734_v32, %v13784_v45  ;;  %vm16688_vm4 = vmmov %vm16683_vm0 }
 0x840   :  { %6029 = vrot.lane.b32.xlu0 %v13782_v38, %s6908_s13  ;;  %6432 = vmatprep.subr.mxu1 %v5772_v31 }
 0x841   :  { %5929 = vrot.lane.b32.xlu1 %v13572_v56, %s6907_s28  ;;  %6433 = vmatpush1.msra.mxu1 %v5775_v19 }
 0x842   :  { %v5600_v15 = vpop.permute.xlu0 %5599  ;;  %6434 = vmatprep.subr.mxu1 %v13572_v56 }
 0x843   :  { %6435 = vmatpush1.msra.mxu1 %v13561_v22  ;;  %v13798_v57 = vpop.permute.xlu1 %5639  ;;  %v5663_v63 = vsel %vm16678_vm10, %v5600_v15, %v5606_v39  ;;  %vm16690_vm10 = vcmp.lt.s32.totalorder %v8114_v33, 19 }
 0x844   :  { %6009 = vrot.lane.b32.xlu0 %v13521_v53, %s6908_s13  ;;  %6357 = vmatprep.subr.mxu0 %v5663_v63  ;;  %v5665_v52 = vsel %vm16683_vm0, %v13798_v57, %v5598_v46 }
 0x845   :  { %6436 = vmatprep.subr.mxu1 %v13569_v60  ;;  %5911 = vrot.lane.b32.xlu1 %v13525_v26, %s6907_s28 }
 0x846   :  { %6437 = vmatpush1.msra.mxu1 %v13549_v62  ;;  %v5612_v1 = vpop.permute.xlu0 %5611 }
 0x847   :  { %6438 = vmatprep.subr.mxu1 %v13557_v23  ;;  %v5602_v18 = vpop.permute.xlu1 %5601  ;;  %v5657_v41 = vsel %vm16679_vm11, %v5612_v1, %v13766_v4  ;;  %v5660_v21 = vsel %vm16680_vm12, %v5606_v39, %v5612_v1  ;;  %vm16691_vm11 = vmmov %vm16690_vm10 }
 0x848   :  { %6439 = vmatpush1.msra.mxu1 %v13545_v2  ;;  %6021 = vrot.lane.b32.xlu0 %v13557_v23, %s6908_s13  ;;  %vm16692_vm12 = vmmov %vm16690_vm10 }
 0x849   :  { %6440 = vmatprep.subr.mxu1 %v5657_v41  ;;  %5921 = vrot.lane.b32.xlu1 %v13549_v62, %s6907_s28 }
 0x84a   :  { %6441 = vmatpush1.msra.mxu1 %v5660_v21  ;;  %v13819_v3 = vpop.permute.xlu0 %5641 }
 0x84b   :  { %v13821_v37 = vpop.permute.xlu1 %5613  ;;  %v5666_v20 = vsel %vm16681_vm1, %v13819_v3, %v5600_v15  ;;  %vm16693_vm1 = vmmov %vm16690_vm10 }
 0x84c   :  { %6003 = vrot.lane.b32.xlu0 %v13508_v24, %s6908_s13  ;;  %6358 = vmatpush1.msra.mxu0 %v5666_v20  ;;  %vm16695_vm0 = vmmov %vm16693_vm1 }
 0x84d   :  { %5933 = vrot.lane.b32.xlu1 %v13782_v38, %s6907_s28 }
 0x84e   :  { %v5604_v32 = vpop.permute.xlu0 %5603 }
 0x84f   :  { %v5504_v34 = vpop.permute.xlu1 %5503  ;;  %v5662_v11 = vsel %vm16682_vm14, %v5598_v46, %v5604_v32  ;;  %v5659_v31 = vsel %vm16685_vm13, %v5604_v32, %v5610_v29  ;;  %vm16694_vm14 = vmmov %vm16693_vm1 }
 0x850   :  { %5923 = vrot.lane.b32.xlu0 %v13561_v22, %s6907_s28  ;;  %6359 = vmatprep.subr.mxu0 %v5662_v11  ;;  %vm16697_vm13 = vmmov %vm16695_vm0 }
 0x851   :  { %5913 = vrot.lane.b32.xlu1 %v13521_v53, %s6907_s28  ;;  %6360 = vmatpush1.msra.mxu0 %v5665_v52 }
 0x852   :  { %v13839_v13 = vpop.permute.xlu0 %5615 }
 0x853   :  { %v5516_v39 = vpop.permute.xlu1 %5515  ;;  %v5656_v27 = vsel %vm16684_vm15, %v5610_v29, %v13839_v13  ;;  %vm16696_vm15 = vmmov %vm16695_vm0 }
 0x854   :  { %5935 = vrot.lane.b32.xlu0 %v13748_v54, %s6907_s28  ;;  %6442 = vmatprep.subr.mxu1 %v5656_v27 }
 0x855   :  { %5925 = vrot.lane.b32.xlu1 %v13557_v23, %s6907_s28  ;;  %6443 = vmatpush1.msra.mxu1 %v5659_v31 }
 0x856   :  { %v5596_v46 = vpop.permute.xlu0 %5595 }
 0x857   :  { %v13850_v19 = vpop.permute.xlu1 %5545  ;;  %v5661_v15 = vsel %vm16686_vm9, %v5596_v46, %v5602_v18  ;;  %vm16698_vm9 = vmmov %vm16695_vm0 }
 0x858   :  { %5915 = vrot.lane.b32.xlu0 %v13535_v36, %s6907_s28  ;;  %6361 = vmatprep.subr.mxu0 %v5661_v15  ;;  %v5570_v27 = vsel %vm16691_vm11, %v13850_v19, %v5504_v34  ;;  %vm16703_vm11 = vcmp.lt.s32.totalorder %v8114_v33, 107 }
 0x859   :  { %5907 = vrot.lane.b32.xlu1 %v13508_v24, %s6907_s28 }
 0x85a   :  { %v5608_v63 = vpop.permute.xlu0 %5607 }
 0x85b   :  { %v5508_v1 = vpop.permute.xlu1 %5507  ;;  %v5655_v29 = vsel %vm16687_vm2, %v5608_v63, %v13821_v37  ;;  %v5658_v41 = vsel %vm16688_vm4, %v5602_v18, %v5608_v63  ;;  %vm16699_vm2 = vmmov %vm16695_vm0 }
 0x85c   :  { %5927 = vrot.lane.b32.xlu0 %v13569_v60, %s6907_s28  ;;  %6444 = vmatprep.subr.mxu1 %v5655_v29  ;;  %vm16700_vm4 = vmmov %vm16695_vm0 }
 0x85d   :  { %5827 = vrot.lane.b32.xlu1 %v13561_v22, %s6906_s27  ;;  %6445 = vmatpush1.msra.mxu1 %v5658_v41 }
 0x85e   :  { %v13867_v21 = vpop.permute.xlu0 %5637 }
 0x85f   :  { %v13869_v20 = vpop.permute.xlu1 %5519  ;;  %v5664_v32 = vsel %vm16689_vm6, %v13867_v21, %v5596_v46  ;;  %vm16701_vm6 = vmmov %vm16695_vm0 }
 0x860   :  { %5909 = vrot.lane.b32.xlu0 %v13515_v16, %s6907_s28  ;;  %6362 = vmatpush1.msra.mxu0 %v5664_v32 }
 0x861   :  { %5839 = vrot.lane.b32.xlu1 %v13748_v54, %s6906_s27 }
 0x862   :  { %v5510_v18 = vpop.permute.xlu0 %5509 }
 0x863   :  { %v5500_v11 = vpop.permute.xlu1 %5499  ;;  %v5567_v52 = vsel %vm16690_vm10, %v5504_v34, %v5510_v18  ;;  %v5564_v63 = vsel %vm16693_vm1, %v5510_v18, %v5516_v39  ;;  %vm6339_vm10 = vcmask 719872   ;;  %vm16705_vm1 = vmmov %vm16703_vm11 }
 0x864   :  { %5919 = vrot.lane.b32.xlu0 %v13545_v2, %s6907_s28  ;;  %6363 = vmatprep.subr.mxu0 %v5567_v52 }
 0x865   :  { %5819 = vrot.lane.b32.xlu1 %v13535_v36, %s6906_s27  ;;  %6364 = vmatpush1.msra.mxu0 %v5570_v27 }
 0x866   :  { %v13887_v31 = vpop.permute.xlu0 %5521 }
 0x867   :  { %v5512_v46 = vpop.permute.xlu1 %5511  ;;  %v5561_v15 = vsel %vm16692_vm12, %v5516_v39, %v13887_v31  ;;  %vm16704_vm12 = vmmov %vm16703_vm11 }
 0x868   :  { %5931 = vrot.lane.b32.xlu0 %v13598_v55, %s6907_s28  ;;  %6446 = vmatprep.subr.mxu1 %v5561_v15 }
 0x869   :  { %5831 = vrot.lane.b32.xlu1 %v13569_v60, %s6906_s27  ;;  %6447 = vmatpush1.msra.mxu1 %v5564_v63 }
 0x86a   :  { %v5502_v34 = vpop.permute.xlu0 %5501 }
 0x86b   :  { %v13898_v29 = vpop.permute.xlu1 %5541  ;;  %v5566_v41 = vsel %vm16694_vm14, %v5502_v34, %v5508_v1  ;;  %vm16706_vm14 = vmmov %vm16705_vm1 }
 0x86c   :  { %5821 = vrot.lane.b32.xlu0 %v13538_v6, %s6906_s27  ;;  %6365 = vmatprep.subr.mxu0 %v5566_v41 }
 0x86d   :  { %5813 = vrot.lane.b32.xlu1 %v13515_v16, %s6906_s27 }
 0x86e   :  { %v5514_v32 = vpop.permute.xlu0 %5513 }
 0x86f   :  { %v5414_v52 = vpop.permute.xlu1 %5413  ;;  %v5560_v39 = vsel %vm16695_vm0, %v5514_v32, %v13869_v20  ;;  %v5563_v18 = vsel %vm16696_vm15, %v5508_v1, %v5514_v32  ;;  %vm16707_vm0 = vmmov %vm16705_vm1 }
 0x870   :  { %5833 = vrot.lane.b32.xlu0 %v13572_v56, %s6906_s27  ;;  %6448 = vmatprep.subr.mxu1 %v5560_v39  ;;  %vm16708_vm15 = vmmov %vm16707_vm0 }
 0x871   :  { %5823 = vrot.lane.b32.xlu1 %v13545_v2, %s6906_s27  ;;  %6449 = vmatpush1.msra.mxu1 %v5563_v18 }
 0x872   :  { %v13915_v27 = vpop.permute.xlu0 %5543 }
 0x873   :  { %v13917_v15 = vpop.permute.xlu1 %5425  ;;  %v5569_v63 = vsel %vm16697_vm13, %v13915_v27, %v5502_v34  ;;  %v5568_v34 = vsel %vm16699_vm2, %v13898_v29, %v5500_v11  ;;  %vm16709_vm13 = vmmov %vm16707_vm0 }
 0x874   :  { %5815 = vrot.lane.b32.xlu0 %v13525_v26, %s6906_s27  ;;  %6366 = vmatpush1.msra.mxu0 %v5569_v63  ;;  %vm16711_vm2 = vmmov %vm16707_vm0 }
 0x875   :  { %5835 = vrot.lane.b32.xlu1 %v13598_v55, %s6906_s27 }
 0x876   :  { %v5506_v1 = vpop.permute.xlu0 %5505 }
 0x877   :  { %v5406_v41 = vpop.permute.xlu1 %5405  ;;  %v5565_v2 = vsel %vm16698_vm9, %v5500_v11, %v5506_v1  ;;  %v5562_v63 = vsel %vm16701_vm6, %v5506_v1, %v5512_v46  ;;  %vm16710_vm9 = vmmov %vm16707_vm0 }
 0x878   :  { %5825 = vrot.lane.b32.xlu0 %v13549_v62, %s6906_s27  ;;  %6367 = vmatprep.subr.mxu0 %v5565_v2  ;;  %vm16713_vm6 = vmmov %vm16707_vm0 }
 0x879   :  { %5725 = vrot.lane.b32.xlu1 %v13538_v6, %s6905_s26  ;;  %6368 = vmatpush1.msra.mxu0 %v5568_v34 }
 0x87a   :  { %v13935_v32 = vpop.permute.xlu0 %5517 }
 0x87b   :  { %v5418_v39 = vpop.permute.xlu1 %5417  ;;  %v5559_v18 = vsel %vm16700_vm4, %v5512_v46, %v13935_v32  ;;  %vm16712_vm4 = vmmov %vm16707_vm0 }
 0x87c   :  { %5837 = vrot.lane.b32.xlu0 %v13782_v38, %s6906_s27  ;;  %6450 = vmatprep.subr.mxu1 %v5559_v18 }
 0x87d   :  { %5737 = vrot.lane.b32.xlu1 %v13572_v56, %s6905_s26  ;;  %6451 = vmatpush1.msra.mxu1 %v5562_v63 }
 0x87e   :  { %v5408_v6 = vpop.permute.xlu0 %5407 }
 0x87f   :  { %v13946_v11 = vpop.permute.xlu1 %5447  ;;  %v5471_v2 = vsel %vm877_vm3, %v5408_v6, %v5414_v52 }
 0x880   :  { %5817 = vrot.lane.b32.xlu0 %v13521_v53, %s6906_s27  ;;  %6369 = vmatprep.subr.mxu0 %v5471_v2 }
 0x881   :  { %5719 = vrot.lane.b32.xlu1 %v13525_v26, %s6905_s26  ;;  %v5186_v26 = vadd.f32 %v13722_v12, %v13390_v51 }
 0x882   :  { %v5420_v34 = vpop.permute.xlu0 %5419 }
 0x883   :  { %v5410_v18 = vpop.permute.xlu1 %5409  ;;  %v5465_v56 = vsel %vm877_vm3, %v5420_v34, %v13917_v15  ;;  %v5468_v46 = vsel %vm877_vm3, %v5414_v52, %v5420_v34  ;;  %v5197_v34 = vpop.f32.mrf.mxu0 }
 0x884   :  { %5829 = vrot.lane.b32.xlu0 %v13557_v23, %s6906_s27  ;;  %6452 = vmatprep.subr.mxu1 %v5465_v56  ;;  %v16702_v23 = vld [vmem:[#allocation19_spill] sm:$0xff]  ;;  %v13995_v56 = vld [vmem:[%s14818_s8 + $0x8] sm:$0xff] }
 0x885   :  { %5729 = vrot.lane.b32.xlu1 %v13549_v62, %s6905_s26  ;;  %6453 = vmatpush1.msra.mxu1 %v5468_v46  ;;  %v13977_v52 = vmul.f32 %v5186_v26, %v16702_v23  ;;  %v5198_v46 = vadd.f32 %v5197_v34, %v13394_v50 }
 0x886   :  { %v13963_v53 = vpop.permute.xlu0 %5449  ;;  %6844 = vmatprep.mubr.msk.f32.mxu1 %vm6339_vm10, %v13995_v56  ;;  %6841 = vmatprep.mubr.msk.f32.mxu0 %vm6339_vm10, %v13995_v56 }
 0x887   :  { %v13967_v1 = vpop.permute.xlu1 %5421  ;;  %v5474_v63 = vsel %vm877_vm3, %v13963_v53, %v5408_v6 }
 0x888   :  { %5811 = vrot.lane.b32.xlu0 %v13508_v24, %s6906_s27  ;;  %6370 = vmatpush1.msra.mxu0 %v5474_v63  ;;  %v5473_v24 = vsel %vm877_vm3, %v13946_v11, %v5406_v41 }
 0x889   :  { %5741 = vrot.lane.b32.xlu1 %v13782_v38, %s6905_s26 }
 0x88a   :  { %v5412_v62 = vpop.permute.xlu0 %5411 }
 0x88b   :  { %v13979_v2 = vpop.permute.xlu1 %5353  ;;  %v5470_v12 = vsel %vm877_vm3, %v5406_v41, %v5412_v62  ;;  %v5467_v26 = vsel %vm877_vm3, %v5412_v62, %v5418_v39  ;;  %v5273_v62 = vadd.f32 %v13600_v43, %v13396_v17  ;;  %v5267_v43 = vadd.f32 %v13594_v25, %v13390_v51 }
 0x88c   :  { %5731 = vrot.lane.b32.xlu0 %v13561_v22, %s6905_s26  ;;  %6371 = vmatprep.subr.mxu0 %v5470_v12  ;;  %v14014_v12 = vmul.f32 %v5198_v46, %v16702_v23  ;;  %v5368_v51 = vsel %vm804_vm5, %v13662_v59, %v13680_v8  ;;  %v5375_v25 = vsel %vm804_vm5, %v13645_v49, %v13654_v30 }
 0x88d   :  { %5745 = vrot.lane.b32.xlu1 %v13977_v52, %s6905_s26  ;;  %6372 = vmatpush1.msra.mxu0 %v5473_v24 }
 0x88e   :  { %v13990_v6 = vpop.permute.xlu0 %5423 }
 0x88f   :  { %v13998_v22 = vpop.permute.xlu1 %5349  ;;  %v5464_v41 = vsel %vm877_vm3, %v5418_v39, %v13990_v6 }
 0x890   :  { %5743 = vrot.lane.b32.xlu0 %v13748_v54, %s6905_s26  ;;  %6454 = vmatprep.subr.mxu1 %v5464_v41 }
 0x891   :  { %5757 = vrot.lane.b32.xlu1 %v13652_v5, %s6905_s26  ;;  %6455 = vmatpush1.msra.mxu1 %v5467_v26 }
 0x892   :  { %v5404_v63 = vpop.permute.xlu0 %5403 }
 0x893   :  { %v14016_v34 = vpop.permute.xlu1 %6019  ;;  %v5469_v24 = vsel %vm877_vm3, %v5404_v63, %v5410_v18 }
 0x894   :  { %5723 = vrot.lane.b32.xlu0 %v13535_v36, %s6905_s26  ;;  %6373 = vmatprep.subr.mxu0 %v5469_v24  ;;  %v5369_v36 = vsel %vm804_vm5, %v13672_v14, %v13678_v47 }
 0x895   :  { %5629 = vrot.lane.b32.xlu1 %v14014_v12, %s6904_s25 }
 0x896   :  { %v5416_v39 = vpop.permute.xlu0 %5415 }
 0x897   :  { %v14026_v41 = vpop.permute.xlu1 %6031  ;;  %v5463_v46 = vsel %vm877_vm3, %v5416_v39, %v13967_v1  ;;  %v5466_v26 = vsel %vm877_vm3, %v5410_v18, %v5416_v39  ;;  %v14050_v18 = vmul.f32 %v5273_v62, %v16576_v48  ;;  %v5378_v62 = vsel %vm804_vm5, %v13979_v2, %v13645_v49 }
 0x898   :  { %5735 = vrot.lane.b32.xlu0 %v13569_v60, %s6905_s26  ;;  %6456 = vmatprep.subr.mxu1 %v5463_v46  ;;  %v5372_v60 = vsel %vm804_vm5, %v13654_v30, %v13672_v14  ;;  %v14072_v14 = vmul.f32 %v5267_v43, %v16576_v48  ;;  %v5367_v30 = vsel %vm804_vm5, %v13664_v40, %v13670_v0 }
 0x899   :  { %5621 = vrot.lane.b32.xlu1 %v13782_v38, %s6904_s25  ;;  %6457 = vmatpush1.msra.mxu1 %v5466_v26  ;;  %v5370_v26 = vsel %vm804_vm5, %v13643_v58, %v13664_v40  ;;  %v5279_v43 = vadd.f32 %v13605_v10, %v13394_v50 }
 0x89a   :  { %v14043_v24 = vpop.permute.xlu0 %5445  ;;  %6458 = vmatprep.subr.mxu1 %v5369_v36 }
 0x89b   :  { %6459 = vmatpush1.msra.mxu1 %v5372_v60  ;;  %v6012_v39 = vpop.permute.xlu1 %6011  ;;  %v5472_v46 = vsel %vm877_vm3, %v14043_v24, %v5404_v63  ;;  %v14122_v50 = vmul.f32 %v5279_v43, %v16576_v48 }
 0x89c   :  { %5717 = vrot.lane.b32.xlu0 %v13515_v16, %s6905_s26  ;;  %6374 = vmatpush1.msra.mxu0 %v5472_v46  ;;  %v5371_v16 = vsel %vm804_vm5, %v13656_v28, %v13662_v59  ;;  %v5374_v59 = vsel %vm804_vm5, %v13636_v61, %v13656_v28  ;;  %v5373_v28 = vsel %vm804_vm5, %v13634_v42, %v13643_v58 }
 0x89d   :  { %6460 = vmatprep.subr.mxu1 %v5368_v51  ;;  %5633 = vrot.lane.b32.xlu1 %v14050_v18, %s6904_s25 }
 0x89e   :  { %6375 = vmatprep.subr.mxu0 %v5375_v25  ;;  %6461 = vmatpush1.msra.mxu1 %v5371_v16  ;;  %v14074_v63 = vpop.permute.xlu0 %5351 }
 0x89f   :  { %6376 = vmatpush1.msra.mxu0 %v5378_v62  ;;  %6462 = vmatprep.subr.mxu1 %v5367_v30  ;;  %v6024_v36 = vpop.permute.xlu1 %6023  ;;  %v5377_v49 = vsel %vm804_vm5, %v14074_v63, %v13636_v61  ;;  %v5376_v61 = vsel %vm804_vm5, %v13998_v22, %v13634_v42  ;;  %v5192_v42 = vadd.f32 %v13732_v35, %v13396_v17 }
 0x8a0   :  { %6377 = vmatprep.subr.mxu0 %v5374_v59  ;;  %6463 = vmatpush1.msra.mxu1 %v5370_v26 }
 0x8a1   :  { %5751 = vrot.lane.b32.xlu0 %v14072_v14, %s6905_s26  ;;  %6378 = vmatpush1.msra.mxu0 %v5377_v49  ;;  %v14137_v48 = vmul.f32 %v5192_v42, %v16702_v23 }
 0x8a2   :  { %5625 = vrot.lane.b32.xlu1 %v13977_v52, %s6904_s25  ;;  %6379 = vmatprep.subr.mxu0 %v5373_v28  ;;  %v6014_v40 = vpop.permute.xlu0 %6013 }
 0x8a3   :  { %6380 = vmatpush1.msra.mxu0 %v5376_v61  ;;  %v14110_v60 = vpop.permute.xlu1 %6005  ;;  %v6068_v58 = vsel %vm16703_vm11, %v6014_v40, %v14016_v34  ;;  %vm16714_vm11 = vmmov %vm16707_vm0 }
 0x8a4   :  { %6391 = vmatprep.subr.mxu0 %v6068_v58  ;;  %v6070_v23 = vsel %vm16708_vm15, %v14110_v60, %v6012_v39 }
 0x8a5   :  { %5623 = vrot.lane.b32.xlu0 %v13748_v54, %s6904_s25 }
 0x8a6   :  { %5527 = vrot.lane.b32.xlu1 %v13748_v54, %s6903_s12  ;;  %v6026_v46 = vpop.permute.xlu0 %6025 }
 0x8a7   :  { %v6016_v10 = vpop.permute.xlu1 %6015  ;;  %v6062_v51 = vsel %vm16704_vm12, %v6026_v46, %v14026_v41  ;;  %v6065_v25 = vsel %vm16705_vm1, %v14016_v34, %v6026_v46  ;;  %vm16724_vm12 = vcmp.lt.s32.totalorder %v8114_v33, 127 }
 0x8a8   :  { %6474 = vmatprep.subr.mxu1 %v6062_v51  ;;  %vm16725_vm1 = vmmov %vm16724_vm12 }
 0x8a9   :  { %5635 = vrot.lane.b32.xlu0 %v14122_v50, %s6904_s25  ;;  %6475 = vmatpush2.msra.mxu1 %v6065_v25 }
 0x8aa   :  { %5539 = vrot.lane.b32.xlu1 %v14122_v50, %s6903_s12  ;;  %v14134_v17 = vpop.permute.xlu0 %6007 }
 0x8ab   :  { %v14139_v35 = vpop.permute.xlu1 %6027  ;;  %v6071_v16 = vsel %vm16706_vm14, %v14134_v17, %v6014_v40  ;;  %vm16727_vm14 = vmmov %vm16725_vm1 }
 0x8ac   :  { %6392 = vmatpush2.msra.mxu0 %v6071_v16 }
 0x8ad   :  { %5627 = vrot.lane.b32.xlu0 %v14137_v48, %s6904_s25 }
 0x8ae   :  { %5531 = vrot.lane.b32.xlu1 %v14137_v48, %s6903_s12  ;;  %v6018_v34 = vpop.permute.xlu0 %6017 }
 0x8af   :  { %v5918_v62 = vpop.permute.xlu1 %5917  ;;  %v6067_v30 = vsel %vm16707_vm0, %v6012_v39, %v6018_v34  ;;  %v6064_v28 = vsel %vm16710_vm9, %v6018_v34, %v6024_v36  ;;  %vm16728_vm0 = vmmov %vm16725_vm1 }
 0x8b0   :  { %6393 = vmatprep.subr.mxu0 %v6067_v30  ;;  %vm16729_vm15 = vmmov %vm16728_vm0 }
 0x8b1   :  { %5619 = vrot.lane.b32.xlu0 %v13598_v55, %s6904_s25  ;;  %6394 = vmatpush2.msra.mxu0 %v6070_v23  ;;  %vm16731_vm9 = vmmov %vm16728_vm0 }
 0x8b2   :  { %5523 = vrot.lane.b32.xlu1 %v13598_v55, %s6903_s12  ;;  %v14157_v59 = vpop.permute.xlu0 %6029 }
 0x8b3   :  { %v5930_v26 = vpop.permute.xlu1 %5929  ;;  %v6061_v49 = vsel %vm16709_vm13, %v6024_v36, %v14157_v59  ;;  %vm16730_vm13 = vmmov %vm16728_vm0 }
 0x8b4   :  { %6476 = vmatprep.subr.mxu1 %v6061_v49 }
 0x8b5   :  { %5631 = vrot.lane.b32.xlu0 %v14072_v14, %s6904_s25  ;;  %6477 = vmatpush2.msra.mxu1 %v6064_v28 }
 0x8b6   :  { %5535 = vrot.lane.b32.xlu1 %v14072_v14, %s6903_s12  ;;  %v6010_v39 = vpop.permute.xlu0 %6009 }
 0x8b7   :  { %v14168_v40 = vpop.permute.xlu1 %5911  ;;  %v6066_v61 = vsel %vm16711_vm2, %v6010_v39, %v6016_v10  ;;  %vm16733_vm2 = vmmov %vm16728_vm0 }
 0x8b8   :  { %6395 = vmatprep.subr.mxu0 %v6066_v61  ;;  %v5975_v30 = vsel %vm1242_vm8, %v14168_v40, %v5918_v62 }
 0x8b9   :  { %5533 = vrot.lane.b32.xlu0 %v14014_v12, %s6903_s12 }
 0x8ba   :  { %5437 = vrot.lane.b32.xlu1 %v14014_v12, %s6902_s30  ;;  %v6022_v36 = vpop.permute.xlu0 %6021 }
 0x8bb   :  { %v5922_v43 = vpop.permute.xlu1 %5921  ;;  %v6060_v58 = vsel %vm16712_vm4, %v6022_v36, %v14139_v35  ;;  %v6063_v46 = vsel %vm16713_vm6, %v6016_v10, %v6022_v36  ;;  %vm16734_vm4 = vmmov %vm16728_vm0 }
 0x8bc   :  { %6478 = vmatprep.subr.mxu1 %v6060_v58  ;;  %vm16735_vm6 = vmmov %vm16728_vm0 }
 0x8bd   :  { %5525 = vrot.lane.b32.xlu0 %v13782_v38, %s6903_s12  ;;  %6479 = vmatpush2.msra.mxu1 %v6063_v46 }
 0x8be   :  { %5429 = vrot.lane.b32.xlu1 %v13782_v38, %s6902_s30  ;;  %v14185_v42 = vpop.permute.xlu0 %6003 }
 0x8bf   :  { %v14187_v51 = vpop.permute.xlu1 %5933  ;;  %v6069_v25 = vsel %vm16714_vm11, %v14185_v42, %v6010_v39  ;;  %vm16736_vm11 = vmmov %vm16728_vm0 }
 0x8c0   :  { %6396 = vmatpush2.msra.mxu0 %v6069_v25 }
 0x8c1   :  { %5537 = vrot.lane.b32.xlu0 %v14050_v18, %s6903_s12 }
 0x8c2   :  { %5441 = vrot.lane.b32.xlu1 %v14050_v18, %s6902_s30  ;;  %v5924_v10 = vpop.permute.xlu0 %5923 }
 0x8c3   :  { %v5914_v16 = vpop.permute.xlu1 %5913  ;;  %v5972_v34 = vsel %vm1242_vm8, %v5918_v62, %v5924_v10  ;;  %v5969_v39 = vsel %vm1242_vm8, %v5924_v10, %v5930_v26 }
 0x8c4   :  { %6397 = vmatprep.subr.mxu0 %v5972_v34 }
 0x8c5   :  { %5529 = vrot.lane.b32.xlu0 %v13977_v52, %s6903_s12  ;;  %6398 = vmatpush2.msra.mxu0 %v5975_v30 }
 0x8c6   :  { %5433 = vrot.lane.b32.xlu1 %v13977_v52, %s6902_s30  ;;  %v14205_v23 = vpop.permute.xlu0 %5935 }
 0x8c7   :  { %v5926_v49 = vpop.permute.xlu1 %5925  ;;  %v5966_v28 = vsel %vm1242_vm8, %v5930_v26, %v14205_v23 }
 0x8c8   :  { %6480 = vmatprep.subr.mxu1 %v5966_v28 }
 0x8c9   :  { %5431 = vrot.lane.b32.xlu0 %v13748_v54, %s6902_s30  ;;  %6481 = vmatpush2.msra.mxu1 %v5969_v39 }
 0x8ca   :  { %5335 = vrot.lane.b32.xlu1 %v13748_v54, %s6901_s29  ;;  %v5916_v62 = vpop.permute.xlu0 %5915 }
 0x8cb   :  { %v14216_v61 = vpop.permute.xlu1 %5907  ;;  %v5971_v36 = vsel %vm1242_vm8, %v5916_v62, %v5922_v43 }
 0x8cc   :  { %6399 = vmatprep.subr.mxu0 %v5971_v36  ;;  %v5973_v36 = vsel %vm1242_vm8, %v14216_v61, %v5914_v16 }
 0x8cd   :  { %5443 = vrot.lane.b32.xlu0 %v14122_v50, %s6902_s30 }
 0x8ce   :  { %5347 = vrot.lane.b32.xlu1 %v14122_v50, %s6901_s29  ;;  %v5928_v26 = vpop.permute.xlu0 %5927 }
 0x8cf   :  { %v5828_v58 = vpop.permute.xlu1 %5827  ;;  %v5965_v46 = vsel %vm1242_vm8, %v5928_v26, %v14187_v51  ;;  %v5968_v25 = vsel %vm1242_vm8, %v5922_v43, %v5928_v26 }
 0x8d0   :  { %6482 = vmatprep.subr.mxu1 %v5965_v46 }
 0x8d1   :  { %5435 = vrot.lane.b32.xlu0 %v14137_v48, %s6902_s30  ;;  %6483 = vmatpush2.msra.mxu1 %v5968_v25 }
 0x8d2   :  { %5339 = vrot.lane.b32.xlu1 %v14137_v48, %s6901_s29  ;;  %v14233_v10 = vpop.permute.xlu0 %5909 }
 0x8d3   :  { %v14235_v34 = vpop.permute.xlu1 %5839  ;;  %v5974_v30 = vsel %vm1242_vm8, %v14233_v10, %v5916_v62 }
 0x8d4   :  { %16715 = vst [vmem:[#allocation16_spill] sm:$0xff] %v14235_v34  ;;  %6400 = vmatpush2.msra.mxu0 %v5974_v30 }
 0x8d5   :  { %5427 = vrot.lane.b32.xlu0 %v13598_v55, %s6902_s30 }
 0x8d6   :  { %5331 = vrot.lane.b32.xlu1 %v13598_v55, %s6901_s29  ;;  %v5920_v43 = vpop.permute.xlu0 %5919 }
 0x8d7   :  { %v5820_v28 = vpop.permute.xlu1 %5819  ;;  %v5970_v39 = vsel %vm1242_vm8, %v5914_v16, %v5920_v43  ;;  %v5967_v25 = vsel %vm1242_vm8, %v5920_v43, %v5926_v49 }
 0x8d8   :  { %6401 = vmatprep.subr.mxu0 %v5970_v39 }
 0x8d9   :  { %5439 = vrot.lane.b32.xlu0 %v14072_v14, %s6902_s30  ;;  %6402 = vmatpush2.msra.mxu0 %v5973_v36 }
 0x8da   :  { %5343 = vrot.lane.b32.xlu1 %v14072_v14, %s6901_s29  ;;  %v14253_v62 = vpop.permute.xlu0 %5931 }
 0x8db   :  { %16716 = vst [vmem:[#allocation10_spill] sm:$0xff] %v14253_v62  ;;  %v5832_v26 = vpop.permute.xlu1 %5831  ;;  %v5964_v46 = vsel %vm1242_vm8, %v5926_v49, %v14253_v62 }
 0x8dc   :  { %6484 = vmatprep.subr.mxu1 %v5964_v46 }
 0x8dd   :  { %5341 = vrot.lane.b32.xlu0 %v14014_v12, %s6901_s29  ;;  %6485 = vmatpush2.msra.mxu1 %v5967_v25 }
 0x8de   :  { %6043 = vrot.lane.b32.xlu1 %v14122_v50, %s6908_s13  ;;  %v5822_v16 = vpop.permute.xlu0 %5821 }
 0x8df   :  { %v14264_v30 = vpop.permute.xlu1 %5813  ;;  %v5876_v39 = vsel %vm1169_vm7, %v5822_v16, %v5828_v58 }
 0x8e0   :  { %16717 = vst [vmem:[#allocation157_spill] sm:$0xff] %v14264_v30  ;;  %6403 = vmatprep.subr.mxu0 %v5876_v39 }
 0x8e1   :  { %5333 = vrot.lane.b32.xlu0 %v13782_v38, %s6901_s29 }
 0x8e2   :  { %6035 = vrot.lane.b32.xlu1 %v14137_v48, %s6908_s13  ;;  %v5834_v49 = vpop.permute.xlu0 %5833 }
 0x8e3   :  { %v5873_v43 = vsel %vm1169_vm7, %v5828_v58, %v5834_v49  ;;  %v5824_v36 = vpop.permute.xlu1 %5823  ;;  %v5870_v46 = vsel %vm1169_vm7, %v5834_v49, %v14235_v34  ;;  %v5878_v34 = vsel %vm1169_vm7, %v14264_v30, %v5820_v28 }
 0x8e4   :  { %6486 = vmatprep.subr.mxu1 %v5870_v46 }
 0x8e5   :  { %5345 = vrot.lane.b32.xlu0 %v14050_v18, %s6901_s29  ;;  %6487 = vmatpush2.msra.mxu1 %v5873_v43 }
 0x8e6   :  { %6047 = vrot.lane.b32.xlu1 %v13608_v44, %s6908_s13  ;;  %v14281_v25 = vpop.permute.xlu0 %5815 }
 0x8e7   :  { %16718 = vst [vmem:[#allocation147_spill] sm:$0xff] %v14281_v25  ;;  %v5879_v39 = vsel %vm1169_vm7, %v14281_v25, %v5822_v16  ;;  %v14286_v58 = vpop.permute.xlu1 %5835 }
 0x8e8   :  { %16719 = vst [vmem:[#allocation146_spill] sm:$0xff] %v14286_v58  ;;  %6404 = vmatpush2.msra.mxu0 %v5879_v39 }
 0x8e9   :  { %5337 = vrot.lane.b32.xlu0 %v13977_v52, %s6901_s29 }
 0x8ea   :  { %6039 = vrot.lane.b32.xlu1 %v14072_v14, %s6908_s13  ;;  %v5826_v49 = vpop.permute.xlu0 %5825 }
 0x8eb   :  { %v5726_v43 = vpop.permute.xlu1 %5725  ;;  %v5875_v46 = vsel %vm1169_vm7, %v5820_v28, %v5826_v49  ;;  %v5872_v62 = vsel %vm1169_vm7, %v5826_v49, %v5832_v26 }
 0x8ec   :  { %6405 = vmatprep.subr.mxu0 %v5875_v46 }
 0x8ed   :  { %6037 = vrot.lane.b32.xlu0 %v14014_v12, %s6908_s13  ;;  %6406 = vmatpush2.msra.mxu0 %v5878_v34 }
 0x8ee   :  { %5941 = vrot.lane.b32.xlu1 %v14014_v12, %s6907_s28  ;;  %v14301_v16 = vpop.permute.xlu0 %5837 }
 0x8ef   :  { %16720 = vst [vmem:[#allocation26_spill] sm:$0xff] %v14301_v16  ;;  %v5738_v39 = vpop.permute.xlu1 %5737  ;;  %v5869_v25 = vsel %vm1169_vm7, %v5832_v26, %v14301_v16 }
 0x8f0   :  { %6488 = vmatprep.subr.mxu1 %v5869_v25 }
 0x8f1   :  { %6049 = vrot.lane.b32.xlu0 %v13620_v7, %s6908_s13  ;;  %6489 = vmatpush2.msra.mxu1 %v5872_v62 }
 0x8f2   :  { %5953 = vrot.lane.b32.xlu1 %v13620_v7, %s6907_s28  ;;  %v5818_v34 = vpop.permute.xlu0 %5817 }
 0x8f3   :  { %v14312_v28 = vpop.permute.xlu1 %5719  ;;  %v5874_v46 = vsel %vm1169_vm7, %v5818_v34, %v5824_v36 }
 0x8f4   :  { %16721 = vst [vmem:[#allocation87_spill] sm:$0xff] %v14312_v28  ;;  %6407 = vmatprep.subr.mxu0 %v5874_v46 }
 0x8f5   :  { %6041 = vrot.lane.b32.xlu0 %v14050_v18, %s6908_s13 }
 0x8f6   :  { %5945 = vrot.lane.b32.xlu1 %v14050_v18, %s6907_s28  ;;  %v5830_v26 = vpop.permute.xlu0 %5829 }
 0x8f7   :  { %v5871_v62 = vsel %vm1169_vm7, %v5824_v36, %v5830_v26  ;;  %v5730_v25 = vpop.permute.xlu1 %5729  ;;  %v5868_v49 = vsel %vm1169_vm7, %v5830_v26, %v14286_v58  ;;  %v5783_v58 = vsel %vm16725_vm1, %v14312_v28, %v5726_v43  ;;  %v14408_v28 = vld [vmem:[%s14818_s8 + $0x28] sm:$0xff]  ;;  %vm16738_vm1 = vcmp.lt.s32.totalorder %v8114_v33, 1 }
 0x8f8   :  { %6490 = vmatprep.subr.mxu1 %v5868_v49 }
 0x8f9   :  { %6033 = vrot.lane.b32.xlu0 %v13977_v52, %s6908_s13  ;;  %6491 = vmatpush2.msra.mxu1 %v5871_v62 }
 0x8fa   :  { %5937 = vrot.lane.b32.xlu1 %v13977_v52, %s6907_s28  ;;  %v14329_v46 = vpop.permute.xlu0 %5811 }
 0x8fb   :  { %16722 = vst [vmem:[#allocation9_spill] sm:$0xff] %v14329_v46  ;;  %v5877_v16 = vsel %vm1169_vm7, %v14329_v46, %v5818_v34  ;;  %v14334_v36 = vpop.permute.xlu1 %5741 }
 0x8fc   :  { %16723 = vst [vmem:[#allocation153_spill] sm:$0xff] %v14334_v36  ;;  %6408 = vmatpush2.msra.mxu0 %v5877_v16 }
 0x8fd   :  { %6045 = vrot.lane.b32.xlu0 %v13652_v5, %s6908_s13 }
 0x8fe   :  { %5949 = vrot.lane.b32.xlu1 %v13652_v5, %s6907_s28  ;;  %v5732_v26 = vpop.permute.xlu0 %5731 }
 0x8ff   :  { %v5746_v62 = vpop.permute.xlu1 %5745  ;;  %v5780_v49 = vsel %vm16724_vm12, %v5726_v43, %v5732_v26  ;;  %v5777_v30 = vsel %vm16728_vm0, %v5732_v26, %v5738_v39  ;;  %vm16737_vm12 = vmmov %vm16728_vm0 }
 0x900   :  { %6409 = vmatprep.subr.mxu0 %v5780_v49  ;;  %vm16740_vm0 = vmmov %vm16738_vm1 }
 0x901   :  { %5947 = vrot.lane.b32.xlu0 %v14122_v50, %s6907_s28  ;;  %6410 = vmatpush2.msra.mxu0 %v5783_v58 }
 0x902   :  { %5851 = vrot.lane.b32.xlu1 %v14122_v50, %s6906_s27  ;;  %v14349_v16 = vpop.permute.xlu0 %5743 }
 0x903   :  { %16726 = vst [vmem:[#allocation139_spill] sm:$0xff] %v14349_v16  ;;  %v5758_v34 = vpop.permute.xlu1 %5757  ;;  %v5774_v46 = vsel %vm16727_vm14, %v5738_v39, %v14349_v16  ;;  %v14383_v16 = vld [vmem:[%s14818_s8 + $0x18] sm:$0xff]  ;;  %vm16739_vm14 = vmmov %vm16738_vm1 }
 0x904   :  { %6492 = vmatprep.subr.mxu1 %v5774_v46 }
 0x905   :  { %5939 = vrot.lane.b32.xlu0 %v14137_v48, %s6907_s28  ;;  %6493 = vmatpush2.msra.mxu1 %v5777_v30 }
 0x906   :  { %5843 = vrot.lane.b32.xlu1 %v14137_v48, %s6906_s27  ;;  %v5724_v58 = vpop.permute.xlu0 %5723 }
 0x907   :  { %v14360_v43 = vpop.permute.xlu1 %5629  ;;  %v5779_v49 = vsel %vm16729_vm15, %v5724_v58, %v5730_v25  ;;  %vm16741_vm15 = vmmov %vm16740_vm0 }
 0x908   :  { %6411 = vmatprep.subr.mxu0 %v5779_v49  ;;  %v14378_v49 = vld [vmem:[%s14818_s8] sm:$0xff] }
 0x909   :  { %5951 = vrot.lane.b32.xlu0 %v13608_v44, %s6907_s28 }
 0x90a   :  { %5855 = vrot.lane.b32.xlu1 %v13608_v44, %s6906_s27  ;;  %v5736_v39 = vpop.permute.xlu0 %5735 }
 0x90b   :  { %v5776_v30 = vsel %vm16730_vm13, %v5730_v25, %v5736_v39  ;;  %v14370_v46 = vpop.permute.xlu1 %5621  ;;  %v5773_v26 = vsel %vm16731_vm9, %v5736_v39, %v14334_v36  ;;  %v5784_v39 = vsel %vm16733_vm2, %v5758_v34, %v13699_v9  ;;  %vm16742_vm13 = vmmov %vm16740_vm0 }
 0x90c   :  { %6494 = vmatprep.subr.mxu1 %v5773_v26  ;;  %vm16743_vm9 = vmmov %vm16740_vm0 }
 0x90d   :  { %5943 = vrot.lane.b32.xlu0 %v14072_v14, %s6907_s28  ;;  %6495 = vmatpush2.msra.mxu1 %v5776_v30  ;;  %v14403_v30 = vld [vmem:[%s14818_s8 + $0x10] sm:$0xff]  ;;  %vm16744_vm2 = vmmov %vm16740_vm0 }
 0x90e   :  { %5847 = vrot.lane.b32.xlu1 %v14072_v14, %s6906_s27  ;;  %v14389_v25 = vpop.permute.xlu0 %5717  ;;  %6497 = vmatmul.mubr.f32.vlgmr.msra.gmra.mxu1 %v14378_v49 }
 0x90f   :  { %16732 = vst [vmem:[#allocation55_spill] sm:$0xff] %v14389_v25  ;;  %v5782_v26 = vsel %vm16734_vm4, %v14389_v25, %v5724_v58  ;;  %6598 = vmatprep.subr.mxu1 %v5784_v39  ;;  %v5634_v36 = vpop.permute.xlu1 %5633  ;;  %6845 = vmatprep.mubr.msk.f32.mxu1 %vm6339_vm10, %v14383_v16  ;;  %v14431_v25 = vld [vmem:[%s14818_s8 + $0x20] sm:$0xff]  ;;  %vm16745_vm4 = vmmov %vm16740_vm0 }
 0x910   :  { %6412 = vmatpush2.msra.mxu0 %v5782_v26 }
 0x911   :  { %5845 = vrot.lane.b32.xlu0 %v14014_v12, %s6906_s27  ;;  %6414 = vmatmul.mubr.f32.vlgmr.msra.gmra.mxu0 %v14378_v49 }
 0x912   :  { %5749 = vrot.lane.b32.xlu1 %v14014_v12, %s6905_s26  ;;  %6503 = vmatmul.mubr.f32.gmra.mxu1 %v14403_v30 }
 0x913   :  { %v5752_v9 = vpop.permute.xlu0 %5751  ;;  %6842 = vmatprep.mubr.msk.f32.mxu0 %vm6339_vm10, %v14383_v16  ;;  %6846 = vmatprep.mubr.msk.f32.mxu1 %vm6339_vm10, %v14408_v28 }
 0x914   :  { %v5763_v58 = vsel %vm16735_vm6, %v5752_v9, %v5758_v34  ;;  %v14422_v39 = vpop.permute.xlu1 %5625  ;;  %v5766_v26 = vsel %vm16736_vm11, %v5746_v62, %v5752_v9  ;;  %v5769_v34 = vsel %vm16737_vm12, %v13784_v45, %v5746_v62  ;;  %vm16746_vm6 = vmmov %vm16740_vm0 }
 0x915   :  { %5857 = vrot.lane.b32.xlu0 %v13620_v7, %s6906_s27  ;;  %6515 = vmatprep.subr.mxu0 %v5766_v26  ;;  %vm16747_vm11 = vmmov %vm16740_vm0 }
 0x916   :  { %6599 = vmatpush1.msra.mxu1 %v5763_v58  ;;  %5761 = vrot.lane.b32.xlu1 %v13620_v7, %s6905_s26  ;;  %vm16748_vm12 = vmmov %vm16740_vm0 }
 0x917   :  { %6420 = vmatmul.mubr.f32.gmra.mxu0 %v14403_v30  ;;  %6600 = vmatprep.subr.mxu1 %v13620_v7  ;;  %v5624_v9 = vpop.permute.xlu0 %5623 }
 0x918   :  { %6516 = vmatpush1.msra.mxu0 %v5769_v34  ;;  %6509 = vmatmul.mubr.f32.gmra.mxu1 %v14431_v25  ;;  %v14441_v26 = vpop.permute.xlu1 %5527  ;;  %v5654_v58 = vsel %vm16742_vm13, %v13766_v4, %v5624_v9  ;;  %v5653_v4 = vsel %vm16745_vm4, %v13839_v13, %v14370_v46 }
 0x919   :  { %6517 = vmatprep.subr.mxu0 %v14014_v12  ;;  %6601 = vmatpush1.msra.mxu1 %v14122_v50  ;;  %v6321_v12 = vld [vmem:[%s14819_s9] sm:$0xff] }
 0x91a   :  { %6518 = vmatpush1.msra.mxu0 %v13748_v54  ;;  %6602 = vmatprep.subr.mxu1 %v13608_v44 }
 0x91b   :  { %5849 = vrot.lane.b32.xlu0 %v14050_v18, %s6906_s27  ;;  %6843 = vmatprep.mubr.msk.f32.mxu0 %vm6339_vm10, %v14408_v28  ;;  %v5636_v7 = vpop.permute.xlu0 %5635 }
 0x91c   :  { %6519 = vmatprep.subr.mxu0 %v14137_v48  ;;  %6603 = vmatpush1.msra.mxu1 %v14050_v18  ;;  %v5540_v45 = vpop.permute.xlu1 %5539  ;;  %v5645_v54 = vsel %vm16738_vm1, %v5636_v7, %v13819_v3  ;;  %vm16749_vm1 = vmmov %vm16740_vm0 }
 0x91d   :  { %5753 = vrot.lane.b32.xlu1 %v14050_v18, %s6905_s26  ;;  %6426 = vmatmul.mubr.f32.gmra.mxu0 %v14431_v25  ;;  %v5648_v18 = vsel %vm16739_vm14, %v14360_v43, %v5636_v7  ;;  %vm16750_vm14 = vcmp.lt.s32.totalorder %v8114_v33, 19 }
 0x91e   :  { %6520 = vmatpush1.msra.mxu0 %v13782_v38  ;;  %6604 = vmatprep.subr.mxu1 %v13652_v5  ;;  %v5651_v38 = vsel %vm16740_vm0, %v5624_v9, %v14360_v43  ;;  %v6323_v43 = vld [vmem:[%s14819_s9 + $0x10] sm:$0xff]  ;;  %vm16751_vm0 = vmmov %vm16750_vm14 }
 0x91f   :  { %6521 = vmatprep.subr.mxu0 %v13977_v52  ;;  %6605 = vmatpush1.msra.mxu1 %v14072_v14  ;;  %v5628_v62 = vpop.permute.xlu0 %5627  ;;  %vm16753_vm13 = vmmov %vm16751_vm0 }
 0x920   :  { %6522 = vmatpush1.msra.mxu0 %v13598_v55  ;;  %5841 = vrot.lane.b32.xlu0 %v13977_v52, %s6906_s27  ;;  %v5532_v3 = vpop.permute.xlu1 %5531  ;;  %v5650_v14 = vsel %vm16741_vm15, %v14370_v46, %v5628_v62  ;;  %v5647_v55 = vsel %vm16743_vm9, %v5628_v62, %v5634_v36  ;;  %v5644_v52 = vsel %vm16744_vm2, %v5634_v36, %v13798_v57  ;;  %vm16752_vm15 = vmmov %vm16751_vm0  ;;  %v6322_v62 = vld [vmem:[%s14819_s9 + $0x8] sm:$0xff] }
 0x921   :  { %6523 = vmatprep.subr.mxu0 %v5651_v38  ;;  %6606 = vmatprep.subr.mxu1 %v5645_v54  ;;  %v5549_v46 = vsel %vm16750_vm14, %v5540_v45, %v13850_v19  ;;  %vm16754_vm9 = vmmov %vm16751_vm0 }
 0x922   :  { %6326 = vperm.xlu1 %6880, %v6321_v12   ;;  %6524 = vmatpush1.msra.mxu0 %v5654_v58  ;;  %vm16755_vm2 = vmmov %vm16751_vm0 }
 0x923   :  { %6607 = vmatpush1.msra.mxu1 %v5648_v18  ;;  %6525 = vmatprep.subr.mxu0 %v5650_v14  ;;  %v5620_v34 = vpop.permute.xlu0 %5619  ;;  %vm16756_vm4 = vmmov %vm16751_vm0 }
 0x924   :  { %6608 = vmatprep.subr.mxu1 %v5644_v52  ;;  %5853 = vrot.lane.b32.xlu0 %v13652_v5, %s6906_s27  ;;  %v5652_v9 = vsel %vm16746_vm6, %v13821_v37, %v5620_v34  ;;  %v5524_v57 = vpop.permute.xlu1 %5523  ;;  %v5649_v36 = vsel %vm16747_vm11, %v5620_v34, %v14422_v39  ;;  %vm16757_vm6 = vmmov %vm16751_vm0 }
 0x925   :  { %6609 = vmatpush1.msra.mxu1 %v5647_v55  ;;  %6526 = vmatpush1.msra.mxu0 %v5653_v4  ;;  %vm16758_vm11 = vmmov %vm16751_vm0 }
 0x926   :  { %6336 = vperm.xlu1 %6880, %v6323_v43   ;;  %6527 = vmatprep.subr.mxu0 %v5649_v36  ;;  %vm16761_vm14 = vmmov %vm16751_vm0 }
 0x927   :  { %6528 = vmatpush1.msra.mxu0 %v5652_v9  ;;  %v5632_v7 = vpop.permute.xlu0 %5631  ;;  %6847 = vmatprep.mubr.msk.f32.mxu0 %vm6339_vm10, %v13995_v56  ;;  %v5556_v55 = vsel %vm16761_vm14, %v13935_v32, %v5524_v57 }
 0x928   :  { %5755 = vrot.lane.b32.xlu0 %v14122_v50, %s6905_s26  ;;  %v5646_v5 = vsel %vm16748_vm12, %v14422_v39, %v5632_v7  ;;  %v5536_v37 = vpop.permute.xlu1 %5535  ;;  %v5643_v13 = vsel %vm16749_vm1, %v5632_v7, %v13867_v21  ;;  %6850 = vmatprep.mubr.msk.f32.mxu1 %vm6339_vm10, %v13995_v56  ;;  %v5558_v56 = vsel %vm16753_vm13, %v13887_v31, %v14441_v26  ;;  %vm16759_vm12 = vmmov %vm16751_vm0 }
 0x929   :  { %6610 = vmatprep.subr.mxu1 %v5643_v13  ;;  %v5547_v18 = vsel %vm16758_vm11, %v5536_v37, %v13898_v29  ;;  %vm16760_vm1 = vmmov %vm16751_vm0 }
 0x92a   :  { %6611 = vmatpush1.msra.mxu1 %v5646_v5 }
 0x92b   :  { %v5534_v54 = vpop.permute.xlu0 %5533  ;;  %6612 = vmatprep.subr.mxu1 %v5549_v46 }
 0x92c   :  { %5747 = vrot.lane.b32.xlu0 %v14137_v48, %s6905_s26  ;;  %v5552_v50 = vsel %vm16751_vm0, %v5534_v54, %v5540_v45  ;;  %v5438_v39 = vpop.permute.xlu1 %5437  ;;  %v5555_v21 = vsel %vm16752_vm15, %v14441_v26, %v5534_v54 }
 0x92d   :  { %6529 = vmatprep.subr.mxu0 %v5555_v21  ;;  %6613 = vmatpush1.msra.mxu1 %v5552_v50 }
 0x92e   :  { %6530 = vmatpush1.msra.mxu0 %v5558_v56 }
 0x92f   :  { %v5526_v19 = vpop.permute.xlu0 %5525 }
 0x930   :  { %5759 = vrot.lane.b32.xlu0 %v13608_v44, %s6905_s26  ;;  %v5557_v48 = vsel %vm16754_vm9, %v13869_v20, %v5526_v19  ;;  %v5430_v45 = vpop.permute.xlu1 %5429  ;;  %v5554_v12 = vsel %vm16755_vm2, %v5526_v19, %v5532_v3 }
 0x931   :  { %6531 = vmatprep.subr.mxu0 %v5554_v12 }
 0x932   :  { %6532 = vmatpush1.msra.mxu0 %v5557_v48 }
 0x933   :  { %v5538_v31 = vpop.permute.xlu0 %5537 }
 0x934   :  { %6331 = vperm.xlu0 %6879, %v6322_v62   ;;  %v5551_v26 = vsel %vm16756_vm4, %v5532_v3, %v5538_v31  ;;  %v5442_v44 = vpop.permute.xlu1 %5441  ;;  %v5548_v20 = vsel %vm16757_vm6, %v5538_v31, %v13915_v27 }
 0x935   :  { %6614 = vmatprep.subr.mxu1 %v5548_v20 }
 0x936   :  { %6615 = vmatpush1.msra.mxu1 %v5551_v26 }
 0x937   :  { %v5530_v38 = vpop.permute.xlu0 %5529  ;;  %6616 = vmatprep.subr.mxu1 %v5547_v18 }
 0x938   :  { %v5550_v14 = vsel %vm16759_vm12, %v5530_v38, %v5536_v37  ;;  %v5434_v58 = vpop.permute.xlu1 %5433  ;;  %v5553_v3 = vsel %vm16760_vm1, %v5524_v57, %v5530_v38  ;;  %v5461_v37 = vsel %vm877_vm3, %v13990_v6, %v5430_v45 }
 0x939   :  { %6533 = vmatprep.subr.mxu0 %v5553_v3  ;;  %6617 = vmatpush1.msra.mxu1 %v5550_v14 }
 0x93a   :  { %6534 = vmatpush1.msra.mxu0 %v5556_v55 }
 0x93b   :  { %v5432_v27 = vpop.permute.xlu0 %5431 }
 0x93c   :  { %v5462_v29 = vsel %vm877_vm3, %v13917_v15, %v5432_v27  ;;  %v5336_v52 = vpop.permute.xlu1 %5335  ;;  %v5459_v43 = vsel %vm877_vm3, %v5432_v27, %v5438_v39  ;;  %v5452_v15 = vsel %vm877_vm3, %v5442_v44, %v13946_v11 }
 0x93d   :  { %6535 = vmatprep.subr.mxu0 %v5459_v43 }
 0x93e   :  { %6536 = vmatpush1.msra.mxu0 %v5462_v29 }
 0x93f   :  { %v5444_v34 = vpop.permute.xlu0 %5443 }
 0x940   :  { %v5456_v4 = vsel %vm877_vm3, %v5438_v39, %v5444_v34  ;;  %v5348_v9 = vpop.permute.xlu1 %5347  ;;  %v5453_v32 = vsel %vm877_vm3, %v5444_v34, %v13963_v53 }
 0x941   :  { %6618 = vmatprep.subr.mxu1 %v5453_v32 }
 0x942   :  { %6619 = vmatpush1.msra.mxu1 %v5456_v4 }
 0x943   :  { %v5436_v57 = vpop.permute.xlu0 %5435  ;;  %6620 = vmatprep.subr.mxu1 %v5452_v15 }
 0x944   :  { %v5455_v36 = vsel %vm877_vm3, %v5436_v57, %v5442_v44  ;;  %v5340_v7 = vpop.permute.xlu1 %5339  ;;  %v5458_v5 = vsel %vm877_vm3, %v5430_v45, %v5436_v57  ;;  %v5366_v45 = vsel %vm804_vm5, %v13678_v47, %v5336_v52 }
 0x945   :  { %6537 = vmatprep.subr.mxu0 %v5458_v5  ;;  %6621 = vmatpush1.msra.mxu1 %v5455_v36 }
 0x946   :  { %6538 = vmatpush1.msra.mxu0 %v5461_v37 }
 0x947   :  { %v5428_v53 = vpop.permute.xlu0 %5427 }
 0x948   :  { %v5460_v11 = vsel %vm877_vm3, %v13967_v1, %v5428_v53  ;;  %v5332_v13 = vpop.permute.xlu1 %5331  ;;  %v5457_v46 = vsel %vm877_vm3, %v5428_v53, %v5434_v58  ;;  %v5357_v1 = vsel %vm804_vm5, %v5348_v9, %v13979_v2 }
 0x949   :  { %6539 = vmatprep.subr.mxu0 %v5457_v46 }
 0x94a   :  { %6540 = vmatpush1.msra.mxu0 %v5460_v11 }
 0x94b   :  { %v5440_v54 = vpop.permute.xlu0 %5439 }
 0x94c   :  { %v5454_v50 = vsel %vm877_vm3, %v5434_v58, %v5440_v54  ;;  %v5344_v39 = vpop.permute.xlu1 %5343  ;;  %v5451_v6 = vsel %vm877_vm3, %v5440_v54, %v14043_v24  ;;  %v5364_v58 = vsel %vm804_vm5, %v13670_v0, %v5332_v13  ;;  %vm16762_vm3 = vcmp.lt.s32.totalorder %v8114_v33, 107 }
 0x94d   :  { %6622 = vmatprep.subr.mxu1 %v5451_v6  ;;  %vm16763_vm0 = vmmov %vm16762_vm3 }
 0x94e   :  { %6623 = vmatpush1.msra.mxu1 %v5454_v50  ;;  %vm16764_vm15 = vmmov %vm16763_vm0 }
 0x94f   :  { %v5342_v21 = vpop.permute.xlu0 %5341  ;;  %6624 = vmatprep.subr.mxu1 %v5357_v1  ;;  %vm16766_vm13 = vmmov %vm16763_vm0 }
 0x950   :  { %v5360_v56 = vsel %vm804_vm5, %v5342_v21, %v5348_v9  ;;  %v6044_v19 = vpop.permute.xlu1 %6043  ;;  %v5363_v48 = vsel %vm804_vm5, %v5336_v52, %v5342_v21  ;;  %vm16767_vm9 = vmmov %vm16763_vm0 }
 0x951   :  { %6541 = vmatprep.subr.mxu0 %v5363_v48  ;;  %6625 = vmatpush1.msra.mxu1 %v5360_v56  ;;  %vm16768_vm2 = vmmov %vm16763_vm0 }
 0x952   :  { %6542 = vmatpush1.msra.mxu0 %v5366_v45  ;;  %vm16769_vm4 = vmmov %vm16763_vm0 }
 0x953   :  { %v5334_v24 = vpop.permute.xlu0 %5333  ;;  %vm16770_vm6 = vmmov %vm16763_vm0 }
 0x954   :  { %v5365_v2 = vsel %vm804_vm5, %v13680_v8, %v5334_v24  ;;  %v6036_v12 = vpop.permute.xlu1 %6035  ;;  %v5362_v62 = vsel %vm804_vm5, %v5334_v24, %v5340_v7  ;;  %v5355_v8 = vsel %vm804_vm5, %v5344_v39, %v13998_v22  ;;  %vm16771_vm11 = vmmov %vm16763_vm0  ;;  %v16775_v24 = vld [vmem:[#allocation16_spill] sm:$0xff] }
 0x955   :  { %6543 = vmatprep.subr.mxu0 %v5362_v62  ;;  %v6058_v32 = vsel %vm16769_vm4, %v14157_v59, %v6036_v12  ;;  %vm16772_vm12 = vmmov %vm16763_vm0 }
 0x956   :  { %6544 = vmatpush1.msra.mxu0 %v5365_v2  ;;  %vm16773_vm1 = vmmov %vm16763_vm0 }
 0x957   :  { %v5346_v31 = vpop.permute.xlu0 %5345 }
 0x958   :  { %v5359_v26 = vsel %vm804_vm5, %v5340_v7, %v5346_v31  ;;  %v6048_v44 = vpop.permute.xlu1 %6047  ;;  %v5356_v47 = vsel %vm804_vm5, %v5346_v31, %v14074_v63  ;;  %v16776_v31 = vld [vmem:[#allocation147_spill] sm:$0xff] }
 0x959   :  { %6626 = vmatprep.subr.mxu1 %v5356_v47  ;;  %v16777_v47 = vld [vmem:[#allocation157_spill] sm:$0xff] }
 0x95a   :  { %6627 = vmatpush1.msra.mxu1 %v5359_v26 }
 0x95b   :  { %v5338_v20 = vpop.permute.xlu0 %5337  ;;  %6628 = vmatprep.subr.mxu1 %v5355_v8 }
 0x95c   :  { %v5358_v18 = vsel %vm804_vm5, %v5338_v20, %v5344_v39  ;;  %v6040_v38 = vpop.permute.xlu1 %6039  ;;  %v5361_v14 = vsel %vm804_vm5, %v5332_v13, %v5338_v20  ;;  %vm16765_vm5 = vmmov %vm16763_vm0 }
 0x95d   :  { %6545 = vmatprep.subr.mxu0 %v5361_v14  ;;  %6629 = vmatpush1.msra.mxu1 %v5358_v18  ;;  %v16778_v14 = vld [vmem:[#allocation26_spill] sm:$0xff] }
 0x95e   :  { %6546 = vmatpush1.msra.mxu0 %v5364_v58 }
 0x95f   :  { %v6038_v63 = vpop.permute.xlu0 %6037 }
 0x960   :  { %v6059_v22 = vsel %vm16762_vm3, %v14026_v41, %v6038_v63  ;;  %v5942_v3 = vpop.permute.xlu1 %5941  ;;  %v6056_v55 = vsel %vm16763_vm0, %v6038_v63, %v6044_v19  ;;  %v6073_v41 = vsel %vm16766_vm13, %v6048_v44, %v14110_v60 }
 0x961   :  { %6557 = vmatprep.subr.mxu0 %v6056_v55  ;;  %v5963_v13 = vsel %vm1242_vm8, %v14205_v23, %v5942_v3 }
 0x962   :  { %6558 = vmatpush2.msra.mxu0 %v6059_v22 }
 0x963   :  { %v6050_v27 = vpop.permute.xlu0 %6049 }
 0x964   :  { %v6053_v29 = vsel %vm16764_vm15, %v6044_v19, %v6050_v27  ;;  %v5954_v52 = vpop.permute.xlu1 %5953  ;;  %v6074_v0 = vsel %vm16765_vm5, %v6050_v27, %v14134_v17  ;;  %v16774_v19 = vld [vmem:[#allocation10_spill] sm:$0xff] }
 0x965   :  { %6640 = vmatprep.subr.mxu1 %v6074_v0 }
 0x966   :  { %6641 = vmatpush2.msra.mxu1 %v6053_v29 }
 0x967   :  { %v6042_v43 = vpop.permute.xlu0 %6041  ;;  %6642 = vmatprep.subr.mxu1 %v6073_v41  ;;  %v16780_v41 = vld [vmem:[#allocation9_spill] sm:$0xff] }
 0x968   :  { %v6052_v34 = vsel %vm16767_vm9, %v6042_v43, %v6048_v44  ;;  %v5946_v4 = vpop.permute.xlu1 %5945  ;;  %v6055_v9 = vsel %vm16768_vm2, %v6036_v12, %v6042_v43 }
 0x969   :  { %6559 = vmatprep.subr.mxu0 %v6055_v9  ;;  %6643 = vmatpush2.msra.mxu1 %v6052_v34  ;;  %v16781_v34 = vld [vmem:[#allocation87_spill] sm:$0xff] }
 0x96a   :  { %6560 = vmatpush2.msra.mxu0 %v6058_v32 }
 0x96b   :  { %v6034_v17 = vpop.permute.xlu0 %6033 }
 0x96c   :  { %v6057_v60 = vsel %vm16770_vm6, %v14139_v35, %v6034_v17  ;;  %v5938_v15 = vpop.permute.xlu1 %5937  ;;  %v6054_v57 = vsel %vm16771_vm11, %v6034_v17, %v6040_v38  ;;  %v5978_v35 = vsel %vm1242_vm8, %v5954_v52, %v14168_v40 }
 0x96d   :  { %6561 = vmatprep.subr.mxu0 %v6054_v57  ;;  %v5961_v48 = vsel %vm1242_vm8, %v16774_v19, %v5938_v15 }
 0x96e   :  { %6562 = vmatpush2.msra.mxu0 %v6057_v60  ;;  %v16785_v60 = vld [vmem:[#allocation139_spill] sm:$0xff] }
 0x96f   :  { %v6046_v36 = vpop.permute.xlu0 %6045 }
 0x970   :  { %v6051_v7 = vsel %vm16772_vm12, %v6040_v38, %v6046_v36  ;;  %v6072_v59 = vsel %vm16773_vm1, %v6046_v36, %v14185_v42  ;;  %v5950_v5 = vpop.permute.xlu1 %5949 }
 0x971   :  { %6644 = vmatprep.subr.mxu1 %v6072_v59 }
 0x972   :  { %6645 = vmatpush2.msra.mxu1 %v6051_v7  ;;  %v16787_v7 = vld [vmem:[#allocation153_spill] sm:$0xff] }
 0x973   :  { %v5948_v37 = vpop.permute.xlu0 %5947  ;;  %6646 = vmatprep.subr.mxu1 %v5978_v35 }
 0x974   :  { %v5957_v53 = vsel %vm1242_vm8, %v5948_v37, %v5954_v52  ;;  %v5960_v11 = vsel %vm1242_vm8, %v5942_v3, %v5948_v37  ;;  %v5852_v46 = vpop.permute.xlu1 %5851  ;;  %v16779_v3 = vld [vmem:[#allocation146_spill] sm:$0xff] }
 0x975   :  { %6563 = vmatprep.subr.mxu0 %v5960_v11  ;;  %6647 = vmatpush2.msra.mxu1 %v5957_v53  ;;  %v16791_v53 = vld [vmem:[#allocation55_spill] sm:$0xff] }
 0x976   :  { %6564 = vmatpush2.msra.mxu0 %v5963_v13 }
 0x977   :  { %v5940_v42 = vpop.permute.xlu0 %5939 }
 0x978   :  { %v5962_v40 = vsel %vm1242_vm8, %v14187_v51, %v5940_v42  ;;  %v5959_v54 = vsel %vm1242_vm8, %v5940_v42, %v5946_v4  ;;  %v5844_v6 = vpop.permute.xlu1 %5843  ;;  %v5976_v51 = vsel %vm1242_vm8, %v5950_v5, %v14216_v61 }
 0x979   :  { %6565 = vmatprep.subr.mxu0 %v5959_v54  ;;  %v5866_v58 = vsel %vm1169_vm7, %v16778_v14, %v5844_v6 }
 0x97a   :  { %6566 = vmatpush2.msra.mxu0 %v5962_v40 }
 0x97b   :  { %v5952_v50 = vpop.permute.xlu0 %5951 }
 0x97c   :  { %v5956_v39 = vsel %vm1242_vm8, %v5946_v4, %v5952_v50  ;;  %v5977_v23 = vsel %vm1242_vm8, %v5952_v50, %v14233_v10  ;;  %v5856_v45 = vpop.permute.xlu1 %5855 }
 0x97d   :  { %6648 = vmatprep.subr.mxu1 %v5977_v23  ;;  %v5881_v8 = vsel %vm1169_vm7, %v5856_v45, %v16777_v47 }
 0x97e   :  { %6649 = vmatpush2.msra.mxu1 %v5956_v39 }
 0x97f   :  { %v5944_v1 = vpop.permute.xlu0 %5943  ;;  %6650 = vmatprep.subr.mxu1 %v5976_v51 }
 0x980   :  { %v5955_v21 = vsel %vm1242_vm8, %v5944_v1, %v5950_v5  ;;  %v5958_v56 = vsel %vm1242_vm8, %v5938_v15, %v5944_v1  ;;  %v5848_v44 = vpop.permute.xlu1 %5847  ;;  %vm16782_vm8 = vcmp.lt.s32.totalorder %v8114_v33, 127 }
 0x981   :  { %6567 = vmatprep.subr.mxu0 %v5958_v56  ;;  %6651 = vmatpush2.msra.mxu1 %v5955_v21  ;;  %vm16783_vm14 = vmmov %vm16782_vm8 }
 0x982   :  { %6568 = vmatpush2.msra.mxu0 %v5961_v48  ;;  %vm16784_vm3 = vmmov %vm16782_vm8 }
 0x983   :  { %v5846_v10 = vpop.permute.xlu0 %5845  ;;  %vm16786_vm0 = vmmov %vm16784_vm3 }
 0x984   :  { %v5867_v61 = vsel %vm1169_vm7, %v16775_v24, %v5846_v10  ;;  %v5864_v2 = vsel %vm1169_vm7, %v5846_v10, %v5852_v46  ;;  %v5750_v63 = vpop.permute.xlu1 %5749  ;;  %vm16789_vm15 = vmmov %vm16786_vm0 }
 0x985   :  { %6569 = vmatprep.subr.mxu0 %v5864_v2  ;;  %v5771_v15 = vsel %vm16786_vm0, %v16785_v60, %v5750_v63  ;;  %vm16790_vm5 = vmmov %vm16786_vm0 }
 0x986   :  { %6570 = vmatpush2.msra.mxu0 %v5867_v61  ;;  %vm16792_vm13 = vmmov %vm16786_vm0 }
 0x987   :  { %v5858_v12 = vpop.permute.xlu0 %5857 }
 0x988   :  { %v5861_v62 = vsel %vm1169_vm7, %v5852_v46, %v5858_v12  ;;  %v5882_v26 = vsel %vm1169_vm7, %v5858_v12, %v16776_v31  ;;  %v5762_v29 = vpop.permute.xlu1 %5761 }
 0x989   :  { %6652 = vmatprep.subr.mxu1 %v5882_v26  ;;  %v5786_v4 = vsel %vm16782_vm8, %v5762_v29, %v16781_v34 }
 0x98a   :  { %6653 = vmatpush2.msra.mxu1 %v5861_v62 }
 0x98b   :  { %6654 = vmatprep.subr.mxu1 %v5881_v8 }
 0x98d   :  { %v5850_v20 = vpop.permute.xlu0 %5849 }
 0x98e   :  { %v5860_v18 = vsel %vm1169_vm7, %v5850_v20, %v5856_v45  ;;  %v5863_v38 = vsel %vm1169_vm7, %v5844_v6, %v5850_v20 }
 0x98f   :  { %6571 = vmatprep.subr.mxu0 %v5863_v38  ;;  %6655 = vmatpush2.msra.mxu1 %v5860_v18  ;;  %v5754_v57 = vpop.permute.xlu1 %5753 }
 0x990   :  { %6572 = vmatpush2.msra.mxu0 %v5866_v58 }
 0x992   :  { %v5842_v22 = vpop.permute.xlu0 %5841 }
 0x993   :  { %v5865_v55 = vsel %vm1169_vm7, %v16779_v3, %v5842_v22  ;;  %v5862_v27 = vsel %vm1169_vm7, %v5842_v22, %v5848_v44 }
 0x994   :  { %6573 = vmatprep.subr.mxu0 %v5862_v27 }
 0x995   :  { %6574 = vmatpush2.msra.mxu0 %v5865_v55 }
 0x996   :  { %v5854_v52 = vpop.permute.xlu0 %5853 }
 0x997   :  { %v5859_v0 = vsel %vm1169_vm7, %v5848_v44, %v5854_v52  ;;  %v5880_v43 = vsel %vm1169_vm7, %v5854_v52, %v16780_v41  ;;  %vm16788_vm7 = vmmov %vm16786_vm0 }
 0x998   :  { %6656 = vmatprep.subr.mxu1 %v5880_v43 }
 0x999   :  { %6657 = vmatpush2.msra.mxu1 %v5859_v0 }
 0x99a   :  { %v5756_v9 = vpop.permute.xlu0 %5755  ;;  %6658 = vmatprep.subr.mxu1 %v5786_v4 }
 0x99b   :  { %v5765_v32 = vsel %vm16783_vm14, %v5756_v9, %v5762_v29  ;;  %v5768_v17 = vsel %vm16784_vm3, %v5750_v63, %v5756_v9 }
 0x99c   :  { %6575 = vmatprep.subr.mxu0 %v5768_v17  ;;  %6659 = vmatpush2.msra.mxu1 %v5765_v32 }
 0x99d   :  { %6576 = vmatpush2.msra.mxu0 %v5771_v15  ;;  %v6327_v33 = vpop.permute.xlu1 %6326 }
 0x99e   :  { %v5748_v36 = vpop.permute.xlu0 %5747 }
 0x99f   :  { %v5770_v59 = vsel %vm16788_vm7, %v16787_v7, %v5748_v36  ;;  %v5767_v5 = vsel %vm16789_vm15, %v5748_v36, %v5754_v57 }
 0x9a0   :  { %6577 = vmatprep.subr.mxu0 %v5767_v5 }
 0x9a1   :  { %6578 = vmatpush2.msra.mxu0 %v5770_v59  ;;  %v6337_v51 = vpop.permute.xlu1 %6336 }
 0x9a2   :  { %v5760_v35 = vpop.permute.xlu0 %5759  ;;  %6580 = vmatmul.mubr.f32.vlgmr.msra.gmra.mxu0 %v14378_v49 }
 0x9a3   :  { %v5764_v37 = vsel %vm16790_vm5, %v5754_v57, %v5760_v35  ;;  %v5785_v11 = vsel %vm16792_vm13, %v5760_v35, %v16791_v53  ;;  %6848 = vmatprep.mubr.msk.f32.mxu0 %vm6339_vm10, %v14383_v16 }
 0x9a4   :  { %6660 = vmatprep.subr.mxu1 %v5785_v11 }
 0x9a5   :  { %6661 = vmatpush2.msra.mxu1 %v5764_v37 }
 0x9a6   :  { %6586 = vmatmul.mubr.f32.gmra.mxu0 %v14403_v30  ;;  %6663 = vmatmul.mubr.f32.vlgmr.msra.gmra.mxu1 %v14378_v49 }
 0x9a7   :  { %6849 = vmatprep.mubr.msk.f32.mxu0 %vm6339_vm10, %v14408_v28  ;;  %6851 = vmatprep.mubr.msk.f32.mxu1 %vm6339_vm10, %v14383_v16 }
 0x9aa   :  { %6592 = vmatmul.mubr.f32.gmra.mxu0 %v14431_v25  ;;  %6669 = vmatmul.mubr.f32.gmra.mxu1 %v14403_v30 }
 0x9ab   :  { %6852 = vmatprep.mubr.msk.f32.mxu1 %vm6339_vm10, %v14408_v28 }
 0x9ae   :  { %6675 = vmatmul.mubr.f32.gmra.mxu1 %v14431_v25 }
 0x9af   :  { %v6332_v16 = vpop.permute.xlu0 %6331 }
 0x9ce   :  { %v6498_v13 = vpop.f32.mrf.mxu1 }
 0x9cf   :  { %v6499_v42 = vadd.f32 %v6498_v13, %v6327_v33 }
 0x9d0   :  { %v6500_v46 = vpop.f32.mrf.mxu1 }
 0x9d1   :  { %6723 = vst [vmem:[%s14812_s11 + $0x150] sm:$0xff] %v6499_v42  ;;  %v6501_v49 = vadd.f32 %v6500_v46, %v6327_v33  ;;  %v6415_v40 = vpop.f32.mrf.mxu0 }
 0x9d2   :  { %v6416_v54 = vadd.f32 %v6415_v40, %v6327_v33  ;;  %v6504_v50 = vpop.f32.mrf.mxu1 }
 0x9d3   :  { %6724 = vst [vmem:[%s14812_s11 + $0x158] sm:$0xff] %v6501_v49  ;;  %v6505_v28 = vadd.f32 %v6504_v50, %v6332_v16  ;;  %v6417_v30 = vpop.f32.mrf.mxu0 }
 0x9d4   :  { %6721 = vst [vmem:[%s14812_s11 + $0x140] sm:$0xff] %v6416_v54  ;;  %v6418_v25 = vadd.f32 %v6417_v30, %v6327_v33  ;;  %v6506_v39 = vpop.f32.mrf.mxu1 }
 0x9d5   :  { %6731 = vst [vmem:[%s14812_s11 + $0x190] sm:$0xff] %v6505_v28  ;;  %v6507_v23 = vadd.f32 %v6506_v39, %v6332_v16 }
 0x9d6   :  { %6722 = vst [vmem:[%s14812_s11 + $0x148] sm:$0xff] %v6418_v25 }
 0x9d7   :  { %6732 = vst [vmem:[%s14812_s11 + $0x198] sm:$0xff] %v6507_v23  ;;  %v6421_v6 = vpop.f32.mrf.mxu0 }
 0x9d8   :  { %v6422_v1 = vadd.f32 %v6421_v6, %v6332_v16  ;;  %v6510_v21 = vpop.f32.mrf.mxu1 }
 0x9d9   :  { %v6511_v56 = vadd.f32 %v6510_v21, %v6337_v51  ;;  %v6423_v19 = vpop.f32.mrf.mxu0 }
 0x9da   :  { %6729 = vst [vmem:[%s14812_s11 + $0x180] sm:$0xff] %v6422_v1  ;;  %v6424_v48 = vadd.f32 %v6423_v19, %v6332_v16  ;;  %v6512_v10 = vpop.f32.mrf.mxu1 }
 0x9db   :  { %6739 = vst [vmem:[%s14812_s11 + $0x1d0] sm:$0xff] %v6511_v56  ;;  %v6513_v45 = vadd.f32 %v6512_v10, %v6337_v51 }
 0x9dc   :  { %6730 = vst [vmem:[%s14812_s11 + $0x188] sm:$0xff] %v6424_v48 }
 0x9dd   :  { %6740 = vst [vmem:[%s14812_s11 + $0x1d8] sm:$0xff] %v6513_v45  ;;  %v6427_v24 = vpop.f32.mrf.mxu0 }
 0x9de   :  { %v6428_v61 = vadd.f32 %v6427_v24, %v6337_v51 }
 0x9df   :  { %v6429_v2 = vpop.f32.mrf.mxu0 }
 0x9e0   :  { %6737 = vst [vmem:[%s14812_s11 + $0x1c0] sm:$0xff] %v6428_v61  ;;  %v6430_v12 = vadd.f32 %v6429_v2, %v6337_v51 }
 0x9e2   :  { %6738 = vst [vmem:[%s14812_s11 + $0x1c8] sm:$0xff] %v6430_v12 }
 0xa62   :  { %v6581_v62 = vpop.f32.mrf.mxu0 }
 0xa63   :  { %v6582_v31 = vadd.f32 %v6581_v62, %v6327_v33 }
 0xa64   :  { %v6583_v26 = vpop.f32.mrf.mxu0 }
 0xa65   :  { %6725 = vst [vmem:[%s14812_s11 + $0x160] sm:$0xff] %v6582_v31  ;;  %v6584_v44 = vadd.f32 %v6583_v26, %v6327_v33 }
 0xa66   :  { %v6587_v47 = vpop.f32.mrf.mxu0  ;;  %v6664_v8 = vpop.f32.mrf.mxu1 }
 0xa67   :  { %6726 = vst [vmem:[%s14812_s11 + $0x168] sm:$0xff] %v6584_v44  ;;  %v6588_v20 = vadd.f32 %v6587_v47, %v6332_v16  ;;  %v6665_v18 = vadd.f32 %v6664_v8, %v6327_v33 }
 0xa68   :  { %v6589_v38 = vpop.f32.mrf.mxu0  ;;  %v6666_v14 = vpop.f32.mrf.mxu1 }
 0xa69   :  { %6733 = vst [vmem:[%s14812_s11 + $0x1a0] sm:$0xff] %v6588_v20  ;;  %6727 = vst [vmem:[%s14812_s11 + $0x170] sm:$0xff] %v6665_v18  ;;  %v6590_v58 = vadd.f32 %v6589_v38, %v6332_v16  ;;  %v6667_v63 = vadd.f32 %v6666_v14, %v6327_v33 }
 0xa6a   :  { %v6593_v22 = vpop.f32.mrf.mxu0  ;;  %v6670_v3 = vpop.f32.mrf.mxu1 }
 0xa6b   :  { %6734 = vst [vmem:[%s14812_s11 + $0x1a8] sm:$0xff] %v6590_v58  ;;  %6728 = vst [vmem:[%s14812_s11 + $0x178] sm:$0xff] %v6667_v63  ;;  %v6594_v55 = vadd.f32 %v6593_v22, %v6337_v51  ;;  %v6671_v27 = vadd.f32 %v6670_v3, %v6332_v16 }
 0xa6c   :  { %v6595_v29 = vpop.f32.mrf.mxu0  ;;  %v6672_v52 = vpop.f32.mrf.mxu1 }
 0xa6d   :  { %6741 = vst [vmem:[%s14812_s11 + $0x1e0] sm:$0xff] %v6594_v55  ;;  %6735 = vst [vmem:[%s14812_s11 + $0x1b0] sm:$0xff] %v6671_v27  ;;  %v6596_v0 = vadd.f32 %v6595_v29, %v6337_v51  ;;  %v6673_v41 = vadd.f32 %v6672_v52, %v6332_v16 }
 0xa6e   :  { %v6676_v43 = vpop.f32.mrf.mxu1 }
 0xa6f   :  { %6742 = vst [vmem:[%s14812_s11 + $0x1e8] sm:$0xff] %v6596_v0  ;;  %6736 = vst [vmem:[%s14812_s11 + $0x1b8] sm:$0xff] %v6673_v41  ;;  %v6677_v34 = vadd.f32 %v6676_v43, %v6337_v51 }
 0xa70   :  { %v6678_v4 = vpop.f32.mrf.mxu1 }
 0xa71   :  { %6743 = vst [vmem:[%s14812_s11 + $0x1f0] sm:$0xff] %v6677_v34  ;;  %v6679_v9 = vadd.f32 %v6678_v4, %v6337_v51 }
 0xa73   :  { %6744 = vst [vmem:[%s14812_s11 + $0x1f8] sm:$0xff] %v6679_v9 }

</bundles_post_ra>
